<compile_context>
chip_gen: v6e
topology: v6e:2x2x1
jax: 0.10.0
libtpu: 0.0.40
codegen_flags: <defaults>
</compile_context>

<pallas_src>
import functools
import math

import jax
import jax.numpy as jnp
from jax import lax
from jax.experimental import pallas as pl
from jax.experimental.pallas import tpu as pltpu

_VMEM_LIMIT = 48 * 1024 * 1024


# ------------------------------ tiling helpers ------------------------------

def _round_up(x, m):
    return ((x + m - 1) // m) * m


def _tile(dim, max_tile, align):
    """Return (padded_dim, tile) with tile % align == 0 and tile | padded_dim."""
    padded = _round_up(dim, align)
    t = min(padded, max_tile)
    while padded % t:
        t -= align
    return padded, t


def _ktile(k, cap=512):
    """Contraction-axis tiling: full K unless K is a large multiple of 128."""
    if k % 128 == 0 and k > cap:
        t = cap
        while k % t:
            t -= 128
        return k, t
    return k, k


def _pad_to(x, shape):
    pads = [(0, t - s) for s, t in zip(x.shape, shape)]
    if all(p[1] == 0 for p in pads):
        return x
    return jnp.pad(x, pads)


def _qkv_group_block(n_groups, dh, cap=512):
    """Largest gb | n_groups with gb*dh <= cap and gb*dh lane-aligned (128)."""
    for gb in range(n_groups, 0, -1):
        if n_groups % gb:
            continue
        w = gb * dh
        if w <= cap and w % 128 == 0:
            return gb
    return n_groups               # full width: block spans the whole N axis


# ----------------------------- tiled linear (+act) --------------------------

def _linear_kernel(x_ref, w_ref, b_ref, o_ref, acc_ref, *, activation):
    k = pl.program_id(2)

    @pl.when(k == 0)
    def _():
        acc_ref[...] = jnp.zeros_like(acc_ref)

    acc_ref[...] += jnp.dot(x_ref[...], w_ref[...],
                            preferred_element_type=jnp.float32)

    @pl.when(k == pl.num_programs(2) - 1)
    def _():
        y = acc_ref[...] + b_ref[...]            # f32 epilogue
        if activation == "gelu":
            # TODO(synk): HF BERT uses erf-based GELU; tanh approx used here.
            c = math.sqrt(2.0 / math.pi)
            y = 0.5 * y * (1.0 + jnp.tanh(c * (y + 0.044715 * y * y * y)))
        elif activation == "tanh":
            y = jnp.tanh(y)
        o_ref[...] = y.astype(o_ref.dtype)


def linear(x, w, b, activation="none", out_dtype=jnp.bfloat16, trim=True):
    M, K = x.shape
    N = w.shape[1]
    Mp, tm = _tile(M, 512, 16)
    Np, tn = _tile(N, 512, 128)
    Kp, tk = _ktile(K)
    xp = _pad_to(x.astype(jnp.bfloat16), (Mp, Kp))
    wp = _pad_to(w.astype(jnp.bfloat16), (Kp, Np))
    bp = _pad_to(b.reshape(1, N).astype(jnp.float32), (1, Np))
    out = pl.pallas_call(
        functools.partial(_linear_kernel, activation=activation),
        out_shape=jax.ShapeDtypeStruct((Mp, Np), out_dtype),
        grid_spec=pltpu.PrefetchScalarGridSpec(
            num_scalar_prefetch=0,
            grid=(Mp // tm, Np // tn, Kp // tk),
            in_specs=[pl.BlockSpec((tm, tk), lambda i, j, k: (i, k)),
                      pl.BlockSpec((tk, tn), lambda i, j, k: (k, j)),
                      pl.BlockSpec((1, tn), lambda i, j, k: (0, j))],
            out_specs=pl.BlockSpec((tm, tn), lambda i, j, k: (i, j)),
            scratch_shapes=[pltpu.VMEM((tm, tn), jnp.float32)]),
        compiler_params=pltpu.CompilerParams(
            dimension_semantics=("parallel", "parallel", "arbitrary"),
            vmem_limit_bytes=_VMEM_LIMIT),
    )(xp, wp, bp)
    if trim:
        out = out[:M, :N]
    return out


# -------------- fused QKV projection -> head-separated layout ---------------

def _qkv_kernel(x_ref, w_ref, b_ref, o_ref, acc_ref, *, gb, dh):
    k = pl.program_id(2)

    @pl.when(k == 0)
    def _():
        acc_ref[...] = jnp.zeros_like(acc_ref)

    acc_ref[...] += jnp.dot(x_ref[...], w_ref[...],
                            preferred_element_type=jnp.float32)

    @pl.when(k == pl.num_programs(2) - 1)
    def _():
        y = acc_ref[...] + b_ref[...]
        for g in range(gb):                      # static unrolled group split
            o_ref[g, :, :] = y[:, g * dh:(g + 1) * dh].astype(o_ref.dtype)


def qkv_projection(x, w, b, nh, dh, out_dtype=jnp.bfloat16):
    """x:(M,K), w:(K,3*nh*dh) with columns [q_h0..q_hN, k_h0.., v_h0..].

    Returns (3*nh, M, dh): group index = type*nh + head, ready for flash.
    """
    M, K = x.shape
    N = 3 * nh * dh
    Mp, tm = _tile(M, 512, 16)
    Kp, tk = _ktile(K)
    gb = _qkv_group_block(3 * nh, dh)
    n_gblk = (3 * nh) // gb
    xp = _pad_to(x.astype(jnp.bfloat16), (Mp, Kp))
    wp = _pad_to(w.astype(jnp.bfloat16), (Kp, N))
    bp = b.reshape(1, N).astype(jnp.float32)
    return pl.pallas_call(
        functools.partial(_qkv_kernel, gb=gb, dh=dh),
        out_shape=jax.ShapeDtypeStruct((3 * nh, Mp, dh), out_dtype),
        grid_spec=pltpu.PrefetchScalarGridSpec(
            num_scalar_prefetch=0,
            grid=(Mp // tm, n_gblk, Kp // tk),
            in_specs=[pl.BlockSpec((tm, tk), lambda i, j, k: (i, k)),
                      pl.BlockSpec((tk, gb * dh), lambda i, j, k: (k, j)),
                      pl.BlockSpec((1, gb * dh), lambda i, j, k: (0, j))],
            out_specs=pl.BlockSpec((gb, tm, dh), lambda i, j, k: (j, i, 0)),
            scratch_shapes=[pltpu.VMEM((tm, gb * dh), jnp.float32)]),
        compiler_params=pltpu.CompilerParams(
            dimension_semantics=("parallel", "parallel", "arbitrary"),
            vmem_limit_bytes=_VMEM_LIMIT),
    )(xp, wp, bp)


# ---------------------------- flash-style attention --------------------------

def _flash_kernel(q_ref, k_ref, v_ref, mask_ref, o_ref, m_sc, l_sc, acc_sc):
    kv = pl.program_id(3)

    @pl.when(kv == 0)
    def _():
        m_sc[...] = jnp.full_like(m_sc, -1e30)
        l_sc[...] = jnp.zeros_like(l_sc)
        acc_sc[...] = jnp.zeros_like(acc_sc)

    q = q_ref[0, 0]                               # (tq, dh) bf16, scale folded
    k = k_ref[0, 0]                               # (tk, dh)
    v = v_ref[0, 0]                               # (tk, dh)
    s = jnp.einsum("qd,kd->qk", q, k,
                   preferred_element_type=jnp.float32)        # (tq, tk) f32
    s = s + mask_ref[0]                                        # (1, tk) f32

    m_prev = m_sc[...]                                         # (tq, 128)
    m_new = jnp.maximum(m_prev, jnp.max(s, axis=-1, keepdims=True))
    alpha = jnp.exp(m_prev - m_new)                            # (tq, 128)
    p = jnp.exp(s - m_new[:, 0:1])                             # (tq, tk)
    l_sc[...] = alpha * l_sc[...] + jnp.sum(p, axis=-1, keepdims=True)
    acc_sc[...] = alpha[:, 0:1] * acc_sc[...] + jnp.dot(
        p.astype(v.dtype), v, preferred_element_type=jnp.float32)
    m_sc[...] = m_new

    @pl.when(kv == pl.num_programs(3) - 1)
    def _():
        o_ref[0, 0] = (acc_sc[...] / l_sc[:, 0:1]).astype(o_ref.dtype)


def flash_attention(qkv, add_mask, out_dtype=jnp.bfloat16):
    """qkv: (3*nh, B, S_pad, dh) head-separated; add_mask: (B, 1, S_pad)."""
    three_nh, B, S_pad, dh = qkv.shape
    nh = three_nh // 3
    _, ts = _tile(S_pad, 512, 128)
    grid = (B, nh, S_pad // ts, S_pad // ts)
    return pl.pallas_call(
        _flash_kernel,
        out_shape=jax.ShapeDtypeStruct((nh, B, S_pad, dh), out_dtype),
        grid_spec=pltpu.PrefetchScalarGridSpec(
            num_scalar_prefetch=0,
            grid=grid,
            in_specs=[
                pl.BlockSpec((1, 1, ts, dh),
                             lambda b, h, qi, ki: (h, b, qi, 0)),
                pl.BlockSpec((1, 1, ts, dh),
                             lambda b, h, qi, ki: (nh + h, b, ki, 0)),
                pl.BlockSpec((1, 1, ts, dh),
                             lambda b, h, qi, ki: (2 * nh + h, b, ki, 0)),
                # un-replicated additive mask, indexed per batch only
                pl.BlockSpec((1, 1, ts), lambda b, h, qi, ki: (b, 0, ki)),
            ],
            out_specs=pl.BlockSpec((1, 1, ts, dh),
                                   lambda b, h, qi, ki: (h, b, qi, 0)),
            scratch_shapes=[pltpu.VMEM((ts, 128), jnp.float32),
                            pltpu.VMEM((ts, 128), jnp.float32),
                            pltpu.VMEM((ts, dh), jnp.float32)]),
        compiler_params=pltpu.CompilerParams(
            dimension_semantics=("parallel", "parallel", "parallel",
                                 "arbitrary"),
            vmem_limit_bytes=_VMEM_LIMIT),
    )(qkv, qkv, qkv, add_mask)


# ----- attention-output projection + residual + LayerNorm (heads fused) -----

def _heads_res_ln_kernel(ctx_ref, w_ref, b_ref, res_ref, g_ref, beta_ref,
                         o_ref, *, nh, eps):
    acc = jnp.dot(ctx_ref[0], w_ref[0], preferred_element_type=jnp.float32)
    for h in range(1, nh):                        # static unrolled head reduce
        acc = acc + jnp.dot(ctx_ref[h], w_ref[h],
                            preferred_element_type=jnp.float32)
    y = acc + b_ref[...] + res_ref[...].astype(jnp.float32)
    mean = jnp.mean(y, axis=-1, keepdims=True)
    yc = y - mean
    var = jnp.mean(yc * yc, axis=-1, keepdims=True)
    inv = lax.rsqrt(var + eps)
    o_ref[...] = (yc * inv * g_ref[...] + beta_ref[...]).astype(o_ref.dtype)


def heads_linear_res_layernorm(ctx, w, b, res, gamma, beta, eps=1e-12,
                               out_dtype=jnp.bfloat16):
    """ctx: (nh, M, dh) flash output; w: (H, H) with rows ordered [head, dh]."""
    nh, M, dh = ctx.shape
    H = w.shape[1]
    Mp, tm = _tile(M, 512, 16)
    w_heads = w.reshape(nh, dh, H).astype(jnp.bfloat16)       # free reshape
    return pl.pallas_call(
        functools.partial(_heads_res_ln_kernel, nh=nh, eps=eps),
        out_shape=jax.ShapeDtypeStruct((Mp, H), out_dtype),
        grid_spec=pltpu.PrefetchScalarGridSpec(
            num_scalar_prefetch=0,
            grid=(Mp // tm,),
            in_specs=[pl.BlockSpec((nh, tm, dh), lambda i: (0, i, 0)),
                      pl.BlockSpec((nh, dh, H), lambda i: (0, 0, 0)),
                      pl.BlockSpec((1, H), lambda i: (0, 0)),
                      pl.BlockSpec((tm, H), lambda i: (i, 0)),
                      pl.BlockSpec((1, H), lambda i: (0, 0)),
                      pl.BlockSpec((1, H), lambda i: (0, 0))],
            out_specs=pl.BlockSpec((tm, H), lambda i: (i, 0))),
        compiler_params=pltpu.CompilerParams(
            dimension_semantics=("parallel",),
            vmem_limit_bytes=_VMEM_LIMIT),
    )(ctx.astype(jnp.bfloat16), w_heads,
      b.reshape(1, H).astype(jnp.float32), res.astype(jnp.bfloat16),
      gamma.reshape(1, H).astype(jnp.float32),
      beta.reshape(1, H).astype(jnp.float32))


# ------------------ fused linear + bias + residual + LayerNorm --------------

def _linear_res_ln_kernel(x_ref, w_ref, b_ref, res_ref, g_ref, beta_ref,
                          o_ref, acc_ref, *, eps):
    k = pl.program_id(1)

    @pl.when(k == 0)
    def _():
        acc_ref[...] = jnp.zeros_like(acc_ref)

    acc_ref[...] += jnp.dot(x_ref[...], w_ref[...],
                            preferred_element_type=jnp.float32)

    @pl.when(k == pl.num_programs(1) - 1)
    def _():
        y = acc_ref[...] + b_ref[...] + res_ref[...].astype(jnp.float32)
        mean = jnp.mean(y, axis=-1, keepdims=True)
        yc = y - mean
        var = jnp.mean(yc * yc, axis=-1, keepdims=True)
        inv = lax.rsqrt(var + eps)
        o_ref[...] = (yc * inv * g_ref[...] + beta_ref[...]).astype(o_ref.dtype)


def linear_res_layernorm(x, w, b, res, gamma, beta, eps=1e-12,
                         out_dtype=jnp.bfloat16):
    M, K = x.shape
    H = w.shape[1]                              # LN axis: kept full
    Mp, tm = _tile(M, 512, 16)
    Kp, tk = _ktile(K)
    xp = _pad_to(x.astype(jnp.bfloat16), (Mp, Kp))
    wp = _pad_to(w.astype(jnp.bfloat16), (Kp, H))
    resp = _pad_to(res.astype(jnp.bfloat16), (Mp, H))
    out = pl.pallas_call(
        functools.partial(_linear_res_ln_kernel, eps=eps),
        out_shape=jax.ShapeDtypeStruct((Mp, H), out_dtype),
        grid_spec=pltpu.PrefetchScalarGridSpec(
            num_scalar_prefetch=0,
            grid=(Mp // tm, Kp // tk),
            in_specs=[pl.BlockSpec((tm, tk), lambda i, k: (i, k)),
                      pl.BlockSpec((tk, H), lambda i, k: (k, 0)),
                      pl.BlockSpec((1, H), lambda i, k: (0, 0)),
                      pl.BlockSpec((tm, H), lambda i, k: (i, 0)),
                      pl.BlockSpec((1, H), lambda i, k: (0, 0)),
                      pl.BlockSpec((1, H), lambda i, k: (0, 0))],
            out_specs=pl.BlockSpec((tm, H), lambda i, k: (i, 0)),
            scratch_shapes=[pltpu.VMEM((tm, H), jnp.float32)]),
        compiler_params=pltpu.CompilerParams(
            dimension_semantics=("parallel", "arbitrary"),
            vmem_limit_bytes=_VMEM_LIMIT),
    )(xp, wp, b.reshape(1, H).astype(jnp.float32), resp,
      gamma.reshape(1, H).astype(jnp.float32),
      beta.reshape(1, H).astype(jnp.float32))
    return out[:M, :]


# ------------------------------- plain LayerNorm -----------------------------

def _layernorm_kernel(x_ref, g_ref, b_ref, o_ref, *, eps):
    x = x_ref[...].astype(jnp.float32)
    mean = jnp.mean(x, axis=-1, keepdims=True)
    xc = x - mean
    var = jnp.mean(xc * xc, axis=-1, keepdims=True)
    inv = lax.rsqrt(var + eps)
    o_ref[...] = (xc * inv * g_ref[...] + b_ref[...]).astype(o_ref.dtype)


def layernorm(x, gamma, beta, eps=1e-12, out_dtype=jnp.bfloat16):
    M, H = x.shape
    Mp, tm = _tile(M, 512, 16)
    xp = _pad_to(x, (Mp, H))
    out = pl.pallas_call(
        functools.partial(_layernorm_kernel, eps=eps),
        out_shape=jax.ShapeDtypeStruct((Mp, H), out_dtype),
        grid_spec=pltpu.PrefetchScalarGridSpec(
            num_scalar_prefetch=0,
            grid=(Mp // tm,),
            in_specs=[pl.BlockSpec((tm, H), lambda i: (i, 0)),
                      pl.BlockSpec((1, H), lambda i: (0, 0)),
                      pl.BlockSpec((1, H), lambda i: (0, 0))],
            out_specs=pl.BlockSpec((tm, H), lambda i: (i, 0))),
        compiler_params=pltpu.CompilerParams(
            dimension_semantics=("parallel",),
            vmem_limit_bytes=_VMEM_LIMIT),
    )(xp, gamma.reshape(1, H).astype(jnp.float32),
      beta.reshape(1, H).astype(jnp.float32))
    return out[:M]


# ----------------- parallel row-blocked masked cross-entropy -----------------

def _ce_kernel(logits_ref, labels_ref, valid_ref, loss_ref, cnt_ref,
               *, num_classes):
    logits = logits_ref[...].astype(jnp.float32)      # (tr, Cp) lane-dense
    labels = labels_ref[...]                          # (tr, 1) int32
    valid = valid_ref[...]                            # (tr, 1) f32
    tr, cp = logits.shape
    col = lax.broadcasted_iota(jnp.int32, (tr, cp), 1)
    logits = jnp.where(col < num_classes, logits, jnp.float32(-1e30))
    mx = jnp.max(logits, axis=-1, keepdims=True)
    lse = jnp.log(jnp.sum(jnp.exp(logits - mx), axis=-1, keepdims=True)) + mx
    onehot = (col == labels).astype(jnp.float32)
    label_logit = jnp.sum(logits * onehot, axis=-1, keepdims=True)
    loss = (lse - label_logit) * valid                # (tr, 1)
    lsum = jnp.sum(loss, axis=0, keepdims=True)       # (1, 1) block partial
    csum = jnp.sum(valid, axis=0, keepdims=True)
    loss_ref[...] = jnp.broadcast_to(lsum.reshape(1, 1, 1), loss_ref.shape)
    cnt_ref[...] = jnp.broadcast_to(csum.reshape(1, 1, 1), cnt_ref.shape)


def cross_entropy(logits_padded, labels, valid, num_classes):
    """Mean CE over rows with valid==1; logits_padded is (Rp, Cp) lane-dense."""
    Rp, Cp = logits_padded.shape
    _, tr = _tile(Rp, 1024, 16)
    nblk = Rp // tr
    labels2 = labels.reshape(Rp, 1).astype(jnp.int32)
    valid2 = valid.reshape(Rp, 1).astype(jnp.float32)
    loss_p, cnt_p = pl.pallas_call(
        functools.partial(_ce_kernel, num_classes=num_classes),
        out_shape=(jax.ShapeDtypeStruct((nblk, 8, 128), jnp.float32),
                   jax.ShapeDtypeStruct((nblk, 8, 128), jnp.float32)),
        grid_spec=pltpu.PrefetchScalarGridSpec(
            num_scalar_prefetch=0,
            grid=(nblk,),
            in_specs=[pl.BlockSpec((tr, Cp), lambda i: (i, 0)),
                      pl.BlockSpec((tr, 1), lambda i: (i, 0)),
                      pl.BlockSpec((tr, 1), lambda i: (i, 0))],
            out_specs=[pl.BlockSpec((1, 8, 128), lambda i: (i, 0, 0)),
                       pl.BlockSpec((1, 8, 128), lambda i: (i, 0, 0))]),
        compiler_params=pltpu.CompilerParams(
            dimension_semantics=("parallel",),
            vmem_limit_bytes=_VMEM_LIMIT),
    )(logits_padded, labels2, valid2)
    loss_sum = jnp.sum(loss_p[:, 0, 0])
    cnt = jnp.sum(cnt_p[:, 0, 0])
    # Reference (PyTorch) would produce NaN if no valid rows; we guard instead.
    return loss_sum / jnp.maximum(cnt, 1.0)


# ---------------------------------- params ----------------------------------

def init_params(key, cfg):
    H, I, nh = cfg["hidden"], cfg["intermediate"], cfg["heads"]
    dh = H // nh
    scale = 1.0 / math.sqrt(dh)

    def nrm(k, shape):
        return 0.02 * jax.random.normal(k, shape, dtype=jnp.float32)

    keys = iter(jax.random.split(key, 8 + 8 * cfg["layers"]))
    params = {
        "word_emb": nrm(next(keys), (cfg["vocab"], H)),
        "pos_emb": nrm(next(keys), (cfg["max_pos"], H)),
        "type_emb": nrm(next(keys), (cfg["type_vocab"], H)),
        "emb_ln_g": jnp.ones((H,), jnp.float32),
        "emb_ln_b": jnp.zeros((H,), jnp.float32),
        "pool_w": nrm(next(keys), (H, H)).astype(jnp.bfloat16),
        "pool_b": jnp.zeros((H,), jnp.float32),
        "intent_w": nrm(next(keys), (H, cfg["num_intent"])).astype(jnp.bfloat16),
        "intent_b": jnp.zeros((cfg["num_intent"],), jnp.float32),
        "slot_w": nrm(next(keys), (H, cfg["num_slot"])).astype(jnp.bfloat16),
        "slot_b": jnp.zeros((cfg["num_slot"],), jnp.float32),
        "layers": [],
    }
    for _ in range(cfg["layers"]):
        q_w = nrm(next(keys), (H, H))
        k_w = nrm(next(keys), (H, H))
        v_w = nrm(next(keys), (H, H))
        # Fused QKV weight, columns ordered [q heads..., k heads..., v heads...];
        # the 1/sqrt(dh) score scale is folded into the Q columns (and would be
        # folded into the Q bias too; biases are zero here).
        qkv_w = jnp.concatenate([q_w * scale, k_w, v_w], axis=1)
        qkv_b = jnp.zeros((3 * H,), jnp.float32)
        lp = {
            "qkv_w": qkv_w.astype(jnp.bfloat16), "qkv_b": qkv_b,
            "ao_w": nrm(next(keys), (H, H)).astype(jnp.bfloat16),
            "ao_b": jnp.zeros((H,), jnp.float32),
            "attn_ln_g": jnp.ones((H,), jnp.float32),
            "attn_ln_b": jnp.zeros((H,), jnp.float32),
            "i_w": nrm(next(keys), (H, I)).astype(jnp.bfloat16),
            "i_b": jnp.zeros((I,), jnp.float32),
            "o_w": nrm(next(keys), (I, H)).astype(jnp.bfloat16),
            "o_b": jnp.zeros((H,), jnp.float32),
            "out_ln_g": jnp.ones((H,), jnp.float32),
            "out_ln_b": jnp.zeros((H,), jnp.float32),
        }
        params["layers"].append(lp)
    return params


# ------------------------------ forward (glue) -------------------------------

def jointbert_forward(params, input_ids, attention_mask, token_type_ids,
                      intent_label_ids, slot_labels_ids, cfg):
    # Eval-mode forward: dropout layers are identity.
    # TODO(synk): g2g graph-augmented BERT, CRF slot head and the
    # num_intent==1 MSE branch are not implemented (CRF raises in reference).
    B, S = input_ids.shape
    H, nh = cfg["hidden"], cfg["heads"]
    dh = H // nh
    S_pad, _ = _tile(S, 512, 128)
    Mp = B * S_pad

    # --- embeddings (gathers stay in XLA), LayerNorm in a Pallas kernel ---
    we = jnp.take(params["word_emb"], input_ids, axis=0)
    pe = params["pos_emb"][:S][None, :, :]
    te = jnp.take(params["type_emb"], token_type_ids, axis=0)
    emb = (we + pe + te).astype(jnp.float32)
    emb = jnp.pad(emb, ((0, 0), (0, S_pad - S), (0, 0))).reshape(Mp, H)
    hidden = layernorm(emb, params["emb_ln_g"], params["emb_ln_b"])   # (Mp,H)

    # additive attention mask, un-replicated across heads: (B, 1, S_pad)
    mask_p = _pad_to(attention_mask.astype(jnp.float32), (B, S_pad))
    add_mask = ((1.0 - mask_p) * -10000.0).reshape(B, 1, S_pad)

    hidden_states = [hidden.reshape(B, S_pad, H)[:, :S, :]]
    for lp in params["layers"]:
        x = hidden                                          # (Mp, H) bf16
        # fused QKV projection, emitted head-separated: (3*nh, Mp, dh)
        qkv = qkv_projection(x, lp["qkv_w"], lp["qkv_b"], nh, dh)
        ctx = flash_attention(qkv.reshape(3 * nh, B, S_pad, dh), add_mask)
        ctx = ctx.reshape(nh, Mp, dh)                       # free reshape
        # attention-output projection + residual + LayerNorm (heads reduced
        # inside the kernel; no context re-layout)
        hidden = heads_linear_res_layernorm(ctx, lp["ao_w"], lp["ao_b"], x,
                                            lp["attn_ln_g"], lp["attn_ln_b"])
        # FFN: up-proj with fused GELU, down-proj with fused residual + LN;
        # intermediate stays lane-padded end-to-end (no trim copies).
        inter = linear(hidden, lp["i_w"], lp["i_b"], activation="gelu",
                       trim=False)
        hidden = linear_res_layernorm(inter, lp["o_w"], lp["o_b"], hidden,
                                      lp["out_ln_g"], lp["out_ln_b"])
        hidden_states.append(hidden.reshape(B, S_pad, H)[:, :S, :])

    # --- pooler: tanh(dense(CLS)) ---
    cls = hidden.reshape(B, S_pad, H)[:, 0, :]
    pooled = linear(cls, params["pool_w"], params["pool_b"],
                    activation="tanh", trim=False)          # (Bp, Hp)

    # --- classifiers: lane-dense padded logits feed the CE kernels ---
    intent_pad = linear(pooled, params["intent_w"], params["intent_b"],
                        out_dtype=jnp.float32, trim=False)  # (Bp, Ci_pad)
    slot_pad = linear(hidden, params["slot_w"], params["slot_b"],
                      out_dtype=jnp.float32, trim=False)    # (Mp, Cs_pad)

    intent_logits = intent_pad[:B, :cfg["num_intent"]]
    slot_logits = slot_pad.reshape(B, S_pad, -1)[:, :S, :cfg["num_slot"]]

    # --- losses ---
    Bp = intent_pad.shape[0]
    intent_labels = _pad_to(intent_label_ids.reshape(-1).astype(jnp.int32),
                            (Bp,))
    intent_valid = (jnp.arange(Bp) < B).astype(jnp.float32)
    intent_loss = cross_entropy(intent_pad, intent_labels, intent_valid,
                                cfg["num_intent"])

    slot_labels = _pad_to(slot_labels_ids.astype(jnp.int32),
                          (B, S_pad)).reshape(-1)
    slot_valid = ((mask_p.reshape(-1) == 1.0)
                  & (slot_labels != cfg["ignore_index"])).astype(jnp.float32)
    slot_loss = cross_entropy(slot_pad, slot_labels, slot_valid,
                              cfg["num_slot"])

    total_loss = intent_loss + cfg["slot_loss_coef"] * slot_loss
    return total_loss, (intent_logits, slot_logits), tuple(hidden_states)


# ----------------------------------- main ------------------------------------

if __name__ == "__main__":
    cfg = dict(vocab=100, hidden=32, layers=2, heads=2, intermediate=64,
               max_pos=16, type_vocab=2, num_intent=5, num_slot=7,
               ignore_index=0, slot_loss_coef=1.0)
    B, S = 2, 8

    key = jax.random.PRNGKey(0)
    kp, k1, k2, k3 = jax.random.split(key, 4)

    params = init_params(kp, cfg)

    input_ids = jax.random.randint(k1, (B, S), 0, cfg["vocab"], dtype=jnp.int32)
    attention_mask = jnp.array([[1, 1, 1, 1, 1, 1, 0, 0],
                                [1, 1, 1, 1, 1, 1, 1, 0]], dtype=jnp.int32)
    token_type_ids = jnp.zeros((B, S), dtype=jnp.int32)
    intent_label_ids = jax.random.randint(k2, (B,), 0, cfg["num_intent"],
                                          dtype=jnp.int32)
    slot_labels_ids = jax.random.randint(k3, (B, S), 1, cfg["num_slot"],
                                         dtype=jnp.int32)

    fwd = jax.jit(functools.partial(jointbert_forward, cfg=cfg))
    total_loss, (intent_logits, slot_logits), hidden_states = fwd(
        params, input_ids, attention_mask, token_type_ids,
        intent_label_ids, slot_labels_ids)

    jax.block_until_ready(total_loss)
    jax.block_until_ready(intent_logits)
    jax.block_until_ready(slot_logits)

    assert intent_logits.shape == (B, cfg["num_intent"])
    assert slot_logits.shape == (B, S, cfg["num_slot"])
    assert len(hidden_states) == cfg["layers"] + 1
    assert bool(jnp.isfinite(total_loss))
    print("KERNEL_OK")
</pallas_src>

<mosaic_0001>
module attributes {stable_mosaic.version = 11 : i64} {
  func.func @_layernorm_kernel(%arg0: i32, %arg1: memref<256x32xf32, #tpu.memory_space<vmem>>, %arg2: memref<1x32xf32, #tpu.memory_space<vmem>>, %arg3: memref<1x32xf32, #tpu.memory_space<vmem>>, %arg4: memref<256x32xbf16, #tpu.memory_space<vmem>>) attributes {dimension_semantics = [#tpu.dimension_semantics<parallel>], iteration_bounds = array<i64: 1>, scalar_prefetch = 0 : i64, scratch_operands = 0 : i64, tpu.core_type = #tpu.core_type<tc>, window_params = [{transform_indices = @transform_0, window_bounds = array<i64: 256, 32>}, {pipeline_mode = #tpu.pipeline_mode<synchronous>, transform_indices = @transform_1, window_bounds = array<i64: 1, 32>}, {pipeline_mode = #tpu.pipeline_mode<synchronous>, transform_indices = @transform_2, window_bounds = array<i64: 1, 32>}, {transform_indices = @transform_3, window_bounds = array<i64: 256, 32>}]} {
    %c0 = arith.constant 0 : index
    %c0_0 = arith.constant 0 : index
    %0 = vector.load %arg1[%c0, %c0_0] : memref<256x32xf32, #tpu.memory_space<vmem>>, vector<256x32xf32>
    %cst = arith.constant dense<0.000000e+00> : vector<256xf32>
    %1 = vector.multi_reduction <add>, %0, %cst [1] : vector<256x32xf32> to vector<256xf32>
    %2 = vector.shape_cast %1 : vector<256xf32> to vector<256x1xf32>
    %cst_1 = arith.constant 3.200000e+01 : f32
    %3 = vector.broadcast %cst_1 : f32 to vector<256x1xf32>
    %4 = arith.divf %2, %3 : vector<256x1xf32>
    %5 = vector.broadcast %4 : vector<256x1xf32> to vector<256x32xf32>
    %6 = arith.subf %0, %5 : vector<256x32xf32>
    %7 = arith.mulf %6, %6 : vector<256x32xf32>
    %cst_2 = arith.constant dense<0.000000e+00> : vector<256xf32>
    %8 = vector.multi_reduction <add>, %7, %cst_2 [1] : vector<256x32xf32> to vector<256xf32>
    %9 = vector.shape_cast %8 : vector<256xf32> to vector<256x1xf32>
    %cst_3 = arith.constant 3.200000e+01 : f32
    %10 = vector.broadcast %cst_3 : f32 to vector<256x1xf32>
    %11 = arith.divf %9, %10 : vector<256x1xf32>
    %cst_4 = arith.constant 9.99999996E-13 : f32
    %12 = vector.broadcast %cst_4 : f32 to vector<256x1xf32>
    %13 = arith.addf %11, %12 : vector<256x1xf32>
    %14 = math.rsqrt %13 : vector<256x1xf32>
    %15 = vector.broadcast %14 : vector<256x1xf32> to vector<256x32xf32>
    %16 = arith.mulf %6, %15 : vector<256x32xf32>
    %c0_5 = arith.constant 0 : index
    %c0_6 = arith.constant 0 : index
    %17 = vector.load %arg2[%c0_5, %c0_6] : memref<1x32xf32, #tpu.memory_space<vmem>>, vector<1x32xf32>
    %18 = vector.broadcast %17 : vector<1x32xf32> to vector<256x32xf32>
    %19 = arith.mulf %16, %18 : vector<256x32xf32>
    %c0_7 = arith.constant 0 : index
    %c0_8 = arith.constant 0 : index
    %20 = vector.load %arg3[%c0_7, %c0_8] : memref<1x32xf32, #tpu.memory_space<vmem>>, vector<1x32xf32>
    %21 = vector.broadcast %20 : vector<1x32xf32> to vector<256x32xf32>
    %22 = arith.addf %19, %21 : vector<256x32xf32>
    %23 = arith.truncf %22 : vector<256x32xf32> to vector<256x32xbf16>
    %c0_9 = arith.constant 0 : index
    %c0_10 = arith.constant 0 : index
    %24 = vector.load %arg4[%c0_9, %c0_10] : memref<256x32xbf16, #tpu.memory_space<vmem>>, vector<256x32xbf16>
    tpu.vector_store %arg4[%c0_9, %c0_10], %23 {strides = array<i32>} : memref<256x32xbf16, #tpu.memory_space<vmem>>, vector<256x32xbf16>,
    return
  }
  func.func @transform_0(%arg0: i32) -> (i32, i32) {
    %c0_i32 = arith.constant 0 : i32
    %c0_i32_0 = arith.constant 0 : i32
    return %arg0, %c0_i32 : i32, i32
  }
  func.func @transform_1(%arg0: i32) -> (i32, i32) {
    %c0_i32 = arith.constant 0 : i32
    %c0_i32_0 = arith.constant 0 : i32
    %c0_i32_1 = arith.constant 0 : i32
    return %c0_i32, %c0_i32_0 : i32, i32
  }
  func.func @transform_2(%arg0: i32) -> (i32, i32) {
    %c0_i32 = arith.constant 0 : i32
    %c0_i32_0 = arith.constant 0 : i32
    %c0_i32_1 = arith.constant 0 : i32
    return %c0_i32, %c0_i32_0 : i32, i32
  }
  func.func @transform_3(%arg0: i32) -> (i32, i32) {
    %c0_i32 = arith.constant 0 : i32
    %c0_i32_0 = arith.constant 0 : i32
    return %arg0, %c0_i32 : i32, i32
  }
}

module attributes {stable_mosaic.version = 11 : i64} {
  func.func @_qkv_kernel(%arg0: i32, %arg1: i32, %arg2: i32, %arg3: memref<256x32xbf16, #tpu.memory_space<vmem>>, %arg4: memref<32x96xbf16, #tpu.memory_space<vmem>>, %arg5: memref<1x96xf32, #tpu.memory_space<vmem>>, %arg6: memref<6x256x16xbf16, #tpu.memory_space<vmem>>, %arg7: memref<256x96xf32, #tpu.memory_space<vmem>>) attributes {dimension_semantics = [#tpu.dimension_semantics<parallel>, #tpu.dimension_semantics<parallel>, #tpu.dimension_semantics<arbitrary>], iteration_bounds = array<i64: 1, 1, 1>, scalar_prefetch = 0 : i64, scratch_operands = 1 : i64, tpu.core_type = #tpu.core_type<tc>, window_params = [{transform_indices = @transform_0, window_bounds = array<i64: 256, 32>}, {transform_indices = @transform_1, window_bounds = array<i64: 32, 96>}, {transform_indices = @transform_2, window_bounds = array<i64: 1, 96>}, {transform_indices = @transform_3, window_bounds = array<i64: 6, 256, 16>}]} {
    %c0_i32 = arith.constant 0 : i32
    %0 = arith.cmpi eq, %arg2, %c0_i32 : i32
    %1 = arith.extui %0 : i1 to i32
    %c0_i32_0 = arith.constant 0 : i32
    %2 = arith.cmpi ne, %1, %c0_i32_0 : i32
    scf.if %2 {
      %cst_10 = arith.constant 0.000000e+00 : f32
      %12 = vector.broadcast %cst_10 : f32 to vector<256x96xf32>
      %c0_11 = arith.constant 0 : index
      %c0_12 = arith.constant 0 : index
      %13 = vector.load %arg7[%c0_11, %c0_12] : memref<256x96xf32, #tpu.memory_space<vmem>>, vector<256x96xf32>
      tpu.vector_store %arg7[%c0_11, %c0_12], %12 {strides = array<i32>} : memref<256x96xf32, #tpu.memory_space<vmem>>, vector<256x96xf32>,
    } else {
    }
    %c0 = arith.constant 0 : index
    %c0_1 = arith.constant 0 : index
    %3 = vector.load %arg7[%c0, %c0_1] : memref<256x96xf32, #tpu.memory_space<vmem>>, vector<256x96xf32>
    %c0_2 = arith.constant 0 : index
    %c0_3 = arith.constant 0 : index
    %4 = vector.load %arg3[%c0_2, %c0_3] : memref<256x32xbf16, #tpu.memory_space<vmem>>, vector<256x32xbf16>
    %c0_4 = arith.constant 0 : index
    %c0_5 = arith.constant 0 : index
    %5 = vector.load %arg4[%c0_4, %c0_5] : memref<32x96xbf16, #tpu.memory_space<vmem>>, vector<32x96xbf16>
    %cst = arith.constant dense<0.000000e+00> : vector<256x96xf32>
    %6 = tpu.matmul %4, %5, %cst {dimension_numbers = #tpu.dot_dimension_numbers<[1], [0], [0], [1], [0, 0, 1, 1], [], []>} : vector<256x32xbf16>, vector<32x96xbf16>, vector<256x96xf32> -> vector<256x96xf32>
    %7 = arith.addf %3, %6 : vector<256x96xf32>
    %c0_6 = arith.constant 0 : index
    %c0_7 = arith.constant 0 : index
    %8 = vector.load %arg7[%c0_6, %c0_7] : memref<256x96xf32, #tpu.memory_space<vmem>>, vector<256x96xf32>
    tpu.vector_store %arg7[%c0_6, %c0_7], %7 {strides = array<i32>} : memref<256x96xf32, #tpu.memory_space<vmem>>, vector<256x96xf32>,
    %c0_i32_8 = arith.constant 0 : i32
    %9 = arith.cmpi eq, %arg2, %c0_i32_8 : i32
    %10 = arith.extui %9 : i1 to i32
    %c0_i32_9 = arith.constant 0 : i32
    %11 = arith.cmpi ne, %10, %c0_i32_9 : i32
    scf.if %11 {
      %c0_10 = arith.constant 0 : index
      %c0_11 = arith.constant 0 : index
      %12 = vector.load %arg7[%c0_10, %c0_11] : memref<256x96xf32, #tpu.memory_space<vmem>>, vector<256x96xf32>
      %c0_12 = arith.constant 0 : index
      %c0_13 = arith.constant 0 : index
      %13 = vector.load %arg5[%c0_12, %c0_13] : memref<1x96xf32, #tpu.memory_space<vmem>>, vector<1x96xf32>
      %14 = vector.broadcast %13 : vector<1x96xf32> to vector<256x96xf32>
      %15 = arith.addf %12, %14 : vector<256x96xf32>
      %16 = vector.extract_strided_slice %15 {offsets = [0, 0], sizes = [256, 16], strides = [1, 1]} : vector<256x96xf32> to vector<256x16xf32>
      %17 = arith.truncf %16 : vector<256x16xf32> to vector<256x16xbf16>
      %c0_14 = arith.constant 0 : index
      %c0_15 = arith.constant 0 : index
      %c0_16 = arith.constant 0 : index
      %18 = vector.load %arg6[%c0_14, %c0_15, %c0_16] : memref<6x256x16xbf16, #tpu.memory_space<vmem>>, vector<1x256x16xbf16>
      %19 = vector.shape_cast %18 : vector<1x256x16xbf16> to vector<256x16xbf16>
      %20 = vector.shape_cast %17 : vector<256x16xbf16> to vector<1x256x16xbf16>
      tpu.vector_store %arg6[%c0_14, %c0_15, %c0_16], %20 {strides = array<i32>} : memref<6x256x16xbf16, #tpu.memory_space<vmem>>, vector<1x256x16xbf16>,
      %21 = vector.extract_strided_slice %15 {offsets = [0, 16], sizes = [256, 16], strides = [1, 1]} : vector<256x96xf32> to vector<256x16xf32>
      %22 = arith.truncf %21 : vector<256x16xf32> to vector<256x16xbf16>
      %c1 = arith.constant 1 : index
      %c0_17 = arith.constant 0 : index
      %c0_18 = arith.constant 0 : index
      %23 = vector.load %arg6[%c1, %c0_17, %c0_18] : memref<6x256x16xbf16, #tpu.memory_space<vmem>>, vector<1x256x16xbf16>
      %24 = vector.shape_cast %23 : vector<1x256x16xbf16> to vector<256x16xbf16>
      %25 = vector.shape_cast %22 : vector<256x16xbf16> to vector<1x256x16xbf16>
      tpu.vector_store %arg6[%c1, %c0_17, %c0_18], %25 {strides = array<i32>} : memref<6x256x16xbf16, #tpu.memory_space<vmem>>, vector<1x256x16xbf16>,
      %26 = vector.extract_strided_slice %15 {offsets = [0, 32], sizes = [256, 16], strides = [1, 1]} : vector<256x96xf32> to vector<256x16xf32>
      %27 = arith.truncf %26 : vector<256x16xf32> to vector<256x16xbf16>
      %c2 = arith.constant 2 : index
      %c0_19 = arith.constant 0 : index
      %c0_20 = arith.constant 0 : index
      %28 = vector.load %arg6[%c2, %c0_19, %c0_20] : memref<6x256x16xbf16, #tpu.memory_space<vmem>>, vector<1x256x16xbf16>
      %29 = vector.shape_cast %28 : vector<1x256x16xbf16> to vector<256x16xbf16>
      %30 = vector.shape_cast %27 : vector<256x16xbf16> to vector<1x256x16xbf16>
      tpu.vector_store %arg6[%c2, %c0_19, %c0_20], %30 {strides = array<i32>} : memref<6x256x16xbf16, #tpu.memory_space<vmem>>, vector<1x256x16xbf16>,
      %31 = vector.extract_strided_slice %15 {offsets = [0, 48], sizes = [256, 16], strides = [1, 1]} : vector<256x96xf32> to vector<256x16xf32>
      %32 = arith.truncf %31 : vector<256x16xf32> to vector<256x16xbf16>
      %c3 = arith.constant 3 : index
      %c0_21 = arith.constant 0 : index
      %c0_22 = arith.constant 0 : index
      %33 = vector.load %arg6[%c3, %c0_21, %c0_22] : memref<6x256x16xbf16, #tpu.memory_space<vmem>>, vector<1x256x16xbf16>
      %34 = vector.shape_cast %33 : vector<1x256x16xbf16> to vector<256x16xbf16>
      %35 = vector.shape_cast %32 : vector<256x16xbf16> to vector<1x256x16xbf16>
      tpu.vector_store %arg6[%c3, %c0_21, %c0_22], %35 {strides = array<i32>} : memref<6x256x16xbf16, #tpu.memory_space<vmem>>, vector<1x256x16xbf16>,
      %36 = vector.extract_strided_slice %15 {offsets = [0, 64], sizes = [256, 16], strides = [1, 1]} : vector<256x96xf32> to vector<256x16xf32>
      %37 = arith.truncf %36 : vector<256x16xf32> to vector<256x16xbf16>
      %c4 = arith.constant 4 : index
      %c0_23 = arith.constant 0 : index
      %c0_24 = arith.constant 0 : index
      %38 = vector.load %arg6[%c4, %c0_23, %c0_24] : memref<6x256x16xbf16, #tpu.memory_space<vmem>>, vector<1x256x16xbf16>
      %39 = vector.shape_cast %38 : vector<1x256x16xbf16> to vector<256x16xbf16>
      %40 = vector.shape_cast %37 : vector<256x16xbf16> to vector<1x256x16xbf16>
      tpu.vector_store %arg6[%c4, %c0_23, %c0_24], %40 {strides = array<i32>} : memref<6x256x16xbf16, #tpu.memory_space<vmem>>, vector<1x256x16xbf16>,
      %41 = vector.extract_strided_slice %15 {offsets = [0, 80], sizes = [256, 16], strides = [1, 1]} : vector<256x96xf32> to vector<256x16xf32>
      %42 = arith.truncf %41 : vector<256x16xf32> to vector<256x16xbf16>
      %c5 = arith.constant 5 : index
      %c0_25 = arith.constant 0 : index
      %c0_26 = arith.constant 0 : index
      %43 = vector.load %arg6[%c5, %c0_25, %c0_26] : memref<6x256x16xbf16, #tpu.memory_space<vmem>>, vector<1x256x16xbf16>
      %44 = vector.shape_cast %43 : vector<1x256x16xbf16> to vector<256x16xbf16>
      %45 = vector.shape_cast %42 : vector<256x16xbf16> to vector<1x256x16xbf16>
      tpu.vector_store %arg6[%c5, %c0_25, %c0_26], %45 {strides = array<i32>} : memref<6x256x16xbf16, #tpu.memory_space<vmem>>, vector<1x256x16xbf16>,
    } else {
    }
    return
  }
  func.func @transform_0(%arg0: i32, %arg1: i32, %arg2: i32) -> (i32, i32) {
    %c0_i32 = arith.constant 0 : i32
    return %arg0, %arg2 : i32, i32
  }
  func.func @transform_1(%arg0: i32, %arg1: i32, %arg2: i32) -> (i32, i32) {
    %c0_i32 = arith.constant 0 : i32
    return %arg2, %arg1 : i32, i32
  }
  func.func @transform_2(%arg0: i32, %arg1: i32, %arg2: i32) -> (i32, i32) {
    %c0_i32 = arith.constant 0 : i32
    %c0_i32_0 = arith.constant 0 : i32
    return %c0_i32, %arg1 : i32, i32
  }
  func.func @transform_3(%arg0: i32, %arg1: i32, %arg2: i32) -> (i32, i32, i32) {
    %c0_i32 = arith.constant 0 : i32
    %c0_i32_0 = arith.constant 0 : i32
    return %arg1, %arg0, %c0_i32 : i32, i32, i32
  }
}

module attributes {stable_mosaic.version = 11 : i64} {
  func.func @_flash_kernel(%arg0: i32, %arg1: i32, %arg2: i32, %arg3: i32, %arg4: memref<1x1x128x16xbf16, #tpu.memory_space<vmem>>, %arg5: memref<1x1x128x16xbf16, #tpu.memory_space<vmem>>, %arg6: memref<1x1x128x16xbf16, #tpu.memory_space<vmem>>, %arg7: memref<1x1x128xf32, #tpu.memory_space<vmem>>, %arg8: memref<1x1x128x16xbf16, #tpu.memory_space<vmem>>, %arg9: memref<128x128xf32, #tpu.memory_space<vmem>>, %arg10: memref<128x128xf32, #tpu.memory_space<vmem>>, %arg11: memref<128x16xf32, #tpu.memory_space<vmem>>) attributes {dimension_semantics = [#tpu.dimension_semantics<parallel>, #tpu.dimension_semantics<parallel>, #tpu.dimension_semantics<parallel>, #tpu.dimension_semantics<arbitrary>], iteration_bounds = array<i64: 2, 2, 1, 1>, scalar_prefetch = 0 : i64, scratch_operands = 3 : i64, tpu.core_type = #tpu.core_type<tc>, window_params = [{transform_indices = @transform_0, window_bounds = array<i64: 1, 1, 128, 16>}, {transform_indices = @transform_1, window_bounds = array<i64: 1, 1, 128, 16>}, {transform_indices = @transform_2, window_bounds = array<i64: 1, 1, 128, 16>}, {transform_indices = @transform_3, window_bounds = array<i64: 1, 1, 128>}, {transform_indices = @transform_4, window_bounds = array<i64: 1, 1, 128, 16>}]} {
    %c0_i32 = arith.constant 0 : i32
    %0 = arith.cmpi eq, %arg3, %c0_i32 : i32
    %1 = arith.extui %0 : i1 to i32
    %c0_i32_0 = arith.constant 0 : i32
    %2 = arith.cmpi ne, %1, %c0_i32_0 : i32
    scf.if %2 {
      %cst_32 = arith.constant -1.000000e+30 : f32
      %44 = vector.broadcast %cst_32 : f32 to vector<128x128xf32>
      %c0_33 = arith.constant 0 : index
      %c0_34 = arith.constant 0 : index
      %45 = vector.load %arg9[%c0_33, %c0_34] : memref<128x128xf32, #tpu.memory_space<vmem>>, vector<128x128xf32>
      tpu.vector_store %arg9[%c0_33, %c0_34], %44 {strides = array<i32>} : memref<128x128xf32, #tpu.memory_space<vmem>>, vector<128x128xf32>,
      %cst_35 = arith.constant 0.000000e+00 : f32
      %46 = vector.broadcast %cst_35 : f32 to vector<128x128xf32>
      %c0_36 = arith.constant 0 : index
      %c0_37 = arith.constant 0 : index
      %47 = vector.load %arg10[%c0_36, %c0_37] : memref<128x128xf32, #tpu.memory_space<vmem>>, vector<128x128xf32>
      tpu.vector_store %arg10[%c0_36, %c0_37], %46 {strides = array<i32>} : memref<128x128xf32, #tpu.memory_space<vmem>>, vector<128x128xf32>,
      %cst_38 = arith.constant 0.000000e+00 : f32
      %48 = vector.broadcast %cst_38 : f32 to vector<128x16xf32>
      %c0_39 = arith.constant 0 : index
      %c0_40 = arith.constant 0 : index
      %49 = vector.load %arg11[%c0_39, %c0_40] : memref<128x16xf32, #tpu.memory_space<vmem>>, vector<128x16xf32>
      tpu.vector_store %arg11[%c0_39, %c0_40], %48 {strides = array<i32>} : memref<128x16xf32, #tpu.memory_space<vmem>>, vector<128x16xf32>,
    } else {
    }
    %c0 = arith.constant 0 : index
    %c0_1 = arith.constant 0 : index
    %c0_2 = arith.constant 0 : index
    %c0_3 = arith.constant 0 : index
    %3 = vector.load %arg4[%c0, %c0_1, %c0_2, %c0_3] : memref<1x1x128x16xbf16, #tpu.memory_space<vmem>>, vector<1x1x128x16xbf16>
    %4 = vector.shape_cast %3 : vector<1x1x128x16xbf16> to vector<128x16xbf16>
    %c0_4 = arith.constant 0 : index
    %c0_5 = arith.constant 0 : index
    %c0_6 = arith.constant 0 : index
    %c0_7 = arith.constant 0 : index
    %5 = vector.load %arg5[%c0_4, %c0_5, %c0_6, %c0_7] : memref<1x1x128x16xbf16, #tpu.memory_space<vmem>>, vector<1x1x128x16xbf16>
    %6 = vector.shape_cast %5 : vector<1x1x128x16xbf16> to vector<128x16xbf16>
    %c0_8 = arith.constant 0 : index
    %c0_9 = arith.constant 0 : index
    %c0_10 = arith.constant 0 : index
    %c0_11 = arith.constant 0 : index
    %7 = vector.load %arg6[%c0_8, %c0_9, %c0_10, %c0_11] : memref<1x1x128x16xbf16, #tpu.memory_space<vmem>>, vector<1x1x128x16xbf16>
    %8 = vector.shape_cast %7 : vector<1x1x128x16xbf16> to vector<128x16xbf16>
    "tpu.trace_start"() <{level = 10 : i32, message = "qd,kd->qk"}> : () -> ()
    %cst = arith.constant dense<0.000000e+00> : vector<128x128xf32>
    %9 = tpu.matmul %4, %6, %cst {dimension_numbers = #tpu.dot_dimension_numbers<[1], [1], [0], [0], [0, 0, 1, 0], [], []>} : vector<128x16xbf16>, vector<128x16xbf16>, vector<128x128xf32> -> vector<128x128xf32>
    "tpu.trace_stop"() : () -> ()
    %c0_12 = arith.constant 0 : index
    %c0_13 = arith.constant 0 : index
    %c0_14 = arith.constant 0 : index
    %10 = vector.load %arg7[%c0_12, %c0_13, %c0_14] : memref<1x1x128xf32, #tpu.memory_space<vmem>>, vector<1x1x128xf32>
    %11 = vector.shape_cast %10 : vector<1x1x128xf32> to vector<1x128xf32>
    %12 = vector.broadcast %11 : vector<1x128xf32> to vector<128x128xf32>
    %13 = arith.addf %9, %12 : vector<128x128xf32>
    %c0_15 = arith.constant 0 : index
    %c0_16 = arith.constant 0 : index
    %14 = vector.load %arg9[%c0_15, %c0_16] : memref<128x128xf32, #tpu.memory_space<vmem>>, vector<128x128xf32>
    %cst_17 = arith.constant dense<0xFF800000> : vector<128xf32>
    %15 = vector.multi_reduction <maximumf>, %13, %cst_17 [1] : vector<128x128xf32> to vector<128xf32>
    %16 = vector.shape_cast %15 : vector<128xf32> to vector<128x1xf32>
    %17 = vector.broadcast %16 : vector<128x1xf32> to vector<128x128xf32>
    %18 = arith.maximumf %14, %17 : vector<128x128xf32>
    %19 = arith.subf %14, %18 : vector<128x128xf32>
    %20 = math.exp %19 : vector<128x128xf32>
    %21 = vector.extract_strided_slice %18 {offsets = [0, 0], sizes = [128, 1], strides = [1, 1]} : vector<128x128xf32> to vector<128x1xf32>
    %22 = vector.broadcast %21 : vector<128x1xf32> to vector<128x128xf32>
    %23 = arith.subf %13, %22 : vector<128x128xf32>
    %24 = math.exp %23 : vector<128x128xf32>
    %c0_18 = arith.constant 0 : index
    %c0_19 = arith.constant 0 : index
    %25 = vector.load %arg10[%c0_18, %c0_19] : memref<128x128xf32, #tpu.memory_space<vmem>>, vector<128x128xf32>
    %26 = arith.mulf %20, %25 : vector<128x128xf32>
    %cst_20 = arith.constant dense<0.000000e+00> : vector<128xf32>
    %27 = vector.multi_reduction <add>, %24, %cst_20 [1] : vector<128x128xf32> to vector<128xf32>
    %28 = vector.shape_cast %27 : vector<128xf32> to vector<128x1xf32>
    %29 = vector.broadcast %28 : vector<128x1xf32> to vector<128x128xf32>
    %30 = arith.addf %26, %29 : vector<128x128xf32>
    %c0_21 = arith.constant 0 : index
    %c0_22 = arith.constant 0 : index
    %31 = vector.load %arg10[%c0_21, %c0_22] : memref<128x128xf32, #tpu.memory_space<vmem>>, vector<128x128xf32>
    tpu.vector_store %arg10[%c0_21, %c0_22], %30 {strides = array<i32>} : memref<128x128xf32, #tpu.memory_space<vmem>>, vector<128x128xf32>,
    %32 = vector.extract_strided_slice %20 {offsets = [0, 0], sizes = [128, 1], strides = [1, 1]} : vector<128x128xf32> to vector<128x1xf32>
    %c0_23 = arith.constant 0 : index
    %c0_24 = arith.constant 0 : index
    %33 = vector.load %arg11[%c0_23, %c0_24] : memref<128x16xf32, #tpu.memory_space<vmem>>, vector<128x16xf32>
    %34 = vector.broadcast %32 : vector<128x1xf32> to vector<128x16xf32>
    %35 = arith.mulf %34, %33 : vector<128x16xf32>
    %36 = arith.truncf %24 : vector<128x128xf32> to vector<128x128xbf16>
    %cst_25 = arith.constant dense<0.000000e+00> : vector<128x16xf32>
    %37 = tpu.matmul %36, %8, %cst_25 {dimension_numbers = #tpu.dot_dimension_numbers<[1], [0], [0], [1], [0, 0, 1, 1], [], []>} : vector<128x128xbf16>, vector<128x16xbf16>, vector<128x16xf32> -> vector<128x16xf32>
    %38 = arith.addf %35, %37 : vector<128x16xf32>
    %c0_26 = arith.constant 0 : index
    %c0_27 = arith.constant 0 : index
    %39 = vector.load %arg11[%c0_26, %c0_27] : memref<128x16xf32, #tpu.memory_space<vmem>>, vector<128x16xf32>
    tpu.vector_store %arg11[%c0_26, %c0_27], %38 {strides = array<i32>} : memref<128x16xf32, #tpu.memory_space<vmem>>, vector<128x16xf32>,
    %c0_28 = arith.constant 0 : index
    %c0_29 = arith.constant 0 : index
    %40 = vector.load %arg9[%c0_28, %c0_29] : memref<128x128xf32, #tpu.memory_space<vmem>>, vector<128x128xf32>
    tpu.vector_store %arg9[%c0_28, %c0_29], %18 {strides = array<i32>} : memref<128x128xf32, #tpu.memory_space<vmem>>, vector<128x128xf32>,
    %c0_i32_30 = arith.constant 0 : i32
    %41 = arith.cmpi eq, %arg3, %c0_i32_30 : i32
    %42 = arith.extui %41 : i1 to i32
    %c0_i32_31 = arith.constant 0 : i32
    %43 = arith.cmpi ne, %42, %c0_i32_31 : i32
    scf.if %43 {
      %c0_32 = arith.constant 0 : index
      %c0_33 = arith.constant 0 : index
      %44 = vector.load %arg11[%c0_32, %c0_33] : memref<128x16xf32, #tpu.memory_space<vmem>>, vector<128x16xf32>
      %c0_34 = arith.constant 0 : index
      %c0_35 = arith.constant 0 : index
      %45 = vector.load %arg10[%c0_34, %c0_35] : memref<128x128xf32, #tpu.memory_space<vmem>>, vector<128x1xf32>
      %46 = vector.broadcast %45 : vector<128x1xf32> to vector<128x16xf32>
      %47 = arith.divf %44, %46 : vector<128x16xf32>
      %48 = arith.truncf %47 : vector<128x16xf32> to vector<128x16xbf16>
      %c0_36 = arith.constant 0 : index
      %c0_37 = arith.constant 0 : index
      %c0_38 = arith.constant 0 : index
      %c0_39 = arith.constant 0 : index
      %49 = vector.load %arg8[%c0_36, %c0_37, %c0_38, %c0_39] : memref<1x1x128x16xbf16, #tpu.memory_space<vmem>>, vector<1x1x128x16xbf16>
      %50 = vector.shape_cast %49 : vector<1x1x128x16xbf16> to vector<128x16xbf16>
      %51 = vector.shape_cast %48 : vector<128x16xbf16> to vector<1x1x128x16xbf16>
      tpu.vector_store %arg8[%c0_36, %c0_37, %c0_38, %c0_39], %51 {strides = array<i32>} : memref<1x1x128x16xbf16, #tpu.memory_space<vmem>>, vector<1x1x128x16xbf16>,
    } else {
    }
    return
  }
  func.func @transform_0(%arg0: i32, %arg1: i32, %arg2: i32, %arg3: i32) -> (i32, i32, i32, i32) {
    %c0_i32 = arith.constant 0 : i32
    %c0_i32_0 = arith.constant 0 : i32
    return %arg1, %arg0, %arg2, %c0_i32 : i32, i32, i32, i32
  }
  func.func @transform_1(%arg0: i32, %arg1: i32, %arg2: i32, %arg3: i32) -> (i32, i32, i32, i32) {
    %c2_i32 = arith.constant 2 : i32
    %0 = arith.addi %c2_i32, %arg1 : i32
    %c0_i32 = arith.constant 0 : i32
    %c0_i32_0 = arith.constant 0 : i32
    return %0, %arg0, %arg3, %c0_i32 : i32, i32, i32, i32
  }
  func.func @transform_2(%arg0: i32, %arg1: i32, %arg2: i32, %arg3: i32) -> (i32, i32, i32, i32) {
    %c4_i32 = arith.constant 4 : i32
    %0 = arith.addi %c4_i32, %arg1 : i32
    %c0_i32 = arith.constant 0 : i32
    %c0_i32_0 = arith.constant 0 : i32
    return %0, %arg0, %arg3, %c0_i32 : i32, i32, i32, i32
  }
  func.func @transform_3(%arg0: i32, %arg1: i32, %arg2: i32, %arg3: i32) -> (i32, i32, i32) {
    %c0_i32 = arith.constant 0 : i32
    %c0_i32_0 = arith.constant 0 : i32
    return %arg0, %c0_i32, %arg3 : i32, i32, i32
  }
  func.func @transform_4(%arg0: i32, %arg1: i32, %arg2: i32, %arg3: i32) -> (i32, i32, i32, i32) {
    %c0_i32 = arith.constant 0 : i32
    %c0_i32_0 = arith.constant 0 : i32
    return %arg1, %arg0, %arg2, %c0_i32 : i32, i32, i32, i32
  }
}

module attributes {stable_mosaic.version = 11 : i64} {
  func.func @_heads_res_ln_kernel(%arg0: i32, %arg1: memref<2x256x16xbf16, #tpu.memory_space<vmem>>, %arg2: memref<2x16x32xbf16, #tpu.memory_space<vmem>>, %arg3: memref<1x32xf32, #tpu.memory_space<vmem>>, %arg4: memref<256x32xbf16, #tpu.memory_space<vmem>>, %arg5: memref<1x32xf32, #tpu.memory_space<vmem>>, %arg6: memref<1x32xf32, #tpu.memory_space<vmem>>, %arg7: memref<256x32xbf16, #tpu.memory_space<vmem>>) attributes {dimension_semantics = [#tpu.dimension_semantics<parallel>], iteration_bounds = array<i64: 1>, scalar_prefetch = 0 : i64, scratch_operands = 0 : i64, tpu.core_type = #tpu.core_type<tc>, window_params = [{transform_indices = @transform_0, window_bounds = array<i64: 2, 256, 16>}, {pipeline_mode = #tpu.pipeline_mode<synchronous>, transform_indices = @transform_1, window_bounds = array<i64: 2, 16, 32>}, {pipeline_mode = #tpu.pipeline_mode<synchronous>, transform_indices = @transform_2, window_bounds = array<i64: 1, 32>}, {transform_indices = @transform_3, window_bounds = array<i64: 256, 32>}, {pipeline_mode = #tpu.pipeline_mode<synchronous>, transform_indices = @transform_4, window_bounds = array<i64: 1, 32>}, {pipeline_mode = #tpu.pipeline_mode<synchronous>, transform_indices = @transform_5, window_bounds = array<i64: 1, 32>}, {transform_indices = @transform_6, window_bounds = array<i64: 256, 32>}]} {
    %c0 = arith.constant 0 : index
    %c0_0 = arith.constant 0 : index
    %c0_1 = arith.constant 0 : index
    %0 = vector.load %arg1[%c0, %c0_0, %c0_1] : memref<2x256x16xbf16, #tpu.memory_space<vmem>>, vector<1x256x16xbf16>
    %1 = vector.shape_cast %0 : vector<1x256x16xbf16> to vector<256x16xbf16>
    %c0_2 = arith.constant 0 : index
    %c0_3 = arith.constant 0 : index
    %c0_4 = arith.constant 0 : index
    %2 = vector.load %arg2[%c0_2, %c0_3, %c0_4] : memref<2x16x32xbf16, #tpu.memory_space<vmem>>, vector<1x16x32xbf16>
    %3 = vector.shape_cast %2 : vector<1x16x32xbf16> to vector<16x32xbf16>
    %cst = arith.constant dense<0.000000e+00> : vector<256x32xf32>
    %4 = tpu.matmul %1, %3, %cst {dimension_numbers = #tpu.dot_dimension_numbers<[1], [0], [0], [1], [0, 0, 1, 1], [], []>} : vector<256x16xbf16>, vector<16x32xbf16>, vector<256x32xf32> -> vector<256x32xf32>
    %c1 = arith.constant 1 : index
    %c0_5 = arith.constant 0 : index
    %c0_6 = arith.constant 0 : index
    %5 = vector.load %arg1[%c1, %c0_5, %c0_6] : memref<2x256x16xbf16, #tpu.memory_space<vmem>>, vector<1x256x16xbf16>
    %6 = vector.shape_cast %5 : vector<1x256x16xbf16> to vector<256x16xbf16>
    %c1_7 = arith.constant 1 : index
    %c0_8 = arith.constant 0 : index
    %c0_9 = arith.constant 0 : index
    %7 = vector.load %arg2[%c1_7, %c0_8, %c0_9] : memref<2x16x32xbf16, #tpu.memory_space<vmem>>, vector<1x16x32xbf16>
    %8 = vector.shape_cast %7 : vector<1x16x32xbf16> to vector<16x32xbf16>
    %cst_10 = arith.constant dense<0.000000e+00> : vector<256x32xf32>
    %9 = tpu.matmul %6, %8, %cst_10 {dimension_numbers = #tpu.dot_dimension_numbers<[1], [0], [0], [1], [0, 0, 1, 1], [], []>} : vector<256x16xbf16>, vector<16x32xbf16>, vector<256x32xf32> -> vector<256x32xf32>
    %10 = arith.addf %4, %9 : vector<256x32xf32>
    %c0_11 = arith.constant 0 : index
    %c0_12 = arith.constant 0 : index
    %11 = vector.load %arg3[%c0_11, %c0_12] : memref<1x32xf32, #tpu.memory_space<vmem>>, vector<1x32xf32>
    %12 = vector.broadcast %11 : vector<1x32xf32> to vector<256x32xf32>
    %13 = arith.addf %10, %12 : vector<256x32xf32>
    %c0_13 = arith.constant 0 : index
    %c0_14 = arith.constant 0 : index
    %14 = vector.load %arg4[%c0_13, %c0_14] : memref<256x32xbf16, #tpu.memory_space<vmem>>, vector<256x32xbf16>
    %15 = arith.extf %14 : vector<256x32xbf16> to vector<256x32xf32>
    %16 = arith.addf %13, %15 : vector<256x32xf32>
    %cst_15 = arith.constant dense<0.000000e+00> : vector<256xf32>
    %17 = vector.multi_reduction <add>, %16, %cst_15 [1] : vector<256x32xf32> to vector<256xf32>
    %18 = vector.shape_cast %17 : vector<256xf32> to vector<256x1xf32>
    %cst_16 = arith.constant 3.200000e+01 : f32
    %19 = vector.broadcast %cst_16 : f32 to vector<256x1xf32>
    %20 = arith.divf %18, %19 : vector<256x1xf32>
    %21 = vector.broadcast %20 : vector<256x1xf32> to vector<256x32xf32>
    %22 = arith.subf %16, %21 : vector<256x32xf32>
    %23 = arith.mulf %22, %22 : vector<256x32xf32>
    %cst_17 = arith.constant dense<0.000000e+00> : vector<256xf32>
    %24 = vector.multi_reduction <add>, %23, %cst_17 [1] : vector<256x32xf32> to vector<256xf32>
    %25 = vector.shape_cast %24 : vector<256xf32> to vector<256x1xf32>
    %cst_18 = arith.constant 3.200000e+01 : f32
    %26 = vector.broadcast %cst_18 : f32 to vector<256x1xf32>
    %27 = arith.divf %25, %26 : vector<256x1xf32>
    %cst_19 = arith.constant 9.99999996E-13 : f32
    %28 = vector.broadcast %cst_19 : f32 to vector<256x1xf32>
    %29 = arith.addf %27, %28 : vector<256x1xf32>
    %30 = math.rsqrt %29 : vector<256x1xf32>
    %31 = vector.broadcast %30 : vector<256x1xf32> to vector<256x32xf32>
    %32 = arith.mulf %22, %31 : vector<256x32xf32>
    %c0_20 = arith.constant 0 : index
    %c0_21 = arith.constant 0 : index
    %33 = vector.load %arg5[%c0_20, %c0_21] : memref<1x32xf32, #tpu.memory_space<vmem>>, vector<1x32xf32>
    %34 = vector.broadcast %33 : vector<1x32xf32> to vector<256x32xf32>
    %35 = arith.mulf %32, %34 : vector<256x32xf32>
    %c0_22 = arith.constant 0 : index
    %c0_23 = arith.constant 0 : index
    %36 = vector.load %arg6[%c0_22, %c0_23] : memref<1x32xf32, #tpu.memory_space<vmem>>, vector<1x32xf32>
    %37 = vector.broadcast %36 : vector<1x32xf32> to vector<256x32xf32>
    %38 = arith.addf %35, %37 : vector<256x32xf32>
    %39 = arith.truncf %38 : vector<256x32xf32> to vector<256x32xbf16>
    %c0_24 = arith.constant 0 : index
    %c0_25 = arith.constant 0 : index
    %40 = vector.load %arg7[%c0_24, %c0_25] : memref<256x32xbf16, #tpu.memory_space<vmem>>, vector<256x32xbf16>
    tpu.vector_store %arg7[%c0_24, %c0_25], %39 {strides = array<i32>} : memref<256x32xbf16, #tpu.memory_space<vmem>>, vector<256x32xbf16>,
    return
  }
  func.func @transform_0(%arg0: i32) -> (i32, i32, i32) {
    %c0_i32 = arith.constant 0 : i32
    %c0_i32_0 = arith.constant 0 : i32
    %c0_i32_1 = arith.constant 0 : i32
    return %c0_i32, %arg0, %c0_i32_0 : i32, i32, i32
  }
  func.func @transform_1(%arg0: i32) -> (i32, i32, i32) {
    %c0_i32 = arith.constant 0 : i32
    %c0_i32_0 = arith.constant 0 : i32
    %c0_i32_1 = arith.constant 0 : i32
    %c0_i32_2 = arith.constant 0 : i32
    return %c0_i32, %c0_i32_0, %c0_i32_1 : i32, i32, i32
  }
  func.func @transform_2(%arg0: i32) -> (i32, i32) {
    %c0_i32 = arith.constant 0 : i32
    %c0_i32_0 = arith.constant 0 : i32
    %c0_i32_1 = arith.constant 0 : i32
    return %c0_i32, %c0_i32_0 : i32, i32
  }
  func.func @transform_3(%arg0: i32) -> (i32, i32) {
    %c0_i32 = arith.constant 0 : i32
    %c0_i32_0 = arith.constant 0 : i32
    return %arg0, %c0_i32 : i32, i32
  }
  func.func @transform_4(%arg0: i32) -> (i32, i32) {
    %c0_i32 = arith.constant 0 : i32
    %c0_i32_0 = arith.constant 0 : i32
    %c0_i32_1 = arith.constant 0 : i32
    return %c0_i32, %c0_i32_0 : i32, i32
  }
  func.func @transform_5(%arg0: i32) -> (i32, i32) {
    %c0_i32 = arith.constant 0 : i32
    %c0_i32_0 = arith.constant 0 : i32
    %c0_i32_1 = arith.constant 0 : i32
    return %c0_i32, %c0_i32_0 : i32, i32
  }
  func.func @transform_6(%arg0: i32) -> (i32, i32) {
    %c0_i32 = arith.constant 0 : i32
    %c0_i32_0 = arith.constant 0 : i32
    return %arg0, %c0_i32 : i32, i32
  }
}

module attributes {stable_mosaic.version = 11 : i64} {
  func.func @_linear_kernel(%arg0: i32, %arg1: i32, %arg2: i32, %arg3: memref<256x32xbf16, #tpu.memory_space<vmem>>, %arg4: memref<32x128xbf16, #tpu.memory_space<vmem>>, %arg5: memref<1x128xf32, #tpu.memory_space<vmem>>, %arg6: memref<256x128xbf16, #tpu.memory_space<vmem>>, %arg7: memref<256x128xf32, #tpu.memory_space<vmem>>) attributes {dimension_semantics = [#tpu.dimension_semantics<parallel>, #tpu.dimension_semantics<parallel>, #tpu.dimension_semantics<arbitrary>], iteration_bounds = array<i64: 1, 1, 1>, scalar_prefetch = 0 : i64, scratch_operands = 1 : i64, tpu.core_type = #tpu.core_type<tc>, window_params = [{transform_indices = @transform_0, window_bounds = array<i64: 256, 32>}, {transform_indices = @transform_1, window_bounds = array<i64: 32, 128>}, {transform_indices = @transform_2, window_bounds = array<i64: 1, 128>}, {transform_indices = @transform_3, window_bounds = array<i64: 256, 128>}]} {
    %c0_i32 = arith.constant 0 : i32
    %0 = arith.cmpi eq, %arg2, %c0_i32 : i32
    %1 = arith.extui %0 : i1 to i32
    %c0_i32_0 = arith.constant 0 : i32
    %2 = arith.cmpi ne, %1, %c0_i32_0 : i32
    scf.if %2 {
      %cst_10 = arith.constant 0.000000e+00 : f32
      %12 = vector.broadcast %cst_10 : f32 to vector<256x128xf32>
      %c0_11 = arith.constant 0 : index
      %c0_12 = arith.constant 0 : index
      %13 = vector.load %arg7[%c0_11, %c0_12] : memref<256x128xf32, #tpu.memory_space<vmem>>, vector<256x128xf32>
      tpu.vector_store %arg7[%c0_11, %c0_12], %12 {strides = array<i32>} : memref<256x128xf32, #tpu.memory_space<vmem>>, vector<256x128xf32>,
    } else {
    }
    %c0 = arith.constant 0 : index
    %c0_1 = arith.constant 0 : index
    %3 = vector.load %arg7[%c0, %c0_1] : memref<256x128xf32, #tpu.memory_space<vmem>>, vector<256x128xf32>
    %c0_2 = arith.constant 0 : index
    %c0_3 = arith.constant 0 : index
    %4 = vector.load %arg3[%c0_2, %c0_3] : memref<256x32xbf16, #tpu.memory_space<vmem>>, vector<256x32xbf16>
    %c0_4 = arith.constant 0 : index
    %c0_5 = arith.constant 0 : index
    %5 = vector.load %arg4[%c0_4, %c0_5] : memref<32x128xbf16, #tpu.memory_space<vmem>>, vector<32x128xbf16>
    %cst = arith.constant dense<0.000000e+00> : vector<256x128xf32>
    %6 = tpu.matmul %4, %5, %cst {dimension_numbers = #tpu.dot_dimension_numbers<[1], [0], [0], [1], [0, 0, 1, 1], [], []>} : vector<256x32xbf16>, vector<32x128xbf16>, vector<256x128xf32> -> vector<256x128xf32>
    %7 = arith.addf %3, %6 : vector<256x128xf32>
    %c0_6 = arith.constant 0 : index
    %c0_7 = arith.constant 0 : index
    %8 = vector.load %arg7[%c0_6, %c0_7] : memref<256x128xf32, #tpu.memory_space<vmem>>, vector<256x128xf32>
    tpu.vector_store %arg7[%c0_6, %c0_7], %7 {strides = array<i32>} : memref<256x128xf32, #tpu.memory_space<vmem>>, vector<256x128xf32>,
    %c0_i32_8 = arith.constant 0 : i32
    %9 = arith.cmpi eq, %arg2, %c0_i32_8 : i32
    %10 = arith.extui %9 : i1 to i32
    %c0_i32_9 = arith.constant 0 : i32
    %11 = arith.cmpi ne, %10, %c0_i32_9 : i32
    scf.if %11 {
      %c0_10 = arith.constant 0 : index
      %c0_11 = arith.constant 0 : index
      %12 = vector.load %arg7[%c0_10, %c0_11] : memref<256x128xf32, #tpu.memory_space<vmem>>, vector<256x128xf32>
      %c0_12 = arith.constant 0 : index
      %c0_13 = arith.constant 0 : index
      %13 = vector.load %arg5[%c0_12, %c0_13] : memref<1x128xf32, #tpu.memory_space<vmem>>, vector<1x128xf32>
      %14 = vector.broadcast %13 : vector<1x128xf32> to vector<256x128xf32>
      %15 = arith.addf %12, %14 : vector<256x128xf32>
      %cst_14 = arith.constant 5.000000e-01 : f32
      %16 = vector.broadcast %cst_14 : f32 to vector<256x128xf32>
      %17 = arith.mulf %16, %15 : vector<256x128xf32>
      %cst_15 = arith.constant 4.471500e-02 : f32
      %18 = vector.broadcast %cst_15 : f32 to vector<256x128xf32>
      %19 = arith.mulf %18, %15 : vector<256x128xf32>
      %20 = arith.mulf %19, %15 : vector<256x128xf32>
      %21 = arith.mulf %20, %15 : vector<256x128xf32>
      %22 = arith.addf %15, %21 : vector<256x128xf32>
      %cst_16 = arith.constant 0.797884583 : f32
      %23 = vector.broadcast %cst_16 : f32 to vector<256x128xf32>
      %24 = arith.mulf %23, %22 : vector<256x128xf32>
      %25 = math.tanh %24 : vector<256x128xf32>
      %cst_17 = arith.constant 1.000000e+00 : f32
      %26 = vector.broadcast %cst_17 : f32 to vector<256x128xf32>
      %27 = arith.addf %26, %25 : vector<256x128xf32>
      %28 = arith.mulf %17, %27 : vector<256x128xf32>
      %29 = arith.truncf %28 : vector<256x128xf32> to vector<256x128xbf16>
      %c0_18 = arith.constant 0 : index
      %c0_19 = arith.constant 0 : index
      %30 = vector.load %arg6[%c0_18, %c0_19] : memref<256x128xbf16, #tpu.memory_space<vmem>>, vector<256x128xbf16>
      tpu.vector_store %arg6[%c0_18, %c0_19], %29 {strides = array<i32>} : memref<256x128xbf16, #tpu.memory_space<vmem>>, vector<256x128xbf16>,
    } else {
    }
    return
  }
  func.func @transform_0(%arg0: i32, %arg1: i32, %arg2: i32) -> (i32, i32) {
    %c0_i32 = arith.constant 0 : i32
    return %arg0, %arg2 : i32, i32
  }
  func.func @transform_1(%arg0: i32, %arg1: i32, %arg2: i32) -> (i32, i32) {
    %c0_i32 = arith.constant 0 : i32
    return %arg2, %arg1 : i32, i32
  }
  func.func @transform_2(%arg0: i32, %arg1: i32, %arg2: i32) -> (i32, i32) {
    %c0_i32 = arith.constant 0 : i32
    %c0_i32_0 = arith.constant 0 : i32
    return %c0_i32, %arg1 : i32, i32
  }
  func.func @transform_3(%arg0: i32, %arg1: i32, %arg2: i32) -> (i32, i32) {
    %c0_i32 = arith.constant 0 : i32
    return %arg0, %arg1 : i32, i32
  }
}

module attributes {stable_mosaic.version = 11 : i64} {
  func.func @_linear_res_ln_kernel(%arg0: i32, %arg1: i32, %arg2: memref<256x128xbf16, #tpu.memory_space<vmem>>, %arg3: memref<128x32xbf16, #tpu.memory_space<vmem>>, %arg4: memref<1x32xf32, #tpu.memory_space<vmem>>, %arg5: memref<256x32xbf16, #tpu.memory_space<vmem>>, %arg6: memref<1x32xf32, #tpu.memory_space<vmem>>, %arg7: memref<1x32xf32, #tpu.memory_space<vmem>>, %arg8: memref<256x32xbf16, #tpu.memory_space<vmem>>, %arg9: memref<256x32xf32, #tpu.memory_space<vmem>>) attributes {dimension_semantics = [#tpu.dimension_semantics<parallel>, #tpu.dimension_semantics<arbitrary>], iteration_bounds = array<i64: 1, 1>, scalar_prefetch = 0 : i64, scratch_operands = 1 : i64, tpu.core_type = #tpu.core_type<tc>, window_params = [{transform_indices = @transform_0, window_bounds = array<i64: 256, 128>}, {transform_indices = @transform_1, window_bounds = array<i64: 128, 32>}, {pipeline_mode = #tpu.pipeline_mode<synchronous>, transform_indices = @transform_2, window_bounds = array<i64: 1, 32>}, {transform_indices = @transform_3, window_bounds = array<i64: 256, 32>}, {pipeline_mode = #tpu.pipeline_mode<synchronous>, transform_indices = @transform_4, window_bounds = array<i64: 1, 32>}, {pipeline_mode = #tpu.pipeline_mode<synchronous>, transform_indices = @transform_5, window_bounds = array<i64: 1, 32>}, {transform_indices = @transform_6, window_bounds = array<i64: 256, 32>}]} {
    %c0_i32 = arith.constant 0 : i32
    %0 = arith.cmpi eq, %arg1, %c0_i32 : i32
    %1 = arith.extui %0 : i1 to i32
    %c0_i32_0 = arith.constant 0 : i32
    %2 = arith.cmpi ne, %1, %c0_i32_0 : i32
    scf.if %2 {
      %cst_10 = arith.constant 0.000000e+00 : f32
      %12 = vector.broadcast %cst_10 : f32 to vector<256x32xf32>
      %c0_11 = arith.constant 0 : index
      %c0_12 = arith.constant 0 : index
      %13 = vector.load %arg9[%c0_11, %c0_12] : memref<256x32xf32, #tpu.memory_space<vmem>>, vector<256x32xf32>
      tpu.vector_store %arg9[%c0_11, %c0_12], %12 {strides = array<i32>} : memref<256x32xf32, #tpu.memory_space<vmem>>, vector<256x32xf32>,
    } else {
    }
    %c0 = arith.constant 0 : index
    %c0_1 = arith.constant 0 : index
    %3 = vector.load %arg9[%c0, %c0_1] : memref<256x32xf32, #tpu.memory_space<vmem>>, vector<256x32xf32>
    %c0_2 = arith.constant 0 : index
    %c0_3 = arith.constant 0 : index
    %4 = vector.load %arg2[%c0_2, %c0_3] : memref<256x128xbf16, #tpu.memory_space<vmem>>, vector<256x128xbf16>
    %c0_4 = arith.constant 0 : index
    %c0_5 = arith.constant 0 : index
    %5 = vector.load %arg3[%c0_4, %c0_5] : memref<128x32xbf16, #tpu.memory_space<vmem>>, vector<128x32xbf16>
    %cst = arith.constant dense<0.000000e+00> : vector<256x32xf32>
    %6 = tpu.matmul %4, %5, %cst {dimension_numbers = #tpu.dot_dimension_numbers<[1], [0], [0], [1], [0, 0, 1, 1], [], []>} : vector<256x128xbf16>, vector<128x32xbf16>, vector<256x32xf32> -> vector<256x32xf32>
    %7 = arith.addf %3, %6 : vector<256x32xf32>
    %c0_6 = arith.constant 0 : index
    %c0_7 = arith.constant 0 : index
    %8 = vector.load %arg9[%c0_6, %c0_7] : memref<256x32xf32, #tpu.memory_space<vmem>>, vector<256x32xf32>
    tpu.vector_store %arg9[%c0_6, %c0_7], %7 {strides = array<i32>} : memref<256x32xf32, #tpu.memory_space<vmem>>, vector<256x32xf32>,
    %c0_i32_8 = arith.constant 0 : i32
    %9 = arith.cmpi eq, %arg1, %c0_i32_8 : i32
    %10 = arith.extui %9 : i1 to i32
    %c0_i32_9 = arith.constant 0 : i32
    %11 = arith.cmpi ne, %10, %c0_i32_9 : i32
    scf.if %11 {
      %c0_10 = arith.constant 0 : index
      %c0_11 = arith.constant 0 : index
      %12 = vector.load %arg9[%c0_10, %c0_11] : memref<256x32xf32, #tpu.memory_space<vmem>>, vector<256x32xf32>
      %c0_12 = arith.constant 0 : index
      %c0_13 = arith.constant 0 : index
      %13 = vector.load %arg4[%c0_12, %c0_13] : memref<1x32xf32, #tpu.memory_space<vmem>>, vector<1x32xf32>
      %14 = vector.broadcast %13 : vector<1x32xf32> to vector<256x32xf32>
      %15 = arith.addf %12, %14 : vector<256x32xf32>
      %c0_14 = arith.constant 0 : index
      %c0_15 = arith.constant 0 : index
      %16 = vector.load %arg5[%c0_14, %c0_15] : memref<256x32xbf16, #tpu.memory_space<vmem>>, vector<256x32xbf16>
      %17 = arith.extf %16 : vector<256x32xbf16> to vector<256x32xf32>
      %18 = arith.addf %15, %17 : vector<256x32xf32>
      %cst_16 = arith.constant dense<0.000000e+00> : vector<256xf32>
      %19 = vector.multi_reduction <add>, %18, %cst_16 [1] : vector<256x32xf32> to vector<256xf32>
      %20 = vector.shape_cast %19 : vector<256xf32> to vector<256x1xf32>
      %cst_17 = arith.constant 3.200000e+01 : f32
      %21 = vector.broadcast %cst_17 : f32 to vector<256x1xf32>
      %22 = arith.divf %20, %21 : vector<256x1xf32>
      %23 = vector.broadcast %22 : vector<256x1xf32> to vector<256x32xf32>
      %24 = arith.subf %18, %23 : vector<256x32xf32>
      %25 = arith.mulf %24, %24 : vector<256x32xf32>
      %cst_18 = arith.constant dense<0.000000e+00> : vector<256xf32>
      %26 = vector.multi_reduction <add>, %25, %cst_18 [1] : vector<256x32xf32> to vector<256xf32>
      %27 = vector.shape_cast %26 : vector<256xf32> to vector<256x1xf32>
      %cst_19 = arith.constant 3.200000e+01 : f32
      %28 = vector.broadcast %cst_19 : f32 to vector<256x1xf32>
      %29 = arith.divf %27, %28 : vector<256x1xf32>
      %cst_20 = arith.constant 9.99999996E-13 : f32
      %30 = vector.broadcast %cst_20 : f32 to vector<256x1xf32>
      %31 = arith.addf %29, %30 : vector<256x1xf32>
      %32 = math.rsqrt %31 : vector<256x1xf32>
      %33 = vector.broadcast %32 : vector<256x1xf32> to vector<256x32xf32>
      %34 = arith.mulf %24, %33 : vector<256x32xf32>
      %c0_21 = arith.constant 0 : index
      %c0_22 = arith.constant 0 : index
      %35 = vector.load %arg6[%c0_21, %c0_22] : memref<1x32xf32, #tpu.memory_space<vmem>>, vector<1x32xf32>
      %36 = vector.broadcast %35 : vector<1x32xf32> to vector<256x32xf32>
      %37 = arith.mulf %34, %36 : vector<256x32xf32>
      %c0_23 = arith.constant 0 : index
      %c0_24 = arith.constant 0 : index
      %38 = vector.load %arg7[%c0_23, %c0_24] : memref<1x32xf32, #tpu.memory_space<vmem>>, vector<1x32xf32>
      %39 = vector.broadcast %38 : vector<1x32xf32> to vector<256x32xf32>
      %40 = arith.addf %37, %39 : vector<256x32xf32>
      %41 = arith.truncf %40 : vector<256x32xf32> to vector<256x32xbf16>
      %c0_25 = arith.constant 0 : index
      %c0_26 = arith.constant 0 : index
      %42 = vector.load %arg8[%c0_25, %c0_26] : memref<256x32xbf16, #tpu.memory_space<vmem>>, vector<256x32xbf16>
      tpu.vector_store %arg8[%c0_25, %c0_26], %41 {strides = array<i32>} : memref<256x32xbf16, #tpu.memory_space<vmem>>, vector<256x32xbf16>,
    } else {
    }
    return
  }
  func.func @transform_0(%arg0: i32, %arg1: i32) -> (i32, i32) {
    %c0_i32 = arith.constant 0 : i32
    return %arg0, %arg1 : i32, i32
  }
  func.func @transform_1(%arg0: i32, %arg1: i32) -> (i32, i32) {
    %c0_i32 = arith.constant 0 : i32
    %c0_i32_0 = arith.constant 0 : i32
    return %arg1, %c0_i32 : i32, i32
  }
  func.func @transform_2(%arg0: i32, %arg1: i32) -> (i32, i32) {
    %c0_i32 = arith.constant 0 : i32
    %c0_i32_0 = arith.constant 0 : i32
    %c0_i32_1 = arith.constant 0 : i32
    return %c0_i32, %c0_i32_0 : i32, i32
  }
  func.func @transform_3(%arg0: i32, %arg1: i32) -> (i32, i32) {
    %c0_i32 = arith.constant 0 : i32
    %c0_i32_0 = arith.constant 0 : i32
    return %arg0, %c0_i32 : i32, i32
  }
  func.func @transform_4(%arg0: i32, %arg1: i32) -> (i32, i32) {
    %c0_i32 = arith.constant 0 : i32
    %c0_i32_0 = arith.constant 0 : i32
    %c0_i32_1 = arith.constant 0 : i32
    return %c0_i32, %c0_i32_0 : i32, i32
  }
  func.func @transform_5(%arg0: i32, %arg1: i32) -> (i32, i32) {
    %c0_i32 = arith.constant 0 : i32
    %c0_i32_0 = arith.constant 0 : i32
    %c0_i32_1 = arith.constant 0 : i32
    return %c0_i32, %c0_i32_0 : i32, i32
  }
  func.func @transform_6(%arg0: i32, %arg1: i32) -> (i32, i32) {
    %c0_i32 = arith.constant 0 : i32
    %c0_i32_0 = arith.constant 0 : i32
    return %arg0, %c0_i32 : i32, i32
  }
}

module attributes {stable_mosaic.version = 11 : i64} {
  func.func @_linear_kernel(%arg0: i32, %arg1: i32, %arg2: i32, %arg3: memref<256x32xbf16, #tpu.memory_space<vmem>>, %arg4: memref<32x128xbf16, #tpu.memory_space<vmem>>, %arg5: memref<1x128xf32, #tpu.memory_space<vmem>>, %arg6: memref<256x128xf32, #tpu.memory_space<vmem>>, %arg7: memref<256x128xf32, #tpu.memory_space<vmem>>) attributes {dimension_semantics = [#tpu.dimension_semantics<parallel>, #tpu.dimension_semantics<parallel>, #tpu.dimension_semantics<arbitrary>], iteration_bounds = array<i64: 1, 1, 1>, scalar_prefetch = 0 : i64, scratch_operands = 1 : i64, tpu.core_type = #tpu.core_type<tc>, window_params = [{transform_indices = @transform_0, window_bounds = array<i64: 256, 32>}, {transform_indices = @transform_1, window_bounds = array<i64: 32, 128>}, {transform_indices = @transform_2, window_bounds = array<i64: 1, 128>}, {transform_indices = @transform_3, window_bounds = array<i64: 256, 128>}]} {
    %c0_i32 = arith.constant 0 : i32
    %0 = arith.cmpi eq, %arg2, %c0_i32 : i32
    %1 = arith.extui %0 : i1 to i32
    %c0_i32_0 = arith.constant 0 : i32
    %2 = arith.cmpi ne, %1, %c0_i32_0 : i32
    scf.if %2 {
      %cst_10 = arith.constant 0.000000e+00 : f32
      %12 = vector.broadcast %cst_10 : f32 to vector<256x128xf32>
      %c0_11 = arith.constant 0 : index
      %c0_12 = arith.constant 0 : index
      %13 = vector.load %arg7[%c0_11, %c0_12] : memref<256x128xf32, #tpu.memory_space<vmem>>, vector<256x128xf32>
      tpu.vector_store %arg7[%c0_11, %c0_12], %12 {strides = array<i32>} : memref<256x128xf32, #tpu.memory_space<vmem>>, vector<256x128xf32>,
    } else {
    }
    %c0 = arith.constant 0 : index
    %c0_1 = arith.constant 0 : index
    %3 = vector.load %arg7[%c0, %c0_1] : memref<256x128xf32, #tpu.memory_space<vmem>>, vector<256x128xf32>
    %c0_2 = arith.constant 0 : index
    %c0_3 = arith.constant 0 : index
    %4 = vector.load %arg3[%c0_2, %c0_3] : memref<256x32xbf16, #tpu.memory_space<vmem>>, vector<256x32xbf16>
    %c0_4 = arith.constant 0 : index
    %c0_5 = arith.constant 0 : index
    %5 = vector.load %arg4[%c0_4, %c0_5] : memref<32x128xbf16, #tpu.memory_space<vmem>>, vector<32x128xbf16>
    %cst = arith.constant dense<0.000000e+00> : vector<256x128xf32>
    %6 = tpu.matmul %4, %5, %cst {dimension_numbers = #tpu.dot_dimension_numbers<[1], [0], [0], [1], [0, 0, 1, 1], [], []>} : vector<256x32xbf16>, vector<32x128xbf16>, vector<256x128xf32> -> vector<256x128xf32>
    %7 = arith.addf %3, %6 : vector<256x128xf32>
    %c0_6 = arith.constant 0 : index
    %c0_7 = arith.constant 0 : index
    %8 = vector.load %arg7[%c0_6, %c0_7] : memref<256x128xf32, #tpu.memory_space<vmem>>, vector<256x128xf32>
    tpu.vector_store %arg7[%c0_6, %c0_7], %7 {strides = array<i32>} : memref<256x128xf32, #tpu.memory_space<vmem>>, vector<256x128xf32>,
    %c0_i32_8 = arith.constant 0 : i32
    %9 = arith.cmpi eq, %arg2, %c0_i32_8 : i32
    %10 = arith.extui %9 : i1 to i32
    %c0_i32_9 = arith.constant 0 : i32
    %11 = arith.cmpi ne, %10, %c0_i32_9 : i32
    scf.if %11 {
      %c0_10 = arith.constant 0 : index
      %c0_11 = arith.constant 0 : index
      %12 = vector.load %arg7[%c0_10, %c0_11] : memref<256x128xf32, #tpu.memory_space<vmem>>, vector<256x128xf32>
      %c0_12 = arith.constant 0 : index
      %c0_13 = arith.constant 0 : index
      %13 = vector.load %arg5[%c0_12, %c0_13] : memref<1x128xf32, #tpu.memory_space<vmem>>, vector<1x128xf32>
      %14 = vector.broadcast %13 : vector<1x128xf32> to vector<256x128xf32>
      %15 = arith.addf %12, %14 : vector<256x128xf32>
      %c0_14 = arith.constant 0 : index
      %c0_15 = arith.constant 0 : index
      %16 = vector.load %arg6[%c0_14, %c0_15] : memref<256x128xf32, #tpu.memory_space<vmem>>, vector<256x128xf32>
      tpu.vector_store %arg6[%c0_14, %c0_15], %15 {strides = array<i32>} : memref<256x128xf32, #tpu.memory_space<vmem>>, vector<256x128xf32>,
    } else {
    }
    return
  }
  func.func @transform_0(%arg0: i32, %arg1: i32, %arg2: i32) -> (i32, i32) {
    %c0_i32 = arith.constant 0 : i32
    return %arg0, %arg2 : i32, i32
  }
  func.func @transform_1(%arg0: i32, %arg1: i32, %arg2: i32) -> (i32, i32) {
    %c0_i32 = arith.constant 0 : i32
    return %arg2, %arg1 : i32, i32
  }
  func.func @transform_2(%arg0: i32, %arg1: i32, %arg2: i32) -> (i32, i32) {
    %c0_i32 = arith.constant 0 : i32
    %c0_i32_0 = arith.constant 0 : i32
    return %c0_i32, %arg1 : i32, i32
  }
  func.func @transform_3(%arg0: i32, %arg1: i32, %arg2: i32) -> (i32, i32) {
    %c0_i32 = arith.constant 0 : i32
    return %arg0, %arg1 : i32, i32
  }
}

module attributes {stable_mosaic.version = 11 : i64} {
  func.func @_ce_kernel(%arg0: i32, %arg1: memref<256x128xf32, #tpu.memory_space<vmem>>, %arg2: memref<256x1xi32, #tpu.memory_space<vmem>>, %arg3: memref<256x1xf32, #tpu.memory_space<vmem>>, %arg4: memref<1x8x128xf32, #tpu.memory_space<vmem>>, %arg5: memref<1x8x128xf32, #tpu.memory_space<vmem>>) attributes {dimension_semantics = [#tpu.dimension_semantics<parallel>], iteration_bounds = array<i64: 1>, scalar_prefetch = 0 : i64, scratch_operands = 0 : i64, tpu.core_type = #tpu.core_type<tc>, window_params = [{transform_indices = @transform_0, window_bounds = array<i64: 256, 128>}, {transform_indices = @transform_1, window_bounds = array<i64: 256, 1>}, {transform_indices = @transform_2, window_bounds = array<i64: 256, 1>}, {transform_indices = @transform_3, window_bounds = array<i64: 1, 8, 128>}, {transform_indices = @transform_4, window_bounds = array<i64: 1, 8, 128>}]} {
    %c0 = arith.constant 0 : index
    %c0_0 = arith.constant 0 : index
    %0 = vector.load %arg1[%c0, %c0_0] : memref<256x128xf32, #tpu.memory_space<vmem>>, vector<256x128xf32>
    %c0_1 = arith.constant 0 : index
    %c0_2 = arith.constant 0 : index
    %1 = vector.load %arg2[%c0_1, %c0_2] : memref<256x1xi32, #tpu.memory_space<vmem>>, vector<256x1xi32>
    %c0_3 = arith.constant 0 : index
    %c0_4 = arith.constant 0 : index
    %2 = vector.load %arg3[%c0_3, %c0_4] : memref<256x1xf32, #tpu.memory_space<vmem>>, vector<256x1xf32>
    %3 = tpu.iota {dimensions = array<i32: 1>} : vector<256x128xi32>
    %c7_i32 = arith.constant 7 : i32
    %4 = vector.broadcast %c7_i32 : i32 to vector<256x128xi32>
    %5 = arith.cmpi slt, %3, %4 : vector<256x128xi32>
    %cst = arith.constant -1.000000e+30 : f32
    %6 = vector.broadcast %cst : f32 to vector<256x128xf32>
    %7 = arith.select %5, %0, %6 : vector<256x128xi1>, vector<256x128xf32>
    %cst_5 = arith.constant dense<0xFF800000> : vector<256xf32>
    %8 = vector.multi_reduction <maximumf>, %7, %cst_5 [1] : vector<256x128xf32> to vector<256xf32>
    %9 = vector.shape_cast %8 : vector<256xf32> to vector<256x1xf32>
    %10 = vector.broadcast %9 : vector<256x1xf32> to vector<256x128xf32>
    %11 = arith.subf %7, %10 : vector<256x128xf32>
    %12 = math.exp %11 : vector<256x128xf32>
    %cst_6 = arith.constant dense<0.000000e+00> : vector<256xf32>
    %13 = vector.multi_reduction <add>, %12, %cst_6 [1] : vector<256x128xf32> to vector<256xf32>
    %14 = vector.shape_cast %13 : vector<256xf32> to vector<256x1xf32>
    %15 = math.log %14 : vector<256x1xf32>
    %16 = arith.addf %15, %9 : vector<256x1xf32>
    %17 = vector.broadcast %1 : vector<256x1xi32> to vector<256x128xi32>
    %18 = arith.cmpi eq, %3, %17 : vector<256x128xi32>
    %19 = arith.extui %18 : vector<256x128xi1> to vector<256x128xi32>
    %20 = arith.sitofp %19 : vector<256x128xi32> to vector<256x128xf32>
    %21 = arith.mulf %7, %20 : vector<256x128xf32>
    %cst_7 = arith.constant dense<0.000000e+00> : vector<256xf32>
    %22 = vector.multi_reduction <add>, %21, %cst_7 [1] : vector<256x128xf32> to vector<256xf32>
    %23 = vector.shape_cast %22 : vector<256xf32> to vector<256x1xf32>
    %24 = arith.subf %16, %23 : vector<256x1xf32>
    %25 = arith.mulf %24, %2 : vector<256x1xf32>
    %cst_8 = arith.constant dense<0.000000e+00> : vector<1xf32>
    %26 = vector.multi_reduction <add>, %25, %cst_8 [0] : vector<256x1xf32> to vector<1xf32>
    %27 = vector.shape_cast %26 : vector<1xf32> to vector<1x1xf32>
    %cst_9 = arith.constant dense<0.000000e+00> : vector<1xf32>
    %28 = vector.multi_reduction <add>, %2, %cst_9 [0] : vector<256x1xf32> to vector<1xf32>
    %29 = vector.shape_cast %28 : vector<1xf32> to vector<1x1xf32>
    %30 = vector.shape_cast %27 : vector<1x1xf32> to vector<1x1x1xf32>
    %31 = vector.shape_cast %30 : vector<1x1x1xf32> to vector<1x1x1xf32>
    %32 = vector.broadcast %31 : vector<1x1x1xf32> to vector<1x8x128xf32>
    %c0_10 = arith.constant 0 : index
    %c0_11 = arith.constant 0 : index
    %c0_12 = arith.constant 0 : index
    %33 = vector.load %arg4[%c0_10, %c0_11, %c0_12] : memref<1x8x128xf32, #tpu.memory_space<vmem>>, vector<1x8x128xf32>
    tpu.vector_store %arg4[%c0_10, %c0_11, %c0_12], %32 {strides = array<i32>} : memref<1x8x128xf32, #tpu.memory_space<vmem>>, vector<1x8x128xf32>,
    %34 = vector.shape_cast %29 : vector<1x1xf32> to vector<1x1x1xf32>
    %35 = vector.shape_cast %34 : vector<1x1x1xf32> to vector<1x1x1xf32>
    %36 = vector.broadcast %35 : vector<1x1x1xf32> to vector<1x8x128xf32>
    %c0_13 = arith.constant 0 : index
    %c0_14 = arith.constant 0 : index
    %c0_15 = arith.constant 0 : index
    %37 = vector.load %arg5[%c0_13, %c0_14, %c0_15] : memref<1x8x128xf32, #tpu.memory_space<vmem>>, vector<1x8x128xf32>
    tpu.vector_store %arg5[%c0_13, %c0_14, %c0_15], %36 {strides = array<i32>} : memref<1x8x128xf32, #tpu.memory_space<vmem>>, vector<1x8x128xf32>,
    return
  }
  func.func @transform_0(%arg0: i32) -> (i32, i32) {
    %c0_i32 = arith.constant 0 : i32
    %c0_i32_0 = arith.constant 0 : i32
    return %arg0, %c0_i32 : i32, i32
  }
  func.func @transform_1(%arg0: i32) -> (i32, i32) {
    %c0_i32 = arith.constant 0 : i32
    %c0_i32_0 = arith.constant 0 : i32
    return %arg0, %c0_i32 : i32, i32
  }
  func.func @transform_2(%arg0: i32) -> (i32, i32) {
    %c0_i32 = arith.constant 0 : i32
    %c0_i32_0 = arith.constant 0 : i32
    return %arg0, %c0_i32 : i32, i32
  }
  func.func @transform_3(%arg0: i32) -> (i32, i32, i32) {
    %c0_i32 = arith.constant 0 : i32
    %c0_i32_0 = arith.constant 0 : i32
    %c0_i32_1 = arith.constant 0 : i32
    return %arg0, %c0_i32, %c0_i32_0 : i32, i32, i32
  }
  func.func @transform_4(%arg0: i32) -> (i32, i32, i32) {
    %c0_i32 = arith.constant 0 : i32
    %c0_i32_0 = arith.constant 0 : i32
    %c0_i32_1 = arith.constant 0 : i32
    return %arg0, %c0_i32, %c0_i32_0 : i32, i32, i32
  }
}

module attributes {stable_mosaic.version = 11 : i64} {
  func.func @_linear_kernel(%arg0: i32, %arg1: i32, %arg2: i32, %arg3: memref<16x32xbf16, #tpu.memory_space<vmem>>, %arg4: memref<32x128xbf16, #tpu.memory_space<vmem>>, %arg5: memref<1x128xf32, #tpu.memory_space<vmem>>, %arg6: memref<16x128xbf16, #tpu.memory_space<vmem>>, %arg7: memref<16x128xf32, #tpu.memory_space<vmem>>) attributes {dimension_semantics = [#tpu.dimension_semantics<parallel>, #tpu.dimension_semantics<parallel>, #tpu.dimension_semantics<arbitrary>], iteration_bounds = array<i64: 1, 1, 1>, scalar_prefetch = 0 : i64, scratch_operands = 1 : i64, tpu.core_type = #tpu.core_type<tc>, window_params = [{transform_indices = @transform_0, window_bounds = array<i64: 16, 32>}, {transform_indices = @transform_1, window_bounds = array<i64: 32, 128>}, {transform_indices = @transform_2, window_bounds = array<i64: 1, 128>}, {transform_indices = @transform_3, window_bounds = array<i64: 16, 128>}]} {
    %c0_i32 = arith.constant 0 : i32
    %0 = arith.cmpi eq, %arg2, %c0_i32 : i32
    %1 = arith.extui %0 : i1 to i32
    %c0_i32_0 = arith.constant 0 : i32
    %2 = arith.cmpi ne, %1, %c0_i32_0 : i32
    scf.if %2 {
      %cst_10 = arith.constant 0.000000e+00 : f32
      %12 = vector.broadcast %cst_10 : f32 to vector<16x128xf32>
      %c0_11 = arith.constant 0 : index
      %c0_12 = arith.constant 0 : index
      %13 = vector.load %arg7[%c0_11, %c0_12] : memref<16x128xf32, #tpu.memory_space<vmem>>, vector<16x128xf32>
      tpu.vector_store %arg7[%c0_11, %c0_12], %12 {strides = array<i32>} : memref<16x128xf32, #tpu.memory_space<vmem>>, vector<16x128xf32>,
    } else {
    }
    %c0 = arith.constant 0 : index
    %c0_1 = arith.constant 0 : index
    %3 = vector.load %arg7[%c0, %c0_1] : memref<16x128xf32, #tpu.memory_space<vmem>>, vector<16x128xf32>
    %c0_2 = arith.constant 0 : index
    %c0_3 = arith.constant 0 : index
    %4 = vector.load %arg3[%c0_2, %c0_3] : memref<16x32xbf16, #tpu.memory_space<vmem>>, vector<16x32xbf16>
    %c0_4 = arith.constant 0 : index
    %c0_5 = arith.constant 0 : index
    %5 = vector.load %arg4[%c0_4, %c0_5] : memref<32x128xbf16, #tpu.memory_space<vmem>>, vector<32x128xbf16>
    %cst = arith.constant dense<0.000000e+00> : vector<16x128xf32>
    %6 = tpu.matmul %4, %5, %cst {dimension_numbers = #tpu.dot_dimension_numbers<[1], [0], [0], [1], [0, 0, 1, 1], [], []>} : vector<16x32xbf16>, vector<32x128xbf16>, vector<16x128xf32> -> vector<16x128xf32>
    %7 = arith.addf %3, %6 : vector<16x128xf32>
    %c0_6 = arith.constant 0 : index
    %c0_7 = arith.constant 0 : index
    %8 = vector.load %arg7[%c0_6, %c0_7] : memref<16x128xf32, #tpu.memory_space<vmem>>, vector<16x128xf32>
    tpu.vector_store %arg7[%c0_6, %c0_7], %7 {strides = array<i32>} : memref<16x128xf32, #tpu.memory_space<vmem>>, vector<16x128xf32>,
    %c0_i32_8 = arith.constant 0 : i32
    %9 = arith.cmpi eq, %arg2, %c0_i32_8 : i32
    %10 = arith.extui %9 : i1 to i32
    %c0_i32_9 = arith.constant 0 : i32
    %11 = arith.cmpi ne, %10, %c0_i32_9 : i32
    scf.if %11 {
      %c0_10 = arith.constant 0 : index
      %c0_11 = arith.constant 0 : index
      %12 = vector.load %arg7[%c0_10, %c0_11] : memref<16x128xf32, #tpu.memory_space<vmem>>, vector<16x128xf32>
      %c0_12 = arith.constant 0 : index
      %c0_13 = arith.constant 0 : index
      %13 = vector.load %arg5[%c0_12, %c0_13] : memref<1x128xf32, #tpu.memory_space<vmem>>, vector<1x128xf32>
      %14 = vector.broadcast %13 : vector<1x128xf32> to vector<16x128xf32>
      %15 = arith.addf %12, %14 : vector<16x128xf32>
      %16 = math.tanh %15 : vector<16x128xf32>
      %17 = arith.truncf %16 : vector<16x128xf32> to vector<16x128xbf16>
      %c0_14 = arith.constant 0 : index
      %c0_15 = arith.constant 0 : index
      %18 = vector.load %arg6[%c0_14, %c0_15] : memref<16x128xbf16, #tpu.memory_space<vmem>>, vector<16x128xbf16>
      tpu.vector_store %arg6[%c0_14, %c0_15], %17 {strides = array<i32>} : memref<16x128xbf16, #tpu.memory_space<vmem>>, vector<16x128xbf16>,
    } else {
    }
    return
  }
  func.func @transform_0(%arg0: i32, %arg1: i32, %arg2: i32) -> (i32, i32) {
    %c0_i32 = arith.constant 0 : i32
    return %arg0, %arg2 : i32, i32
  }
  func.func @transform_1(%arg0: i32, %arg1: i32, %arg2: i32) -> (i32, i32) {
    %c0_i32 = arith.constant 0 : i32
    return %arg2, %arg1 : i32, i32
  }
  func.func @transform_2(%arg0: i32, %arg1: i32, %arg2: i32) -> (i32, i32) {
    %c0_i32 = arith.constant 0 : i32
    %c0_i32_0 = arith.constant 0 : i32
    return %c0_i32, %arg1 : i32, i32
  }
  func.func @transform_3(%arg0: i32, %arg1: i32, %arg2: i32) -> (i32, i32) {
    %c0_i32 = arith.constant 0 : i32
    return %arg0, %arg1 : i32, i32
  }
}

module attributes {stable_mosaic.version = 11 : i64} {
  func.func @_linear_kernel(%arg0: i32, %arg1: i32, %arg2: i32, %arg3: memref<16x128xbf16, #tpu.memory_space<vmem>>, %arg4: memref<128x128xbf16, #tpu.memory_space<vmem>>, %arg5: memref<1x128xf32, #tpu.memory_space<vmem>>, %arg6: memref<16x128xf32, #tpu.memory_space<vmem>>, %arg7: memref<16x128xf32, #tpu.memory_space<vmem>>) attributes {dimension_semantics = [#tpu.dimension_semantics<parallel>, #tpu.dimension_semantics<parallel>, #tpu.dimension_semantics<arbitrary>], iteration_bounds = array<i64: 1, 1, 1>, scalar_prefetch = 0 : i64, scratch_operands = 1 : i64, tpu.core_type = #tpu.core_type<tc>, window_params = [{transform_indices = @transform_0, window_bounds = array<i64: 16, 128>}, {transform_indices = @transform_1, window_bounds = array<i64: 128, 128>}, {transform_indices = @transform_2, window_bounds = array<i64: 1, 128>}, {transform_indices = @transform_3, window_bounds = array<i64: 16, 128>}]} {
    %c0_i32 = arith.constant 0 : i32
    %0 = arith.cmpi eq, %arg2, %c0_i32 : i32
    %1 = arith.extui %0 : i1 to i32
    %c0_i32_0 = arith.constant 0 : i32
    %2 = arith.cmpi ne, %1, %c0_i32_0 : i32
    scf.if %2 {
      %cst_10 = arith.constant 0.000000e+00 : f32
      %12 = vector.broadcast %cst_10 : f32 to vector<16x128xf32>
      %c0_11 = arith.constant 0 : index
      %c0_12 = arith.constant 0 : index
      %13 = vector.load %arg7[%c0_11, %c0_12] : memref<16x128xf32, #tpu.memory_space<vmem>>, vector<16x128xf32>
      tpu.vector_store %arg7[%c0_11, %c0_12], %12 {strides = array<i32>} : memref<16x128xf32, #tpu.memory_space<vmem>>, vector<16x128xf32>,
    } else {
    }
    %c0 = arith.constant 0 : index
    %c0_1 = arith.constant 0 : index
    %3 = vector.load %arg7[%c0, %c0_1] : memref<16x128xf32, #tpu.memory_space<vmem>>, vector<16x128xf32>
    %c0_2 = arith.constant 0 : index
    %c0_3 = arith.constant 0 : index
    %4 = vector.load %arg3[%c0_2, %c0_3] : memref<16x128xbf16, #tpu.memory_space<vmem>>, vector<16x128xbf16>
    %c0_4 = arith.constant 0 : index
    %c0_5 = arith.constant 0 : index
    %5 = vector.load %arg4[%c0_4, %c0_5] : memref<128x128xbf16, #tpu.memory_space<vmem>>, vector<128x128xbf16>
    %cst = arith.constant dense<0.000000e+00> : vector<16x128xf32>
    %6 = tpu.matmul %4, %5, %cst {dimension_numbers = #tpu.dot_dimension_numbers<[1], [0], [0], [1], [0, 0, 1, 1], [], []>} : vector<16x128xbf16>, vector<128x128xbf16>, vector<16x128xf32> -> vector<16x128xf32>
    %7 = arith.addf %3, %6 : vector<16x128xf32>
    %c0_6 = arith.constant 0 : index
    %c0_7 = arith.constant 0 : index
    %8 = vector.load %arg7[%c0_6, %c0_7] : memref<16x128xf32, #tpu.memory_space<vmem>>, vector<16x128xf32>
    tpu.vector_store %arg7[%c0_6, %c0_7], %7 {strides = array<i32>} : memref<16x128xf32, #tpu.memory_space<vmem>>, vector<16x128xf32>,
    %c0_i32_8 = arith.constant 0 : i32
    %9 = arith.cmpi eq, %arg2, %c0_i32_8 : i32
    %10 = arith.extui %9 : i1 to i32
    %c0_i32_9 = arith.constant 0 : i32
    %11 = arith.cmpi ne, %10, %c0_i32_9 : i32
    scf.if %11 {
      %c0_10 = arith.constant 0 : index
      %c0_11 = arith.constant 0 : index
      %12 = vector.load %arg7[%c0_10, %c0_11] : memref<16x128xf32, #tpu.memory_space<vmem>>, vector<16x128xf32>
      %c0_12 = arith.constant 0 : index
      %c0_13 = arith.constant 0 : index
      %13 = vector.load %arg5[%c0_12, %c0_13] : memref<1x128xf32, #tpu.memory_space<vmem>>, vector<1x128xf32>
      %14 = vector.broadcast %13 : vector<1x128xf32> to vector<16x128xf32>
      %15 = arith.addf %12, %14 : vector<16x128xf32>
      %c0_14 = arith.constant 0 : index
      %c0_15 = arith.constant 0 : index
      %16 = vector.load %arg6[%c0_14, %c0_15] : memref<16x128xf32, #tpu.memory_space<vmem>>, vector<16x128xf32>
      tpu.vector_store %arg6[%c0_14, %c0_15], %15 {strides = array<i32>} : memref<16x128xf32, #tpu.memory_space<vmem>>, vector<16x128xf32>,
    } else {
    }
    return
  }
  func.func @transform_0(%arg0: i32, %arg1: i32, %arg2: i32) -> (i32, i32) {
    %c0_i32 = arith.constant 0 : i32
    return %arg0, %arg2 : i32, i32
  }
  func.func @transform_1(%arg0: i32, %arg1: i32, %arg2: i32) -> (i32, i32) {
    %c0_i32 = arith.constant 0 : i32
    return %arg2, %arg1 : i32, i32
  }
  func.func @transform_2(%arg0: i32, %arg1: i32, %arg2: i32) -> (i32, i32) {
    %c0_i32 = arith.constant 0 : i32
    %c0_i32_0 = arith.constant 0 : i32
    return %c0_i32, %arg1 : i32, i32
  }
  func.func @transform_3(%arg0: i32, %arg1: i32, %arg2: i32) -> (i32, i32) {
    %c0_i32 = arith.constant 0 : i32
    return %arg0, %arg1 : i32, i32
  }
}

module attributes {stable_mosaic.version = 11 : i64} {
  func.func @_ce_kernel(%arg0: i32, %arg1: memref<16x128xf32, #tpu.memory_space<vmem>>, %arg2: memref<16x1xi32, #tpu.memory_space<vmem>>, %arg3: memref<16x1xf32, #tpu.memory_space<vmem>>, %arg4: memref<1x8x128xf32, #tpu.memory_space<vmem>>, %arg5: memref<1x8x128xf32, #tpu.memory_space<vmem>>) attributes {dimension_semantics = [#tpu.dimension_semantics<parallel>], iteration_bounds = array<i64: 1>, scalar_prefetch = 0 : i64, scratch_operands = 0 : i64, tpu.core_type = #tpu.core_type<tc>, window_params = [{transform_indices = @transform_0, window_bounds = array<i64: 16, 128>}, {transform_indices = @transform_1, window_bounds = array<i64: 16, 1>}, {transform_indices = @transform_2, window_bounds = array<i64: 16, 1>}, {transform_indices = @transform_3, window_bounds = array<i64: 1, 8, 128>}, {transform_indices = @transform_4, window_bounds = array<i64: 1, 8, 128>}]} {
    %c0 = arith.constant 0 : index
    %c0_0 = arith.constant 0 : index
    %0 = vector.load %arg1[%c0, %c0_0] : memref<16x128xf32, #tpu.memory_space<vmem>>, vector<16x128xf32>
    %c0_1 = arith.constant 0 : index
    %c0_2 = arith.constant 0 : index
    %1 = vector.load %arg2[%c0_1, %c0_2] : memref<16x1xi32, #tpu.memory_space<vmem>>, vector<16x1xi32>
    %c0_3 = arith.constant 0 : index
    %c0_4 = arith.constant 0 : index
    %2 = vector.load %arg3[%c0_3, %c0_4] : memref<16x1xf32, #tpu.memory_space<vmem>>, vector<16x1xf32>
    %3 = tpu.iota {dimensions = array<i32: 1>} : vector<16x128xi32>
    %c5_i32 = arith.constant 5 : i32
    %4 = vector.broadcast %c5_i32 : i32 to vector<16x128xi32>
    %5 = arith.cmpi slt, %3, %4 : vector<16x128xi32>
    %cst = arith.constant -1.000000e+30 : f32
    %6 = vector.broadcast %cst : f32 to vector<16x128xf32>
    %7 = arith.select %5, %0, %6 : vector<16x128xi1>, vector<16x128xf32>
    %cst_5 = arith.constant dense<0xFF800000> : vector<16xf32>
    %8 = vector.multi_reduction <maximumf>, %7, %cst_5 [1] : vector<16x128xf32> to vector<16xf32>
    %9 = vector.shape_cast %8 : vector<16xf32> to vector<16x1xf32>
    %10 = vector.broadcast %9 : vector<16x1xf32> to vector<16x128xf32>
    %11 = arith.subf %7, %10 : vector<16x128xf32>
    %12 = math.exp %11 : vector<16x128xf32>
    %cst_6 = arith.constant dense<0.000000e+00> : vector<16xf32>
    %13 = vector.multi_reduction <add>, %12, %cst_6 [1] : vector<16x128xf32> to vector<16xf32>
    %14 = vector.shape_cast %13 : vector<16xf32> to vector<16x1xf32>
    %15 = math.log %14 : vector<16x1xf32>
    %16 = arith.addf %15, %9 : vector<16x1xf32>
    %17 = vector.broadcast %1 : vector<16x1xi32> to vector<16x128xi32>
    %18 = arith.cmpi eq, %3, %17 : vector<16x128xi32>
    %19 = arith.extui %18 : vector<16x128xi1> to vector<16x128xi32>
    %20 = arith.sitofp %19 : vector<16x128xi32> to vector<16x128xf32>
    %21 = arith.mulf %7, %20 : vector<16x128xf32>
    %cst_7 = arith.constant dense<0.000000e+00> : vector<16xf32>
    %22 = vector.multi_reduction <add>, %21, %cst_7 [1] : vector<16x128xf32> to vector<16xf32>
    %23 = vector.shape_cast %22 : vector<16xf32> to vector<16x1xf32>
    %24 = arith.subf %16, %23 : vector<16x1xf32>
    %25 = arith.mulf %24, %2 : vector<16x1xf32>
    %cst_8 = arith.constant dense<0.000000e+00> : vector<1xf32>
    %26 = vector.multi_reduction <add>, %25, %cst_8 [0] : vector<16x1xf32> to vector<1xf32>
    %27 = vector.shape_cast %26 : vector<1xf32> to vector<1x1xf32>
    %cst_9 = arith.constant dense<0.000000e+00> : vector<1xf32>
    %28 = vector.multi_reduction <add>, %2, %cst_9 [0] : vector<16x1xf32> to vector<1xf32>
    %29 = vector.shape_cast %28 : vector<1xf32> to vector<1x1xf32>
    %30 = vector.shape_cast %27 : vector<1x1xf32> to vector<1x1x1xf32>
    %31 = vector.shape_cast %30 : vector<1x1x1xf32> to vector<1x1x1xf32>
    %32 = vector.broadcast %31 : vector<1x1x1xf32> to vector<1x8x128xf32>
    %c0_10 = arith.constant 0 : index
    %c0_11 = arith.constant 0 : index
    %c0_12 = arith.constant 0 : index
    %33 = vector.load %arg4[%c0_10, %c0_11, %c0_12] : memref<1x8x128xf32, #tpu.memory_space<vmem>>, vector<1x8x128xf32>
    tpu.vector_store %arg4[%c0_10, %c0_11, %c0_12], %32 {strides = array<i32>} : memref<1x8x128xf32, #tpu.memory_space<vmem>>, vector<1x8x128xf32>,
    %34 = vector.shape_cast %29 : vector<1x1xf32> to vector<1x1x1xf32>
    %35 = vector.shape_cast %34 : vector<1x1x1xf32> to vector<1x1x1xf32>
    %36 = vector.broadcast %35 : vector<1x1x1xf32> to vector<1x8x128xf32>
    %c0_13 = arith.constant 0 : index
    %c0_14 = arith.constant 0 : index
    %c0_15 = arith.constant 0 : index
    %37 = vector.load %arg5[%c0_13, %c0_14, %c0_15] : memref<1x8x128xf32, #tpu.memory_space<vmem>>, vector<1x8x128xf32>
    tpu.vector_store %arg5[%c0_13, %c0_14, %c0_15], %36 {strides = array<i32>} : memref<1x8x128xf32, #tpu.memory_space<vmem>>, vector<1x8x128xf32>,
    return
  }
  func.func @transform_0(%arg0: i32) -> (i32, i32) {
    %c0_i32 = arith.constant 0 : i32
    %c0_i32_0 = arith.constant 0 : i32
    return %arg0, %c0_i32 : i32, i32
  }
  func.func @transform_1(%arg0: i32) -> (i32, i32) {
    %c0_i32 = arith.constant 0 : i32
    %c0_i32_0 = arith.constant 0 : i32
    return %arg0, %c0_i32 : i32, i32
  }
  func.func @transform_2(%arg0: i32) -> (i32, i32) {
    %c0_i32 = arith.constant 0 : i32
    %c0_i32_0 = arith.constant 0 : i32
    return %arg0, %c0_i32 : i32, i32
  }
  func.func @transform_3(%arg0: i32) -> (i32, i32, i32) {
    %c0_i32 = arith.constant 0 : i32
    %c0_i32_0 = arith.constant 0 : i32
    %c0_i32_1 = arith.constant 0 : i32
    return %arg0, %c0_i32, %c0_i32_0 : i32, i32, i32
  }
  func.func @transform_4(%arg0: i32) -> (i32, i32, i32) {
    %c0_i32 = arith.constant 0 : i32
    %c0_i32_0 = arith.constant 0 : i32
    %c0_i32_1 = arith.constant 0 : i32
    return %arg0, %c0_i32, %c0_i32_0 : i32, i32, i32
  }
}

</mosaic_0001>

<bundles_post_ra>
// kernel: jointbert_forward.16
= control target key start
LH: loop header
LB: loop body
LE: loop exit
PB: predicated region body
PF: predicated region fallthrough
CT: control target
= control target key end

     0   :  { %vm46_vm0 = vcmask 261120   ;;  %vm670_vm1 = vcmask 257024   ;;  %s1507_s0 = inlined_call_operand.vmem [shape: f32[256,32], index: 0, kind: input, shape index: {}]   ;;  %s1508_s1 = inlined_call_operand.vmem [shape: f32[1,32], index: 1, kind: input, shape index: {}]   ;;  %s1509_s2 = inlined_call_operand.vmem [shape: f32[1,32], index: 2, kind: input, shape index: {}]   ;;  %s1510_s3 = inlined_call_operand.vmem [shape: bf16[256,32], index: 3, kind: output, shape index: {}]  }
   0x1   :  { %v860_v0 = vld [vmem:[%s1507_s0] sm:$0xff]  ;;  %v865_v1 = vld [vmem:[%s1507_s0 + $0x10] sm:$0xff]  ;;  %v870_v2 = vld [vmem:[%s1507_s0 + $0x8] sm:$0xff] }
   0x2   :  { %v47_v3 = vsel %vm46_vm0, %v860_v0, 0.0  ;;  %v53_v4 = vsel %vm46_vm0, %v865_v1, 0.0  ;;  %v879_v5 = vld [vmem:[%s1507_s0 + $0x18] sm:$0xff]  ;;  %v50_v6 = vsel %vm46_vm0, %v870_v2, 0.0  ;;  %v888_v8 = vld [vmem:[%s1507_s0 + $0x20] sm:$0xff]  ;;  %v893_v9 = vld [vmem:[%s1507_s0 + $0x28] sm:$0xff] }
   0x3   :  { %48 = vadd.xlane.f32.xlu0 %v47_v3  ;;  %54 = vadd.xlane.f32.xlu1 %v53_v4  ;;  %v56_v7 = vsel %vm46_vm0, %v879_v5, 0.0  ;;  %v59_v10 = vsel %vm46_vm0, %v888_v8, 0.0  ;;  %v62_v11 = vsel %vm46_vm0, %v893_v9, 0.0  ;;  %v902_v12 = vld [vmem:[%s1507_s0 + $0x30] sm:$0xff]  ;;  %v907_v13 = vld [vmem:[%s1507_s0 + $0x38] sm:$0xff]  ;;  %v916_v16 = vld [vmem:[%s1507_s0 + $0x40] sm:$0xff] }
   0x4   :  { %v65_v14 = vsel %vm46_vm0, %v902_v12, 0.0  ;;  %v68_v15 = vsel %vm46_vm0, %v907_v13, 0.0  ;;  %v921_v17 = vld [vmem:[%s1507_s0 + $0x48] sm:$0xff]  ;;  %v71_v18 = vsel %vm46_vm0, %v916_v16, 0.0  ;;  %v930_v20 = vld [vmem:[%s1507_s0 + $0x50] sm:$0xff]  ;;  %v935_v21 = vld [vmem:[%s1507_s0 + $0x58] sm:$0xff] }
   0x5   :  { %v74_v19 = vsel %vm46_vm0, %v921_v17, 0.0  ;;  %v77_v22 = vsel %vm46_vm0, %v930_v20, 0.0  ;;  %v80_v23 = vsel %vm46_vm0, %v935_v21, 0.0  ;;  %v944_v24 = vld [vmem:[%s1507_s0 + $0x60] sm:$0xff]  ;;  %v949_v25 = vld [vmem:[%s1507_s0 + $0x68] sm:$0xff]  ;;  %v958_v28 = vld [vmem:[%s1507_s0 + $0x70] sm:$0xff] }
   0x6   :  { %v83_v26 = vsel %vm46_vm0, %v944_v24, 0.0  ;;  %v86_v27 = vsel %vm46_vm0, %v949_v25, 0.0  ;;  %v963_v29 = vld [vmem:[%s1507_s0 + $0x78] sm:$0xff]  ;;  %v89_v30 = vsel %vm46_vm0, %v958_v28, 0.0  ;;  %v972_v32 = vld [vmem:[%s1507_s0 + $0x80] sm:$0xff]  ;;  %v977_v33 = vld [vmem:[%s1507_s0 + $0x88] sm:$0xff] }
   0x7   :  { %51 = vadd.xlane.f32.xlu0 %v50_v6  ;;  %57 = vadd.xlane.f32.xlu1 %v56_v7  ;;  %v92_v31 = vsel %vm46_vm0, %v963_v29, 0.0  ;;  %v95_v34 = vsel %vm46_vm0, %v972_v32, 0.0  ;;  %v98_v35 = vsel %vm46_vm0, %v977_v33, 0.0  ;;  %v986_v36 = vld [vmem:[%s1507_s0 + $0x90] sm:$0xff]  ;;  %v991_v37 = vld [vmem:[%s1507_s0 + $0x98] sm:$0xff]  ;;  %v1000_v40 = vld [vmem:[%s1507_s0 + $0xa0] sm:$0xff] }
   0x8   :  { %v101_v38 = vsel %vm46_vm0, %v986_v36, 0.0  ;;  %v104_v39 = vsel %vm46_vm0, %v991_v37, 0.0  ;;  %v1005_v41 = vld [vmem:[%s1507_s0 + $0xa8] sm:$0xff]  ;;  %v107_v42 = vsel %vm46_vm0, %v1000_v40, 0.0  ;;  %v1014_v44 = vld [vmem:[%s1507_s0 + $0xb0] sm:$0xff]  ;;  %v1019_v45 = vld [vmem:[%s1507_s0 + $0xb8] sm:$0xff] }
   0x9   :  { %v110_v43 = vsel %vm46_vm0, %v1005_v41, 0.0  ;;  %v113_v46 = vsel %vm46_vm0, %v1014_v44, 0.0  ;;  %v116_v47 = vsel %vm46_vm0, %v1019_v45, 0.0  ;;  %v1028_v48 = vld [vmem:[%s1507_s0 + $0xc0] sm:$0xff]  ;;  %v1033_v49 = vld [vmem:[%s1507_s0 + $0xc8] sm:$0xff]  ;;  %v1042_v52 = vld [vmem:[%s1507_s0 + $0xd0] sm:$0xff] }
   0xa   :  { %v119_v50 = vsel %vm46_vm0, %v1028_v48, 0.0  ;;  %v122_v51 = vsel %vm46_vm0, %v1033_v49, 0.0  ;;  %v1047_v53 = vld [vmem:[%s1507_s0 + $0xd8] sm:$0xff]  ;;  %v125_v54 = vsel %vm46_vm0, %v1042_v52, 0.0  ;;  %v1056_v56 = vld [vmem:[%s1507_s0 + $0xe0] sm:$0xff]  ;;  %v1061_v57 = vld [vmem:[%s1507_s0 + $0xe8] sm:$0xff] }
   0xb   :  { %60 = vadd.xlane.f32.xlu0 %v59_v10  ;;  %63 = vadd.xlane.f32.xlu1 %v62_v11  ;;  %v128_v55 = vsel %vm46_vm0, %v1047_v53, 0.0  ;;  %v131_v58 = vsel %vm46_vm0, %v1056_v56, 0.0  ;;  %v134_v59 = vsel %vm46_vm0, %v1061_v57, 0.0  ;;  %v1070_v60 = vld [vmem:[%s1507_s0 + $0xf0] sm:$0xff]  ;;  %v1075_v61 = vld [vmem:[%s1507_s0 + $0xf8] sm:$0xff] }
   0xc   :  { %v137_v62 = vsel %vm46_vm0, %v1070_v60, 0.0  ;;  %v140_v63 = vsel %vm46_vm0, %v1075_v61, 0.0 }
   0xf   :  { %66 = vadd.xlane.f32.xlu0 %v65_v14  ;;  %69 = vadd.xlane.f32.xlu1 %v68_v15 }
  0x13   :  { %72 = vadd.xlane.f32.xlu0 %v71_v18  ;;  %75 = vadd.xlane.f32.xlu1 %v74_v19 }
  0x17   :  { %78 = vadd.xlane.f32.xlu0 %v77_v22  ;;  %81 = vadd.xlane.f32.xlu1 %v80_v23 }
  0x1b   :  { %84 = vadd.xlane.f32.xlu0 %v83_v26  ;;  %87 = vadd.xlane.f32.xlu1 %v86_v27 }
  0x1f   :  { %90 = vadd.xlane.f32.xlu0 %v89_v30  ;;  %93 = vadd.xlane.f32.xlu1 %v92_v31 }
  0x23   :  { %96 = vadd.xlane.f32.xlu0 %v95_v34  ;;  %99 = vadd.xlane.f32.xlu1 %v98_v35 }
  0x27   :  { %102 = vadd.xlane.f32.xlu0 %v101_v38  ;;  %105 = vadd.xlane.f32.xlu1 %v104_v39 }
  0x2b   :  { %108 = vadd.xlane.f32.xlu0 %v107_v42  ;;  %111 = vadd.xlane.f32.xlu1 %v110_v43 }
  0x2f   :  { %114 = vadd.xlane.f32.xlu0 %v113_v46  ;;  %117 = vadd.xlane.f32.xlu1 %v116_v47 }
  0x33   :  { %120 = vadd.xlane.f32.xlu0 %v119_v50  ;;  %123 = vadd.xlane.f32.xlu1 %v122_v51 }
  0x37   :  { %126 = vadd.xlane.f32.xlu0 %v125_v54  ;;  %129 = vadd.xlane.f32.xlu1 %v128_v55 }
  0x3b   :  { %132 = vadd.xlane.f32.xlu0 %v131_v58  ;;  %135 = vadd.xlane.f32.xlu1 %v134_v59 }
  0x3f   :  { %138 = vadd.xlane.f32.xlu0 %v137_v62  ;;  %141 = vadd.xlane.f32.xlu1 %v140_v63 }
  0x8c   :  { %v49_v3 = vpop.xlane.xlu0 %48  ;;  %v55_v4 = vpop.xlane.xlu1 %54 }
  0x8d   :  { %v144_v6 = vmul.f32 0.03125, %v49_v3  ;;  %v146_v7 = vmul.f32 0.03125, %v55_v4 }
  0x8f   :  { %v1082_v10 = vsub.f32 %v860_v0, %v144_v6  ;;  %v1085_v11 = vsub.f32 %v865_v1, %v146_v7 }
  0x90   :  { %v52_v14 = vpop.xlane.xlu0 %51  ;;  %v58_v15 = vpop.xlane.xlu1 %57 }
  0x91   :  { %v145_v18 = vmul.f32 0.03125, %v52_v14  ;;  %v147_v19 = vmul.f32 0.03125, %v58_v15  ;;  %v208_v22 = vmul.f32 %v1082_v10, %v1082_v10  ;;  %v210_v23 = vmul.f32 %v1085_v11, %v1085_v11 }
  0x93   :  { %v1092_v26 = vsub.f32 %v870_v2, %v145_v18  ;;  %v1095_v27 = vsub.f32 %v879_v5, %v147_v19  ;;  %v240_v0 = vsel %vm46_vm0, %v208_v22, 0.0  ;;  %v246_v31 = vsel %vm46_vm0, %v210_v23, 0.0 }
  0x94   :  { %241 = vadd.xlane.f32.xlu0 %v240_v0  ;;  %v61_v1 = vpop.xlane.xlu0 %60  ;;  %v64_v30 = vpop.xlane.xlu1 %63 }
  0x95   :  { %v148_v34 = vmul.f32 0.03125, %v61_v1  ;;  %v149_v35 = vmul.f32 0.03125, %v64_v30  ;;  %v209_v38 = vmul.f32 %v1092_v26, %v1092_v26  ;;  %v211_v39 = vmul.f32 %v1095_v27, %v1095_v27 }
  0x97   :  { %v1104_v2 = vsub.f32 %v888_v8, %v148_v34  ;;  %v1107_v5 = vsub.f32 %v893_v9, %v149_v35  ;;  %v243_v42 = vsel %vm46_vm0, %v209_v38, 0.0  ;;  %v249_v47 = vsel %vm46_vm0, %v211_v39, 0.0 }
  0x98   :  { %247 = vadd.xlane.f32.xlu0 %v246_v31  ;;  %244 = vadd.xlane.f32.xlu1 %v243_v42  ;;  %v67_v43 = vpop.xlane.xlu0 %66  ;;  %v70_v46 = vpop.xlane.xlu1 %69 }
  0x99   :  { %v150_v50 = vmul.f32 0.03125, %v67_v43  ;;  %v151_v51 = vmul.f32 0.03125, %v70_v46  ;;  %v212_v54 = vmul.f32 %v1104_v2, %v1104_v2  ;;  %v213_v8 = vmul.f32 %v1107_v5, %v1107_v5 }
  0x9b   :  { %v1116_v55 = vsub.f32 %v902_v12, %v150_v50  ;;  %v1119_v9 = vsub.f32 %v907_v13, %v151_v51  ;;  %v252_v58 = vsel %vm46_vm0, %v212_v54, 0.0  ;;  %v255_v63 = vsel %vm46_vm0, %v213_v8, 0.0 }
  0x9c   :  { %250 = vadd.xlane.f32.xlu1 %v249_v47  ;;  %253 = vadd.xlane.f32.xlu0 %v252_v58  ;;  %v73_v59 = vpop.xlane.xlu0 %72  ;;  %v76_v62 = vpop.xlane.xlu1 %75 }
  0x9d   :  { %v152_v3 = vmul.f32 0.03125, %v73_v59  ;;  %v153_v4 = vmul.f32 0.03125, %v76_v62  ;;  %v214_v6 = vmul.f32 %v1116_v55, %v1116_v55  ;;  %v215_v12 = vmul.f32 %v1119_v9, %v1119_v9 }
  0x9f   :  { %v1128_v7 = vsub.f32 %v916_v16, %v152_v3  ;;  %v1131_v13 = vsub.f32 %v921_v17, %v153_v4  ;;  %v258_v14 = vsel %vm46_vm0, %v214_v6, 0.0  ;;  %v261_v19 = vsel %vm46_vm0, %v215_v12, 0.0 }
  0xa0   :  { %256 = vadd.xlane.f32.xlu1 %v255_v63  ;;  %259 = vadd.xlane.f32.xlu0 %v258_v14  ;;  %v79_v15 = vpop.xlane.xlu0 %78  ;;  %v82_v18 = vpop.xlane.xlu1 %81 }
  0xa1   :  { %v154_v22 = vmul.f32 0.03125, %v79_v15  ;;  %v155_v23 = vmul.f32 0.03125, %v82_v18  ;;  %v216_v0 = vmul.f32 %v1128_v7, %v1128_v7  ;;  %v217_v16 = vmul.f32 %v1131_v13, %v1131_v13 }
  0xa3   :  { %v1140_v1 = vsub.f32 %v930_v20, %v154_v22  ;;  %v1143_v17 = vsub.f32 %v935_v21, %v155_v23  ;;  %v264_v30 = vsel %vm46_vm0, %v216_v0, 0.0  ;;  %v267_v35 = vsel %vm46_vm0, %v217_v16, 0.0 }
  0xa4   :  { %262 = vadd.xlane.f32.xlu1 %v261_v19  ;;  %265 = vadd.xlane.f32.xlu0 %v264_v30  ;;  %v85_v31 = vpop.xlane.xlu0 %84  ;;  %v88_v34 = vpop.xlane.xlu1 %87 }
  0xa5   :  { %v156_v38 = vmul.f32 0.03125, %v85_v31  ;;  %v157_v39 = vmul.f32 0.03125, %v88_v34  ;;  %v218_v42 = vmul.f32 %v1140_v1, %v1140_v1  ;;  %v219_v20 = vmul.f32 %v1143_v17, %v1143_v17 }
  0xa7   :  { %v1152_v43 = vsub.f32 %v944_v24, %v156_v38  ;;  %v1155_v21 = vsub.f32 %v949_v25, %v157_v39  ;;  %v270_v46 = vsel %vm46_vm0, %v218_v42, 0.0  ;;  %v273_v51 = vsel %vm46_vm0, %v219_v20, 0.0 }
  0xa8   :  { %268 = vadd.xlane.f32.xlu1 %v267_v35  ;;  %271 = vadd.xlane.f32.xlu0 %v270_v46  ;;  %v91_v47 = vpop.xlane.xlu0 %90  ;;  %v94_v50 = vpop.xlane.xlu1 %93 }
  0xa9   :  { %v158_v54 = vmul.f32 0.03125, %v91_v47  ;;  %v159_v8 = vmul.f32 0.03125, %v94_v50  ;;  %v220_v58 = vmul.f32 %v1152_v43, %v1152_v43  ;;  %v221_v24 = vmul.f32 %v1155_v21, %v1155_v21 }
  0xab   :  { %v1164_v59 = vsub.f32 %v958_v28, %v158_v54  ;;  %v1167_v25 = vsub.f32 %v963_v29, %v159_v8  ;;  %v276_v62 = vsel %vm46_vm0, %v220_v58, 0.0  ;;  %v279_v4 = vsel %vm46_vm0, %v221_v24, 0.0 }
  0xac   :  { %274 = vadd.xlane.f32.xlu1 %v273_v51  ;;  %277 = vadd.xlane.f32.xlu0 %v276_v62  ;;  %v97_v63 = vpop.xlane.xlu0 %96  ;;  %v100_v3 = vpop.xlane.xlu1 %99 }
  0xad   :  { %v160_v6 = vmul.f32 0.03125, %v97_v63  ;;  %v161_v12 = vmul.f32 0.03125, %v100_v3  ;;  %v222_v14 = vmul.f32 %v1164_v59, %v1164_v59  ;;  %v223_v28 = vmul.f32 %v1167_v25, %v1167_v25 }
  0xaf   :  { %v1176_v15 = vsub.f32 %v972_v32, %v160_v6  ;;  %v1179_v29 = vsub.f32 %v977_v33, %v161_v12  ;;  %v282_v18 = vsel %vm46_vm0, %v222_v14, 0.0  ;;  %v285_v23 = vsel %vm46_vm0, %v223_v28, 0.0 }
  0xb0   :  { %280 = vadd.xlane.f32.xlu1 %v279_v4  ;;  %283 = vadd.xlane.f32.xlu0 %v282_v18  ;;  %v103_v19 = vpop.xlane.xlu0 %102  ;;  %v106_v22 = vpop.xlane.xlu1 %105 }
  0xb1   :  { %v162_v0 = vmul.f32 0.03125, %v103_v19  ;;  %v163_v16 = vmul.f32 0.03125, %v106_v22  ;;  %v224_v30 = vmul.f32 %v1176_v15, %v1176_v15  ;;  %v225_v32 = vmul.f32 %v1179_v29, %v1179_v29 }
  0xb3   :  { %v1188_v31 = vsub.f32 %v986_v36, %v162_v0  ;;  %v1191_v33 = vsub.f32 %v991_v37, %v163_v16  ;;  %v288_v34 = vsel %vm46_vm0, %v224_v30, 0.0  ;;  %v291_v39 = vsel %vm46_vm0, %v225_v32, 0.0 }
  0xb4   :  { %286 = vadd.xlane.f32.xlu1 %v285_v23  ;;  %289 = vadd.xlane.f32.xlu0 %v288_v34  ;;  %v109_v35 = vpop.xlane.xlu0 %108  ;;  %v112_v38 = vpop.xlane.xlu1 %111 }
  0xb5   :  { %v164_v42 = vmul.f32 0.03125, %v109_v35  ;;  %v165_v20 = vmul.f32 0.03125, %v112_v38  ;;  %v226_v46 = vmul.f32 %v1188_v31, %v1188_v31  ;;  %v227_v36 = vmul.f32 %v1191_v33, %v1191_v33 }
  0xb7   :  { %v1200_v47 = vsub.f32 %v1000_v40, %v164_v42  ;;  %v1203_v37 = vsub.f32 %v1005_v41, %v165_v20  ;;  %v294_v50 = vsel %vm46_vm0, %v226_v46, 0.0  ;;  %v297_v8 = vsel %vm46_vm0, %v227_v36, 0.0 }
  0xb8   :  { %292 = vadd.xlane.f32.xlu1 %v291_v39  ;;  %295 = vadd.xlane.f32.xlu0 %v294_v50  ;;  %v115_v51 = vpop.xlane.xlu0 %114  ;;  %v118_v54 = vpop.xlane.xlu1 %117 }
  0xb9   :  { %v166_v58 = vmul.f32 0.03125, %v115_v51  ;;  %v167_v24 = vmul.f32 0.03125, %v118_v54  ;;  %v228_v62 = vmul.f32 %v1200_v47, %v1200_v47  ;;  %v229_v40 = vmul.f32 %v1203_v37, %v1203_v37 }
  0xbb   :  { %v1212_v63 = vsub.f32 %v1014_v44, %v166_v58  ;;  %v1215_v41 = vsub.f32 %v1019_v45, %v167_v24  ;;  %v300_v3 = vsel %vm46_vm0, %v228_v62, 0.0  ;;  %v303_v12 = vsel %vm46_vm0, %v229_v40, 0.0 }
  0xbc   :  { %298 = vadd.xlane.f32.xlu1 %v297_v8  ;;  %301 = vadd.xlane.f32.xlu0 %v300_v3  ;;  %v121_v4 = vpop.xlane.xlu0 %120  ;;  %v124_v6 = vpop.xlane.xlu1 %123 }
  0xbd   :  { %v168_v14 = vmul.f32 0.03125, %v121_v4  ;;  %v169_v28 = vmul.f32 0.03125, %v124_v6  ;;  %v230_v18 = vmul.f32 %v1212_v63, %v1212_v63  ;;  %v231_v44 = vmul.f32 %v1215_v41, %v1215_v41 }
  0xbf   :  { %v1224_v19 = vsub.f32 %v1028_v48, %v168_v14  ;;  %v1227_v45 = vsub.f32 %v1033_v49, %v169_v28  ;;  %v306_v22 = vsel %vm46_vm0, %v230_v18, 0.0  ;;  %v309_v16 = vsel %vm46_vm0, %v231_v44, 0.0 }
  0xc0   :  { %304 = vadd.xlane.f32.xlu1 %v303_v12  ;;  %307 = vadd.xlane.f32.xlu0 %v306_v22  ;;  %v127_v23 = vpop.xlane.xlu0 %126  ;;  %v130_v0 = vpop.xlane.xlu1 %129 }
  0xc1   :  { %v170_v30 = vmul.f32 0.03125, %v127_v23  ;;  %v171_v32 = vmul.f32 0.03125, %v130_v0  ;;  %v232_v34 = vmul.f32 %v1224_v19, %v1224_v19  ;;  %v233_v48 = vmul.f32 %v1227_v45, %v1227_v45 }
  0xc3   :  { %v1236_v35 = vsub.f32 %v1042_v52, %v170_v30  ;;  %v1239_v49 = vsub.f32 %v1047_v53, %v171_v32  ;;  %v312_v38 = vsel %vm46_vm0, %v232_v34, 0.0  ;;  %v315_v20 = vsel %vm46_vm0, %v233_v48, 0.0 }
  0xc4   :  { %310 = vadd.xlane.f32.xlu1 %v309_v16  ;;  %313 = vadd.xlane.f32.xlu0 %v312_v38  ;;  %v133_v39 = vpop.xlane.xlu0 %132  ;;  %v136_v42 = vpop.xlane.xlu1 %135 }
  0xc5   :  { %v172_v46 = vmul.f32 0.03125, %v133_v39  ;;  %v173_v36 = vmul.f32 0.03125, %v136_v42  ;;  %v234_v50 = vmul.f32 %v1236_v35, %v1236_v35  ;;  %v235_v52 = vmul.f32 %v1239_v49, %v1239_v49 }
  0xc7   :  { %v1248_v51 = vsub.f32 %v1056_v56, %v172_v46  ;;  %v1251_v53 = vsub.f32 %v1061_v57, %v173_v36  ;;  %v318_v54 = vsel %vm46_vm0, %v234_v50, 0.0  ;;  %v321_v24 = vsel %vm46_vm0, %v235_v52, 0.0 }
  0xc8   :  { %316 = vadd.xlane.f32.xlu1 %v315_v20  ;;  %319 = vadd.xlane.f32.xlu0 %v318_v54  ;;  %v139_v8 = vpop.xlane.xlu0 %138  ;;  %v142_v58 = vpop.xlane.xlu1 %141 }
  0xc9   :  { %v174_v62 = vmul.f32 0.03125, %v139_v8  ;;  %v175_v40 = vmul.f32 0.03125, %v142_v58  ;;  %v236_v3 = vmul.f32 %v1248_v51, %v1248_v51  ;;  %v237_v56 = vmul.f32 %v1251_v53, %v1251_v53 }
  0xcb   :  { %v1260_v4 = vsub.f32 %v1070_v60, %v174_v62  ;;  %v1263_v57 = vsub.f32 %v1075_v61, %v175_v40  ;;  %v324_v6 = vsel %vm46_vm0, %v236_v3, 0.0  ;;  %v327_v12 = vsel %vm46_vm0, %v237_v56, 0.0 }
  0xcc   :  { %322 = vadd.xlane.f32.xlu1 %v321_v24  ;;  %325 = vadd.xlane.f32.xlu0 %v324_v6  ;;  %v1276_v6 = vld [vmem:[%s1508_s1] ss:$0 sm:$0xff] }
  0xcd   :  { %v238_v14 = vmul.f32 %v1260_v4, %v1260_v4  ;;  %v239_v28 = vmul.f32 %v1263_v57, %v1263_v57 }
  0xcf   :  { %v330_v18 = vsel %vm46_vm0, %v238_v14, 0.0  ;;  %v333_v60 = vsel %vm46_vm0, %v239_v28, 0.0 }
  0xd0   :  { %328 = vadd.xlane.f32.xlu1 %v327_v12  ;;  %331 = vadd.xlane.f32.xlu0 %v330_v18  ;;  %v1282_v18 = vld [vmem:[%s1509_s2] ss:$0 sm:$0xff] }
  0xd4   :  { %334 = vadd.xlane.f32.xlu1 %v333_v60 }
 0x11d   :  { %v242_v61 = vpop.xlane.xlu0 %241 }
 0x11e   :  { %v336_v44 = vmul.f32 0.03125, %v242_v61 }
 0x120   :  { %v368_v22 = vadd.f32 1e-12, %v336_v44 }
 0x121   :  { %v245_v23 = vpop.xlane.xlu1 %244  ;;  %v248_v0 = vpop.xlane.xlu0 %247 }
 0x122   :  { %773 = vrsqrt.f32 %v368_v22  ;;  %v337_v16 = vmul.f32 0.03125, %v245_v23  ;;  %v338_v30 = vmul.f32 0.03125, %v248_v0 }
 0x124   :  { %v369_v32 = vadd.f32 1e-12, %v337_v16  ;;  %v370_v34 = vadd.f32 1e-12, %v338_v30 }
 0x125   :  { %v251_v48 = vpop.xlane.xlu1 %250  ;;  %v254_v38 = vpop.xlane.xlu0 %253 }
 0x126   :  { %775 = vrsqrt.f32 %v369_v32  ;;  %v339_v39 = vmul.f32 0.03125, %v251_v48  ;;  %v340_v42 = vmul.f32 0.03125, %v254_v38 }
 0x127   :  { %777 = vrsqrt.f32 %v370_v34 }
 0x128   :  { %v371_v20 = vadd.f32 1e-12, %v339_v39  ;;  %v372_v46 = vadd.f32 1e-12, %v340_v42 }
 0x129   :  { %v257_v36 = vpop.xlane.xlu1 %256  ;;  %v260_v50 = vpop.xlane.xlu0 %259 }
 0x12a   :  { %779 = vrsqrt.f32 %v371_v20  ;;  %v341_v52 = vmul.f32 0.03125, %v257_v36  ;;  %v342_v54 = vmul.f32 0.03125, %v260_v50 }
 0x12b   :  { %781 = vrsqrt.f32 %v372_v46 }
 0x12c   :  { %v373_v8 = vadd.f32 1e-12, %v341_v52  ;;  %v374_v58 = vadd.f32 1e-12, %v342_v54 }
 0x12d   :  { %v263_v24 = vpop.xlane.xlu1 %262  ;;  %v266_v62 = vpop.xlane.xlu0 %265 }
 0x12e   :  { %783 = vrsqrt.f32 %v373_v8  ;;  %v343_v40 = vmul.f32 0.03125, %v263_v24  ;;  %v344_v3 = vmul.f32 0.03125, %v266_v62 }
 0x12f   :  { %v774_v56 = vpop.eup %773  ;;  %785 = vrsqrt.f32 %v374_v58 }
 0x130   :  { %v432_v12 = vmul.f32 %v774_v56, %v1082_v10  ;;  %v375_v14 = vadd.f32 1e-12, %v343_v40  ;;  %v376_v28 = vadd.f32 1e-12, %v344_v3 }
 0x131   :  { %v269_v60 = vpop.xlane.xlu1 %268  ;;  %v272_v61 = vpop.xlane.xlu0 %271 }
 0x132   :  { %v471_v44 = vmul.f32 %v1276_v6, %v432_v12  ;;  %787 = vrsqrt.f32 %v375_v14  ;;  %v345_v22 = vmul.f32 0.03125, %v269_v60  ;;  %v346_v23 = vmul.f32 0.03125, %v272_v61 }
 0x133   :  { %v776_v0 = vpop.eup %775  ;;  %789 = vrsqrt.f32 %v376_v28 }
 0x134   :  { %v778_v16 = vpop.eup %777  ;;  %v510_v30 = vadd.f32 %v1282_v18, %v471_v44  ;;  %v433_v10 = vmul.f32 %v776_v0, %v1092_v26  ;;  %v377_v32 = vadd.f32 1e-12, %v345_v22  ;;  %v378_v34 = vadd.f32 1e-12, %v346_v23 }
 0x135   :  { %v434_v48 = vmul.f32 %v778_v16, %v1085_v11  ;;  %v275_v38 = vpop.xlane.xlu1 %274  ;;  %v278_v39 = vpop.xlane.xlu0 %277 }
 0x136   :  { %v741_v42 = vpack.c.bf16 %v510_v30, %v510_v30  ;;  %v472_v20 = vmul.f32 %v1276_v6, %v433_v10  ;;  %791 = vrsqrt.f32 %v377_v32  ;;  %v347_v46 = vmul.f32 0.03125, %v275_v38 }
 0x137   :  { %v780_v36 = vpop.eup %779  ;;  %v473_v50 = vmul.f32 %v1276_v6, %v434_v48  ;;  %793 = vrsqrt.f32 %v378_v34  ;;  %v348_v52 = vmul.f32 0.03125, %v278_v39 }
 0x138   :  { %v782_v54 = vpop.eup %781  ;;  %671 = vst.msk [vmem:[%s1510_s3] sm:$0xf] %vm670_vm1, %v741_v42  ;;  %v511_v11 = vadd.f32 %v1282_v18, %v472_v20  ;;  %v435_v26 = vmul.f32 %v780_v36, %v1095_v27  ;;  %v379_v8 = vadd.f32 1e-12, %v347_v46 }
 0x139   :  { %v512_v58 = vadd.f32 %v1282_v18, %v473_v50  ;;  %v436_v24 = vmul.f32 %v782_v54, %v1104_v2  ;;  %v380_v62 = vadd.f32 1e-12, %v348_v52  ;;  %v281_v40 = vpop.xlane.xlu1 %280  ;;  %v284_v3 = vpop.xlane.xlu0 %283 }
 0x13a   :  { %v742_v56 = vpack.c.bf16 %v511_v11, %v511_v11  ;;  %v474_v12 = vmul.f32 %v1276_v6, %v435_v26  ;;  %795 = vrsqrt.f32 %v379_v8  ;;  %v349_v14 = vmul.f32 0.03125, %v281_v40 }
 0x13b   :  { %v784_v28 = vpop.eup %783  ;;  %v743_v60 = vpack.c.bf16 %v512_v58, %v512_v58  ;;  %v475_v61 = vmul.f32 %v1276_v6, %v436_v24  ;;  %797 = vrsqrt.f32 %v380_v62  ;;  %v350_v44 = vmul.f32 0.03125, %v284_v3 }
 0x13c   :  { %v786_v27 = vpop.eup %785  ;;  %672 = vst.msk [vmem:[%s1510_s3 + $0x4] sm:$0xf] %vm670_vm1, %v742_v56  ;;  %v513_v2 = vadd.f32 %v1282_v18, %v474_v12  ;;  %v437_v22 = vmul.f32 %v784_v28, %v1107_v5  ;;  %v381_v23 = vadd.f32 1e-12, %v349_v14 }
 0x13d   :  { %673 = vst.msk [vmem:[%s1510_s3 + $0x8] sm:$0xf] %vm670_vm1, %v743_v60  ;;  %v514_v0 = vadd.f32 %v1282_v18, %v475_v61  ;;  %v438_v16 = vmul.f32 %v786_v27, %v1116_v55  ;;  %v382_v30 = vadd.f32 1e-12, %v350_v44  ;;  %v287_v10 = vpop.xlane.xlu1 %286  ;;  %v290_v32 = vpop.xlane.xlu0 %289 }
 0x13e   :  { %v744_v34 = vpack.c.bf16 %v513_v2, %v513_v2  ;;  %v476_v48 = vmul.f32 %v1276_v6, %v437_v22  ;;  %799 = vrsqrt.f32 %v381_v23  ;;  %v351_v38 = vmul.f32 0.03125, %v287_v10 }
 0x13f   :  { %v788_v39 = vpop.eup %787  ;;  %v745_v5 = vpack.c.bf16 %v514_v0, %v514_v0  ;;  %v477_v42 = vmul.f32 %v1276_v6, %v438_v16  ;;  %801 = vrsqrt.f32 %v382_v30  ;;  %v352_v20 = vmul.f32 0.03125, %v290_v32 }
 0x140   :  { %v790_v46 = vpop.eup %789  ;;  %674 = vst.msk [vmem:[%s1510_s3 + $0xc] sm:$0xf] %vm670_vm1, %v744_v34  ;;  %v515_v55 = vadd.f32 %v1282_v18, %v476_v48  ;;  %v439_v36 = vmul.f32 %v788_v39, %v1119_v9  ;;  %v383_v50 = vadd.f32 1e-12, %v351_v38 }
 0x141   :  { %675 = vst.msk [vmem:[%s1510_s3 + $0x10] sm:$0xf] %vm670_vm1, %v745_v5  ;;  %v516_v52 = vadd.f32 %v1282_v18, %v477_v42  ;;  %v440_v54 = vmul.f32 %v790_v46, %v1128_v7  ;;  %v384_v11 = vadd.f32 1e-12, %v352_v20  ;;  %v293_v26 = vpop.xlane.xlu1 %292  ;;  %v296_v8 = vpop.xlane.xlu0 %295 }
 0x142   :  { %v746_v58 = vpack.c.bf16 %v515_v55, %v515_v55  ;;  %v478_v24 = vmul.f32 %v1276_v6, %v439_v36  ;;  %803 = vrsqrt.f32 %v383_v50  ;;  %v353_v62 = vmul.f32 0.03125, %v293_v26 }
 0x143   :  { %v792_v40 = vpop.eup %791  ;;  %v747_v9 = vpack.c.bf16 %v516_v52, %v516_v52  ;;  %v479_v3 = vmul.f32 %v1276_v6, %v440_v54  ;;  %805 = vrsqrt.f32 %v384_v11  ;;  %v354_v56 = vmul.f32 0.03125, %v296_v8 }
 0x144   :  { %v794_v12 = vpop.eup %793  ;;  %676 = vst.msk [vmem:[%s1510_s3 + $0x14] sm:$0xf] %vm670_vm1, %v746_v58  ;;  %v517_v7 = vadd.f32 %v1282_v18, %v478_v24  ;;  %v441_v14 = vmul.f32 %v792_v40, %v1131_v13  ;;  %v385_v28 = vadd.f32 1e-12, %v353_v62 }
 0x145   :  { %677 = vst.msk [vmem:[%s1510_s3 + $0x18] sm:$0xf] %vm670_vm1, %v747_v9  ;;  %v518_v60 = vadd.f32 %v1282_v18, %v479_v3  ;;  %v442_v61 = vmul.f32 %v794_v12, %v1140_v1  ;;  %v386_v44 = vadd.f32 1e-12, %v354_v56  ;;  %v299_v27 = vpop.xlane.xlu1 %298  ;;  %v302_v2 = vpop.xlane.xlu0 %301 }
 0x146   :  { %v748_v22 = vpack.c.bf16 %v517_v7, %v517_v7  ;;  %v480_v23 = vmul.f32 %v1276_v6, %v441_v14  ;;  %807 = vrsqrt.f32 %v385_v28  ;;  %v355_v0 = vmul.f32 0.03125, %v299_v27 }
 0x147   :  { %v796_v16 = vpop.eup %795  ;;  %v749_v13 = vpack.c.bf16 %v518_v60, %v518_v60  ;;  %v481_v30 = vmul.f32 %v1276_v6, %v442_v61  ;;  %809 = vrsqrt.f32 %v386_v44  ;;  %v356_v10 = vmul.f32 0.03125, %v302_v2 }
 0x148   :  { %v798_v32 = vpop.eup %797  ;;  %678 = vst.msk [vmem:[%s1510_s3 + $0x1c] sm:$0xf] %vm670_vm1, %v748_v22  ;;  %v519_v1 = vadd.f32 %v1282_v18, %v480_v23  ;;  %v443_v34 = vmul.f32 %v796_v16, %v1143_v17  ;;  %v387_v48 = vadd.f32 1e-12, %v355_v0 }
 0x149   :  { %679 = vst.msk [vmem:[%s1510_s3 + $0x20] sm:$0xf] %vm670_vm1, %v749_v13  ;;  %v520_v38 = vadd.f32 %v1282_v18, %v481_v30  ;;  %v444_v39 = vmul.f32 %v798_v32, %v1152_v43  ;;  %v388_v5 = vadd.f32 1e-12, %v356_v10  ;;  %v305_v42 = vpop.xlane.xlu1 %304  ;;  %v308_v20 = vpop.xlane.xlu0 %307 }
 0x14a   :  { %v750_v46 = vpack.c.bf16 %v519_v1, %v519_v1  ;;  %v482_v55 = vmul.f32 %v1276_v6, %v443_v34  ;;  %811 = vrsqrt.f32 %v387_v48  ;;  %v357_v36 = vmul.f32 0.03125, %v305_v42 }
 0x14b   :  { %v800_v50 = vpop.eup %799  ;;  %v751_v17 = vpack.c.bf16 %v520_v38, %v520_v38  ;;  %v483_v52 = vmul.f32 %v1276_v6, %v444_v39  ;;  %813 = vrsqrt.f32 %v388_v5  ;;  %v358_v54 = vmul.f32 0.03125, %v308_v20 }
 0x14c   :  { %v802_v11 = vpop.eup %801  ;;  %680 = vst.msk [vmem:[%s1510_s3 + $0x24] sm:$0xf] %vm670_vm1, %v750_v46  ;;  %v521_v43 = vadd.f32 %v1282_v18, %v482_v55  ;;  %v445_v26 = vmul.f32 %v800_v50, %v1155_v21  ;;  %v389_v8 = vadd.f32 1e-12, %v357_v36 }
 0x14d   :  { %681 = vst.msk [vmem:[%s1510_s3 + $0x28] sm:$0xf] %vm670_vm1, %v751_v17  ;;  %v522_v58 = vadd.f32 %v1282_v18, %v483_v52  ;;  %v446_v24 = vmul.f32 %v802_v11, %v1164_v59  ;;  %v390_v62 = vadd.f32 1e-12, %v358_v54  ;;  %v311_v40 = vpop.xlane.xlu1 %310  ;;  %v314_v9 = vpop.xlane.xlu0 %313 }
 0x14e   :  { %v752_v3 = vpack.c.bf16 %v521_v43, %v521_v43  ;;  %v484_v56 = vmul.f32 %v1276_v6, %v445_v26  ;;  %815 = vrsqrt.f32 %v389_v8  ;;  %v359_v12 = vmul.f32 0.03125, %v311_v40 }
 0x14f   :  { %v804_v7 = vpop.eup %803  ;;  %v753_v21 = vpack.c.bf16 %v522_v58, %v522_v58  ;;  %v485_v14 = vmul.f32 %v1276_v6, %v446_v24  ;;  %817 = vrsqrt.f32 %v390_v62  ;;  %v360_v28 = vmul.f32 0.03125, %v314_v9 }
 0x150   :  { %v806_v60 = vpop.eup %805  ;;  %682 = vst.msk [vmem:[%s1510_s3 + $0x2c] sm:$0xf] %vm670_vm1, %v752_v3  ;;  %v523_v59 = vadd.f32 %v1282_v18, %v484_v56  ;;  %v447_v61 = vmul.f32 %v804_v7, %v1167_v25  ;;  %v391_v44 = vadd.f32 1e-12, %v359_v12 }
 0x151   :  { %683 = vst.msk [vmem:[%s1510_s3 + $0x30] sm:$0xf] %vm670_vm1, %v753_v21  ;;  %v524_v27 = vadd.f32 %v1282_v18, %v485_v14  ;;  %v448_v2 = vmul.f32 %v806_v60, %v1176_v15  ;;  %v392_v22 = vadd.f32 1e-12, %v360_v28  ;;  %v317_v23 = vpop.xlane.xlu1 %316  ;;  %v320_v0 = vpop.xlane.xlu0 %319 }
 0x152   :  { %v754_v16 = vpack.c.bf16 %v523_v59, %v523_v59  ;;  %v486_v13 = vmul.f32 %v1276_v6, %v447_v61  ;;  %819 = vrsqrt.f32 %v391_v44  ;;  %v361_v30 = vmul.f32 0.03125, %v317_v23 }
 0x153   :  { %v808_v10 = vpop.eup %807  ;;  %v755_v25 = vpack.c.bf16 %v524_v27, %v524_v27  ;;  %v487_v32 = vmul.f32 %v1276_v6, %v448_v2  ;;  %821 = vrsqrt.f32 %v392_v22  ;;  %v362_v1 = vmul.f32 0.03125, %v320_v0 }
 0x154   :  { %v810_v34 = vpop.eup %809  ;;  %684 = vst.msk [vmem:[%s1510_s3 + $0x34] sm:$0xf] %vm670_vm1, %v754_v16  ;;  %v525_v15 = vadd.f32 %v1282_v18, %v486_v13  ;;  %v449_v48 = vmul.f32 %v808_v10, %v1179_v29  ;;  %v393_v38 = vadd.f32 1e-12, %v361_v30 }
 0x155   :  { %685 = vst.msk [vmem:[%s1510_s3 + $0x38] sm:$0xf] %vm670_vm1, %v755_v25  ;;  %v526_v39 = vadd.f32 %v1282_v18, %v487_v32  ;;  %v450_v5 = vmul.f32 %v810_v34, %v1188_v31  ;;  %v394_v42 = vadd.f32 1e-12, %v362_v1  ;;  %v323_v20 = vpop.xlane.xlu1 %322  ;;  %v326_v46 = vpop.xlane.xlu0 %325 }
 0x156   :  { %v756_v55 = vpack.c.bf16 %v525_v15, %v525_v15  ;;  %v488_v36 = vmul.f32 %v1276_v6, %v449_v48  ;;  %823 = vrsqrt.f32 %v393_v38  ;;  %v363_v50 = vmul.f32 0.03125, %v323_v20 }
 0x157   :  { %v812_v17 = vpop.eup %811  ;;  %v757_v29 = vpack.c.bf16 %v526_v39, %v526_v39  ;;  %v489_v52 = vmul.f32 %v1276_v6, %v450_v5  ;;  %825 = vrsqrt.f32 %v394_v42  ;;  %v364_v54 = vmul.f32 0.03125, %v326_v46 }
 0x158   :  { %v814_v11 = vpop.eup %813  ;;  %686 = vst.msk [vmem:[%s1510_s3 + $0x3c] sm:$0xf] %vm670_vm1, %v756_v55  ;;  %v527_v31 = vadd.f32 %v1282_v18, %v488_v36  ;;  %v451_v43 = vmul.f32 %v812_v17, %v1191_v33  ;;  %v395_v26 = vadd.f32 1e-12, %v363_v50 }
 0x159   :  { %687 = vst.msk [vmem:[%s1510_s3 + $0x40] sm:$0xf] %vm670_vm1, %v757_v29  ;;  %v528_v8 = vadd.f32 %v1282_v18, %v489_v52  ;;  %v452_v58 = vmul.f32 %v814_v11, %v1200_v47  ;;  %v396_v24 = vadd.f32 1e-12, %v364_v54  ;;  %v329_v62 = vpop.xlane.xlu1 %328  ;;  %v332_v40 = vpop.xlane.xlu0 %331 }
 0x15a   :  { %v758_v9 = vpack.c.bf16 %v527_v31, %v527_v31  ;;  %v490_v3 = vmul.f32 %v1276_v6, %v451_v43  ;;  %827 = vrsqrt.f32 %v395_v26  ;;  %v365_v56 = vmul.f32 0.03125, %v329_v62 }
 0x15b   :  { %v816_v12 = vpop.eup %815  ;;  %v759_v33 = vpack.c.bf16 %v528_v8, %v528_v8  ;;  %v491_v7 = vmul.f32 %v1276_v6, %v452_v58  ;;  %829 = vrsqrt.f32 %v396_v24  ;;  %v366_v21 = vmul.f32 0.03125, %v332_v40 }
 0x15c   :  { %v818_v14 = vpop.eup %817  ;;  %688 = vst.msk [vmem:[%s1510_s3 + $0x44] sm:$0xf] %vm670_vm1, %v758_v9  ;;  %v529_v47 = vadd.f32 %v1282_v18, %v490_v3  ;;  %v453_v28 = vmul.f32 %v816_v12, %v1203_v37  ;;  %v397_v60 = vadd.f32 1e-12, %v365_v56 }
 0x15d   :  { %689 = vst.msk [vmem:[%s1510_s3 + $0x48] sm:$0xf] %vm670_vm1, %v759_v33  ;;  %v530_v59 = vadd.f32 %v1282_v18, %v491_v7  ;;  %v454_v61 = vmul.f32 %v818_v14, %v1212_v63  ;;  %v398_v44 = vadd.f32 1e-12, %v366_v21  ;;  %v335_v27 = vpop.xlane.xlu1 %334 }
 0x15e   :  { %v760_v2 = vpack.c.bf16 %v529_v47, %v529_v47  ;;  %v492_v22 = vmul.f32 %v1276_v6, %v453_v28  ;;  %831 = vrsqrt.f32 %v397_v60  ;;  %v367_v23 = vmul.f32 0.03125, %v335_v27 }
 0x15f   :  { %v820_v0 = vpop.eup %819  ;;  %v761_v16 = vpack.c.bf16 %v530_v59, %v530_v59  ;;  %v493_v37 = vmul.f32 %v1276_v6, %v454_v61  ;;  %833 = vrsqrt.f32 %v398_v44 }
 0x160   :  { %v822_v13 = vpop.eup %821  ;;  %690 = vst.msk [vmem:[%s1510_s3 + $0x4c] sm:$0xf] %vm670_vm1, %v760_v2  ;;  %v531_v63 = vadd.f32 %v1282_v18, %v492_v22  ;;  %v455_v30 = vmul.f32 %v820_v0, %v1215_v41  ;;  %v399_v10 = vadd.f32 1e-12, %v367_v23 }
 0x161   :  { %691 = vst.msk [vmem:[%s1510_s3 + $0x50] sm:$0xf] %vm670_vm1, %v761_v16  ;;  %v532_v25 = vadd.f32 %v1282_v18, %v493_v37  ;;  %v456_v32 = vmul.f32 %v822_v13, %v1224_v19 }
 0x162   :  { %v762_v1 = vpack.c.bf16 %v531_v63, %v531_v63  ;;  %v494_v34 = vmul.f32 %v1276_v6, %v455_v30  ;;  %835 = vrsqrt.f32 %v399_v10 }
 0x163   :  { %v824_v15 = vpop.eup %823  ;;  %v763_v48 = vpack.c.bf16 %v532_v25, %v532_v25  ;;  %v495_v38 = vmul.f32 %v1276_v6, %v456_v32 }
 0x164   :  { %v826_v39 = vpop.eup %825  ;;  %692 = vst.msk [vmem:[%s1510_s3 + $0x54] sm:$0xf] %vm670_vm1, %v762_v1  ;;  %v533_v41 = vadd.f32 %v1282_v18, %v494_v34  ;;  %v457_v5 = vmul.f32 %v824_v15, %v1227_v45 }
 0x165   :  { %693 = vst.msk [vmem:[%s1510_s3 + $0x58] sm:$0xf] %vm670_vm1, %v763_v48  ;;  %v534_v19 = vadd.f32 %v1282_v18, %v495_v38  ;;  %v458_v42 = vmul.f32 %v826_v39, %v1236_v35 }
 0x166   :  { %v764_v20 = vpack.c.bf16 %v533_v41, %v533_v41  ;;  %v496_v46 = vmul.f32 %v1276_v6, %v457_v5 }
 0x167   :  { %v828_v55 = vpop.eup %827  ;;  %v765_v36 = vpack.c.bf16 %v534_v19, %v534_v19  ;;  %v497_v50 = vmul.f32 %v1276_v6, %v458_v42 }
 0x168   :  { %v830_v17 = vpop.eup %829  ;;  %694 = vst.msk [vmem:[%s1510_s3 + $0x5c] sm:$0xf] %vm670_vm1, %v764_v20  ;;  %v535_v45 = vadd.f32 %v1282_v18, %v496_v46  ;;  %v459_v29 = vmul.f32 %v828_v55, %v1239_v49 }
 0x169   :  { %695 = vst.msk [vmem:[%s1510_s3 + $0x60] sm:$0xf] %vm670_vm1, %v765_v36  ;;  %v536_v35 = vadd.f32 %v1282_v18, %v497_v50  ;;  %v460_v52 = vmul.f32 %v830_v17, %v1248_v51 }
 0x16a   :  { %v766_v54 = vpack.c.bf16 %v535_v45, %v535_v45  ;;  %v498_v11 = vmul.f32 %v1276_v6, %v459_v29 }
 0x16b   :  { %v832_v31 = vpop.eup %831  ;;  %v767_v43 = vpack.c.bf16 %v536_v35, %v536_v35  ;;  %v499_v26 = vmul.f32 %v1276_v6, %v460_v52 }
 0x16c   :  { %v834_v8 = vpop.eup %833  ;;  %696 = vst.msk [vmem:[%s1510_s3 + $0x64] sm:$0xf] %vm670_vm1, %v766_v54  ;;  %v537_v49 = vadd.f32 %v1282_v18, %v498_v11  ;;  %v461_v58 = vmul.f32 %v832_v31, %v1251_v53 }
 0x16d   :  { %697 = vst.msk [vmem:[%s1510_s3 + $0x68] sm:$0xf] %vm670_vm1, %v767_v43  ;;  %v538_v51 = vadd.f32 %v1282_v18, %v499_v26  ;;  %v462_v24 = vmul.f32 %v834_v8, %v1260_v4 }
 0x16e   :  { %v768_v62 = vpack.c.bf16 %v537_v49, %v537_v49  ;;  %v500_v40 = vmul.f32 %v1276_v6, %v461_v58 }
 0x16f   :  { %v836_v9 = vpop.eup %835  ;;  %v769_v3 = vpack.c.bf16 %v538_v51, %v538_v51  ;;  %v501_v56 = vmul.f32 %v1276_v6, %v462_v24 }
 0x170   :  { %698 = vst.msk [vmem:[%s1510_s3 + $0x6c] sm:$0xf] %vm670_vm1, %v768_v62  ;;  %v539_v53 = vadd.f32 %v1282_v18, %v500_v40  ;;  %v463_v12 = vmul.f32 %v836_v9, %v1263_v57 }
 0x171   :  { %699 = vst.msk [vmem:[%s1510_s3 + $0x70] sm:$0xf] %vm670_vm1, %v769_v3  ;;  %v540_v4 = vadd.f32 %v1282_v18, %v501_v56 }
 0x172   :  { %v770_v33 = vpack.c.bf16 %v539_v53, %v539_v53  ;;  %v502_v7 = vmul.f32 %v1276_v6, %v463_v12 }
 0x173   :  { %v771_v21 = vpack.c.bf16 %v540_v4, %v540_v4 }
 0x174   :  { %700 = vst.msk [vmem:[%s1510_s3 + $0x74] sm:$0xf] %vm670_vm1, %v770_v33  ;;  %v541_v14 = vadd.f32 %v1282_v18, %v502_v7 }
 0x175   :  { %701 = vst.msk [vmem:[%s1510_s3 + $0x78] sm:$0xf] %vm670_vm1, %v771_v21 }
 0x176   :  { %v772_v57 = vpack.c.bf16 %v541_v14, %v541_v14 }
 0x178   :  { %702 = vst.msk [vmem:[%s1510_s3 + $0x7c] sm:$0xf] %vm670_vm1, %v772_v57 }

// kernel: jointbert_forward.18
= control target key start
LH: loop header
LB: loop body
LE: loop exit
PB: predicated region body
PF: predicated region fallthrough
CT: control target
= control target key end

     0   :  { %s2223_s15 = smov 0   ;;  %s2225_s16 = smov 0   ;;  %s2624_s0 = inlined_call_operand.vmem [shape: bf16[6,2,128,16], index: 0, kind: input, shape index: {}, may-alias: {0,1,2}]   ;;  %s2625_s1 = inlined_call_operand.vmem [shape: bf16[6,2,128,16], index: 1, kind: input, shape index: {}, may-alias: {0,1,2}]   ;;  %s2626_s2 = inlined_call_operand.vmem [shape: bf16[6,2,128,16], index: 2, kind: input, shape index: {}, may-alias: {0,1,2}]   ;;  %s2627_s3 = inlined_call_operand.vmem [shape: f32[2,1,128], index: 3, kind: input, shape index: {}]   ;;  %s2628_s4 = inlined_call_operand.vmem [shape: bf16[2,2,128,16], index: 4, kind: output, shape index: {}]  }
   0x1   :  { %s2227_s17 = smov 0   ;;  %s2229_s18 = smov 0  }
   0x2   :  { %s2231_s19 = smov 0  }
   0x3 LB: > { %s36_s20 = sadd.s32 1, %s2186_s17  ;;  %s40_s21 = sadd.s32 1, %s2190_s18  ;;  %s2194_s19 = sphi %s2231_s19, %s14_s19   ;;  %s2190_s18 = sphi %s2229_s18, %s2632_s18   ;;  %s2186_s17 = sphi %s2227_s17, %s2631_s17   ;;  %s2182_s16 = sphi %s2225_s16, %s2630_s16   ;;  %s2178_s15 = sphi %s2223_s15, %s2629_s15  }
   0x4   : > { %p38_p0 = scmp.ge.s32.totalorder %s36_s20, 2  ;;  %p1808_p1 = scmp.ge.s32.totalorder %s2194_s19, 1 }
   0x5   : > { %p272_p2 = scmp.lt.s32.totalorder %s2194_s19, 5 }
   0x6   : > { %s2634_s20 = smov (%p38_p0, %s36_s20), 0  ;;  %s2636_s21 = smov (!%p38_p0, %s40_s21), %s2190_s18 }
   0x7   : > { %p273_p3 = pnand %p1808_p1, %p272_p2  ;;  %p42_p4 = scmp.ge.s32.totalorder %s2636_s21, 2 }
   0x8   : > { %p351_p5 = scmp.lt.s32.totalorder (!%p273_p3), %s2182_s16, 1  ;;  %s362_s22 = sadd.s32 (!%p273_p3), 2, %s2178_s15 }
   0x9   : > { %s2638_s21 = smov (%p42_p4, %s2636_s21), 0  ;;  %276 = sbr.rel (%p273_p3) target bundleno = 892 (0x37c), region = 36 }
   0xa   : > { %p364_p6 = scmp.lt.s32.totalorder (!%p273_p3), %s362_s22, 5  ;;  %p349_p7 = scmp.lt.s32.totalorder (!%p273_p3), %s2178_s15, 5 }
   0xb   : > { %s378_s14 = sadd.s32 (!%p273_p3), 4, %s2178_s15  ;;  %p401_p9 = scmp.lt.s32.totalorder (!%p273_p3), %s2178_s15, 1 }
   0xc   : > { %p380_p8 = scmp.lt.s32.totalorder (!%p273_p3), %s378_s14, 5 }
   0xe   : > { %s2640_s16 = smov (!%p351_p5, %s2182_s16), 1  ;;  %s2642_s22 = smov (!%p364_p6, %s362_s22), 5  ;;  %vm451_vm0 = vcmask 130048   ;;  %v2196_v39 = vmov 0   ;;  %vm1609_vm1 = vcmask 125952  }
   0xf   : > { %s2259_s23 = sshll.u32 %s2640_s16, 4  ;;  %s1813_s24 = sshll.u32 %s2642_s22, 5  ;;  %2035 = vset.pattern.permute.xlu1 %v2196_v39  ;;  %2034 = vset.pattern.permute.xlu0 %v2196_v39 }
  0x10   : > { %s373_s25 = sadd.s32 %s1813_s24, %s2259_s23  ;;  %s399_s13 = scalar_lea.vmem %s2627_s3, %s2640_s16 }
  0x11   : > { %s1814_s26 = sshll.u32 %s373_s25, 2  ;;  %v1821_v24 = vld [vmem:[%s399_s13] ss:$0 sm:$0xff]  ;;  %s2644_s14 = smov (!%p380_p8, %s378_s14), 5 }
  0x12   : > { %s2265_s29 = scalar_lea.vmem %s2625_s1, %s1814_s26  ;;  %s1816_s16 = sshll.u32 %s2644_s14, 5 }
  0x13   : > { %v2036_v0 = vld [vmem:[%s2265_s29 + $0x38] sm:$0xff]   ;;  %v2037_v1 = vld [vmem:[%s2265_s29 + $0x30] sm:$0xff]   ;;  %s350_s30 = scalar_select %p349_p7, %s2178_s15, 5  ;;  %v2038_v4 = vld [vmem:[%s2265_s29 + $0x28] sm:$0xff]  }
  0x14   : > { %1984 = vmatprep.subr.msk.bf16.mxu0 %vm451_vm0, %v2036_v0  ;;  %v650_v2 = vsel %vm451_vm0, %v2036_v0, 0  ;;  %v647_v3 = vsel %vm451_vm0, %v2037_v1, 0  ;;  %v644_v6 = vsel %vm451_vm0, %v2038_v4, 0  ;;  %v2039_v7 = vld [vmem:[%s2265_s29 + $0x20] sm:$0xff]   ;;  %v2040_v9 = vld [vmem:[%s2265_s29 + $0x18] sm:$0xff]   ;;  %v2041_v11 = vld [vmem:[%s2265_s29 + $0x10] sm:$0xff]   ;;  %s389_s22 = sadd.s32 %s1816_s16, %s2259_s23 }
  0x15   : > { %1921 = vmatpush3.bf16.xpose.msra.mxu0 %v650_v2  ;;  %s1810_s5 = sshll.u32 %s350_s30, 5  ;;  %v641_v8 = vsel %vm451_vm0, %v2039_v7, 0  ;;  %v638_v10 = vsel %vm451_vm0, %v2040_v9, 0  ;;  %v635_v12 = vsel %vm451_vm0, %v2041_v11, 0  ;;  %v2042_v13 = vld [vmem:[%s2265_s29 + $0x8] sm:$0xff]   ;;  %v2043_v15 = vld [vmem:[%s2265_s29] sm:$0xff]  }
  0x16   : > { %1985 = vmatprep.subr.msk.bf16.mxu0 %vm451_vm0, %v2037_v1  ;;  %s358_s6 = sadd.s32 %s1810_s5, %s2259_s23  ;;  %v632_v14 = vsel %vm451_vm0, %v2042_v13, 0  ;;  %v629_v16 = vsel %vm451_vm0, %v2043_v15, 0  ;;  %s1817_s24 = sshll.u32 %s389_s22, 2 }
  0x17   : > { %s1811_s7 = sshll.u32 %s358_s6, 2  ;;  %s2372_s27 = scalar_lea.vmem %s2626_s2, %s1817_s24 }
  0x18   : > { %s2280_s10 = scalar_lea.vmem %s2624_s0, %s1811_s7  ;;  %v2052_v58 = vld [vmem:[%s2372_s27 + $0x38] sm:$0xff]   ;;  %v2053_v59 = vld [vmem:[%s2372_s27 + $0x30] sm:$0xff]   ;;  %v2054_v63 = vld [vmem:[%s2372_s27 + $0x28] sm:$0xff]   ;;  %s2646_s15 = smov (!%p401_p9, %s2178_s15), 1 }
  0x19   : > { %v2044_v5 = vld [vmem:[%s2280_s10] sm:$0xff]   ;;  %v2045_v17 = vld [vmem:[%s2280_s10 + $0x8] sm:$0xff]   ;;  %v2046_v18 = vld [vmem:[%s2280_s10 + $0x10] sm:$0xff]   ;;  %1952 = vmatprep.subr.bf16.mxu1 %v2052_v58  ;;  %s1819_s28 = sshll.u32 %s2646_s15, 5 }
  0x1a   : > { %1936 = vmatprep.mubr.msk.bf16.mxu0 %vm451_vm0, %v2044_v5  ;;  %v2047_v19 = vld [vmem:[%s2280_s10 + $0x18] sm:$0xff]   ;;  %v2048_v20 = vld [vmem:[%s2280_s10 + $0x20] sm:$0xff]   ;;  %v2049_v21 = vld [vmem:[%s2280_s10 + $0x28] sm:$0xff]   ;;  %1953 = vmatpush3.bf16.msra.mxu1 %v2052_v58  ;;  %s410_s29 = sadd.s32 %s1819_s28, %s2259_s23 }
  0x1b   : > { %v2050_v22 = vld [vmem:[%s2280_s10 + $0x30] sm:$0xff]   ;;  %v2051_v23 = vld [vmem:[%s2280_s10 + $0x38] sm:$0xff]   ;;  %1954 = vmatprep.subr.bf16.mxu1 %v2053_v59  ;;  %s1820_s30 = sshll.u32 %s410_s29, 2 }
  0x1c   : > { %s2571_s7 = scalar_lea.vmem %s2628_s4, %s1820_s30 }
  0x1d   : > { %1923 = vmatpush3.bf16.xpose.msra.mxu0 %v647_v3 }
  0x1e   : > { %1986 = vmatprep.subr.msk.bf16.mxu0 %vm451_vm0, %v2038_v4  ;;  %1955 = vmatpush3.bf16.msra.mxu1 %v2053_v59  ;;  %v2055_v4 = vld [vmem:[%s2372_s27 + $0x20] sm:$0xff]  }
  0x1f   : > { %1956 = vmatprep.subr.bf16.mxu1 %v2054_v63 }
  0x22   : > { %1957 = vmatpush3.bf16.msra.mxu1 %v2054_v63 }
  0x23   : > { %1958 = vmatprep.subr.bf16.mxu1 %v2055_v4 }
  0x25   : > { %1925 = vmatpush3.bf16.xpose.msra.mxu0 %v644_v6 }
  0x26   : > { %1987 = vmatprep.subr.msk.bf16.mxu0 %vm451_vm0, %v2039_v7  ;;  %1959 = vmatpush3.bf16.msra.mxu1 %v2055_v4  ;;  %v2056_v7 = vld [vmem:[%s2372_s27 + $0x18] sm:$0xff]  }
  0x27   : > { %1960 = vmatprep.subr.bf16.mxu1 %v2056_v7 }
  0x2a   : > { %1961 = vmatpush3.bf16.msra.mxu1 %v2056_v7 }
  0x2d   : > { %1927 = vmatpush3.bf16.xpose.msra.mxu0 %v641_v8 }
  0x2e   : > { %1988 = vmatprep.subr.msk.bf16.mxu0 %vm451_vm0, %v2040_v9 }
  0x35   : > { %1929 = vmatpush3.bf16.xpose.msra.mxu0 %v638_v10  ;;  %v2057_v10 = vld [vmem:[%s2372_s27 + $0x10] sm:$0xff]  }
  0x36   : > { %1989 = vmatprep.subr.msk.bf16.mxu0 %vm451_vm0, %v2041_v11  ;;  %1962 = vmatprep.subr.bf16.mxu1 %v2057_v10 }
  0x37   : > { %1963 = vmatpush3.bf16.msra.mxu1 %v2057_v10 }
  0x3d   : > { %1931 = vmatpush3.bf16.xpose.msra.mxu0 %v635_v12 }
  0x3e   : > { %1990 = vmatprep.subr.msk.bf16.mxu0 %vm451_vm0, %v2042_v13  ;;  %v2058_v13 = vld [vmem:[%s2372_s27 + $0x8] sm:$0xff]  }
  0x3f   : > { %1964 = vmatprep.subr.bf16.mxu1 %v2058_v13 }
  0x40   : > { %1965 = vmatpush3.bf16.msra.mxu1 %v2058_v13 }
  0x45   : > { %1933 = vmatpush3.bf16.xpose.msra.mxu0 %v632_v14 }
  0x46   : > { %1991 = vmatprep.subr.msk.bf16.mxu0 %vm451_vm0, %v2043_v15 }
  0x4d   : > { %1935 = vmatpush3.bf16.xpose.msra.mxu0 %v629_v16 }
  0x54   : > { %1937 = vmatmul.mubr.msk.bf16.vlgmr.msra.gmra.mxu0 %vm451_vm0, %v2045_v17 }
  0x55   : > { %1940 = vmatprep.mubr.msk.bf16.mxu0 %vm451_vm0, %v2046_v18  ;;  %v2059_v18 = vld [vmem:[%s2372_s27] sm:$0xff]  }
  0x56   : > { %1966 = vmatprep.subr.bf16.mxu1 %v2059_v18 }
  0x57   : > { %1967 = vmatpush3.bf16.msra.mxu1 %v2059_v18 }
  0x5c   : > { %1941 = vmatmul.mubr.msk.bf16.gmra.mxu0 %vm451_vm0, %v2047_v19 }
  0x5d   : > { %1944 = vmatprep.mubr.msk.bf16.mxu0 %vm451_vm0, %v2048_v20 }
  0x64   : > { %1945 = vmatmul.mubr.msk.bf16.gmra.mxu0 %vm451_vm0, %v2049_v21 }
  0x65   : > { %1948 = vmatprep.mubr.msk.bf16.mxu0 %vm451_vm0, %v2050_v22 }
  0x6c   : > { %1949 = vmatmul.mubr.msk.bf16.gmra.mxu0 %vm451_vm0, %v2051_v23 }
 0x114   : > { %v1938_v25 = vpop.f32.mrf.mxu0 }
 0x115   : > { %v2319_v26 = vadd.f32 %v1938_v25, %v1821_v24 }
 0x116   : > { %v686_v27 = vpop.f32.mrf.mxu0 }
 0x117   : > { %v2321_v28 = vadd.f32 %v1821_v24, %v686_v27  ;;  %769 = vmax.xlane.f32.xlu1 %v2319_v26 }
 0x118   : > { %v1939_v29 = vpop.f32.mrf.mxu0 }
 0x119   : > { %v2324_v30 = vadd.f32 %v1939_v29, %v1821_v24  ;;  %765 = vmax.xlane.f32.xlu0 %v2321_v28 }
 0x11a   : > { %v689_v31 = vpop.f32.mrf.mxu0 }
 0x11b   : > { %v2327_v32 = vadd.f32 %v1821_v24, %v689_v31  ;;  %771 = vmax.xlane.f32.xlu1 %v2324_v30 }
 0x11c   : > { %v1942_v33 = vpop.f32.mrf.mxu0 }
 0x11d   : > { %767 = vmax.xlane.f32.xlu0 %v2327_v32  ;;  %v2336_v40 = vadd.f32 %v1942_v33, %v1821_v24 }
 0x11e   : > { %v702_v34 = vpop.f32.mrf.mxu0 }
 0x11f   : > { %v2331_v35 = vadd.f32 %v1821_v24, %v702_v34 }
 0x120   : > { %v1943_v36 = vpop.f32.mrf.mxu0 }
 0x121   : > { %v2333_v37 = vadd.f32 %v1943_v36, %v1821_v24  ;;  %773 = vmax.xlane.f32.xlu0 %v2331_v35 }
 0x122   : > { %v705_v38 = vpop.f32.mrf.mxu0 }
 0x123   : > { %779 = vmax.xlane.f32.xlu1 %v2333_v37  ;;  %v2339_v42 = vadd.f32 %v1821_v24, %v705_v38 }
 0x124   : > { %v1946_v41 = vpop.f32.mrf.mxu0 }
 0x125   : > { %777 = vmax.xlane.f32.xlu0 %v2336_v40  ;;  %v2345_v46 = vadd.f32 %v1946_v41, %v1821_v24  ;;  %v2197_v41 = vmov 0.0  }
 0x126   : > { %v718_v43 = vpop.f32.mrf.mxu0  ;;  %452 = vst.msk [vmem:[#allocation4] sm:$0xff] %vm451_vm0, %v2197_v41  ;;  %453 = vst.msk [vmem:[#allocation4 + $0x8] sm:$0xff] %vm451_vm0, %v2197_v41 }
 0x127   : > { %v2342_v44 = vadd.f32 %v1821_v24, %v718_v43  ;;  %775 = vmax.xlane.f32.xlu1 %v2339_v42  ;;  %454 = vst.msk [vmem:[#allocation4 + $0x10] sm:$0xff] %vm451_vm0, %v2197_v41  ;;  %455 = vst.msk [vmem:[#allocation4 + $0x18] sm:$0xff] %vm451_vm0, %v2197_v41 }
 0x128   : > { %v1947_v45 = vpop.f32.mrf.mxu0  ;;  %456 = vst.msk [vmem:[#allocation4 + $0x20] sm:$0xff] %vm451_vm0, %v2197_v41  ;;  %457 = vst.msk [vmem:[#allocation4 + $0x28] sm:$0xff] %vm451_vm0, %v2197_v41 }
 0x129   : > { %v2347_v47 = vadd.f32 %v1947_v45, %v1821_v24  ;;  %781 = vmax.xlane.f32.xlu0 %v2342_v44  ;;  %458 = vst.msk [vmem:[#allocation4 + $0x30] sm:$0xff] %vm451_vm0, %v2197_v41  ;;  %459 = vst.msk [vmem:[#allocation4 + $0x38] sm:$0xff] %vm451_vm0, %v2197_v41 }
 0x12a   : > { %v721_v48 = vpop.f32.mrf.mxu0  ;;  %460 = vst.msk [vmem:[#allocation4 + $0x40] sm:$0xff] %vm451_vm0, %v2197_v41  ;;  %461 = vst.msk [vmem:[#allocation4 + $0x48] sm:$0xff] %vm451_vm0, %v2197_v41 }
 0x12b   : > { %787 = vmax.xlane.f32.xlu1 %v2347_v47  ;;  %v2351_v50 = vadd.f32 %v1821_v24, %v721_v48  ;;  %462 = vst.msk [vmem:[#allocation4 + $0x50] sm:$0xff] %vm451_vm0, %v2197_v41  ;;  %463 = vst.msk [vmem:[#allocation4 + $0x58] sm:$0xff] %vm451_vm0, %v2197_v41 }
 0x12c   : > { %v1950_v49 = vpop.f32.mrf.mxu0  ;;  %464 = vst.msk [vmem:[#allocation4 + $0x60] sm:$0xff] %vm451_vm0, %v2197_v41  ;;  %465 = vst.msk [vmem:[#allocation4 + $0x68] sm:$0xff] %vm451_vm0, %v2197_v41 }
 0x12d   : > { %785 = vmax.xlane.f32.xlu0 %v2345_v46  ;;  %v2357_v54 = vadd.f32 %v1950_v49, %v1821_v24  ;;  %466 = vst.msk [vmem:[#allocation4 + $0x70] sm:$0xff] %vm451_vm0, %v2197_v41  ;;  %467 = vst.msk [vmem:[#allocation4 + $0x78] sm:$0xff] %vm451_vm0, %v2197_v41 }
 0x12e   : > { %v734_v51 = vpop.f32.mrf.mxu0 }
 0x12f   : > { %v2354_v52 = vadd.f32 %v1821_v24, %v734_v51  ;;  %783 = vmax.xlane.f32.xlu1 %v2351_v50 }
 0x130   : > { %v1951_v53 = vpop.f32.mrf.mxu0 }
 0x131   : > { %v2359_v55 = vadd.f32 %v1951_v53, %v1821_v24  ;;  %789 = vmax.xlane.f32.xlu0 %v2354_v52 }
 0x132   : > { %v737_v56 = vpop.f32.mrf.mxu0 }
 0x133   : > { %795 = vmax.xlane.f32.xlu1 %v2359_v55  ;;  %v2363_v57 = vadd.f32 %v1821_v24, %v737_v56 }
 0x135   : > { %793 = vmax.xlane.f32.xlu0 %v2357_v54 }
 0x137   : > { %791 = vmax.xlane.f32.xlu1 %v2363_v57 }
 0x1a0   : > { %v770_v60 = vpop.xlane.xlu1 %769 }
 0x1a1   : > { %v799_v61 = vmax.f32 %v770_v60, -1e+30 }
 0x1a2   : > { %v766_v62 = vpop.xlane.xlu0 %765 }
 0x1a3   : > { %v797_v0 = vmax.f32 %v766_v62, -1e+30  ;;  %873 = vperm.xlu1 %2035, %v799_v61   ;;  %v815_v36 = vsub.f32 -1e+30, %v799_v61 }
 0x1a4   : > { %v772_v1 = vpop.xlane.xlu1 %771 }
 0x1a5   : > { %v800_v2 = vmax.f32 %v772_v1, -1e+30  ;;  %863 = vperm.xlu0 %2034, %v797_v0   ;;  %v813_v15 = vsub.f32 -1e+30, %v797_v0  ;;  %v833_v53 = vmul.f32 1.442695, %v815_v36 }
 0x1a6   : > { %v768_v3 = vpop.xlane.xlu0 %767 }
 0x1a7   : > { %878 = vperm.xlu1 %2035, %v800_v2   ;;  %v798_v5 = vmax.f32 %v768_v3, -1e+30  ;;  %v829_v20 = vmul.f32 1.442695, %v813_v15  ;;  %v816_v22 = vsub.f32 -1e+30, %v800_v2 }
 0x1a9   : > { %v814_v25 = vsub.f32 -1e+30, %v798_v5  ;;  %2060 = vpow2.f32 %v829_v20  ;;  %v835_v31 = vmul.f32 1.442695, %v816_v22 }
 0x1aa   : > { %v2378_v6 = vpop.xlane.xlu0 %773 }
 0x1ab   : > { %868 = vperm.xlu1 %2035, %v798_v5   ;;  %v801_v14 = vmax.f32 %v2378_v6, -1e+30  ;;  %v831_v38 = vmul.f32 1.442695, %v814_v25  ;;  %2062 = vpow2.f32 %v835_v31 }
 0x1ac   : > { %v780_v8 = vpop.xlane.xlu1 %779 }
 0x1ad   : > { %v804_v23 = vmax.f32 %v780_v8, -1e+30  ;;  %2064 = vpow2.f32 %v831_v38  ;;  %v817_v56 = vsub.f32 -1e+30, %v801_v14 }
 0x1ae   : > { %v2381_v9 = vpop.xlane.xlu0 %777 }
 0x1af   : > { %v803_v11 = vmax.f32 %v2381_v9, -1e+30  ;;  %v820_v33 = vsub.f32 -1e+30, %v804_v23  ;;  %v837_v61 = vmul.f32 1.442695, %v817_v56 }
 0x1b0   : > { %v776_v12 = vpop.xlane.xlu1 %775 }
 0x1b1   : > { %893 = vperm.xlu1 %2035, %v803_v11   ;;  %v802_v19 = vmax.f32 %v776_v12, -1e+30  ;;  %v843_v45 = vmul.f32 1.442695, %v820_v33  ;;  %v819_v62 = vsub.f32 -1e+30, %v803_v11 }
 0x1b2   : > { %v2391_v17 = vpop.xlane.xlu0 %781 }
 0x1b3   : > { %v805_v39 = vmax.f32 %v2391_v17, -1e+30  ;;  %v818_v48 = vsub.f32 -1e+30, %v802_v19  ;;  %2066 = vpow2.f32 %v843_v45  ;;  %v841_v2 = vmul.f32 1.442695, %v819_v62 }
 0x1b4   : > { %v2389_v16 = vpop.xlane.xlu1 %787  ;;  %2068 = vpow2.f32 %v833_v53 }
 0x1b5   : > { %883 = vperm.xlu1 %2035, %v801_v14   ;;  %v808_v34 = vmax.f32 %v2389_v16, -1e+30  ;;  %v839_v59 = vmul.f32 1.442695, %v818_v48  ;;  %v821_v3 = vsub.f32 -1e+30, %v805_v39 }
 0x1b6   : > { %v2399_v27 = vpop.xlane.xlu0 %785  ;;  %v2443_v1 = vpop.eup %2060 }
 0x1b7   : > { %v807_v58 = vmax.f32 %v2399_v27, -1e+30  ;;  %2070 = vpow2.f32 %v839_v59  ;;  %v845_v6 = vmul.f32 1.442695, %v821_v3 }
 0x1b8   : > { %v2394_v21 = vpop.xlane.xlu1 %783  ;;  %2072 = vpow2.f32 %v837_v61  ;;  %v2449_v5 = vpop.eup %2062 }
 0x1b9   : > { %v806_v24 = vmax.f32 %v2394_v21, -1e+30  ;;  %888 = vperm.xlu1 %2035, %v802_v19   ;;  %2074 = vpow2.f32 %v841_v2 }
 0x1ba   : > { %v2426_v51 = vpop.xlane.xlu0 %789  ;;  %v2452_v7 = vpop.eup %2064  ;;  %2076 = vpow2.f32 %v845_v6 }
 0x1bb   : > { %908 = vperm.xlu0 %2034, %v806_v24   ;;  %v809_v63 = vmax.f32 %v2426_v51, -1e+30 }
 0x1bc   : > { %v2401_v29 = vpop.xlane.xlu1 %795 }
 0x1bd   : > { %898 = vperm.xlu1 %2035, %v804_v23   ;;  %v812_v60 = vmax.f32 %v2401_v29, -1e+30 }
 0x1be   : > { %v2439_v0 = vpop.xlane.xlu0 %793 }
 0x1bf   : > { %918 = vperm.xlu0 %2034, %v808_v34   ;;  %v811_v4 = vmax.f32 %v2439_v0, -1e+30 }
 0x1c0   : > { %v2423_v43 = vpop.xlane.xlu1 %791  ;;  %v2455_v8 = vpop.eup %2066 }
 0x1c1   : > { %v810_v49 = vmax.f32 %v2423_v43, -1e+30  ;;  %903 = vperm.xlu1 %2035, %v805_v39   ;;  %v2458_v9 = vpop.eup %2068 }
 0x1c3   : > { %928 = vperm.xlu0 %2034, %v810_v49  }
 0x1c4   : > { %v2461_v10 = vpop.eup %2070 }
 0x1c5   : > { %913 = vperm.xlu1 %2035, %v807_v58   ;;  %v2464_v11 = vpop.eup %2072  ;;  %v1010_v29 = vmul.f32 0.0, %v2461_v10 }
 0x1c6   : > { %v2467_v12 = vpop.eup %2074 }
 0x1c7   : > { %938 = vperm.xlu0 %2034, %v812_v60   ;;  %v2470_v13 = vpop.eup %2076 }
 0x1c9   : > { %923 = vperm.xlu1 %2035, %v809_v63  }
 0x1cb   : > { %1103 = vperm.xlu0 %2034, %v2443_v1  }
 0x1cd   : > { %933 = vperm.xlu1 %2035, %v811_v4  }
 0x1cf   : > { %1118 = vperm.xlu0 %2034, %v2449_v5  }
 0x1d1   : > { %1108 = vperm.xlu1 %2035, %v2452_v7  }
 0x1d3   : > { %1138 = vperm.xlu0 %2034, %v2455_v8  }
 0x1d5   : > { %1113 = vperm.xlu1 %2035, %v2458_v9  }
 0x1d7   : > { %1128 = vperm.xlu0 %2034, %v2461_v10  }
 0x1d9   : > { %1123 = vperm.xlu1 %2035, %v2464_v11  }
 0x1dd   : > { %1133 = vperm.xlu1 %2035, %v2467_v12  }
 0x1e1   : > { %1143 = vperm.xlu1 %2035, %v2470_v13  }
 0x21e   : > { %v874_v14 = vpop.permute.xlu1 %873 }
 0x21f   : > { %v943_v15 = vsub.f32 %v2319_v26, %v874_v14 }
 0x220   : > { %v864_v17 = vpop.permute.xlu0 %863 }
 0x221   : > { %v961_v18 = vmul.f32 1.442695, %v943_v15  ;;  %v941_v19 = vsub.f32 %v2321_v28, %v864_v17 }
 0x222   : > { %v879_v20 = vpop.permute.xlu1 %878 }
 0x223   : > { %2078 = vpow2.f32 %v961_v18  ;;  %v957_v22 = vmul.f32 1.442695, %v941_v19  ;;  %v944_v23 = vsub.f32 %v2324_v30, %v879_v20 }
 0x225   : > { %2080 = vpow2.f32 %v957_v22  ;;  %v963_v25 = vmul.f32 1.442695, %v944_v23 }
 0x226   : > { %v869_v31 = vpop.permute.xlu1 %868 }
 0x227   : > { %v942_v33 = vsub.f32 %v2327_v32, %v869_v31  ;;  %2082 = vpow2.f32 %v963_v25 }
 0x229   : > { %v959_v36 = vmul.f32 1.442695, %v942_v33 }
 0x22b   : > { %2084 = vpow2.f32 %v959_v36 }
 0x22c   : > { %v894_v38 = vpop.permute.xlu1 %893 }
 0x22d   : > { %v947_v26 = vsub.f32 %v2336_v40, %v894_v38 }
 0x22f   : > { %v969_v39 = vmul.f32 1.442695, %v947_v26 }
 0x230   : > { %v2079_v41 = vpop.eup %2078  ;;  %v884_v45 = vpop.permute.xlu1 %883 }
 0x231   : > { %2086 = vpow2.f32 %v969_v39  ;;  %v945_v28 = vsub.f32 %v2331_v35, %v884_v45  ;;  %1025 = vadd.xlane.f32.xlu0 %v2079_v41 }
 0x232   : > { %v2081_v48 = vpop.eup %2080 }
 0x233   : > { %v965_v30 = vmul.f32 1.442695, %v945_v28  ;;  %1021 = vadd.xlane.f32.xlu1 %v2081_v48 }
 0x234   : > { %v889_v53 = vpop.permute.xlu1 %888  ;;  %v2083_v56 = vpop.eup %2082 }
 0x235   : > { %2088 = vpow2.f32 %v965_v30  ;;  %v946_v32 = vsub.f32 %v2339_v42, %v889_v53  ;;  %v1198_v14 = vpack.c.bf16 %v2083_v56, %v2079_v41 }
 0x236   : > { %v909_v59 = vpop.permute.xlu0 %908 }
 0x237   : > { %v967_v61 = vmul.f32 1.442695, %v946_v32  ;;  %1027 = vadd.xlane.f32.xlu1 %v2083_v56  ;;  %v950_v40 = vsub.f32 %v2351_v50, %v909_v59 }
 0x238   : > { %v2085_v62 = vpop.eup %2084  ;;  %v899_v2 = vpop.permute.xlu1 %898 }
 0x239   : > { %2090 = vpow2.f32 %v967_v61  ;;  %v948_v3 = vsub.f32 %v2333_v37, %v899_v2  ;;  %1023 = vadd.xlane.f32.xlu0 %v2085_v62  ;;  %v1197_v35 = vpack.c.bf16 %v2085_v62, %v2081_v48  ;;  %v975_v17 = vmul.f32 1.442695, %v950_v40 }
 0x23a   : > { %v919_v6 = vpop.permute.xlu0 %918 }
 0x23b   : > { %v971_v15 = vmul.f32 1.442695, %v948_v3  ;;  %1968 = vmatprep.mubr.bf16.mxu1 %v1197_v35  ;;  %v952_v42 = vsub.f32 %v2347_v47, %v919_v6  ;;  %v823_v6 = vsub.f32 -1e+30, %v807_v58 }
 0x23c   : > { %v904_v18 = vpop.permute.xlu1 %903  ;;  %1969 = vmatmul.mubr.bf16.vlgmr.msra.gmra.mxu1 %v1198_v14 }
 0x23d   : > { %2092 = vpow2.f32 %v971_v15  ;;  %v949_v19 = vsub.f32 %v2342_v44, %v904_v18  ;;  %v979_v37 = vmul.f32 1.442695, %v952_v42  ;;  %v849_v15 = vmul.f32 1.442695, %v823_v6 }
 0x23e   : > { %v2087_v20 = vpop.eup %2086  ;;  %v929_v50 = vpop.permute.xlu0 %928  ;;  %2094 = vpow2.f32 %v975_v17  ;;  %v825_v17 = vsub.f32 -1e+30, %v809_v63  ;;  %v822_v42 = vsub.f32 -1e+30, %v806_v24 }
 0x23f   : > { %v973_v22 = vmul.f32 1.442695, %v949_v19  ;;  %1033 = vadd.xlane.f32.xlu0 %v2087_v20  ;;  %v954_v23 = vsub.f32 %v2363_v57, %v929_v50  ;;  %v824_v19 = vsub.f32 -1e+30, %v808_v34 }
 0x240   : > { %v914_v25 = vpop.permute.xlu1 %913  ;;  %v853_v18 = vmul.f32 1.442695, %v825_v17  ;;  %v847_v27 = vmul.f32 1.442695, %v822_v42 }
 0x241   : > { %2096 = vpow2.f32 %v973_v22  ;;  %v951_v31 = vsub.f32 %v2345_v46, %v914_v25  ;;  %v983_v38 = vmul.f32 1.442695, %v954_v23  ;;  %v851_v58 = vmul.f32 1.442695, %v824_v19 }
 0x242   : > { %v2089_v33 = vpop.eup %2088  ;;  %v939_v36 = vpop.permute.xlu0 %938  ;;  %2098 = vpow2.f32 %v979_v37 }
 0x243   : > { %v977_v47 = vmul.f32 1.442695, %v951_v31  ;;  %1029 = vadd.xlane.f32.xlu0 %v2089_v33  ;;  %v956_v44 = vsub.f32 %v2359_v55, %v939_v36  ;;  %v1007_v36 = vmul.f32 0.0, %v2458_v9  ;;  %v1011_v9 = vmul.f32 0.0, %v2467_v12 }
 0x244   : > { %v924_v26 = vpop.permute.xlu1 %923  ;;  %v1012_v12 = vmul.f32 0.0, %v2455_v8  ;;  %v1013_v8 = vmul.f32 0.0, %v2470_v13 }
 0x245   : > { %2100 = vpow2.f32 %v977_v47  ;;  %v953_v39 = vsub.f32 %v2354_v52, %v924_v26  ;;  %v987_v57 = vmul.f32 1.442695, %v956_v44  ;;  %v1005_v26 = vmul.f32 0.0, %v2443_v1 }
 0x246   : > { %v2091_v41 = vpop.eup %2090  ;;  %2102 = vpow2.f32 %v983_v38  ;;  %v2507_v43 = vpop.permute.xlu0 %1103  ;;  %v828_v1 = vsub.f32 -1e+30, %v812_v60 }
 0x247   : > { %v981_v45 = vmul.f32 1.442695, %v953_v39  ;;  %v1199_v28 = vpack.c.bf16 %v2091_v41, %v2089_v33 }
 0x248   : > { %v934_v48 = vpop.permute.xlu1 %933 }
 0x249   : > { %2104 = vpow2.f32 %v981_v45  ;;  %v955_v46 = vsub.f32 %v2357_v54, %v934_v48  ;;  %1972 = vmatprep.mubr.bf16.mxu1 %v1199_v28  ;;  %v1006_v48 = vmul.f32 0.0, %v2452_v7 }
 0x24a   : > { %v2093_v30 = vpop.eup %2092  ;;  %2106 = vpow2.f32 %v987_v57  ;;  %v2511_v22 = vpop.permute.xlu0 %1118 }
 0x24b   : > { %v985_v53 = vmul.f32 1.442695, %v955_v46  ;;  %1035 = vadd.xlane.f32.xlu1 %v2093_v30  ;;  %v1200_v32 = vpack.c.bf16 %v2093_v30, %v2087_v20  ;;  %v2095_v55 = vpop.eup %2094  ;;  %v826_v20 = vsub.f32 -1e+30, %v810_v49 }
 0x24c   : > { %v2505_v50 = vpop.permute.xlu1 %1108 }
 0x24d   : > { %2108 = vpow2.f32 %v985_v53  ;;  %1973 = vmatmul.mubr.bf16.gmra.mxu1 %v1200_v32  ;;  %v855_v51 = vmul.f32 1.442695, %v826_v20  ;;  %v827_v32 = vsub.f32 -1e+30, %v811_v4 }
 0x24e   : > { %v2097_v56 = vpop.eup %2096  ;;  %2110 = vpow2.f32 %v849_v15  ;;  %v2515_v23 = vpop.permute.xlu0 %1138 }
 0x24f   : > { %1031 = vadd.xlane.f32.xlu1 %v2091_v41  ;;  %v1201_v52 = vpack.c.bf16 %v2095_v55, %v2097_v56  ;;  %v2099_v59 = vpop.eup %2098  ;;  %2112 = vpow2.f32 %v853_v18  ;;  %v1008_v41 = vmul.f32 0.0, %v2449_v5  ;;  %v1009_v5 = vmul.f32 0.0, %v2464_v11 }
 0x250   : > { %2114 = vpow2.f32 %v847_v27  ;;  %v2509_v49 = vpop.permute.xlu1 %1113  ;;  %v857_v7 = vmul.f32 1.442695, %v827_v32 }
 0x251   : > { %1976 = vmatprep.mubr.bf16.mxu1 %v1201_v52  ;;  %2116 = vpow2.f32 %v851_v58  ;;  %v859_v52 = vmul.f32 1.442695, %v828_v1 }
 0x252   : > { %v2101_v61 = vpop.eup %2100  ;;  %2118 = vpow2.f32 %v855_v51  ;;  %v2519_v31 = vpop.permute.xlu0 %1128 }
 0x253   : > { %1041 = vadd.xlane.f32.xlu0 %v2101_v61  ;;  %1043 = vadd.xlane.f32.xlu1 %v2099_v59  ;;  %v1202_v62 = vpack.c.bf16 %v2099_v59, %v2101_v61  ;;  %v2103_v40 = vpop.eup %2102  ;;  %2120 = vpow2.f32 %v859_v52 }
 0x254   : > { %v2513_v37 = vpop.permute.xlu1 %1123  ;;  %2122 = vpow2.f32 %v857_v7 }
 0x255   : > { %1977 = vmatmul.mubr.bf16.gmra.mxu1 %v1202_v62 }
 0x256   : > { %v2105_v54 = vpop.eup %2104 }
 0x257   : > { %1037 = vadd.xlane.f32.xlu0 %v2097_v56  ;;  %1039 = vadd.xlane.f32.xlu1 %v2095_v55  ;;  %v1203_v2 = vpack.c.bf16 %v2103_v40, %v2105_v54  ;;  %v2107_v3 = vpop.eup %2106 }
 0x258   : > { %v2517_v25 = vpop.permute.xlu1 %1133 }
 0x259   : > { %1980 = vmatprep.mubr.bf16.mxu1 %v1203_v2 }
 0x25a   : > { %v2109_v35 = vpop.eup %2108 }
 0x25b   : > { %1049 = vadd.xlane.f32.xlu0 %v2109_v35  ;;  %1051 = vadd.xlane.f32.xlu1 %v2107_v3  ;;  %v1204_v14 = vpack.c.bf16 %v2107_v3, %v2109_v35  ;;  %v2111_v63 = vpop.eup %2110 }
 0x25c   : > { %v2499_v21 = vpop.eup %2112  ;;  %v2521_v33 = vpop.permute.xlu1 %1143  ;;  %v1015_v62 = vmul.f32 0.0, %v2111_v63 }
 0x25d   : > { %1981 = vmatmul.mubr.bf16.gmra.mxu1 %v1204_v14  ;;  %v2115_v24 = vpop.eup %2114 }
 0x25e   : > { %v2117_v16 = vpop.eup %2116  ;;  %v1014_v35 = vmul.f32 0.0, %v2115_v24 }
 0x25f   : > { %1045 = vadd.xlane.f32.xlu0 %v2105_v54  ;;  %1047 = vadd.xlane.f32.xlu1 %v2103_v40  ;;  %v2502_v34 = vpop.eup %2118  ;;  %v1016_v4 = vmul.f32 0.0, %v2117_v16 }
 0x260   : > { %v2121_v3 = vpop.eup %2120  ;;  %v1018_v51 = vmul.f32 0.0, %v2502_v34 }
 0x261   : > { %v2123_v6 = vpop.eup %2122  ;;  %v1020_v42 = vmul.f32 0.0, %v2121_v3 }
 0x262   : > { %v1019_v18 = vmul.f32 0.0, %v2123_v6 }
 0x270   : > { %1153 = vperm.xlu1 %2035, %v2111_v63   ;;  %v1017_v63 = vmul.f32 0.0, %v2499_v21 }
 0x274   : > { %1163 = vperm.xlu1 %2035, %v2499_v21  }
 0x275   : > { %1148 = vperm.xlu0 %2034, %v2115_v24  }
 0x279   : > { %1158 = vperm.xlu0 %2034, %v2117_v16  }
 0x27d   : > { %1168 = vperm.xlu0 %2034, %v2502_v34   ;;  %v1086_v34 = vld [vmem:[#allocation4 + $0x8] sm:$0xff] }
 0x2ba   : > { %v1026_v47 = vpop.xlane.xlu0 %1025 }
 0x2bb   : > { %v1055_v38 = vadd.f32 %v1026_v47, %v1007_v36  ;;  %v1087_v47 = vld [vmem:[#allocation4 + $0x10] sm:$0xff] }
 0x2bc   : > { %v1022_v44 = vpop.xlane.xlu1 %1021 }
 0x2bd   : > { %1445 = vperm.xlu1 %2035, %v1055_v38   ;;  %v1053_v39 = vadd.f32 %v1022_v44, %v1005_v26  ;;  %v1085_v38 = vld [vmem:[#allocation4] sm:$0xff]  ;;  %v1183_v44 = vmul.f32 %v2509_v49, %v1087_v47  ;;  %v1088_v26 = vld [vmem:[#allocation4 + $0x18] sm:$0xff] }
 0x2be   : > { %v1184_v21 = vmul.f32 %v2511_v22, %v1088_v26  ;;  %v1092_v22 = vld [vmem:[#allocation4 + $0x38] sm:$0xff] }
 0x2bf   : > { %v1188_v7 = vmul.f32 %v2515_v23, %v1092_v22 }
 0x2c0   : > { %v1028_v45 = vpop.xlane.xlu1 %1027 }
 0x2c1   : > { %v1056_v28 = vadd.f32 %v1028_v45, %v1008_v41  ;;  %1435 = vperm.xlu1 %2035, %v1053_v39   ;;  %v1181_v41 = vmul.f32 %v2507_v43, %v1085_v38  ;;  %v1091_v43 = vld [vmem:[#allocation4 + $0x30] sm:$0xff] }
 0x2c2   : > { %v1024_v57 = vpop.xlane.xlu0 %1023  ;;  %v1187_v1 = vmul.f32 %v2517_v25, %v1091_v43 }
 0x2c3   : > { %1450 = vperm.xlu0 %2034, %v1056_v28   ;;  %v1054_v46 = vadd.f32 %v1024_v57, %v1006_v48 }
 0x2c7   : > { %1440 = vperm.xlu0 %2034, %v1054_v46   ;;  %v1182_v46 = vmul.f32 %v2505_v50, %v1086_v34 }
 0x2c8   : > { %v1034_v30 = vpop.xlane.xlu0 %1033 }
 0x2c9   : > { %v1059_v53 = vadd.f32 %v1034_v30, %v1011_v9 }
 0x2cb   : > { %1465 = vperm.xlu1 %2035, %v1059_v53   ;;  %v1089_v53 = vld [vmem:[#allocation4 + $0x20] sm:$0xff] }
 0x2cc   : > { %v1030_v55 = vpop.xlane.xlu0 %1029 }
 0x2cd   : > { %v1057_v56 = vadd.f32 %v1030_v55, %v1009_v5  ;;  %v1185_v5 = vmul.f32 %v2513_v37, %v1089_v53 }
 0x2cf   : > { %1455 = vperm.xlu1 %2035, %v1057_v56   ;;  %v1090_v56 = vld [vmem:[#allocation4 + $0x28] sm:$0xff] }
 0x2d4   : > { %v1036_v59 = vpop.xlane.xlu1 %1035 }
 0x2d5   : > { %v1060_v61 = vadd.f32 %v1036_v59, %v1012_v12  ;;  %v1095_v59 = vld [vmem:[#allocation4 + $0x50] sm:$0xff] }
 0x2d7   : > { %1470 = vperm.xlu0 %2034, %v1060_v61  }
 0x2d8   : > { %v1032_v60 = vpop.xlane.xlu1 %1031 }
 0x2d9   : > { %v1058_v0 = vadd.f32 %v1032_v60, %v1010_v29  ;;  %v1186_v60 = vmul.f32 %v2519_v31, %v1090_v56 }
 0x2db   : > { %1460 = vperm.xlu0 %2034, %v1058_v0   ;;  %v1093_v0 = vld [vmem:[#allocation4 + $0x40] sm:$0xff] }
 0x2dc   : > { %v1044_v11 = vpop.xlane.xlu1 %1043  ;;  %v1042_v40 = vpop.xlane.xlu0 %1041 }
 0x2dd   : > { %v1064_v54 = vadd.f32 %v1044_v11, %v1016_v4  ;;  %v1063_v2 = vadd.f32 %v1042_v40, %v1015_v62  ;;  %v1096_v11 = vld [vmem:[#allocation4 + $0x58] sm:$0xff] }
 0x2df   : > { %1490 = vperm.xlu0 %2034, %v1064_v54   ;;  %1485 = vperm.xlu1 %2035, %v1063_v2   ;;  %v1189_v54 = vmul.f32 %v2521_v33, %v1093_v0 }
 0x2e0   : > { %v1040_v14 = vpop.xlane.xlu1 %1039  ;;  %v1038_v15 = vpop.xlane.xlu0 %1037 }
 0x2e1   : > { %v1062_v17 = vadd.f32 %v1040_v14, %v1014_v35  ;;  %v1061_v10 = vadd.f32 %v1038_v15, %v1013_v8 }
 0x2e3   : > { %1480 = vperm.xlu0 %2034, %v1062_v17   ;;  %1475 = vperm.xlu1 %2035, %v1061_v10   ;;  %v1097_v17 = vld [vmem:[#allocation4 + $0x60] sm:$0xff] }
 0x2e4   : > { %v1052_v19 = vpop.xlane.xlu1 %1051  ;;  %v1050_v27 = vpop.xlane.xlu0 %1049 }
 0x2e5   : > { %v1068_v58 = vadd.f32 %v1052_v19, %v1020_v42  ;;  %v1067_v20 = vadd.f32 %v1050_v27, %v1019_v18  ;;  %v1098_v27 = vld [vmem:[#allocation4 + $0x68] sm:$0xff] }
 0x2e7   : > { %1510 = vperm.xlu0 %2034, %v1068_v58   ;;  %1505 = vperm.xlu1 %2035, %v1067_v20  }
 0x2e8   : > { %v1048_v13 = vpop.xlane.xlu1 %1047  ;;  %v1046_v24 = vpop.xlane.xlu0 %1045 }
 0x2e9   : > { %v1066_v16 = vadd.f32 %v1048_v13, %v1018_v51  ;;  %v1065_v36 = vadd.f32 %v1046_v24, %v1017_v63 }
 0x2eb   : > { %1500 = vperm.xlu0 %2034, %v1066_v16   ;;  %1495 = vperm.xlu1 %2035, %v1065_v36  }
 0x2ec   : > { %v1154_v61 = vpop.permute.xlu1 %1153 }
 0x2ed   : > { %v1191_v37 = vmul.f32 %v1154_v61, %v1095_v59 }
 0x2ef   : > { %1178 = vperm.xlu0 %2034, %v2121_v3   ;;  %1173 = vperm.xlu1 %2035, %v2123_v6   ;;  %v1094_v3 = vld [vmem:[#allocation4 + $0x48] sm:$0xff] }
 0x2f0   : > { %v1149_v50 = vpop.permute.xlu0 %1148  ;;  %v1164_v10 = vpop.permute.xlu1 %1163 }
 0x2f1   : > { %v1190_v14 = vmul.f32 %v1149_v50, %v1094_v3  ;;  %v1193_v19 = vmul.f32 %v1164_v10, %v1097_v17  ;;  %v1099_v17 = vld [vmem:[#allocation4 + $0x70] sm:$0xff]  ;;  %v1100_v10 = vld [vmem:[#allocation4 + $0x78] sm:$0xff] }
 0x2f4   : > { %v1159_v40 = vpop.permute.xlu0 %1158 }
 0x2f5   : > { %v1192_v31 = vmul.f32 %v1159_v40, %v1096_v11 }
 0x2f8   : > { %v1169_v58 = vpop.permute.xlu0 %1168 }
 0x2f9   : > { %v1194_v13 = vmul.f32 %v1169_v58, %v1098_v27 }
 0x2fc   : > { %v1970_v39 = vpop.f32.mrf.mxu1 }
 0x2fd   : > { %v1352_v45 = vadd.f32 %v1970_v39, %v1183_v44 }
 0x2fe   : > { %v1287_v28 = vpop.f32.mrf.mxu1 }
 0x2ff   : > { %1368 = vst.msk [vmem:[#allocation4 + $0x10] sm:$0xff] %vm451_vm0, %v1352_v45  ;;  %v1350_v57 = vadd.f32 %v1287_v28, %v1181_v41 }
 0x300   : > { %v1971_v48 = vpop.f32.mrf.mxu1 }
 0x301   : > { %1366 = vst.msk [vmem:[#allocation4] sm:$0xff] %vm451_vm0, %v1350_v57  ;;  %v1353_v9 = vadd.f32 %v1971_v48, %v1184_v21 }
 0x302   : > { %v1290_v30 = vpop.f32.mrf.mxu1 }
 0x303   : > { %1369 = vst.msk [vmem:[#allocation4 + $0x18] sm:$0xff] %vm451_vm0, %v1353_v9  ;;  %v1351_v49 = vadd.f32 %v1290_v30, %v1182_v46 }
 0x305   : > { %1367 = vst.msk [vmem:[#allocation4 + $0x8] sm:$0xff] %vm451_vm0, %v1351_v49 }
 0x306   : > { %v1403_v39 = vld [vmem:[#allocation4 + $0x10] sm:$0xff] }
 0x308   : > { %v1401_v21 = vld [vmem:[#allocation4] sm:$0xff] }
 0x30a   : > { %v1404_v9 = vld [vmem:[#allocation4 + $0x18] sm:$0xff] }
 0x30d   : > { %v1974_v32 = vpop.f32.mrf.mxu1 }
 0x30e   : > { %v1356_v55 = vadd.f32 %v1974_v32, %v1187_v1  ;;  %v1402_v1 = vld [vmem:[#allocation4 + $0x8] sm:$0xff] }
 0x30f   : > { %v1303_v52 = vpop.f32.mrf.mxu1 }
 0x310   : > { %1372 = vst.msk [vmem:[#allocation4 + $0x30] sm:$0xff] %vm451_vm0, %v1356_v55  ;;  %v1354_v12 = vadd.f32 %v1303_v52, %v1185_v5 }
 0x311   : > { %v1975_v29 = vpop.f32.mrf.mxu1 }
 0x312   : > { %1370 = vst.msk [vmem:[#allocation4 + $0x20] sm:$0xff] %vm451_vm0, %v1354_v12  ;;  %v1357_v25 = vadd.f32 %v1975_v29, %v1188_v7 }
 0x313   : > { %v1306_v4 = vpop.f32.mrf.mxu1 }
 0x314   : > { %1373 = vst.msk [vmem:[#allocation4 + $0x38] sm:$0xff] %vm451_vm0, %v1357_v25  ;;  %v1355_v62 = vadd.f32 %v1306_v4, %v1186_v60 }
 0x315   : > { %v1978_v23 = vpop.f32.mrf.mxu1 }
 0x316   : > { %1371 = vst.msk [vmem:[#allocation4 + $0x28] sm:$0xff] %vm451_vm0, %v1355_v62  ;;  %v1360_v2 = vadd.f32 %v1978_v23, %v1191_v37 }
 0x317   : > { %v1319_v35 = vpop.f32.mrf.mxu1  ;;  %v1407_v56 = vld [vmem:[#allocation4 + $0x30] sm:$0xff] }
 0x318   : > { %1376 = vst.msk [vmem:[#allocation4 + $0x50] sm:$0xff] %vm451_vm0, %v1360_v2  ;;  %v1358_v8 = vadd.f32 %v1319_v35, %v1189_v54 }
 0x319   : > { %v1979_v6 = vpop.f32.mrf.mxu1  ;;  %v1405_v59 = vld [vmem:[#allocation4 + $0x20] sm:$0xff] }
 0x31a   : > { %1374 = vst.msk [vmem:[#allocation4 + $0x40] sm:$0xff] %vm451_vm0, %v1358_v8  ;;  %v1361_v15 = vadd.f32 %v1979_v6, %v1192_v31 }
 0x31b   : > { %v1322_v42 = vpop.f32.mrf.mxu1  ;;  %v1408_v62 = vld [vmem:[#allocation4 + $0x38] sm:$0xff] }
 0x31c   : > { %1377 = vst.msk [vmem:[#allocation4 + $0x58] sm:$0xff] %vm451_vm0, %v1361_v15  ;;  %v1359_v33 = vadd.f32 %v1322_v42, %v1190_v14 }
 0x31d   : > { %v2558_v18 = vpop.f32.mrf.mxu1  ;;  %v1406_v3 = vld [vmem:[#allocation4 + $0x28] sm:$0xff] }
 0x31e   : > { %1375 = vst.msk [vmem:[#allocation4 + $0x48] sm:$0xff] %vm451_vm0, %v1359_v33 }
 0x31f   : > { %v1335_v20 = vpop.f32.mrf.mxu1  ;;  %v1411_v15 = vld [vmem:[#allocation4 + $0x50] sm:$0xff] }
 0x320   : > { %v1362_v51 = vadd.f32 %v1335_v20, %v1193_v19 }
 0x321   : > { %v2561_v63 = vpop.f32.mrf.mxu1 }
 0x322   : > { %1378 = vst.msk [vmem:[#allocation4 + $0x60] sm:$0xff] %vm451_vm0, %v1362_v51 }
 0x323   : > { %v1338_v24 = vpop.f32.mrf.mxu1  ;;  %v1412_v19 = vld [vmem:[#allocation4 + $0x58] sm:$0xff] }
 0x324   : > { %v1363_v16 = vadd.f32 %v1338_v24, %v1194_v13 }
 0x326   : > { %1379 = vst.msk [vmem:[#allocation4 + $0x68] sm:$0xff] %vm451_vm0, %v1363_v16 }
 0x338   : > { %v1446_v36 = vpop.permute.xlu1 %1445 }
 0x339   : > { %2124 = vrcp.f32 %v1446_v36 }
 0x33c   : > { %v1436_v47 = vpop.permute.xlu1 %1435 }
 0x33d   : > { %2126 = vrcp.f32 %v1436_v47  ;;  %v1409_v47 = vld [vmem:[#allocation4 + $0x40] sm:$0xff] }
 0x33e   : > { %v1451_v38 = vpop.permute.xlu0 %1450 }
 0x33f   : > { %2128 = vrcp.f32 %v1451_v38 }
 0x342   : > { %v1441_v44 = vpop.permute.xlu0 %1440 }
 0x343   : > { %2130 = vrcp.f32 %v1441_v44 }
 0x346   : > { %v2125_v26 = vpop.eup %2124  ;;  %v1466_v41 = vpop.permute.xlu1 %1465 }
 0x347   : > { %v1518_v45 = vmul.f32 %v2125_v26, %v1403_v39  ;;  %2132 = vrcp.f32 %v1466_v41  ;;  %v1410_v26 = vld [vmem:[#allocation4 + $0x48] sm:$0xff] }
 0x349   : > { %v1874_v34 = vpack.c.bf16 %v1518_v45, %v1518_v45 }
 0x34a   : > { %v2127_v28 = vpop.eup %2126  ;;  %v1456_v57 = vpop.permute.xlu1 %1455 }
 0x34b   : > { %1612 = vst.msk [vmem:[%s2571_s7 + $0x8] sm:$0xf] %vm1609_vm1, %v1874_v34  ;;  %v1514_v48 = vmul.f32 %v2127_v28, %v1401_v21  ;;  %2134 = vrcp.f32 %v1456_v57 }
 0x34c   : > { %v2129_v46 = vpop.eup %2128 }
 0x34d   : > { %v1872_v30 = vpack.c.bf16 %v1514_v48, %v1514_v48  ;;  %v1520_v49 = vmul.f32 %v2129_v46, %v1404_v9  ;;  %v1414_v46 = vld [vmem:[#allocation4 + $0x68] sm:$0xff] }
 0x34f   : > { %1610 = vst.msk [vmem:[%s2571_s7] sm:$0xf] %vm1609_vm1, %v1872_v30  ;;  %v1875_v43 = vpack.c.bf16 %v1520_v49, %v1520_v49 }
 0x350   : > { %v2131_v53 = vpop.eup %2130 }
 0x351   : > { %1613 = vst.msk [vmem:[%s2571_s7 + $0xc] sm:$0xf] %vm1609_vm1, %v1875_v43  ;;  %v1516_v22 = vmul.f32 %v2131_v53, %v1402_v1 }
 0x352   : > { %v1471_v32 = vpop.permute.xlu0 %1470 }
 0x353   : > { %v1873_v5 = vpack.c.bf16 %v1516_v22, %v1516_v22  ;;  %2136 = vrcp.f32 %v1471_v32 }
 0x354   : > { %v2133_v55 = vpop.eup %2132 }
 0x355   : > { %1611 = vst.msk [vmem:[%s2571_s7 + $0x4] sm:$0xf] %vm1609_vm1, %v1873_v5  ;;  %v1526_v50 = vmul.f32 %v2133_v55, %v1407_v56 }
 0x356   : > { %v1461_v52 = vpop.permute.xlu0 %1460 }
 0x357   : > { %v1878_v7 = vpack.c.bf16 %v1526_v50, %v1526_v50  ;;  %2138 = vrcp.f32 %v1461_v52 }
 0x358   : > { %v2135_v12 = vpop.eup %2134 }
 0x359   : > { %1616 = vst.msk [vmem:[%s2571_s7 + $0x18] sm:$0xf] %vm1609_vm1, %v1878_v7  ;;  %v1522_v61 = vmul.f32 %v2135_v12, %v1405_v59 }
 0x35a   : > { %v1486_v29 = vpop.permute.xlu1 %1485  ;;  %v1491_v60 = vpop.permute.xlu0 %1490 }
 0x35b   : > { %v1876_v25 = vpack.c.bf16 %v1522_v61, %v1522_v61  ;;  %2140 = vrcp.f32 %v1486_v29 }
 0x35c   : > { %2142 = vrcp.f32 %v1491_v60 }
 0x35d   : > { %1614 = vst.msk [vmem:[%s2571_s7 + $0x10] sm:$0xf] %vm1609_vm1, %v1876_v25 }
 0x35e   : > { %v1476_v0 = vpop.permute.xlu1 %1475  ;;  %v1481_v4 = vpop.permute.xlu0 %1480 }
 0x35f   : > { %2144 = vrcp.f32 %v1476_v0 }
 0x360   : > { %v2137_v37 = vpop.eup %2136  ;;  %2146 = vrcp.f32 %v1481_v4 }
 0x361   : > { %v1528_v11 = vmul.f32 %v2137_v37, %v1408_v62 }
 0x362   : > { %v1506_v40 = vpop.permute.xlu1 %1505  ;;  %v1511_v23 = vpop.permute.xlu0 %1510 }
 0x363   : > { %v1879_v54 = vpack.c.bf16 %v1528_v11, %v1528_v11  ;;  %2148 = vrcp.f32 %v1506_v40 }
 0x364   : > { %v2139_v2 = vpop.eup %2138 }
 0x365   : > { %1617 = vst.msk [vmem:[%s2571_s7 + $0x1c] sm:$0xf] %vm1609_vm1, %v1879_v54  ;;  %v1524_v35 = vmul.f32 %v2139_v2, %v1406_v3 }
 0x366   : > { %v1496_v31 = vpop.permute.xlu1 %1495  ;;  %v1501_v8 = vpop.permute.xlu0 %1500 }
 0x367   : > { %v1877_v6 = vpack.c.bf16 %v1524_v35, %v1524_v35  ;;  %2150 = vrcp.f32 %v1496_v31 }
 0x368   : > { %v2141_v14 = vpop.eup %2140  ;;  %2152 = vrcp.f32 %v1501_v8 }
 0x369   : > { %v2143_v42 = vpop.eup %2142  ;;  %1615 = vst.msk [vmem:[%s2571_s7 + $0x14] sm:$0xf] %vm1609_vm1, %v1877_v6  ;;  %v1534_v33 = vmul.f32 %v2141_v14, %v1411_v15  ;;  %2154 = vrcp.f32 %v1511_v23 }
 0x36a   : > { %v1536_v27 = vmul.f32 %v2143_v42, %v1412_v19  ;;  %v1174_v58 = vpop.permute.xlu1 %1173  ;;  %v1179_v20 = vpop.permute.xlu0 %1178 }
 0x36b   : > { %v1882_v51 = vpack.c.bf16 %v1534_v33, %v1534_v33  ;;  %v1195_v13 = vmul.f32 %v1174_v58, %v1099_v17  ;;  %v1196_v24 = vmul.f32 %v1179_v20, %v1100_v10 }
 0x36c   : > { %v2145_v16 = vpop.eup %2144  ;;  %v1883_v36 = vpack.c.bf16 %v1536_v27, %v1536_v27 }
 0x36d   : > { %v2147_v38 = vpop.eup %2146  ;;  %1620 = vst.msk [vmem:[%s2571_s7 + $0x28] sm:$0xf] %vm1609_vm1, %v1882_v51  ;;  %v1530_v44 = vmul.f32 %v2145_v16, %v1409_v47  ;;  %v1364_v39 = vadd.f32 %v2558_v18, %v1195_v13  ;;  %v1365_v41 = vadd.f32 %v2561_v63, %v1196_v24  ;;  %v1413_v18 = vld [vmem:[#allocation4 + $0x60] sm:$0xff] }
 0x36e   : > { %1621 = vst.msk [vmem:[%s2571_s7 + $0x2c] sm:$0xf] %vm1609_vm1, %v1883_v36  ;;  %v1532_v45 = vmul.f32 %v2147_v38, %v1410_v26 }
 0x36f   : > { %v1880_v34 = vpack.c.bf16 %v1530_v44, %v1530_v44  ;;  %1380 = vst.msk [vmem:[#allocation4 + $0x70] sm:$0xff] %vm451_vm0, %v1364_v39  ;;  %1381 = vst.msk [vmem:[#allocation4 + $0x78] sm:$0xff] %vm451_vm0, %v1365_v41 }
 0x370   : > { %v1881_v28 = vpack.c.bf16 %v1532_v45, %v1532_v45  ;;  %v2149_v21 = vpop.eup %2148 }
 0x371   : > { %1618 = vst.msk [vmem:[%s2571_s7 + $0x20] sm:$0xf] %vm1609_vm1, %v1880_v34 }
 0x372   : > { %1619 = vst.msk [vmem:[%s2571_s7 + $0x24] sm:$0xf] %vm1609_vm1, %v1881_v28 }
 0x374   : > { %v2151_v57 = vpop.eup %2150 }
 0x375   : > { %v2153_v63 = vpop.eup %2152  ;;  %v1538_v48 = vmul.f32 %v2151_v57, %v1413_v18 }
 0x376   : > { %v2155_v9 = vpop.eup %2154  ;;  %v1540_v30 = vmul.f32 %v2153_v63, %v1414_v46  ;;  %v1415_v49 = vld [vmem:[#allocation4 + $0x70] sm:$0xff]  ;;  %v1416_v43 = vld [vmem:[#allocation4 + $0x78] sm:$0xff] }
 0x377   : > { %v1884_v53 = vpack.c.bf16 %v1538_v48, %v1538_v48  ;;  %v1542_v1 = vmul.f32 %v2149_v21, %v1415_v49  ;;  %v1544_v22 = vmul.f32 %v2155_v9, %v1416_v43 }
 0x378   : > { %v1885_v32 = vpack.c.bf16 %v1540_v30, %v1540_v30 }
 0x379   : > { %1622 = vst.msk [vmem:[%s2571_s7 + $0x30] sm:$0xf] %vm1609_vm1, %v1884_v53  ;;  %v1886_v5 = vpack.c.bf16 %v1542_v1, %v1542_v1  ;;  %v1887_v55 = vpack.c.bf16 %v1544_v22, %v1544_v22 }
 0x37a   : > { %1623 = vst.msk [vmem:[%s2571_s7 + $0x34] sm:$0xf] %vm1609_vm1, %v1885_v32 }
 0x37b   : > { %1624 = vst.msk [vmem:[%s2571_s7 + $0x38] sm:$0xf] %vm1609_vm1, %v1886_v5  ;;  %1625 = vst.msk [vmem:[%s2571_s7 + $0x3c] sm:$0xf] %vm1609_vm1, %v1887_v55 }
 0x37c PF: > { %s14_s19 = sadd.s32 1, %s2194_s19   ;;  %s2629_s15 = smov %s2186_s17 }
 0x37d   : > { %p11_p10 = scmp.ge.s32.totalorder %s14_s19, 6   ;;  %s2630_s16 = smov %s2190_s18 }
 0x37e   : > { %s2631_s17 = smov %s2634_s20  ;;  %s2632_s18 = smov %s2638_s21 }
 0x37f   :  { %13 = sbr.rel (!%p11_p10) target bundleno = 3 (0x3), region = 83 }

// kernel: jointbert_forward.19
= control target key start
LH: loop header
LB: loop body
LE: loop exit
PB: predicated region body
PF: predicated region fallthrough
CT: control target
= control target key end

     0   :  { %vm180_vm0 = vcmask 130048   ;;  %vm820_vm1 = vcmask 261120   ;;  %vm1444_vm2 = vcmask 257024   ;;  %s2735_s1 = inlined_call_operand.vmem [shape: bf16[2,16,32], index: 1, kind: input, shape index: {}]   ;;  %s2736_s0 = inlined_call_operand.vmem [shape: bf16[2,256,16], index: 0, kind: input, shape index: {}]   ;;  %s2737_s3 = inlined_call_operand.vmem [shape: bf16[256,32], index: 3, kind: input, shape index: {}]   ;;  %s2738_s2 = inlined_call_operand.vmem [shape: f32[1,32], index: 2, kind: input, shape index: {}]   ;;  %s2739_s4 = inlined_call_operand.vmem [shape: f32[1,32], index: 4, kind: input, shape index: {}]   ;;  %s2740_s5 = inlined_call_operand.vmem [shape: f32[1,32], index: 5, kind: input, shape index: {}]   ;;  %s2741_s6 = inlined_call_operand.vmem [shape: bf16[256,32], index: 6, kind: output, shape index: {}]  }
   0x1   :  { %v1829_v0 = vld [vmem:[%s2735_s1 + $0x8] sm:$0xff]   ;;  %v1830_v1 = vld [vmem:[%s2735_s1] sm:$0xff]   ;;  %v1835_v6 = vld [vmem:[%s2736_s0 + $0x90] sm:$0xff]  }
   0x2   :  { %1761 = vmatprep.subr.bf16.mxu0 %v1829_v0  ;;  %v1831_v2 = vld [vmem:[%s2736_s0 + $0x80] sm:$0xff]   ;;  %1795 = vmatprep.subr.bf16.mxu1 %v1830_v1  ;;  %v1833_v4 = vld [vmem:[%s2736_s0 + $0x88] sm:$0xff]   ;;  %v1836_v7 = vld [vmem:[%s2736_s0 + $0x10] sm:$0xff]  }
   0x3   :  { %1762 = vmatpush3.bf16.msra.mxu0 %v1829_v0  ;;  %v1832_v3 = vld [vmem:[%s2736_s0] sm:$0xff]   ;;  %1796 = vmatpush3.bf16.msra.mxu1 %v1830_v1  ;;  %v1834_v5 = vld [vmem:[%s2736_s0 + $0x8] sm:$0xff]   ;;  %v1837_v8 = vld [vmem:[%s2736_s0 + $0x98] sm:$0xff]  }
   0x4   :  { %1763 = vmatprep.mubr.msk.bf16.mxu0 %vm180_vm0, %v1831_v2  ;;  %1797 = vmatprep.mubr.msk.bf16.mxu1 %vm180_vm0, %v1832_v3  ;;  %v1838_v9 = vld [vmem:[%s2736_s0 + $0x18] sm:$0xff]   ;;  %v1839_v10 = vld [vmem:[%s2736_s0 + $0xa0] sm:$0xff]   ;;  %v1841_v12 = vld [vmem:[%s2736_s0 + $0xa8] sm:$0xff]  }
   0x5   :  { %v1840_v11 = vld [vmem:[%s2736_s0 + $0x20] sm:$0xff]   ;;  %v1842_v13 = vld [vmem:[%s2736_s0 + $0x28] sm:$0xff]   ;;  %v1843_v14 = vld [vmem:[%s2736_s0 + $0xb0] sm:$0xff]  }
   0x6   :  { %1764 = vmatmul.mubr.msk.bf16.vlgmr.msra.gmra.mxu0 %vm180_vm0, %v1833_v4  ;;  %1798 = vmatmul.mubr.msk.bf16.vlgmr.msra.gmra.mxu1 %vm180_vm0, %v1834_v5  ;;  %v1844_v15 = vld [vmem:[%s2736_s0 + $0x30] sm:$0xff]   ;;  %v1845_v16 = vld [vmem:[%s2736_s0 + $0xb8] sm:$0xff]   ;;  %v1847_v18 = vld [vmem:[%s2736_s0 + $0xc0] sm:$0xff]  }
   0x7   :  { %1767 = vmatprep.mubr.msk.bf16.mxu0 %vm180_vm0, %v1835_v6  ;;  %1801 = vmatprep.mubr.msk.bf16.mxu1 %vm180_vm0, %v1836_v7  ;;  %v1846_v17 = vld [vmem:[%s2736_s0 + $0x38] sm:$0xff]   ;;  %v1848_v19 = vld [vmem:[%s2736_s0 + $0x40] sm:$0xff]   ;;  %v1849_v20 = vld [vmem:[%s2736_s0 + $0xc8] sm:$0xff]  }
   0x8   :  { %v1850_v21 = vld [vmem:[%s2736_s0 + $0x48] sm:$0xff]   ;;  %v1851_v22 = vld [vmem:[%s2736_s0 + $0xd0] sm:$0xff]   ;;  %v1853_v24 = vld [vmem:[%s2736_s0 + $0xd8] sm:$0xff]  }
   0x9   :  { %v1852_v23 = vld [vmem:[%s2736_s0 + $0x50] sm:$0xff]   ;;  %v1854_v25 = vld [vmem:[%s2736_s0 + $0x58] sm:$0xff]   ;;  %v1855_v26 = vld [vmem:[%s2736_s0 + $0xe0] sm:$0xff]  }
   0xa   :  { %v1856_v27 = vld [vmem:[%s2736_s0 + $0x60] sm:$0xff]   ;;  %v1857_v28 = vld [vmem:[%s2736_s0 + $0xe8] sm:$0xff]   ;;  %v1859_v30 = vld [vmem:[%s2736_s0 + $0xf0] sm:$0xff]  }
   0xb   :  { %v1858_v29 = vld [vmem:[%s2736_s0 + $0x68] sm:$0xff]   ;;  %v1860_v31 = vld [vmem:[%s2736_s0 + $0x70] sm:$0xff]   ;;  %v1861_v32 = vld [vmem:[%s2736_s0 + $0xf8] sm:$0xff]  }
   0xc   :  { %v1862_v33 = vld [vmem:[%s2736_s0 + $0x78] sm:$0xff]   ;;  %v1712_v34 = vld [vmem:[%s2737_s3 + $0x8] sm:$0xff]   ;;  %v2102_v37 = vld [vmem:[%s2738_s2] ss:$0 sm:$0xff] }
   0xd   :  { %v1649_v38 = vld [vmem:[%s2737_s3] sm:$0xff]   ;;  %v1654_v41 = vunpack.c.l.bf16 %v1712_v34  ;;  %v1655_v52 = vunpack.c.h.bf16 %v1712_v34  ;;  %v1714_v53 = vld [vmem:[%s2737_s3 + $0x18] sm:$0xff]   ;;  %v1713_v4 = vld [vmem:[%s2737_s3 + $0x10] sm:$0xff]  }
   0xe   :  { %1768 = vmatmul.mubr.msk.bf16.gmra.mxu0 %vm180_vm0, %v1837_v8  ;;  %1802 = vmatmul.mubr.msk.bf16.gmra.mxu1 %vm180_vm0, %v1838_v9  ;;  %v1650_v46 = vunpack.c.l.bf16 %v1649_v38  ;;  %v1651_v55 = vunpack.c.h.bf16 %v1649_v38  ;;  %v1662_v62 = vunpack.c.l.bf16 %v1714_v53 }
   0xf   :  { %1771 = vmatprep.mubr.msk.bf16.mxu0 %vm180_vm0, %v1839_v10  ;;  %1805 = vmatprep.mubr.msk.bf16.mxu1 %vm180_vm0, %v1840_v11 }
  0x16   :  { %1772 = vmatmul.mubr.msk.bf16.gmra.mxu0 %vm180_vm0, %v1841_v12  ;;  %1806 = vmatmul.mubr.msk.bf16.gmra.mxu1 %vm180_vm0, %v1842_v13  ;;  %v1663_v12 = vunpack.c.h.bf16 %v1714_v53  ;;  %v1658_v13 = vunpack.c.l.bf16 %v1713_v4 }
  0x17   :  { %1775 = vmatprep.mubr.msk.bf16.mxu0 %vm180_vm0, %v1843_v14  ;;  %1809 = vmatprep.mubr.msk.bf16.mxu1 %vm180_vm0, %v1844_v15 }
  0x1e   :  { %1776 = vmatmul.mubr.msk.bf16.gmra.mxu0 %vm180_vm0, %v1845_v16  ;;  %1810 = vmatmul.mubr.msk.bf16.gmra.mxu1 %vm180_vm0, %v1846_v17 }
  0x1f   :  { %1779 = vmatprep.mubr.msk.bf16.mxu0 %vm180_vm0, %v1847_v18  ;;  %1813 = vmatprep.mubr.msk.bf16.mxu1 %vm180_vm0, %v1848_v19  ;;  %v1716_v19 = vld [vmem:[%s2737_s3 + $0x28] sm:$0xff]  }
  0x26   :  { %1780 = vmatmul.mubr.msk.bf16.gmra.mxu0 %vm180_vm0, %v1849_v20  ;;  %1814 = vmatmul.mubr.msk.bf16.gmra.mxu1 %vm180_vm0, %v1850_v21 }
  0x27   :  { %1783 = vmatprep.mubr.msk.bf16.mxu0 %vm180_vm0, %v1851_v22  ;;  %1817 = vmatprep.mubr.msk.bf16.mxu1 %vm180_vm0, %v1852_v23 }
  0x2e   :  { %1784 = vmatmul.mubr.msk.bf16.gmra.mxu0 %vm180_vm0, %v1853_v24  ;;  %1818 = vmatmul.mubr.msk.bf16.gmra.mxu1 %vm180_vm0, %v1854_v25  ;;  %v1659_v24 = vunpack.c.h.bf16 %v1713_v4 }
  0x2f   :  { %1787 = vmatprep.mubr.msk.bf16.mxu0 %vm180_vm0, %v1855_v26  ;;  %1821 = vmatprep.mubr.msk.bf16.mxu1 %vm180_vm0, %v1856_v27  ;;  %v1670_v27 = vunpack.c.l.bf16 %v1716_v19 }
  0x36   :  { %1788 = vmatmul.mubr.msk.bf16.gmra.mxu0 %vm180_vm0, %v1857_v28  ;;  %1822 = vmatmul.mubr.msk.bf16.gmra.mxu1 %vm180_vm0, %v1858_v29 }
  0x37   :  { %1791 = vmatprep.mubr.msk.bf16.mxu0 %vm180_vm0, %v1859_v30  ;;  %1825 = vmatprep.mubr.msk.bf16.mxu1 %vm180_vm0, %v1860_v31 }
  0x3e   :  { %1792 = vmatmul.mubr.msk.bf16.gmra.mxu0 %vm180_vm0, %v1861_v32  ;;  %1826 = vmatmul.mubr.msk.bf16.gmra.mxu1 %vm180_vm0, %v1862_v33  ;;  %v1715_v33 = vld [vmem:[%s2737_s3 + $0x20] sm:$0xff]  }
  0xc6   :  { %v1765_v35 = vpop.f32.mrf.mxu0  ;;  %v1799_v36 = vpop.f32.mrf.mxu1 }
  0xc7   :  { %v567_v39 = vadd.f32 %v1799_v36, %v1765_v35 }
  0xc8   :  { %v263_v40 = vpop.f32.mrf.mxu0  ;;  %v558_v42 = vpop.f32.mrf.mxu1 }
  0xc9   :  { %v694_v43 = vadd.f32 %v2102_v37, %v567_v39  ;;  %v559_v44 = vadd.f32 %v558_v42, %v263_v40  ;;  %v1671_v42 = vunpack.c.h.bf16 %v1716_v19 }
  0xca   :  { %v1766_v45 = vpop.f32.mrf.mxu0  ;;  %v1800_v47 = vpop.f32.mrf.mxu1 }
  0xcb   :  { %v692_v48 = vadd.f32 %v2102_v37, %v559_v44  ;;  %v570_v49 = vadd.f32 %v1800_v47, %v1766_v45  ;;  %v2109_v51 = vadd.f32 %v1654_v41, %v694_v43  ;;  %v1666_v43 = vunpack.c.l.bf16 %v1715_v33 }
  0xcc   :  { %v266_v50 = vpop.f32.mrf.mxu0  ;;  %v561_v54 = vpop.f32.mrf.mxu1 }
  0xcd   :  { %v695_v56 = vadd.f32 %v2102_v37, %v570_v49  ;;  %v562_v57 = vadd.f32 %v561_v54, %v266_v50  ;;  %v827_v59 = vsel %vm820_vm1, %v2109_v51, 0.0  ;;  %v2117_v60 = vadd.f32 %v1650_v46, %v692_v48  ;;  %v1718_v49 = vld [vmem:[%s2737_s3 + $0x38] sm:$0xff]  }
  0xce   :  { %v1769_v58 = vpop.f32.mrf.mxu0  ;;  %828 = vadd.xlane.f32.xlu1 %v827_v59  ;;  %v1803_v61 = vpop.f32.mrf.mxu1  ;;  %v1678_v59 = vunpack.c.l.bf16 %v1718_v49 }
  0xcf   :  { %v693_v63 = vadd.f32 %v2102_v37, %v562_v57  ;;  %v583_v0 = vadd.f32 %v1803_v61, %v1769_v58  ;;  %v821_v2 = vsel %vm820_vm1, %v2117_v60, 0.0  ;;  %v2122_v3 = vadd.f32 %v1655_v52, %v695_v56 }
  0xd0   :  { %v279_v1 = vpop.f32.mrf.mxu0  ;;  %v574_v5 = vpop.f32.mrf.mxu1  ;;  %822 = vadd.xlane.f32.xlu0 %v821_v2  ;;  %v1667_v56 = vunpack.c.h.bf16 %v1715_v33  ;;  %v1717_v2 = vld [vmem:[%s2737_s3 + $0x30] sm:$0xff]  }
  0xd1   :  { %v698_v6 = vadd.f32 %v2102_v37, %v583_v0  ;;  %v575_v7 = vadd.f32 %v574_v5, %v279_v1  ;;  %v830_v9 = vsel %vm820_vm1, %v2122_v3, 0.0  ;;  %v2130_v10 = vadd.f32 %v1651_v55, %v693_v63 }
  0xd2   :  { %v1770_v8 = vpop.f32.mrf.mxu0  ;;  %831 = vadd.xlane.f32.xlu1 %v830_v9  ;;  %v1804_v11 = vpop.f32.mrf.mxu1 }
  0xd3   :  { %v696_v14 = vadd.f32 %v2102_v37, %v575_v7  ;;  %v586_v15 = vadd.f32 %v1804_v11, %v1770_v8  ;;  %v824_v17 = vsel %vm820_vm1, %v2130_v10, 0.0  ;;  %v2135_v18 = vadd.f32 %v1662_v62, %v698_v6 }
  0xd4   :  { %v282_v16 = vpop.f32.mrf.mxu0  ;;  %v577_v20 = vpop.f32.mrf.mxu1  ;;  %825 = vadd.xlane.f32.xlu0 %v824_v17 }
  0xd5   :  { %v699_v21 = vadd.f32 %v2102_v37, %v586_v15  ;;  %v578_v22 = vadd.f32 %v577_v20, %v282_v16  ;;  %v839_v26 = vsel %vm820_vm1, %v2135_v18, 0.0  ;;  %v2146_v32 = vadd.f32 %v1658_v13, %v696_v14  ;;  %v1720_v20 = vld [vmem:[%s2737_s3 + $0x48] sm:$0xff]  }
  0xd6   :  { %v1773_v23 = vpop.f32.mrf.mxu0  ;;  %v1807_v25 = vpop.f32.mrf.mxu1  ;;  %v1674_v13 = vunpack.c.l.bf16 %v1717_v2 }
  0xd7   :  { %v697_v28 = vadd.f32 %v2102_v37, %v578_v22  ;;  %v599_v29 = vadd.f32 %v1807_v25, %v1773_v23  ;;  %v2144_v31 = vadd.f32 %v1663_v12, %v699_v21  ;;  %v833_v47 = vsel %vm820_vm1, %v2146_v32, 0.0 }
  0xd8   :  { %v295_v30 = vpop.f32.mrf.mxu0  ;;  %v590_v34 = vpop.f32.mrf.mxu1  ;;  %840 = vadd.xlane.f32.xlu0 %v839_v26  ;;  %v1679_v12 = vunpack.c.h.bf16 %v1718_v49  ;;  %v1675_v26 = vunpack.c.h.bf16 %v1717_v2 }
  0xd9   :  { %v702_v35 = vadd.f32 %v2102_v37, %v599_v29  ;;  %v591_v36 = vadd.f32 %v590_v34, %v295_v30  ;;  %v842_v39 = vsel %vm820_vm1, %v2144_v31, 0.0  ;;  %v2154_v40 = vadd.f32 %v1659_v24, %v697_v28 }
  0xda   :  { %v1774_v38 = vpop.f32.mrf.mxu0  ;;  %843 = vadd.xlane.f32.xlu1 %v842_v39  ;;  %v1808_v41 = vpop.f32.mrf.mxu1  ;;  %v1686_v29 = vunpack.c.l.bf16 %v1720_v20 }
  0xdb   :  { %v700_v44 = vadd.f32 %v2102_v37, %v591_v36  ;;  %v602_v45 = vadd.f32 %v1808_v41, %v1774_v38  ;;  %v2159_v48 = vadd.f32 %v1670_v27, %v702_v35  ;;  %v836_v55 = vsel %vm820_vm1, %v2154_v40, 0.0  ;;  %v1719_v38 = vld [vmem:[%s2737_s3 + $0x40] sm:$0xff]  }
  0xdc   :  { %v298_v46 = vpop.f32.mrf.mxu0  ;;  %v593_v50 = vpop.f32.mrf.mxu1  ;;  %834 = vadd.xlane.f32.xlu0 %v833_v47  ;;  %v1687_v47 = vunpack.c.h.bf16 %v1720_v20  ;;  %v1682_v49 = vunpack.c.l.bf16 %v1719_v38 }
  0xdd   :  { %v703_v52 = vadd.f32 %v2102_v37, %v602_v45  ;;  %v594_v53 = vadd.f32 %v593_v50, %v298_v46  ;;  %v851_v58 = vsel %vm820_vm1, %v2159_v48, 0.0  ;;  %v2172_v1 = vadd.f32 %v1666_v43, %v700_v44 }
  0xde   :  { %v1777_v54 = vpop.f32.mrf.mxu0  ;;  %v1811_v57 = vpop.f32.mrf.mxu1  ;;  %837 = vadd.xlane.f32.xlu1 %v836_v55 }
  0xdf   :  { %v701_v61 = vadd.f32 %v2102_v37, %v594_v53  ;;  %v615_v62 = vadd.f32 %v1811_v57, %v1777_v54  ;;  %v2170_v0 = vadd.f32 %v1671_v42, %v703_v52  ;;  %v845_v17 = vsel %vm820_vm1, %v2172_v1, 0.0 }
  0xe0   :  { %v311_v63 = vpop.f32.mrf.mxu0  ;;  %v606_v4 = vpop.f32.mrf.mxu1  ;;  %852 = vadd.xlane.f32.xlu0 %v851_v58 }
  0xe1   :  { %v706_v5 = vadd.f32 %v2102_v37, %v615_v62  ;;  %v607_v6 = vadd.f32 %v606_v4, %v311_v63  ;;  %v854_v8 = vsel %vm820_vm1, %v2170_v0, 0.0  ;;  %v2180_v9 = vadd.f32 %v1667_v56, %v701_v61  ;;  %v1722_v56 = vld [vmem:[%s2737_s3 + $0x58] sm:$0xff]  }
  0xe2   :  { %v1778_v7 = vpop.f32.mrf.mxu0  ;;  %v1812_v11 = vpop.f32.mrf.mxu1  ;;  %855 = vadd.xlane.f32.xlu1 %v854_v8  ;;  %v1683_v63 = vunpack.c.h.bf16 %v1719_v38 }
  0xe3   :  { %v704_v14 = vadd.f32 %v2102_v37, %v607_v6  ;;  %v618_v15 = vadd.f32 %v1812_v11, %v1778_v7  ;;  %v2185_v19 = vadd.f32 %v1678_v59, %v706_v5  ;;  %v848_v25 = vsel %vm820_vm1, %v2180_v9, 0.0 }
  0xe4   :  { %v314_v16 = vpop.f32.mrf.mxu0  ;;  %v609_v21 = vpop.f32.mrf.mxu1  ;;  %846 = vadd.xlane.f32.xlu0 %v845_v17  ;;  %v1694_v5 = vunpack.c.l.bf16 %v1722_v56 }
  0xe5   :  { %v707_v22 = vadd.f32 %v2102_v37, %v618_v15  ;;  %v610_v23 = vadd.f32 %v609_v21, %v314_v16  ;;  %v863_v28 = vsel %vm820_vm1, %v2185_v19, 0.0  ;;  %v2198_v36 = vadd.f32 %v1674_v13, %v704_v14  ;;  %v1721_v13 = vld [vmem:[%s2737_s3 + $0x50] sm:$0xff]  }
  0xe6   :  { %v1781_v24 = vpop.f32.mrf.mxu0  ;;  %v1815_v27 = vpop.f32.mrf.mxu1  ;;  %849 = vadd.xlane.f32.xlu1 %v848_v25 }
  0xe7   :  { %v705_v30 = vadd.f32 %v2102_v37, %v610_v23  ;;  %v631_v33 = vadd.f32 %v1815_v27, %v1781_v24  ;;  %v2196_v35 = vadd.f32 %v1679_v12, %v707_v22  ;;  %v857_v54 = vsel %vm820_vm1, %v2198_v36, 0.0 }
  0xe8   :  { %v327_v34 = vpop.f32.mrf.mxu0  ;;  %v622_v39 = vpop.f32.mrf.mxu1  ;;  %864 = vadd.xlane.f32.xlu0 %v863_v28  ;;  %v1695_v23 = vunpack.c.h.bf16 %v1722_v56  ;;  %v1690_v24 = vunpack.c.l.bf16 %v1721_v13 }
  0xe9   :  { %v710_v41 = vadd.f32 %v2102_v37, %v631_v33  ;;  %v623_v42 = vadd.f32 %v622_v39, %v327_v34  ;;  %v866_v44 = vsel %vm820_vm1, %v2196_v35, 0.0  ;;  %v2206_v45 = vadd.f32 %v1675_v26, %v705_v30  ;;  %v1724_v30 = vld [vmem:[%s2737_s3 + $0x68] sm:$0xff]  }
  0xea   :  { %v1782_v43 = vpop.f32.mrf.mxu0  ;;  %v1816_v46 = vpop.f32.mrf.mxu1  ;;  %867 = vadd.xlane.f32.xlu1 %v866_v44 }
  0xeb   :  { %v708_v50 = vadd.f32 %v2102_v37, %v623_v42  ;;  %v634_v52 = vadd.f32 %v1816_v46, %v1782_v43  ;;  %v2211_v55 = vadd.f32 %v1686_v29, %v710_v41  ;;  %v860_v62 = vsel %vm820_vm1, %v2206_v45, 0.0 }
  0xec   :  { %v330_v53 = vpop.f32.mrf.mxu0  ;;  %v625_v57 = vpop.f32.mrf.mxu1  ;;  %858 = vadd.xlane.f32.xlu0 %v857_v54  ;;  %v1691_v42 = vunpack.c.h.bf16 %v1721_v13  ;;  %v1702_v46 = vunpack.c.l.bf16 %v1724_v30  ;;  %v1723_v54 = vld [vmem:[%s2737_s3 + $0x60] sm:$0xff]  }
  0xed   :  { %v711_v58 = vadd.f32 %v2102_v37, %v634_v52  ;;  %v626_v59 = vadd.f32 %v625_v57, %v330_v53  ;;  %v875_v4 = vsel %vm820_vm1, %v2211_v55, 0.0  ;;  %v2224_v12 = vadd.f32 %v1682_v49, %v708_v50 }
  0xee   :  { %v1785_v61 = vpop.f32.mrf.mxu0  ;;  %v1819_v2 = vpop.f32.mrf.mxu1  ;;  %861 = vadd.xlane.f32.xlu1 %v860_v62 }
  0xef   :  { %v709_v6 = vadd.f32 %v2102_v37, %v626_v59  ;;  %v647_v7 = vadd.f32 %v1819_v2, %v1785_v61  ;;  %v2222_v11 = vadd.f32 %v1687_v47, %v711_v58  ;;  %v869_v28 = vsel %vm820_vm1, %v2224_v12, 0.0 }
  0xf0   :  { %v343_v8 = vpop.f32.mrf.mxu0  ;;  %v638_v14 = vpop.f32.mrf.mxu1  ;;  %876 = vadd.xlane.f32.xlu0 %v875_v4  ;;  %v1703_v2 = vunpack.c.h.bf16 %v1724_v30  ;;  %v1698_v4 = vunpack.c.l.bf16 %v1723_v54 }
  0xf1   :  { %v714_v15 = vadd.f32 %v2102_v37, %v647_v7  ;;  %v639_v16 = vadd.f32 %v638_v14, %v343_v8  ;;  %v878_v20 = vsel %vm820_vm1, %v2222_v11, 0.0  ;;  %v2232_v21 = vadd.f32 %v1683_v63, %v709_v6 }
  0xf2   :  { %v1786_v17 = vpop.f32.mrf.mxu0  ;;  %v1820_v22 = vpop.f32.mrf.mxu1  ;;  %879 = vadd.xlane.f32.xlu1 %v878_v20 }
  0xf3   :  { %v712_v25 = vadd.f32 %v2102_v37, %v639_v16  ;;  %v650_v26 = vadd.f32 %v1820_v22, %v1786_v17  ;;  %v2237_v29 = vadd.f32 %v1694_v5, %v714_v15  ;;  %v872_v41 = vsel %vm820_vm1, %v2232_v21, 0.0 }
  0xf4   :  { %v346_v27 = vpop.f32.mrf.mxu0  ;;  %v641_v33 = vpop.f32.mrf.mxu1  ;;  %870 = vadd.xlane.f32.xlu0 %v869_v28  ;;  %v1699_v22 = vunpack.c.h.bf16 %v1723_v54 }
  0xf5   :  { %v715_v34 = vadd.f32 %v2102_v37, %v650_v26  ;;  %v642_v38 = vadd.f32 %v641_v33, %v346_v27  ;;  %v887_v44 = vsel %vm820_vm1, %v2237_v29, 0.0  ;;  %v2250_v53 = vadd.f32 %v1690_v24, %v712_v25  ;;  %v1725_v25 = vld [vmem:[%s2737_s3 + $0x70] sm:$0xff]  }
  0xf6   :  { %v1789_v39 = vpop.f32.mrf.mxu0  ;;  %v1823_v43 = vpop.f32.mrf.mxu1  ;;  %873 = vadd.xlane.f32.xlu1 %v872_v41 }
  0xf7   :  { %v713_v47 = vadd.f32 %v2102_v37, %v642_v38  ;;  %v663_v49 = vadd.f32 %v1823_v43, %v1789_v39  ;;  %v2248_v52 = vadd.f32 %v1695_v23, %v715_v34  ;;  %v881_v8 = vsel %vm820_vm1, %v2250_v53, 0.0  ;;  %v1726_v34 = vld [vmem:[%s2737_s3 + $0x78] sm:$0xff]  }
  0xf8   :  { %v359_v50 = vpop.f32.mrf.mxu0  ;;  %v654_v56 = vpop.f32.mrf.mxu1  ;;  %888 = vadd.xlane.f32.xlu0 %v887_v44  ;;  %v1706_v44 = vunpack.c.l.bf16 %v1725_v25 }
  0xf9   :  { %v718_v57 = vadd.f32 %v2102_v37, %v663_v49  ;;  %v655_v58 = vadd.f32 %v654_v56, %v359_v50  ;;  %v890_v61 = vsel %vm820_vm1, %v2248_v52, 0.0  ;;  %v2258_v62 = vadd.f32 %v1691_v42, %v713_v47 }
  0xfa   :  { %v1790_v59 = vpop.f32.mrf.mxu0  ;;  %v1824_v63 = vpop.f32.mrf.mxu1  ;;  %891 = vadd.xlane.f32.xlu1 %v890_v61  ;;  %v1710_v47 = vunpack.c.l.bf16 %v1726_v34 }
  0xfb   :  { %v716_v5 = vadd.f32 %v2102_v37, %v655_v58  ;;  %v666_v6 = vadd.f32 %v1824_v63, %v1790_v59  ;;  %v2263_v13 = vadd.f32 %v1702_v46, %v718_v57  ;;  %v884_v20 = vsel %vm820_vm1, %v2258_v62, 0.0 }
  0xfc   :  { %v362_v7 = vpop.f32.mrf.mxu0  ;;  %v657_v14 = vpop.f32.mrf.mxu1  ;;  %882 = vadd.xlane.f32.xlu0 %v881_v8 }
  0xfd   :  { %v719_v15 = vadd.f32 %v2102_v37, %v666_v6  ;;  %v658_v16 = vadd.f32 %v657_v14, %v362_v7  ;;  %v899_v24 = vsel %vm820_vm1, %v2263_v13, 0.0  ;;  %v2276_v33 = vadd.f32 %v1698_v4, %v716_v5 }
  0xfe   :  { %v1793_v17 = vpop.f32.mrf.mxu0  ;;  %v1827_v23 = vpop.f32.mrf.mxu1  ;;  %885 = vadd.xlane.f32.xlu1 %v884_v20  ;;  %v1711_v4 = vunpack.c.h.bf16 %v1726_v34 }
  0xff   :  { %v717_v26 = vadd.f32 %v2102_v37, %v658_v16  ;;  %v679_v27 = vadd.f32 %v1827_v23, %v1793_v17  ;;  %v2274_v30 = vadd.f32 %v1703_v2, %v719_v15  ;;  %v893_v57 = vsel %vm820_vm1, %v2276_v33, 0.0 }
 0x100   :  { %v375_v28 = vpop.f32.mrf.mxu0  ;;  %v670_v38 = vpop.f32.mrf.mxu1  ;;  %900 = vadd.xlane.f32.xlu0 %v899_v24  ;;  %v1707_v2 = vunpack.c.h.bf16 %v1725_v25 }
 0x101   :  { %v671_v39 = vadd.f32 %v670_v38, %v375_v28  ;;  %v902_v42 = vsel %vm820_vm1, %v2274_v30, 0.0  ;;  %v2283_v43 = vadd.f32 %v1699_v22, %v717_v26  ;;  %v722_v49 = vadd.f32 %v2102_v37, %v679_v27 }
 0x102   :  { %v1794_v41 = vpop.f32.mrf.mxu0  ;;  %v1828_v46 = vpop.f32.mrf.mxu1  ;;  %903 = vadd.xlane.f32.xlu1 %v902_v42 }
 0x103   :  { %v720_v50 = vadd.f32 %v2102_v37, %v671_v39  ;;  %v682_v54 = vadd.f32 %v1828_v46, %v1794_v41  ;;  %v896_v61 = vsel %vm820_vm1, %v2283_v43, 0.0  ;;  %v2297_v8 = vadd.f32 %v1710_v47, %v722_v49 }
 0x104   :  { %v378_v56 = vpop.f32.mrf.mxu0  ;;  %v673_v58 = vpop.f32.mrf.mxu1  ;;  %894 = vadd.xlane.f32.xlu0 %v893_v57 }
 0x105   :  { %v674_v59 = vadd.f32 %v673_v58, %v378_v56  ;;  %v2291_v63 = vadd.f32 %v1706_v44, %v720_v50  ;;  %v723_v5 = vadd.f32 %v2102_v37, %v682_v54  ;;  %v911_v16 = vsel %vm820_vm1, %v2297_v8, 0.0 }
 0x106   :  { %897 = vadd.xlane.f32.xlu1 %v896_v61 }
 0x107   :  { %v721_v6 = vadd.f32 %v2102_v37, %v674_v59  ;;  %v905_v7 = vsel %vm820_vm1, %v2291_v63, 0.0  ;;  %v2305_v17 = vadd.f32 %v1711_v4, %v723_v5 }
 0x108   :  { %906 = vadd.xlane.f32.xlu0 %v905_v7 }
 0x109   :  { %v2299_v14 = vadd.f32 %v1707_v2, %v721_v6  ;;  %v914_v37 = vsel %vm820_vm1, %v2305_v17, 0.0 }
 0x10b   :  { %v908_v15 = vsel %vm820_vm1, %v2299_v14, 0.0 }
 0x10c   :  { %909 = vadd.xlane.f32.xlu1 %v908_v15  ;;  %912 = vadd.xlane.f32.xlu0 %v911_v16 }
 0x110   :  { %915 = vadd.xlane.f32.xlu1 %v914_v37 }
 0x157   :  { %v829_v20 = vpop.xlane.xlu1 %828 }
 0x158   :  { %v920_v22 = vmul.f32 0.03125, %v829_v20 }
 0x159   :  { %v823_v23 = vpop.xlane.xlu0 %822 }
 0x15a   :  { %v2310_v24 = vsub.f32 %v2109_v51, %v920_v22  ;;  %v918_v25 = vmul.f32 0.03125, %v823_v23 }
 0x15b   :  { %v832_v26 = vpop.xlane.xlu1 %831 }
 0x15c   :  { %v2313_v27 = vsub.f32 %v2117_v60, %v918_v25  ;;  %v921_v28 = vmul.f32 0.03125, %v832_v26  ;;  %v984_v34 = vmul.f32 %v2310_v24, %v2310_v24 }
 0x15d   :  { %v826_v38 = vpop.xlane.xlu0 %825 }
 0x15e   :  { %v2318_v39 = vsub.f32 %v2122_v3, %v921_v28  ;;  %v919_v41 = vmul.f32 0.03125, %v826_v38  ;;  %v1020_v42 = vsel %vm820_vm1, %v984_v34, 0.0  ;;  %v982_v51 = vmul.f32 %v2313_v27, %v2313_v27 }
 0x15f   :  { %1021 = vadd.xlane.f32.xlu0 %v1020_v42 }
 0x160   :  { %v2324_v44 = vsub.f32 %v2130_v10, %v919_v41  ;;  %v985_v60 = vmul.f32 %v2318_v39, %v2318_v39  ;;  %v1014_v3 = vsel %vm820_vm1, %v982_v51, 0.0 }
 0x161   :  { %v841_v46 = vpop.xlane.xlu0 %840 }
 0x162   :  { %v924_v47 = vmul.f32 0.03125, %v841_v46  ;;  %v1023_v49 = vsel %vm820_vm1, %v985_v60, 0.0  ;;  %v983_v50 = vmul.f32 %v2324_v44, %v2324_v44 }
 0x163   :  { %v844_v54 = vpop.xlane.xlu1 %843  ;;  %1024 = vadd.xlane.f32.xlu1 %v1023_v49  ;;  %1015 = vadd.xlane.f32.xlu0 %v1014_v3 }
 0x164   :  { %v2333_v56 = vsub.f32 %v2135_v18, %v924_v47  ;;  %v925_v10 = vmul.f32 0.03125, %v844_v54  ;;  %v1017_v61 = vsel %vm820_vm1, %v983_v50, 0.0 }
 0x165   :  { %v835_v57 = vpop.xlane.xlu0 %834 }
 0x166   :  { %v2336_v58 = vsub.f32 %v2144_v31, %v925_v10  ;;  %v922_v59 = vmul.f32 0.03125, %v835_v57  ;;  %v988_v2 = vmul.f32 %v2333_v56, %v2333_v56 }
 0x167   :  { %v838_v4 = vpop.xlane.xlu1 %837  ;;  %1018 = vadd.xlane.f32.xlu1 %v1017_v61 }
 0x168   :  { %v2342_v5 = vsub.f32 %v2146_v32, %v922_v59  ;;  %v923_v6 = vmul.f32 0.03125, %v838_v4  ;;  %v1032_v18 = vsel %vm820_vm1, %v988_v2, 0.0  ;;  %v989_v7 = vmul.f32 %v2336_v58, %v2336_v58 }
 0x169   :  { %1033 = vadd.xlane.f32.xlu0 %v1032_v18  ;;  %v853_v31 = vpop.xlane.xlu0 %852 }
 0x16a   :  { %v2348_v15 = vsub.f32 %v2154_v40, %v923_v6  ;;  %v928_v16 = vmul.f32 0.03125, %v853_v31  ;;  %v1035_v37 = vsel %vm820_vm1, %v989_v7, 0.0  ;;  %v986_v20 = vmul.f32 %v2342_v5, %v2342_v5 }
 0x16b   :  { %v856_v22 = vpop.xlane.xlu1 %855  ;;  %1036 = vadd.xlane.f32.xlu1 %v1035_v37 }
 0x16c   :  { %v2354_v32 = vsub.f32 %v2159_v48, %v928_v16  ;;  %v929_v23 = vmul.f32 0.03125, %v856_v22  ;;  %v1026_v25 = vsel %vm820_vm1, %v986_v20, 0.0  ;;  %v987_v26 = vmul.f32 %v2348_v15, %v2348_v15 }
 0x16d   :  { %1027 = vadd.xlane.f32.xlu0 %v1026_v25  ;;  %v847_v40 = vpop.xlane.xlu0 %846 }
 0x16e   :  { %v2360_v28 = vsub.f32 %v2170_v0, %v929_v23  ;;  %v926_v34 = vmul.f32 0.03125, %v847_v40  ;;  %v1029_v38 = vsel %vm820_vm1, %v987_v26, 0.0  ;;  %v992_v41 = vmul.f32 %v2354_v32, %v2354_v32 }
 0x16f   :  { %v850_v42 = vpop.xlane.xlu1 %849  ;;  %1030 = vadd.xlane.f32.xlu1 %v1029_v38 }
 0x170   :  { %v2366_v48 = vsub.f32 %v2172_v1, %v926_v34  ;;  %v927_v51 = vmul.f32 0.03125, %v850_v42  ;;  %v1044_v60 = vsel %vm820_vm1, %v992_v41, 0.0  ;;  %v993_v46 = vmul.f32 %v2360_v28, %v2360_v28 }
 0x171   :  { %1045 = vadd.xlane.f32.xlu0 %v1044_v60  ;;  %v865_v0 = vpop.xlane.xlu0 %864 }
 0x172   :  { %v2372_v47 = vsub.f32 %v2180_v9, %v927_v51  ;;  %v932_v49 = vmul.f32 0.03125, %v865_v0  ;;  %v1047_v3 = vsel %vm820_vm1, %v993_v46, 0.0  ;;  %v990_v50 = vmul.f32 %v2366_v48, %v2366_v48 }
 0x173   :  { %v868_v54 = vpop.xlane.xlu1 %867  ;;  %1048 = vadd.xlane.f32.xlu1 %v1047_v3 }
 0x174   :  { %v2378_v1 = vsub.f32 %v2185_v19, %v932_v49  ;;  %v933_v10 = vmul.f32 0.03125, %v868_v54  ;;  %v1038_v57 = vsel %vm820_vm1, %v990_v50, 0.0  ;;  %v991_v59 = vmul.f32 %v2372_v47, %v2372_v47 }
 0x175   :  { %1039 = vadd.xlane.f32.xlu0 %v1038_v57  ;;  %v859_v9 = vpop.xlane.xlu0 %858 }
 0x176   :  { %v2384_v61 = vsub.f32 %v2196_v35, %v933_v10  ;;  %v930_v2 = vmul.f32 0.03125, %v859_v9  ;;  %v1041_v4 = vsel %vm820_vm1, %v991_v59, 0.0  ;;  %v996_v6 = vmul.f32 %v2378_v1, %v2378_v1 }
 0x177   :  { %v862_v18 = vpop.xlane.xlu1 %861  ;;  %1042 = vadd.xlane.f32.xlu1 %v1041_v4 }
 0x178   :  { %v2390_v19 = vsub.f32 %v2198_v36, %v930_v2  ;;  %v931_v7 = vmul.f32 0.03125, %v862_v18  ;;  %v1056_v31 = vsel %vm820_vm1, %v996_v6, 0.0  ;;  %v997_v16 = vmul.f32 %v2384_v61, %v2384_v61 }
 0x179   :  { %1057 = vadd.xlane.f32.xlu0 %v1056_v31  ;;  %v877_v35 = vpop.xlane.xlu0 %876 }
 0x17a   :  { %v2396_v37 = vsub.f32 %v2206_v45, %v931_v7  ;;  %v936_v20 = vmul.f32 0.03125, %v877_v35  ;;  %v1059_v22 = vsel %vm820_vm1, %v997_v16, 0.0  ;;  %v994_v23 = vmul.f32 %v2390_v19, %v2390_v19 }
 0x17b   :  { %v880_v25 = vpop.xlane.xlu1 %879  ;;  %1060 = vadd.xlane.f32.xlu1 %v1059_v22 }
 0x17c   :  { %v2402_v36 = vsub.f32 %v2211_v55, %v936_v20  ;;  %v937_v26 = vmul.f32 0.03125, %v880_v25  ;;  %v1050_v40 = vsel %vm820_vm1, %v994_v23, 0.0  ;;  %v995_v34 = vmul.f32 %v2396_v37, %v2396_v37 }
 0x17d   :  { %1051 = vadd.xlane.f32.xlu0 %v1050_v40  ;;  %v871_v45 = vpop.xlane.xlu0 %870 }
 0x17e   :  { %v2408_v38 = vsub.f32 %v2222_v11, %v937_v26  ;;  %v934_v41 = vmul.f32 0.03125, %v871_v45  ;;  %v1053_v42 = vsel %vm820_vm1, %v995_v34, 0.0  ;;  %v1000_v51 = vmul.f32 %v2402_v36, %v2402_v36 }
 0x17f   :  { %v874_v60 = vpop.xlane.xlu1 %873  ;;  %1054 = vadd.xlane.f32.xlu1 %v1053_v42 }
 0x180   :  { %v2414_v55 = vsub.f32 %v2224_v12, %v934_v41  ;;  %v935_v46 = vmul.f32 0.03125, %v874_v60  ;;  %v1068_v0 = vsel %vm820_vm1, %v1000_v51, 0.0  ;;  %v1001_v49 = vmul.f32 %v2408_v38, %v2408_v38 }
 0x181   :  { %1069 = vadd.xlane.f32.xlu0 %v1068_v0  ;;  %v889_v11 = vpop.xlane.xlu0 %888 }
 0x182   :  { %v2420_v3 = vsub.f32 %v2232_v21, %v935_v46  ;;  %v940_v50 = vmul.f32 0.03125, %v889_v11  ;;  %v1071_v54 = vsel %vm820_vm1, %v1001_v49, 0.0  ;;  %v998_v10 = vmul.f32 %v2414_v55, %v2414_v55 }
 0x183   :  { %v892_v57 = vpop.xlane.xlu1 %891  ;;  %1072 = vadd.xlane.f32.xlu1 %v1071_v54 }
 0x184   :  { %v2426_v12 = vsub.f32 %v2237_v29, %v940_v50  ;;  %v941_v59 = vmul.f32 0.03125, %v892_v57  ;;  %v1062_v9 = vsel %vm820_vm1, %v998_v10, 0.0  ;;  %v999_v2 = vmul.f32 %v2420_v3, %v2420_v3 }
 0x185   :  { %1063 = vadd.xlane.f32.xlu0 %v1062_v9  ;;  %v883_v21 = vpop.xlane.xlu0 %882 }
 0x186   :  { %v2432_v4 = vsub.f32 %v2248_v52, %v941_v59  ;;  %v938_v6 = vmul.f32 0.03125, %v883_v21  ;;  %v1065_v18 = vsel %vm820_vm1, %v999_v2, 0.0  ;;  %v1004_v7 = vmul.f32 %v2426_v12, %v2426_v12 }
 0x187   :  { %v886_v31 = vpop.xlane.xlu1 %885  ;;  %1066 = vadd.xlane.f32.xlu1 %v1065_v18 }
 0x188   :  { %v2438_v29 = vsub.f32 %v2250_v53, %v938_v6  ;;  %v939_v16 = vmul.f32 0.03125, %v886_v31  ;;  %v1080_v35 = vsel %vm820_vm1, %v1004_v7, 0.0  ;;  %v1005_v20 = vmul.f32 %v2432_v4, %v2432_v4 }
 0x189   :  { %1081 = vadd.xlane.f32.xlu0 %v1080_v35  ;;  %v901_v52 = vpop.xlane.xlu0 %900 }
 0x18a   :  { %v2444_v22 = vsub.f32 %v2258_v62, %v939_v16  ;;  %v944_v23 = vmul.f32 0.03125, %v901_v52  ;;  %v1083_v25 = vsel %vm820_vm1, %v1005_v20, 0.0  ;;  %v1002_v26 = vmul.f32 %v2438_v29, %v2438_v29 }
 0x18b   :  { %v904_v40 = vpop.xlane.xlu1 %903  ;;  %1084 = vadd.xlane.f32.xlu1 %v1083_v25 }
 0x18c   :  { %v2450_v53 = vsub.f32 %v2263_v13, %v944_v23  ;;  %v945_v34 = vmul.f32 0.03125, %v904_v40  ;;  %v1074_v45 = vsel %vm820_vm1, %v1002_v26, 0.0  ;;  %v1003_v41 = vmul.f32 %v2444_v22, %v2444_v22 }
 0x18d   :  { %1075 = vadd.xlane.f32.xlu0 %v1074_v45  ;;  %v895_v62 = vpop.xlane.xlu0 %894 }
 0x18e   :  { %v2456_v42 = vsub.f32 %v2274_v30, %v945_v34  ;;  %v942_v51 = vmul.f32 0.03125, %v895_v62  ;;  %v1077_v60 = vsel %vm820_vm1, %v1003_v41, 0.0  ;;  %v1008_v46 = vmul.f32 %v2450_v53, %v2450_v53 }
 0x18f   :  { %v898_v0 = vpop.xlane.xlu1 %897  ;;  %1078 = vadd.xlane.f32.xlu1 %v1077_v60 }
 0x190   :  { %v2462_v13 = vsub.f32 %v2276_v33, %v942_v51  ;;  %v943_v49 = vmul.f32 0.03125, %v898_v0  ;;  %v1092_v11 = vsel %vm820_vm1, %v1008_v46, 0.0  ;;  %v1009_v50 = vmul.f32 %v2456_v42, %v2456_v42 }
 0x191   :  { %1093 = vadd.xlane.f32.xlu0 %v1092_v11  ;;  %v907_v30 = vpop.xlane.xlu0 %906 }
 0x192   :  { %v2468_v54 = vsub.f32 %v2283_v43, %v943_v49  ;;  %v946_v10 = vmul.f32 0.03125, %v907_v30  ;;  %v1095_v57 = vsel %vm820_vm1, %v1009_v50, 0.0  ;;  %v1006_v59 = vmul.f32 %v2462_v13, %v2462_v13 }
 0x193   :  { %1096 = vadd.xlane.f32.xlu1 %v1095_v57 }
 0x194   :  { %v2474_v33 = vsub.f32 %v2291_v63, %v946_v10  ;;  %v1086_v9 = vsel %vm820_vm1, %v1006_v59, 0.0  ;;  %v1007_v2 = vmul.f32 %v2468_v54, %v2468_v54 }
 0x195   :  { %v910_v21 = vpop.xlane.xlu1 %909  ;;  %1087 = vadd.xlane.f32.xlu0 %v1086_v9  ;;  %v913_v6 = vpop.xlane.xlu0 %912 }
 0x196   :  { %v947_v43 = vmul.f32 0.03125, %v910_v21  ;;  %v948_v18 = vmul.f32 0.03125, %v913_v6  ;;  %v1089_v7 = vsel %vm820_vm1, %v1007_v2, 0.0  ;;  %v1010_v31 = vmul.f32 %v2474_v33, %v2474_v33 }
 0x197   :  { %1090 = vadd.xlane.f32.xlu1 %v1089_v7 }
 0x198   :  { %v2483_v16 = vsub.f32 %v2299_v14, %v947_v43  ;;  %v2486_v63 = vsub.f32 %v2297_v8, %v948_v18  ;;  %v1098_v35 = vsel %vm820_vm1, %v1010_v31, 0.0 }
 0x199   :  { %v916_v20 = vpop.xlane.xlu1 %915  ;;  %1099 = vadd.xlane.f32.xlu0 %v1098_v35 }
 0x19a   :  { %v949_v52 = vmul.f32 0.03125, %v916_v20  ;;  %v1011_v23 = vmul.f32 %v2483_v16, %v2483_v16  ;;  %v1012_v25 = vmul.f32 %v2486_v63, %v2486_v63  ;;  %v2504_v20 = vld [vmem:[%s2739_s4] ss:$0 sm:$0xff] }
 0x19c   :  { %v2494_v26 = vsub.f32 %v2305_v17, %v949_v52  ;;  %v1101_v14 = vsel %vm820_vm1, %v1011_v23, 0.0  ;;  %v1104_v40 = vsel %vm820_vm1, %v1012_v25, 0.0 }
 0x19d   :  { %1102 = vadd.xlane.f32.xlu1 %v1101_v14  ;;  %1105 = vadd.xlane.f32.xlu0 %v1104_v40  ;;  %v2510_v40 = vld [vmem:[%s2740_s5] ss:$0 sm:$0xff] }
 0x19e   :  { %v1013_v8 = vmul.f32 %v2494_v26, %v2494_v26 }
 0x1a0   :  { %v1107_v34 = vsel %vm820_vm1, %v1013_v8, 0.0 }
 0x1a1   :  { %1108 = vadd.xlane.f32.xlu1 %v1107_v34 }
 0x1e8   :  { %v1022_v45 = vpop.xlane.xlu0 %1021 }
 0x1e9   :  { %v1112_v41 = vmul.f32 0.03125, %v1022_v45 }
 0x1eb   :  { %v1144_v62 = vadd.f32 1e-12, %v1112_v41 }
 0x1ec   :  { %v1025_v51 = vpop.xlane.xlu1 %1024  ;;  %v1016_v60 = vpop.xlane.xlu0 %1015 }
 0x1ed   :  { %1863 = vrsqrt.f32 %v1144_v62  ;;  %v1113_v17 = vmul.f32 0.03125, %v1025_v51  ;;  %v1110_v46 = vmul.f32 0.03125, %v1016_v60 }
 0x1ef   :  { %v1145_v0 = vadd.f32 1e-12, %v1113_v17  ;;  %v1142_v49 = vadd.f32 1e-12, %v1110_v46 }
 0x1f0   :  { %v1019_v11 = vpop.xlane.xlu1 %1018 }
 0x1f1   :  { %1865 = vrsqrt.f32 %v1145_v0  ;;  %v1111_v50 = vmul.f32 0.03125, %v1019_v11 }
 0x1f2   :  { %1867 = vrsqrt.f32 %v1142_v49  ;;  %v1034_v30 = vpop.xlane.xlu0 %1033 }
 0x1f3   :  { %v1143_v10 = vadd.f32 1e-12, %v1111_v50  ;;  %v1116_v57 = vmul.f32 0.03125, %v1034_v30 }
 0x1f4   :  { %v1037_v59 = vpop.xlane.xlu1 %1036 }
 0x1f5   :  { %1869 = vrsqrt.f32 %v1143_v10  ;;  %v1148_v9 = vadd.f32 1e-12, %v1116_v57  ;;  %v1117_v2 = vmul.f32 0.03125, %v1037_v59 }
 0x1f6   :  { %v1028_v21 = vpop.xlane.xlu0 %1027 }
 0x1f7   :  { %1871 = vrsqrt.f32 %v1148_v9  ;;  %v1149_v6 = vadd.f32 1e-12, %v1117_v2  ;;  %v1114_v43 = vmul.f32 0.03125, %v1028_v21 }
 0x1f8   :  { %v1031_v18 = vpop.xlane.xlu1 %1030 }
 0x1f9   :  { %1873 = vrsqrt.f32 %v1149_v6  ;;  %v1146_v7 = vadd.f32 1e-12, %v1114_v43  ;;  %v1115_v31 = vmul.f32 0.03125, %v1031_v18 }
 0x1fa   :  { %v1864_v35 = vpop.eup %1863  ;;  %v1046_v52 = vpop.xlane.xlu0 %1045 }
 0x1fb   :  { %v1208_v23 = vmul.f32 %v1864_v35, %v2310_v24  ;;  %1875 = vrsqrt.f32 %v1146_v7  ;;  %v1147_v25 = vadd.f32 1e-12, %v1115_v31  ;;  %v1120_v14 = vmul.f32 0.03125, %v1046_v52 }
 0x1fc   :  { %v1049_v8 = vpop.xlane.xlu1 %1048 }
 0x1fd   :  { %v1247_v34 = vmul.f32 %v2504_v20, %v1208_v23  ;;  %1877 = vrsqrt.f32 %v1147_v25  ;;  %v1152_v45 = vadd.f32 1e-12, %v1120_v14  ;;  %v1121_v41 = vmul.f32 0.03125, %v1049_v8 }
 0x1fe   :  { %v1866_v62 = vpop.eup %1865  ;;  %v1040_v51 = vpop.xlane.xlu0 %1039 }
 0x1ff   :  { %v1868_v60 = vpop.eup %1867  ;;  %v1286_v17 = vadd.f32 %v2510_v40, %v1247_v34  ;;  %v1209_v24 = vmul.f32 %v1866_v62, %v2318_v39  ;;  %1879 = vrsqrt.f32 %v1152_v45  ;;  %v1153_v46 = vadd.f32 1e-12, %v1121_v41 }
 0x200   :  { %v1206_v0 = vmul.f32 %v1868_v60, %v2313_v27  ;;  %v1118_v49 = vmul.f32 0.03125, %v1040_v51  ;;  %v1043_v11 = vpop.xlane.xlu1 %1042 }
 0x201   :  { %v1618_v50 = vpack.c.bf16 %v1286_v17, %v1286_v17  ;;  %v1248_v30 = vmul.f32 %v2504_v20, %v1209_v24  ;;  %1881 = vrsqrt.f32 %v1153_v46  ;;  %v1119_v10 = vmul.f32 0.03125, %v1043_v11 }
 0x202   :  { %v1870_v57 = vpop.eup %1869  ;;  %v1245_v59 = vmul.f32 %v2504_v20, %v1206_v0  ;;  %v1150_v9 = vadd.f32 1e-12, %v1118_v49  ;;  %v1058_v2 = vpop.xlane.xlu0 %1057 }
 0x203   :  { %1447 = vst.msk [vmem:[%s2741_s6 + $0x8] sm:$0xf] %vm1444_vm2, %v1618_v50  ;;  %v1287_v39 = vadd.f32 %v2510_v40, %v1248_v30  ;;  %v1207_v27 = vmul.f32 %v1870_v57, %v2324_v44  ;;  %v1151_v21 = vadd.f32 1e-12, %v1119_v10  ;;  %v1124_v6 = vmul.f32 0.03125, %v1058_v2 }
 0x204   :  { %v1872_v43 = vpop.eup %1871  ;;  %v1284_v18 = vadd.f32 %v2510_v40, %v1245_v59  ;;  %1883 = vrsqrt.f32 %v1150_v9  ;;  %v1061_v7 = vpop.xlane.xlu1 %1060 }
 0x205   :  { %v1619_v31 = vpack.c.bf16 %v1287_v39, %v1287_v39  ;;  %v1246_v35 = vmul.f32 %v2504_v20, %v1207_v27  ;;  %v1212_v52 = vmul.f32 %v1872_v43, %v2333_v56  ;;  %1885 = vrsqrt.f32 %v1151_v21 }
 0x206   :  { %v1874_v23 = vpop.eup %1873  ;;  %v1616_v25 = vpack.c.bf16 %v1284_v18, %v1284_v18  ;;  %v1156_v14 = vadd.f32 1e-12, %v1124_v6  ;;  %v1125_v8 = vmul.f32 0.03125, %v1061_v7  ;;  %v1052_v34 = vpop.xlane.xlu0 %1051 }
 0x207   :  { %1448 = vst.msk [vmem:[%s2741_s6 + $0xc] sm:$0xf] %vm1444_vm2, %v1619_v31  ;;  %v1285_v44 = vadd.f32 %v2510_v40, %v1246_v35  ;;  %v1251_v45 = vmul.f32 %v2504_v20, %v1212_v52  ;;  %v1213_v41 = vmul.f32 %v1874_v23, %v2336_v58  ;;  %v1122_v62 = vmul.f32 0.03125, %v1052_v34 }
 0x208   :  { %v1876_v51 = vpop.eup %1875  ;;  %1445 = vst.msk [vmem:[%s2741_s6] sm:$0xf] %vm1444_vm2, %v1616_v25  ;;  %1887 = vrsqrt.f32 %v1156_v14  ;;  %v1157_v56 = vadd.f32 1e-12, %v1125_v8  ;;  %v1055_v60 = vpop.xlane.xlu1 %1054 }
 0x209   :  { %v1617_v17 = vpack.c.bf16 %v1285_v44, %v1285_v44  ;;  %v1290_v24 = vadd.f32 %v2510_v40, %v1251_v45  ;;  %v1252_v46 = vmul.f32 %v2504_v20, %v1213_v41  ;;  %v1210_v0 = vmul.f32 %v1876_v51, %v2342_v5 }
 0x20a   :  { %v1878_v49 = vpop.eup %1877  ;;  %1889 = vrsqrt.f32 %v1157_v56  ;;  %v1154_v58 = vadd.f32 1e-12, %v1122_v62  ;;  %v1123_v11 = vmul.f32 0.03125, %v1055_v60  ;;  %v1070_v50 = vpop.xlane.xlu0 %1069 }
 0x20b   :  { %1446 = vst.msk [vmem:[%s2741_s6 + $0x4] sm:$0xf] %vm1444_vm2, %v1617_v17  ;;  %v1622_v30 = vpack.c.bf16 %v1290_v24, %v1290_v24  ;;  %v1291_v10 = vadd.f32 %v2510_v40, %v1252_v46  ;;  %v1249_v57 = vmul.f32 %v2504_v20, %v1210_v0  ;;  %v1211_v59 = vmul.f32 %v1878_v49, %v2348_v15 }
 0x20c   :  { %v1880_v9 = vpop.eup %1879  ;;  %1891 = vrsqrt.f32 %v1154_v58  ;;  %v1155_v5 = vadd.f32 1e-12, %v1123_v11  ;;  %v1128_v2 = vmul.f32 0.03125, %v1070_v50  ;;  %v1073_v39 = vpop.xlane.xlu1 %1072 }
 0x20d   :  { %1451 = vst.msk [vmem:[%s2741_s6 + $0x18] sm:$0xf] %vm1444_vm2, %v1622_v30  ;;  %v1623_v27 = vpack.c.bf16 %v1291_v10, %v1291_v10  ;;  %v1288_v21 = vadd.f32 %v2510_v40, %v1249_v57  ;;  %v1250_v6 = vmul.f32 %v2504_v20, %v1211_v59  ;;  %v1216_v43 = vmul.f32 %v1880_v9, %v2354_v32 }
 0x20e   :  { %v1882_v18 = vpop.eup %1881  ;;  %1893 = vrsqrt.f32 %v1155_v5  ;;  %v1160_v15 = vadd.f32 1e-12, %v1128_v2  ;;  %v1129_v7 = vmul.f32 0.03125, %v1073_v39  ;;  %v1064_v31 = vpop.xlane.xlu0 %1063 }
 0x20f   :  { %1452 = vst.msk [vmem:[%s2741_s6 + $0x1c] sm:$0xf] %vm1444_vm2, %v1623_v27  ;;  %v1620_v35 = vpack.c.bf16 %v1288_v21, %v1288_v21  ;;  %v1289_v52 = vadd.f32 %v2510_v40, %v1250_v6  ;;  %v1255_v23 = vmul.f32 %v2504_v20, %v1216_v43  ;;  %v1217_v25 = vmul.f32 %v1882_v18, %v2360_v28 }
 0x210   :  { %1895 = vrsqrt.f32 %v1160_v15  ;;  %v1161_v14 = vadd.f32 1e-12, %v1129_v7  ;;  %v1126_v32 = vmul.f32 0.03125, %v1064_v31  ;;  %v1067_v8 = vpop.xlane.xlu1 %1066 }
 0x211   :  { %v1884_v34 = vpop.eup %1883  ;;  %1449 = vst.msk [vmem:[%s2741_s6 + $0x10] sm:$0xf] %vm1444_vm2, %v1620_v35  ;;  %v1621_v44 = vpack.c.bf16 %v1289_v52, %v1289_v52  ;;  %v1294_v45 = vadd.f32 %v2510_v40, %v1255_v23  ;;  %v1256_v41 = vmul.f32 %v2504_v20, %v1217_v25  ;;  %v1127_v62 = vmul.f32 0.03125, %v1067_v8 }
 0x212   :  { %v1886_v51 = vpop.eup %1885  ;;  %v1214_v56 = vmul.f32 %v1884_v34, %v2366_v48  ;;  %1897 = vrsqrt.f32 %v1161_v14  ;;  %v1158_v28 = vadd.f32 1e-12, %v1126_v32  ;;  %v1082_v60 = vpop.xlane.xlu0 %1081 }
 0x213   :  { %1450 = vst.msk [vmem:[%s2741_s6 + $0x14] sm:$0xf] %vm1444_vm2, %v1621_v44  ;;  %v1626_v17 = vpack.c.bf16 %v1294_v45, %v1294_v45  ;;  %v1295_v24 = vadd.f32 %v2510_v40, %v1256_v41  ;;  %v1215_v46 = vmul.f32 %v1886_v51, %v2372_v47  ;;  %v1159_v0 = vadd.f32 1e-12, %v1127_v62 }
 0x214   :  { %v1253_v49 = vmul.f32 %v2504_v20, %v1214_v56  ;;  %1899 = vrsqrt.f32 %v1158_v28  ;;  %v1132_v58 = vmul.f32 0.03125, %v1082_v60  ;;  %v1085_v11 = vpop.xlane.xlu1 %1084 }
 0x215   :  { %v1888_v48 = vpop.eup %1887  ;;  %1455 = vst.msk [vmem:[%s2741_s6 + $0x28] sm:$0xf] %vm1444_vm2, %v1626_v17  ;;  %v1627_v50 = vpack.c.bf16 %v1295_v24, %v1295_v24  ;;  %v1254_v30 = vmul.f32 %v2504_v20, %v1215_v46  ;;  %1901 = vrsqrt.f32 %v1159_v0  ;;  %v1133_v10 = vmul.f32 0.03125, %v1085_v11 }
 0x216   :  { %v1292_v57 = vadd.f32 %v2510_v40, %v1253_v49  ;;  %v1220_v47 = vmul.f32 %v1888_v48, %v2378_v1  ;;  %v1164_v59 = vadd.f32 1e-12, %v1132_v58  ;;  %v1076_v9 = vpop.xlane.xlu0 %1075 }
 0x217   :  { %v1890_v5 = vpop.eup %1889  ;;  %1456 = vst.msk [vmem:[%s2741_s6 + $0x2c] sm:$0xf] %vm1444_vm2, %v1627_v50  ;;  %v1293_v2 = vadd.f32 %v2510_v40, %v1254_v30  ;;  %v1165_v39 = vadd.f32 1e-12, %v1133_v10  ;;  %v1130_v27 = vmul.f32 0.03125, %v1076_v9 }
 0x218   :  { %v1624_v21 = vpack.c.bf16 %v1292_v57, %v1292_v57  ;;  %v1259_v6 = vmul.f32 %v2504_v20, %v1220_v47  ;;  %v1221_v43 = vmul.f32 %v1890_v5, %v2384_v61  ;;  %1903 = vrsqrt.f32 %v1164_v59  ;;  %v1079_v18 = vpop.xlane.xlu1 %1078 }
 0x219   :  { %v1892_v1 = vpop.eup %1891  ;;  %v1625_v15 = vpack.c.bf16 %v1293_v2, %v1293_v2  ;;  %1905 = vrsqrt.f32 %v1165_v39  ;;  %v1162_v7 = vadd.f32 1e-12, %v1130_v27  ;;  %v1131_v31 = vmul.f32 0.03125, %v1079_v18 }
 0x21a   :  { %1453 = vst.msk [vmem:[%s2741_s6 + $0x20] sm:$0xf] %vm1444_vm2, %v1624_v21  ;;  %v1298_v35 = vadd.f32 %v2510_v40, %v1259_v6  ;;  %v1260_v52 = vmul.f32 %v2504_v20, %v1221_v43  ;;  %v1218_v23 = vmul.f32 %v1892_v1, %v2390_v19  ;;  %v1094_v25 = vpop.xlane.xlu0 %1093 }
 0x21b   :  { %v1894_v61 = vpop.eup %1893  ;;  %1454 = vst.msk [vmem:[%s2741_s6 + $0x24] sm:$0xf] %vm1444_vm2, %v1625_v15  ;;  %1907 = vrsqrt.f32 %v1162_v7  ;;  %v1163_v14 = vadd.f32 1e-12, %v1131_v31  ;;  %v1136_v32 = vmul.f32 0.03125, %v1094_v25 }
 0x21c   :  { %v1630_v8 = vpack.c.bf16 %v1298_v35, %v1298_v35  ;;  %v1299_v34 = vadd.f32 %v2510_v40, %v1260_v52  ;;  %v1257_v44 = vmul.f32 %v2504_v20, %v1218_v23  ;;  %v1219_v45 = vmul.f32 %v1894_v61, %v2396_v37  ;;  %v1097_v41 = vpop.xlane.xlu1 %1096 }
 0x21d   :  { %v1896_v62 = vpop.eup %1895  ;;  %1909 = vrsqrt.f32 %v1163_v14  ;;  %v1168_v19 = vadd.f32 1e-12, %v1136_v32  ;;  %v1137_v51 = vmul.f32 0.03125, %v1097_v41 }
 0x21e   :  { %1459 = vst.msk [vmem:[%s2741_s6 + $0x38] sm:$0xf] %vm1444_vm2, %v1630_v8  ;;  %v1631_v56 = vpack.c.bf16 %v1299_v34, %v1299_v34  ;;  %v1296_v28 = vadd.f32 %v2510_v40, %v1257_v44  ;;  %v1258_v60 = vmul.f32 %v2504_v20, %v1219_v45  ;;  %v1224_v17 = vmul.f32 %v1896_v62, %v2402_v36  ;;  %v1088_v24 = vpop.xlane.xlu0 %1087 }
 0x21f   :  { %v1898_v46 = vpop.eup %1897  ;;  %1911 = vrsqrt.f32 %v1168_v19  ;;  %v1169_v37 = vadd.f32 1e-12, %v1137_v51  ;;  %v1134_v0 = vmul.f32 0.03125, %v1088_v24 }
 0x220   :  { %1460 = vst.msk [vmem:[%s2741_s6 + $0x3c] sm:$0xf] %vm1444_vm2, %v1631_v56  ;;  %v1628_v49 = vpack.c.bf16 %v1296_v28, %v1296_v28  ;;  %v1297_v58 = vadd.f32 %v2510_v40, %v1258_v60  ;;  %v1263_v11 = vmul.f32 %v2504_v20, %v1224_v17  ;;  %v1225_v48 = vmul.f32 %v1898_v46, %v2408_v38  ;;  %v1091_v50 = vpop.xlane.xlu1 %1090 }
 0x221   :  { %v1900_v30 = vpop.eup %1899  ;;  %1913 = vrsqrt.f32 %v1169_v37  ;;  %v1166_v36 = vadd.f32 1e-12, %v1134_v0  ;;  %v1135_v10 = vmul.f32 0.03125, %v1091_v50 }
 0x222   :  { %v1902_v57 = vpop.eup %1901  ;;  %1457 = vst.msk [vmem:[%s2741_s6 + $0x30] sm:$0xf] %vm1444_vm2, %v1628_v49  ;;  %v1629_v47 = vpack.c.bf16 %v1297_v58, %v1297_v58  ;;  %v1302_v59 = vadd.f32 %v2510_v40, %v1263_v11  ;;  %v1264_v9 = vmul.f32 %v2504_v20, %v1225_v48  ;;  %v1222_v5 = vmul.f32 %v1900_v30, %v2414_v55  ;;  %v1100_v2 = vpop.xlane.xlu0 %1099 }
 0x223   :  { %v1223_v38 = vmul.f32 %v1902_v57, %v2420_v3  ;;  %1915 = vrsqrt.f32 %v1166_v36  ;;  %v1167_v39 = vadd.f32 1e-12, %v1135_v10  ;;  %v1138_v27 = vmul.f32 0.03125, %v1100_v2 }
 0x224   :  { %1458 = vst.msk [vmem:[%s2741_s6 + $0x34] sm:$0xf] %vm1444_vm2, %v1629_v47  ;;  %v1634_v21 = vpack.c.bf16 %v1302_v59, %v1302_v59  ;;  %v1303_v6 = vadd.f32 %v2510_v40, %v1264_v9  ;;  %v1261_v43 = vmul.f32 %v2504_v20, %v1222_v5 }
 0x225   :  { %v1904_v18 = vpop.eup %1903  ;;  %v1262_v1 = vmul.f32 %v2504_v20, %v1223_v38  ;;  %1917 = vrsqrt.f32 %v1167_v39  ;;  %v1170_v55 = vadd.f32 1e-12, %v1138_v27 }
 0x226   :  { %v1906_v15 = vpop.eup %1905  ;;  %1463 = vst.msk [vmem:[%s2741_s6 + $0x48] sm:$0xf] %vm1444_vm2, %v1634_v21  ;;  %v1635_v3 = vpack.c.bf16 %v1303_v6, %v1303_v6  ;;  %v1300_v7 = vadd.f32 %v2510_v40, %v1261_v43  ;;  %v1228_v31 = vmul.f32 %v1904_v18, %v2426_v12  ;;  %v1103_v35 = vpop.xlane.xlu1 %1102 }
 0x227   :  { %v1106_v52 = vpop.xlane.xlu0 %1105  ;;  %v1301_v23 = vadd.f32 %v2510_v40, %v1262_v1  ;;  %v1229_v25 = vmul.f32 %v1906_v15, %v2432_v4  ;;  %1919 = vrsqrt.f32 %v1170_v55  ;;  %v1139_v61 = vmul.f32 0.03125, %v1103_v35 }
 0x228   :  { %v1908_v14 = vpop.eup %1907  ;;  %1464 = vst.msk [vmem:[%s2741_s6 + $0x4c] sm:$0xf] %vm1444_vm2, %v1635_v3  ;;  %v1632_v32 = vpack.c.bf16 %v1300_v7, %v1300_v7  ;;  %v1267_v8 = vmul.f32 %v2504_v20, %v1228_v31  ;;  %v1140_v34 = vmul.f32 0.03125, %v1106_v52 }
 0x229   :  { %v1633_v44 = vpack.c.bf16 %v1301_v23, %v1301_v23  ;;  %v1268_v12 = vmul.f32 %v2504_v20, %v1229_v25  ;;  %v1226_v45 = vmul.f32 %v1908_v14, %v2438_v29  ;;  %v1171_v41 = vadd.f32 1e-12, %v1139_v61 }
 0x22a   :  { %v1910_v62 = vpop.eup %1909  ;;  %1461 = vst.msk [vmem:[%s2741_s6 + $0x40] sm:$0xf] %vm1444_vm2, %v1632_v32  ;;  %v1306_v4 = vadd.f32 %v2510_v40, %v1267_v8  ;;  %v1172_v19 = vadd.f32 1e-12, %v1140_v34  ;;  %v1109_v51 = vpop.xlane.xlu1 %1108 }
 0x22b   :  { %1462 = vst.msk [vmem:[%s2741_s6 + $0x44] sm:$0xf] %vm1444_vm2, %v1633_v44  ;;  %v1307_v56 = vadd.f32 %v2510_v40, %v1268_v12  ;;  %v1265_v29 = vmul.f32 %v2504_v20, %v1226_v45  ;;  %v1227_v28 = vmul.f32 %v1910_v62, %v2444_v22  ;;  %1921 = vrsqrt.f32 %v1171_v41 }
 0x22c   :  { %v1912_v60 = vpop.eup %1911  ;;  %v1638_v17 = vpack.c.bf16 %v1306_v4, %v1306_v4  ;;  %1923 = vrsqrt.f32 %v1172_v19  ;;  %v1141_v24 = vmul.f32 0.03125, %v1109_v51 }
 0x22d   :  { %v1639_v46 = vpack.c.bf16 %v1307_v56, %v1307_v56  ;;  %v1304_v37 = vadd.f32 %v2510_v40, %v1265_v29  ;;  %v1266_v0 = vmul.f32 %v2504_v20, %v1227_v28  ;;  %v1232_v49 = vmul.f32 %v1912_v60, %v2450_v53 }
 0x22e   :  { %v1914_v58 = vpop.eup %1913  ;;  %1467 = vst.msk [vmem:[%s2741_s6 + $0x58] sm:$0xf] %vm1444_vm2, %v1638_v17  ;;  %v1173_v11 = vadd.f32 1e-12, %v1141_v24 }
 0x22f   :  { %1468 = vst.msk [vmem:[%s2741_s6 + $0x5c] sm:$0xf] %vm1444_vm2, %v1639_v46  ;;  %v1636_v22 = vpack.c.bf16 %v1304_v37, %v1304_v37  ;;  %v1305_v48 = vadd.f32 %v2510_v40, %v1266_v0  ;;  %v1271_v50 = vmul.f32 %v2504_v20, %v1232_v49  ;;  %v1233_v30 = vmul.f32 %v1914_v58, %v2456_v42 }
 0x230   :  { %v1916_v53 = vpop.eup %1915  ;;  %1925 = vrsqrt.f32 %v1173_v11 }
 0x231   :  { %1465 = vst.msk [vmem:[%s2741_s6 + $0x50] sm:$0xf] %vm1444_vm2, %v1636_v22  ;;  %v1637_v36 = vpack.c.bf16 %v1305_v48, %v1305_v48  ;;  %v1310_v10 = vadd.f32 %v2510_v40, %v1271_v50  ;;  %v1272_v57 = vmul.f32 %v2504_v20, %v1233_v30  ;;  %v1230_v47 = vmul.f32 %v1916_v53, %v2462_v13 }
 0x232   :  { %v1918_v59 = vpop.eup %1917 }
 0x233   :  { %1466 = vst.msk [vmem:[%s2741_s6 + $0x54] sm:$0xf] %vm1444_vm2, %v1637_v36  ;;  %v1642_v42 = vpack.c.bf16 %v1310_v10, %v1310_v10  ;;  %v1311_v9 = vadd.f32 %v2510_v40, %v1272_v57  ;;  %v1269_v5 = vmul.f32 %v2504_v20, %v1230_v47  ;;  %v1231_v2 = vmul.f32 %v1918_v59, %v2468_v54 }
 0x234   :  { %v1920_v38 = vpop.eup %1919 }
 0x235   :  { %1471 = vst.msk [vmem:[%s2741_s6 + $0x68] sm:$0xf] %vm1444_vm2, %v1642_v42  ;;  %v1643_v13 = vpack.c.bf16 %v1311_v9, %v1311_v9  ;;  %v1308_v39 = vadd.f32 %v2510_v40, %v1269_v5  ;;  %v1270_v27 = vmul.f32 %v2504_v20, %v1231_v2  ;;  %v1234_v21 = vmul.f32 %v1920_v38, %v2474_v33 }
 0x237   :  { %1472 = vst.msk [vmem:[%s2741_s6 + $0x6c] sm:$0xf] %vm1444_vm2, %v1643_v13  ;;  %v1640_v6 = vpack.c.bf16 %v1308_v39, %v1308_v39  ;;  %v1309_v54 = vadd.f32 %v2510_v40, %v1270_v27  ;;  %v1273_v43 = vmul.f32 %v2504_v20, %v1234_v21 }
 0x238   :  { %v1922_v18 = vpop.eup %1921 }
 0x239   :  { %v1924_v1 = vpop.eup %1923  ;;  %1469 = vst.msk [vmem:[%s2741_s6 + $0x60] sm:$0xf] %vm1444_vm2, %v1640_v6  ;;  %v1641_v55 = vpack.c.bf16 %v1309_v54, %v1309_v54  ;;  %v1312_v33 = vadd.f32 %v2510_v40, %v1273_v43  ;;  %v1235_v15 = vmul.f32 %v1922_v18, %v2483_v16 }
 0x23a   :  { %v1236_v3 = vmul.f32 %v1924_v1, %v2486_v63 }
 0x23b   :  { %1470 = vst.msk [vmem:[%s2741_s6 + $0x64] sm:$0xf] %vm1444_vm2, %v1641_v55  ;;  %v1644_v7 = vpack.c.bf16 %v1312_v33, %v1312_v33  ;;  %v1274_v31 = vmul.f32 %v2504_v20, %v1235_v15 }
 0x23c   :  { %v1275_v35 = vmul.f32 %v2504_v20, %v1236_v3 }
 0x23d   :  { %v1926_v52 = vpop.eup %1925  ;;  %1473 = vst.msk [vmem:[%s2741_s6 + $0x70] sm:$0xf] %vm1444_vm2, %v1644_v7  ;;  %v1313_v16 = vadd.f32 %v2510_v40, %v1274_v31 }
 0x23e   :  { %v1314_v63 = vadd.f32 %v2510_v40, %v1275_v35  ;;  %v1237_v23 = vmul.f32 %v1926_v52, %v2494_v26 }
 0x23f   :  { %v1645_v25 = vpack.c.bf16 %v1313_v16, %v1313_v16 }
 0x240   :  { %v1646_v61 = vpack.c.bf16 %v1314_v63, %v1314_v63  ;;  %v1276_v14 = vmul.f32 %v2504_v20, %v1237_v23 }
 0x241   :  { %1474 = vst.msk [vmem:[%s2741_s6 + $0x74] sm:$0xf] %vm1444_vm2, %v1645_v25 }
 0x242   :  { %1475 = vst.msk [vmem:[%s2741_s6 + $0x78] sm:$0xf] %vm1444_vm2, %v1646_v61  ;;  %v1315_v32 = vadd.f32 %v2510_v40, %v1276_v14 }
 0x244   :  { %v1647_v8 = vpack.c.bf16 %v1315_v32, %v1315_v32 }
 0x246   :  { %1476 = vst.msk [vmem:[%s2741_s6 + $0x7c] sm:$0xf] %vm1444_vm2, %v1647_v8 }

// kernel: jointbert_forward.17
= control target key start
LH: loop header
LB: loop body
LE: loop exit
PB: predicated region body
PF: predicated region fallthrough
CT: control target
= control target key end

     0   :  { %vm19_vm0 = vcmask 785408   ;;  %v1712_v1 = vmov 0.0   ;;  %vm212_vm1 = vcmask 261120   ;;  %vm689_vm2 = vcmask 125952   ;;  %s1714_s28 = smov 96   ;;  %s1715_s18 = smov 80   ;;  %s3093_s1 = inlined_call_operand.vmem [shape: bf16[32,96], index: 1, kind: input, shape index: {}]   ;;  %s3094_s0 = inlined_call_operand.vmem [shape: bf16[256,32], index: 0, kind: input, shape index: {}]   ;;  %s3095_s2 = inlined_call_operand.vmem [shape: f32[1,96], index: 2, kind: input, shape index: {}]   ;;  %s3096_s3 = inlined_call_operand.vmem [shape: bf16[6,256,16], index: 3, kind: output, shape index: {}]  }
   0x1   :  { %v1694_v0 = vld [vmem:[%s3093_s1 + $0x8] sm:$0xff]   ;;  %22 = vst.msk [vmem:[#allocation2 + $0x10] sm:$0xff] %vm19_vm0, %v1712_v1  ;;  %20 = vst.msk [vmem:[#allocation2] sm:$0xff] %vm19_vm0, %v1712_v1  ;;  %v1695_v2 = vld [vmem:[%s3093_s1] sm:$0xff]   ;;  %s1716_s7 = smov 64   ;;  %s1717_s17 = smov 48  }
   0x2   :  { %21 = vst.msk [vmem:[#allocation2 + $0x8] sm:$0xff] %vm19_vm0, %v1712_v1  ;;  %23 = vst.msk [vmem:[#allocation2 + $0x18] sm:$0xff] %vm19_vm0, %v1712_v1  ;;  %1648 = vmatprep.subr.bf16.mxu0 %v1694_v0  ;;  %1684 = vmatprep.subr.bf16.mxu1 %v1694_v0  ;;  %v1696_v3 = vld [vmem:[%s3094_s0] sm:$0xff]   ;;  %v1698_v5 = vld [vmem:[%s3094_s0 + $0x8] sm:$0xff]  }
   0x3   :  { %24 = vst.msk [vmem:[#allocation2 + $0x20] sm:$0xff] %vm19_vm0, %v1712_v1  ;;  %25 = vst.msk [vmem:[#allocation2 + $0x28] sm:$0xff] %vm19_vm0, %v1712_v1  ;;  %1649 = vmatpush3.bf16.msra.mxu0 %v1694_v0  ;;  %1686 = vmatpush3.bf16.msra.mxu1 %v1694_v0  ;;  %v1697_v4 = vld [vmem:[%s3094_s0 + $0x40] sm:$0xff]   ;;  %v1699_v6 = vld [vmem:[%s3094_s0 + $0x48] sm:$0xff]  }
   0x4   :  { %26 = vst.msk [vmem:[#allocation2 + $0x30] sm:$0xff] %vm19_vm0, %v1712_v1  ;;  %27 = vst.msk [vmem:[#allocation2 + $0x38] sm:$0xff] %vm19_vm0, %v1712_v1  ;;  %1650 = vmatprep.subr.bf16.mxu0 %v1695_v2  ;;  %1685 = vmatprep.subr.bf16.mxu1 %v1695_v2  ;;  %v1700_v7 = vld [vmem:[%s3094_s0 + $0x10] sm:$0xff]   ;;  %v1701_v9 = vld [vmem:[%s3094_s0 + $0x18] sm:$0xff]  }
   0x5   :  { %28 = vst.msk [vmem:[#allocation2 + $0x40] sm:$0xff] %vm19_vm0, %v1712_v1  ;;  %29 = vst.msk [vmem:[#allocation2 + $0x48] sm:$0xff] %vm19_vm0, %v1712_v1  ;;  %1652 = vmatprep.mubr.msk.bf16.mxu0 %vm212_vm1, %v1696_v3  ;;  %1668 = vmatprep.mubr.msk.bf16.mxu1 %vm212_vm1, %v1697_v4  ;;  %v1702_v8 = vld [vmem:[%s3094_s0 + $0x50] sm:$0xff]   ;;  %v1703_v10 = vld [vmem:[%s3094_s0 + $0x58] sm:$0xff]  }
   0x6   :  { %30 = vst.msk [vmem:[#allocation2 + $0x50] sm:$0xff] %vm19_vm0, %v1712_v1  ;;  %31 = vst.msk [vmem:[#allocation2 + $0x58] sm:$0xff] %vm19_vm0, %v1712_v1  ;;  %v1704_v11 = vld [vmem:[%s3094_s0 + $0x20] sm:$0xff]   ;;  %v1705_v13 = vld [vmem:[%s3094_s0 + $0x28] sm:$0xff]  }
   0x7   :  { %32 = vst.msk [vmem:[#allocation2 + $0x60] sm:$0xff] %vm19_vm0, %v1712_v1  ;;  %33 = vst.msk [vmem:[#allocation2 + $0x68] sm:$0xff] %vm19_vm0, %v1712_v1  ;;  %1651 = vmatpush3.bf16.msra.mxu0 %v1695_v2  ;;  %1687 = vmatpush3.bf16.msra.mxu1 %v1695_v2  ;;  %v1706_v12 = vld [vmem:[%s3094_s0 + $0x60] sm:$0xff]   ;;  %v1707_v14 = vld [vmem:[%s3094_s0 + $0x68] sm:$0xff]  }
   0x8   :  { %34 = vst.msk [vmem:[#allocation2 + $0x70] sm:$0xff] %vm19_vm0, %v1712_v1  ;;  %35 = vst.msk [vmem:[#allocation2 + $0x78] sm:$0xff] %vm19_vm0, %v1712_v1  ;;  %v1708_v15 = vld [vmem:[%s3094_s0 + $0x30] sm:$0xff]   ;;  %v1709_v17 = vld [vmem:[%s3094_s0 + $0x38] sm:$0xff]  }
   0x9   :  { %36 = vst.msk [vmem:[#allocation2 + $0x80] sm:$0xff] %vm19_vm0, %v1712_v1  ;;  %37 = vst.msk [vmem:[#allocation2 + $0x88] sm:$0xff] %vm19_vm0, %v1712_v1  ;;  %v1710_v16 = vld [vmem:[%s3094_s0 + $0x70] sm:$0xff]   ;;  %v1711_v18 = vld [vmem:[%s3094_s0 + $0x78] sm:$0xff]  }
   0xa   :  { %38 = vst.msk [vmem:[#allocation2 + $0x90] sm:$0xff] %vm19_vm0, %v1712_v1  ;;  %39 = vst.msk [vmem:[#allocation2 + $0x98] sm:$0xff] %vm19_vm0, %v1712_v1  ;;  %1653 = vmatmul.mubr.msk.bf16.vlgmr.msra.gmra.mxu0 %vm212_vm1, %v1698_v5  ;;  %1669 = vmatmul.mubr.msk.bf16.vlgmr.msra.gmra.mxu1 %vm212_vm1, %v1699_v6  ;;  %v54_v19 = vld [vmem:[#allocation2 + $0x10] sm:$0xff]  ;;  %v52_v23 = vld [vmem:[#allocation2] sm:$0xff] }
   0xb   :  { %40 = vst.msk [vmem:[#allocation2 + $0xa0] sm:$0xff] %vm19_vm0, %v1712_v1  ;;  %41 = vst.msk [vmem:[#allocation2 + $0xa8] sm:$0xff] %vm19_vm0, %v1712_v1  ;;  %1656 = vmatprep.mubr.msk.bf16.mxu0 %vm212_vm1, %v1700_v7  ;;  %1672 = vmatprep.mubr.msk.bf16.mxu1 %vm212_vm1, %v1702_v8  ;;  %v55_v29 = vld [vmem:[#allocation2 + $0x18] sm:$0xff]  ;;  %v53_v35 = vld [vmem:[#allocation2 + $0x8] sm:$0xff] }
   0xc   :  { %42 = vst.msk [vmem:[#allocation2 + $0xb0] sm:$0xff] %vm19_vm0, %v1712_v1  ;;  %43 = vst.msk [vmem:[#allocation2 + $0xb8] sm:$0xff] %vm19_vm0, %v1712_v1  ;;  %v58_v41 = vld [vmem:[#allocation2 + $0x30] sm:$0xff]  ;;  %v1849_v45 = vld [vmem:[%s3095_s2] ss:$0 sm:$0xff]  ;;  %s1713_s2 = smov 112  }
   0xd   :  { %44 = vst.msk [vmem:[#allocation2 + $0xc0] sm:$0xff] %vm19_vm0, %v1712_v1  ;;  %45 = vst.msk [vmem:[#allocation2 + $0xc8] sm:$0xff] %vm19_vm0, %v1712_v1  ;;  %v56_v47 = vld [vmem:[#allocation2 + $0x20] sm:$0xff]  ;;  %v59_v59 = vld [vmem:[#allocation2 + $0x38] sm:$0xff] }
   0xe   :  { %46 = vst.msk [vmem:[#allocation2 + $0xd0] sm:$0xff] %vm19_vm0, %v1712_v1  ;;  %47 = vst.msk [vmem:[#allocation2 + $0xd8] sm:$0xff] %vm19_vm0, %v1712_v1  ;;  %v57_v6 = vld [vmem:[#allocation2 + $0x28] sm:$0xff] }
   0xf   :  { %48 = vst.msk [vmem:[#allocation2 + $0xe0] sm:$0xff] %vm19_vm0, %v1712_v1  ;;  %49 = vst.msk [vmem:[#allocation2 + $0xe8] sm:$0xff] %vm19_vm0, %v1712_v1 }
  0x10   :  { %50 = vst.msk [vmem:[#allocation2 + $0xf0] sm:$0xff] %vm19_vm0, %v1712_v1  ;;  %51 = vst.msk [vmem:[#allocation2 + $0xf8] sm:$0xff] %vm19_vm0, %v1712_v1  ;;  %v68_v24 = vld [vmem:[#allocation2 + $0x80] sm:$0xff]  ;;  %v69_v36 = vld [vmem:[#allocation2 + $0x88] sm:$0xff] }
  0x11   :  { %v70_v20 = vld [vmem:[#allocation2 + $0x90] sm:$0xff]  ;;  %v71_v30 = vld [vmem:[#allocation2 + $0x98] sm:$0xff] }
  0x12   :  { %1657 = vmatmul.mubr.msk.bf16.gmra.mxu0 %vm212_vm1, %v1701_v9  ;;  %1673 = vmatmul.mubr.msk.bf16.gmra.mxu1 %vm212_vm1, %v1703_v10  ;;  %v72_v49 = vld [vmem:[#allocation2 + $0xa0] sm:$0xff]  ;;  %v73_v7 = vld [vmem:[#allocation2 + $0xa8] sm:$0xff] }
  0x13   :  { %1660 = vmatprep.mubr.msk.bf16.mxu0 %vm212_vm1, %v1704_v11  ;;  %1676 = vmatprep.mubr.msk.bf16.mxu1 %vm212_vm1, %v1706_v12  ;;  %v74_v42 = vld [vmem:[#allocation2 + $0xb0] sm:$0xff]  ;;  %v75_v61 = vld [vmem:[#allocation2 + $0xb8] sm:$0xff] }
  0x1a   :  { %1661 = vmatmul.mubr.msk.bf16.gmra.mxu0 %vm212_vm1, %v1705_v13  ;;  %1677 = vmatmul.mubr.msk.bf16.gmra.mxu1 %vm212_vm1, %v1707_v14 }
  0x1b   :  { %1664 = vmatprep.mubr.msk.bf16.mxu0 %vm212_vm1, %v1708_v15  ;;  %1680 = vmatprep.mubr.msk.bf16.mxu1 %vm212_vm1, %v1710_v16 }
  0x22   :  { %1665 = vmatmul.mubr.msk.bf16.gmra.mxu0 %vm212_vm1, %v1709_v17  ;;  %1681 = vmatmul.mubr.msk.bf16.gmra.mxu1 %vm212_vm1, %v1711_v18  ;;  %v62_v17 = vld [vmem:[#allocation2 + $0x50] sm:$0xff] }
  0x23   :  { %v78_v18 = vld [vmem:[#allocation2 + $0xd0] sm:$0xff] }
  0xca   :  { %v1654_v21 = vpop.f32.mrf.mxu0  ;;  %v1670_v22 = vpop.f32.mrf.mxu1 }
  0xcb   :  { %v424_v25 = vadd.f32 %v1654_v21, %v54_v19  ;;  %v440_v26 = vadd.f32 %v1670_v22, %v70_v20 }
  0xcc   :  { %v295_v27 = vpop.f32.mrf.mxu0  ;;  %v359_v28 = vpop.f32.mrf.mxu1 }
  0xcd   :  { %457 = vst.msk [vmem:[#allocation2 + $0x10] sm:$0xff] %vm19_vm0, %v424_v25  ;;  %473 = vst.msk [vmem:[#allocation2 + $0x90] sm:$0xff] %vm19_vm0, %v440_v26  ;;  %v422_v31 = vadd.f32 %v295_v27, %v52_v23  ;;  %v438_v32 = vadd.f32 %v359_v28, %v68_v24 }
  0xce   :  { %v1655_v33 = vpop.f32.mrf.mxu0  ;;  %v1671_v34 = vpop.f32.mrf.mxu1 }
  0xcf   :  { %455 = vst.msk [vmem:[#allocation2] sm:$0xff] %vm19_vm0, %v422_v31  ;;  %471 = vst.msk [vmem:[#allocation2 + $0x80] sm:$0xff] %vm19_vm0, %v438_v32  ;;  %v425_v37 = vadd.f32 %v1655_v33, %v55_v29  ;;  %v441_v38 = vadd.f32 %v1671_v34, %v71_v30  ;;  %v60_v30 = vld [vmem:[#allocation2 + $0x40] sm:$0xff] }
  0xd0   :  { %v298_v39 = vpop.f32.mrf.mxu0  ;;  %v362_v40 = vpop.f32.mrf.mxu1  ;;  %v76_v31 = vld [vmem:[#allocation2 + $0xc0] sm:$0xff] }
  0xd1   :  { %458 = vst.msk [vmem:[#allocation2 + $0x18] sm:$0xff] %vm19_vm0, %v425_v37  ;;  %474 = vst.msk [vmem:[#allocation2 + $0x98] sm:$0xff] %vm19_vm0, %v441_v38  ;;  %v423_v43 = vadd.f32 %v298_v39, %v53_v35  ;;  %v439_v44 = vadd.f32 %v362_v40, %v69_v36  ;;  %v63_v36 = vld [vmem:[#allocation2 + $0x58] sm:$0xff] }
  0xd2   :  { %v1658_v46 = vpop.f32.mrf.mxu0  ;;  %v1674_v48 = vpop.f32.mrf.mxu1 }
  0xd3   :  { %456 = vst.msk [vmem:[#allocation2 + $0x8] sm:$0xff] %vm19_vm0, %v423_v43  ;;  %472 = vst.msk [vmem:[#allocation2 + $0x88] sm:$0xff] %vm19_vm0, %v439_v44  ;;  %v428_v50 = vadd.f32 %v1658_v46, %v58_v41  ;;  %v444_v51 = vadd.f32 %v1674_v48, %v74_v42  ;;  %v79_v42 = vld [vmem:[#allocation2 + $0xd8] sm:$0xff] }
  0xd4   :  { %v508_v52 = vld [vmem:[#allocation2 + $0x90] sm:$0xff]  ;;  %v311_v54 = vpop.f32.mrf.mxu0  ;;  %v375_v55 = vpop.f32.mrf.mxu1 }
  0xd5   :  { %v492_v53 = vld [vmem:[#allocation2 + $0x10] sm:$0xff]  ;;  %v547_v56 = vadd.f32 %v1849_v45, %v508_v52  ;;  %461 = vst.msk [vmem:[#allocation2 + $0x30] sm:$0xff] %vm19_vm0, %v428_v50  ;;  %v426_v58 = vadd.f32 %v311_v54, %v56_v47  ;;  %477 = vst.msk [vmem:[#allocation2 + $0xb0] sm:$0xff] %vm19_vm0, %v444_v51  ;;  %v442_v60 = vadd.f32 %v375_v55, %v72_v49  ;;  %v61_v49 = vld [vmem:[#allocation2 + $0x48] sm:$0xff] }
  0xd6   :  { %v531_v57 = vadd.f32 %v1849_v45, %v492_v53  ;;  %v490_v62 = vld [vmem:[#allocation2] sm:$0xff]  ;;  %v1659_v0 = vpop.f32.mrf.mxu0  ;;  %v1675_v1 = vpop.f32.mrf.mxu1 }
  0xd7   :  { %v506_v63 = vld [vmem:[#allocation2 + $0x80] sm:$0xff]  ;;  %v1857_v2 = vpack.c.bf16 %v547_v56, %v547_v56  ;;  %v529_v4 = vadd.f32 %v1849_v45, %v490_v62  ;;  %459 = vst.msk [vmem:[#allocation2 + $0x20] sm:$0xff] %vm19_vm0, %v426_v58  ;;  %475 = vst.msk [vmem:[#allocation2 + $0xa0] sm:$0xff] %vm19_vm0, %v442_v60  ;;  %v429_v10 = vadd.f32 %v1659_v0, %v59_v59  ;;  %v77_v56 = vld [vmem:[#allocation2 + $0xc8] sm:$0xff] }
  0xd8   :  { %v1859_v3 = vpack.c.bf16 %v531_v57, %v531_v57  ;;  %v545_v5 = vadd.f32 %v1849_v45, %v506_v63  ;;  %v493_v8 = vld [vmem:[#allocation2 + $0x18] sm:$0xff]  ;;  %v314_v11 = vpop.f32.mrf.mxu0  ;;  %v445_v12 = vadd.f32 %v1675_v1, %v75_v61  ;;  %v378_v13 = vpop.f32.mrf.mxu1 }
  0xd9   :  { %v509_v9 = vld [vmem:[#allocation2 + $0x98] sm:$0xff]  ;;  %758 = vrot.lane.b32.xlu0 %v1857_v2, %s1713_s2  ;;  %708 = vst.msk [vmem:[%s3096_s3 + $0x48] sm:$0xf] %vm689_vm2, %v1857_v2  ;;  %v532_v14 = vadd.f32 %v1849_v45, %v493_v8  ;;  %v1881_v16 = vpack.c.bf16 %v529_v4, %v529_v4  ;;  %v427_v22 = vadd.f32 %v314_v11, %v57_v6 }
  0xda   :  { %726 = vrot.lane.b32.xlu1 %v1859_v3, %s1713_s2  ;;  %692 = vst.msk [vmem:[%s3096_s3 + $0x8] sm:$0xf] %vm689_vm2, %v1859_v3  ;;  %v548_v15 = vadd.f32 %v1849_v45, %v509_v9  ;;  %v1883_v19 = vpack.c.bf16 %v545_v5, %v545_v5  ;;  %v507_v20 = vld [vmem:[#allocation2 + $0x88] sm:$0xff]  ;;  %v443_v23 = vadd.f32 %v378_v13, %v73_v7  ;;  %v1662_v24 = vpop.f32.mrf.mxu0  ;;  %v1678_v25 = vpop.f32.mrf.mxu1 }
  0xdb   :  { %v491_v21 = vld [vmem:[#allocation2 + $0x8] sm:$0xff]  ;;  %462 = vst.msk [vmem:[#allocation2 + $0x38] sm:$0xff] %vm19_vm0, %v429_v10  ;;  %478 = vst.msk [vmem:[#allocation2 + $0xb8] sm:$0xff] %vm19_vm0, %v445_v12  ;;  %v1887_v26 = vpack.c.bf16 %v532_v14, %v532_v14  ;;  %v546_v28 = vadd.f32 %v1849_v45, %v507_v20  ;;  %v432_v34 = vadd.f32 %v1662_v24, %v62_v17 }
  0xdc   :  { %v1889_v27 = vpack.c.bf16 %v548_v15, %v548_v15  ;;  %690 = vst.msk [vmem:[%s3096_s3] sm:$0xf] %vm689_vm2, %v1881_v16  ;;  %v530_v29 = vadd.f32 %v1849_v45, %v491_v21  ;;  %706 = vst.msk [vmem:[%s3096_s3 + $0x40] sm:$0xf] %vm689_vm2, %v1883_v19  ;;  %v496_v32 = vld [vmem:[#allocation2 + $0x30] sm:$0xff]  ;;  %v327_v35 = vpop.f32.mrf.mxu0  ;;  %v448_v37 = vadd.f32 %v1678_v25, %v78_v18  ;;  %v391_v38 = vpop.f32.mrf.mxu1 }
  0xdd   :  { %460 = vst.msk [vmem:[#allocation2 + $0x28] sm:$0xff] %vm19_vm0, %v427_v22  ;;  %476 = vst.msk [vmem:[#allocation2 + $0xa8] sm:$0xff] %vm19_vm0, %v443_v23  ;;  %v512_v33 = vld [vmem:[#allocation2 + $0xb0] sm:$0xff]  ;;  %855 = vrot.lane.b32.xlu0 %v1859_v3, %s1714_s28  ;;  %v1919_v39 = vpack.c.bf16 %v546_v28, %v546_v28  ;;  %v535_v41 = vadd.f32 %v1849_v45, %v496_v32  ;;  %v430_v47 = vadd.f32 %v327_v35, %v60_v30 }
  0xde   :  { %728 = vrot.lane.b32.xlu1 %v1887_v26, %s1713_s2  ;;  %693 = vst.msk [vmem:[%s3096_s3 + $0xc] sm:$0xf] %vm689_vm2, %v1887_v26  ;;  %709 = vst.msk [vmem:[%s3096_s3 + $0x4c] sm:$0xf] %vm689_vm2, %v1889_v27  ;;  %v1921_v40 = vpack.c.bf16 %v530_v29, %v530_v29  ;;  %v551_v43 = vadd.f32 %v1849_v45, %v512_v33  ;;  %v494_v44 = vld [vmem:[#allocation2 + $0x20] sm:$0xff]  ;;  %v1663_v48 = vpop.f32.mrf.mxu0  ;;  %v446_v50 = vadd.f32 %v391_v38, %v76_v31  ;;  %v1679_v51 = vpop.f32.mrf.mxu1 }
  0xdf   :  { %v510_v46 = vld [vmem:[#allocation2 + $0xa0] sm:$0xff]  ;;  %465 = vst.msk [vmem:[#allocation2 + $0x50] sm:$0xff] %vm19_vm0, %v432_v34  ;;  %481 = vst.msk [vmem:[#allocation2 + $0xd0] sm:$0xff] %vm19_vm0, %v448_v37  ;;  %v1937_v52 = vpack.c.bf16 %v535_v41, %v535_v41  ;;  %v533_v53 = vadd.f32 %v1849_v45, %v494_v44  ;;  %v433_v55 = vadd.f32 %v1663_v48, %v63_v36 }
  0xe0   :  { %707 = vst.msk [vmem:[%s3096_s3 + $0x44] sm:$0xf] %vm689_vm2, %v1919_v39  ;;  %691 = vst.msk [vmem:[%s3096_s3 + $0x4] sm:$0xf] %vm689_vm2, %v1921_v40  ;;  %v549_v54 = vadd.f32 %v1849_v45, %v510_v46  ;;  %v1941_v57 = vpack.c.bf16 %v551_v43, %v551_v43  ;;  %v330_v58 = vpop.f32.mrf.mxu0  ;;  %v449_v59 = vadd.f32 %v1679_v51, %v79_v42  ;;  %v394_v60 = vpop.f32.mrf.mxu1  ;;  %v66_v46 = vld [vmem:[#allocation2 + $0x70] sm:$0xff] }
  0xe1   :  { %463 = vst.msk [vmem:[#allocation2 + $0x40] sm:$0xff] %vm19_vm0, %v430_v47  ;;  %479 = vst.msk [vmem:[#allocation2 + $0xc0] sm:$0xff] %vm19_vm0, %v446_v50  ;;  %887 = vrot.lane.b32.xlu0 %v1857_v2, %s1714_s28  ;;  %v1954_v63 = vpack.c.bf16 %v533_v53, %v533_v53  ;;  %v431_v1 = vadd.f32 %v330_v58, %v61_v49  ;;  %v447_v6 = vadd.f32 %v394_v60, %v77_v56  ;;  %v64_v49 = vld [vmem:[#allocation2 + $0x60] sm:$0xff]  ;;  %v67_v53 = vld [vmem:[#allocation2 + $0x78] sm:$0xff] }
  0xe2   :  { %760 = vrot.lane.b32.xlu1 %v1889_v27, %s1713_s2  ;;  %696 = vst.msk [vmem:[%s3096_s3 + $0x18] sm:$0xf] %vm689_vm2, %v1937_v52  ;;  %v497_v61 = vld [vmem:[#allocation2 + $0x38] sm:$0xff]  ;;  %v1956_v0 = vpack.c.bf16 %v549_v54, %v549_v54  ;;  %712 = vst.msk [vmem:[%s3096_s3 + $0x58] sm:$0xf] %vm689_vm2, %v1941_v57  ;;  %v1666_v47 = vpop.f32.mrf.mxu0  ;;  %v1682_v56 = vpop.f32.mrf.mxu1  ;;  %v65_v60 = vld [vmem:[#allocation2 + $0x68] sm:$0xff] }
  0xe3   :  { %v513_v62 = vld [vmem:[#allocation2 + $0xb8] sm:$0xff]  ;;  %466 = vst.msk [vmem:[#allocation2 + $0x58] sm:$0xff] %vm19_vm0, %v433_v55  ;;  %v536_v4 = vadd.f32 %v1849_v45, %v497_v61  ;;  %482 = vst.msk [vmem:[#allocation2 + $0xd8] sm:$0xff] %vm19_vm0, %v449_v59  ;;  %v436_v48 = vadd.f32 %v1666_v47, %v66_v46  ;;  %v82_v55 = vld [vmem:[#allocation2 + $0xf0] sm:$0xff] }
  0xe4   :  { %v552_v5 = vadd.f32 %v1849_v45, %v513_v62  ;;  %694 = vst.msk [vmem:[%s3096_s3 + $0x10] sm:$0xf] %vm689_vm2, %v1954_v63  ;;  %v495_v7 = vld [vmem:[#allocation2 + $0x28] sm:$0xff]  ;;  %710 = vst.msk [vmem:[%s3096_s3 + $0x50] sm:$0xf] %vm689_vm2, %v1956_v0  ;;  %v343_v50 = vpop.f32.mrf.mxu0  ;;  %v452_v59 = vadd.f32 %v1682_v56, %v82_v55  ;;  %v80_v61 = vld [vmem:[#allocation2 + $0xe0] sm:$0xff] }
  0xe5   :  { %v511_v8 = vld [vmem:[#allocation2 + $0xa8] sm:$0xff]  ;;  %464 = vst.msk [vmem:[#allocation2 + $0x48] sm:$0xff] %vm19_vm0, %v431_v1  ;;  %v1978_v9 = vpack.c.bf16 %v536_v4, %v536_v4  ;;  %v534_v11 = vadd.f32 %v1849_v45, %v495_v7  ;;  %480 = vst.msk [vmem:[#allocation2 + $0xc8] sm:$0xff] %vm19_vm0, %v447_v6  ;;  %984 = vrot.lane.b32.xlu0 %v1859_v3, %s1715_s18  ;;  %v434_v51 = vadd.f32 %v343_v50, %v64_v49  ;;  %v407_v1 = vpop.f32.mrf.mxu1  ;;  %v83_v6 = vld [vmem:[#allocation2 + $0xf8] sm:$0xff] }
  0xe6   :  { %v1980_v10 = vpack.c.bf16 %v552_v5, %v552_v5  ;;  %v550_v12 = vadd.f32 %v1849_v45, %v511_v8  ;;  %857 = vrot.lane.b32.xlu1 %v1887_v26, %s1714_s28  ;;  %v500_v13 = vld [vmem:[#allocation2 + $0x50] sm:$0xff]  ;;  %469 = vst.msk [vmem:[#allocation2 + $0x70] sm:$0xff] %vm19_vm0, %v436_v48  ;;  %v1667_v54 = vpop.f32.mrf.mxu0  ;;  %485 = vst.msk [vmem:[#allocation2 + $0xf0] sm:$0xff] %vm19_vm0, %v452_v59  ;;  %v450_v5 = vadd.f32 %v407_v1, %v80_v61 }
  0xe7   :  { %v516_v14 = vld [vmem:[#allocation2 + $0xd0] sm:$0xff]  ;;  %697 = vst.msk [vmem:[%s3096_s3 + $0x1c] sm:$0xf] %vm689_vm2, %v1978_v9  ;;  %v1999_v15 = vpack.c.bf16 %v534_v11, %v534_v11  ;;  %v539_v18 = vadd.f32 %v1849_v45, %v500_v13  ;;  %v437_v58 = vadd.f32 %v1667_v54, %v67_v53  ;;  %v1683_v7 = vpop.f32.mrf.mxu1  ;;  %v81_v11 = vld [vmem:[#allocation2 + $0xe8] sm:$0xff] }
  0xe8   :  { %713 = vst.msk [vmem:[%s3096_s3 + $0x5c] sm:$0xf] %vm689_vm2, %v1980_v10  ;;  %v2001_v17 = vpack.c.bf16 %v550_v12, %v550_v12  ;;  %v555_v20 = vadd.f32 %v1849_v45, %v516_v14  ;;  %v498_v21 = vld [vmem:[#allocation2 + $0x40] sm:$0xff]  ;;  %v346_v62 = vpop.f32.mrf.mxu0  ;;  %v453_v8 = vadd.f32 %v1683_v7, %v83_v6 }
  0xe9   :  { %v514_v22 = vld [vmem:[#allocation2 + $0xc0] sm:$0xff]  ;;  %695 = vst.msk [vmem:[%s3096_s3 + $0x14] sm:$0xf] %vm689_vm2, %v1999_v15  ;;  %v2015_v23 = vpack.c.bf16 %v539_v18, %v539_v18  ;;  %v537_v28 = vadd.f32 %v1849_v45, %v498_v21  ;;  %1016 = vrot.lane.b32.xlu0 %v1857_v2, %s1715_s18  ;;  %v435_v4 = vadd.f32 %v346_v62, %v65_v60  ;;  %v410_v12 = vpop.f32.mrf.mxu1 }
  0xea   :  { %711 = vst.msk [vmem:[%s3096_s3 + $0x54] sm:$0xf] %vm689_vm2, %v2001_v17  ;;  %v501_v24 = vld [vmem:[#allocation2 + $0x58] sm:$0xff]  ;;  %v2017_v25 = vpack.c.bf16 %v555_v20, %v555_v20  ;;  %v553_v29 = vadd.f32 %v1849_v45, %v514_v22  ;;  %889 = vrot.lane.b32.xlu1 %v1889_v27, %s1714_s28  ;;  %v451_v13 = vadd.f32 %v410_v12, %v81_v11 }
  0xeb   :  { %v540_v30 = vadd.f32 %v1849_v45, %v501_v24  ;;  %v517_v31 = vld [vmem:[#allocation2 + $0xd8] sm:$0xff]  ;;  %700 = vst.msk [vmem:[%s3096_s3 + $0x28] sm:$0xf] %vm689_vm2, %v2015_v23  ;;  %v2037_v33 = vpack.c.bf16 %v537_v28, %v537_v28 }
  0xec   :  { %716 = vst.msk [vmem:[%s3096_s3 + $0x68] sm:$0xf] %vm689_vm2, %v2017_v25  ;;  %v556_v32 = vadd.f32 %v1849_v45, %v517_v31  ;;  %v499_v34 = vld [vmem:[#allocation2 + $0x48] sm:$0xff]  ;;  %v2039_v35 = vpack.c.bf16 %v553_v29, %v553_v29 }
  0xed   :  { %v2041_v36 = vpack.c.bf16 %v540_v30, %v540_v30  ;;  %v538_v37 = vadd.f32 %v1849_v45, %v499_v34  ;;  %v515_v38 = vld [vmem:[#allocation2 + $0xc8] sm:$0xff]  ;;  %698 = vst.msk [vmem:[%s3096_s3 + $0x20] sm:$0xf] %vm689_vm2, %v2037_v33  ;;  %1113 = vrot.lane.b32.xlu0 %v1859_v3, %s1716_s7  ;;  %v504_v14 = vld [vmem:[#allocation2 + $0x70] sm:$0xff] }
  0xee   :  { %v2044_v41 = vpack.c.bf16 %v556_v32, %v556_v32  ;;  %714 = vst.msk [vmem:[%s3096_s3 + $0x60] sm:$0xf] %vm689_vm2, %v2039_v35  ;;  %v554_v42 = vadd.f32 %v1849_v45, %v515_v38  ;;  %986 = vrot.lane.b32.xlu1 %v1887_v26, %s1715_s18  ;;  %v543_v21 = vadd.f32 %v1849_v45, %v504_v14  ;;  %v520_v34 = vld [vmem:[#allocation2 + $0xf0] sm:$0xff] }
  0xef   :  { %701 = vst.msk [vmem:[%s3096_s3 + $0x2c] sm:$0xf] %vm689_vm2, %v2041_v36  ;;  %v2066_v43 = vpack.c.bf16 %v538_v37, %v538_v37  ;;  %v559_v46 = vadd.f32 %v1849_v45, %v520_v34 }
  0xf0   :  { %717 = vst.msk [vmem:[%s3096_s3 + $0x6c] sm:$0xf] %vm689_vm2, %v2044_v41  ;;  %v2073_v44 = vpack.c.bf16 %v554_v42, %v554_v42  ;;  %v2133_v30 = vpack.c.bf16 %v543_v21, %v543_v21 }
  0xf1   :  { %699 = vst.msk [vmem:[%s3096_s3 + $0x24] sm:$0xf] %vm689_vm2, %v2066_v43  ;;  %1145 = vrot.lane.b32.xlu0 %v1857_v2, %s1716_s7 }
  0xf2   :  { %715 = vst.msk [vmem:[%s3096_s3 + $0x64] sm:$0xf] %vm689_vm2, %v2073_v44  ;;  %1018 = vrot.lane.b32.xlu1 %v1889_v27, %s1715_s18  ;;  %704 = vst.msk [vmem:[%s3096_s3 + $0x38] sm:$0xf] %vm689_vm2, %v2133_v30 }
  0xf3   :  { %467 = vst.msk [vmem:[#allocation2 + $0x60] sm:$0xff] %vm19_vm0, %v434_v51  ;;  %470 = vst.msk [vmem:[#allocation2 + $0x78] sm:$0xff] %vm19_vm0, %v437_v58  ;;  %v2169_v51 = vpack.c.bf16 %v559_v46, %v559_v46 }
  0xf4   :  { %468 = vst.msk [vmem:[#allocation2 + $0x68] sm:$0xff] %vm19_vm0, %v435_v4  ;;  %483 = vst.msk [vmem:[#allocation2 + $0xe0] sm:$0xff] %vm19_vm0, %v450_v5 }
  0xf5   :  { %722 = vrot.lane.b32.xlu0 %v1881_v16, %s1713_s2  ;;  %486 = vst.msk [vmem:[#allocation2 + $0xf8] sm:$0xff] %vm19_vm0, %v453_v8  ;;  %484 = vst.msk [vmem:[#allocation2 + $0xe8] sm:$0xff] %vm19_vm0, %v451_v13 }
  0xf6   :  { %1115 = vrot.lane.b32.xlu1 %v1887_v26, %s1716_s7  ;;  %720 = vst.msk [vmem:[%s3096_s3 + $0x78] sm:$0xf] %vm689_vm2, %v2169_v51 }
  0xf9   :  { %754 = vrot.lane.b32.xlu0 %v1883_v19, %s1713_s2 }
  0xfa   :  { %1147 = vrot.lane.b32.xlu1 %v1889_v27, %s1716_s7  ;;  %v505_v18 = vld [vmem:[#allocation2 + $0x78] sm:$0xff]  ;;  %v502_v20 = vld [vmem:[#allocation2 + $0x60] sm:$0xff] }
  0xfb   :  { %v544_v22 = vadd.f32 %v1849_v45, %v505_v18  ;;  %v541_v24 = vadd.f32 %v1849_v45, %v502_v20  ;;  %v503_v28 = vld [vmem:[#allocation2 + $0x68] sm:$0xff]  ;;  %v518_v42 = vld [vmem:[#allocation2 + $0xe0] sm:$0xff] }
  0xfc   :  { %v542_v29 = vadd.f32 %v1849_v45, %v503_v28  ;;  %v521_v37 = vld [vmem:[#allocation2 + $0xf8] sm:$0xff]  ;;  %v557_v48 = vadd.f32 %v1849_v45, %v518_v42  ;;  %v519_v49 = vld [vmem:[#allocation2 + $0xe8] sm:$0xff] }
  0xfd   :  { %851 = vrot.lane.b32.xlu0 %v1881_v16, %s1714_s28  ;;  %v2135_v31 = vpack.c.bf16 %v544_v22, %v544_v22  ;;  %v2137_v32 = vpack.c.bf16 %v541_v24, %v541_v24  ;;  %v560_v47 = vadd.f32 %v1849_v45, %v521_v37  ;;  %v558_v50 = vadd.f32 %v1849_v45, %v519_v49 }
  0xfe   :  { %756 = vrot.lane.b32.xlu1 %v1919_v39, %s1713_s2  ;;  %v2143_v38 = vpack.c.bf16 %v542_v29, %v542_v29  ;;  %v2173_v54 = vpack.c.bf16 %v557_v48, %v557_v48 }
  0xff   :  { %705 = vst.msk [vmem:[%s3096_s3 + $0x3c] sm:$0xf] %vm689_vm2, %v2135_v31  ;;  %702 = vst.msk [vmem:[%s3096_s3 + $0x30] sm:$0xf] %vm689_vm2, %v2137_v32  ;;  %v2171_v53 = vpack.c.bf16 %v560_v47, %v560_v47  ;;  %v2179_v55 = vpack.c.bf16 %v558_v50, %v558_v50 }
 0x100   :  { %703 = vst.msk [vmem:[%s3096_s3 + $0x34] sm:$0xf] %vm689_vm2, %v2143_v38  ;;  %718 = vst.msk [vmem:[%s3096_s3 + $0x70] sm:$0xf] %vm689_vm2, %v2173_v54 }
 0x101   :  { %883 = vrot.lane.b32.xlu0 %v1883_v19, %s1714_s28  ;;  %721 = vst.msk [vmem:[%s3096_s3 + $0x7c] sm:$0xf] %vm689_vm2, %v2171_v53  ;;  %719 = vst.msk [vmem:[%s3096_s3 + $0x74] sm:$0xf] %vm689_vm2, %v2179_v55 }
 0x102   :  { %853 = vrot.lane.b32.xlu1 %v1921_v40, %s1714_s28 }
 0x105   :  { %980 = vrot.lane.b32.xlu0 %v1881_v16, %s1715_s18 }
 0x106   :  { %885 = vrot.lane.b32.xlu1 %v1919_v39, %s1714_s28 }
 0x109   :  { %1012 = vrot.lane.b32.xlu0 %v1883_v19, %s1715_s18 }
 0x10a   :  { %982 = vrot.lane.b32.xlu1 %v1921_v40, %s1715_s18 }
 0x10d   :  { %1109 = vrot.lane.b32.xlu0 %v1881_v16, %s1716_s7 }
 0x10e   :  { %1014 = vrot.lane.b32.xlu1 %v1919_v39, %s1715_s18 }
 0x111   :  { %1141 = vrot.lane.b32.xlu0 %v1883_v19, %s1716_s7 }
 0x112   :  { %1111 = vrot.lane.b32.xlu1 %v1921_v40, %s1716_s7 }
 0x115   :  { %724 = vrot.lane.b32.xlu0 %v1921_v40, %s1713_s2 }
 0x116   :  { %1143 = vrot.lane.b32.xlu1 %v1919_v39, %s1716_s7 }
 0x119   :  { %734 = vrot.lane.b32.xlu0 %v1937_v52, %s1713_s2 }
 0x11a   :  { %736 = vrot.lane.b32.xlu1 %v1978_v9, %s1713_s2 }
 0x11d   :  { %766 = vrot.lane.b32.xlu0 %v1941_v57, %s1713_s2 }
 0x11e   :  { %768 = vrot.lane.b32.xlu1 %v1980_v10, %s1713_s2 }
 0x121   :  { %863 = vrot.lane.b32.xlu0 %v1937_v52, %s1714_s28 }
 0x122   :  { %865 = vrot.lane.b32.xlu1 %v1978_v9, %s1714_s28 }
 0x125   :  { %895 = vrot.lane.b32.xlu0 %v1941_v57, %s1714_s28 }
 0x126   :  { %897 = vrot.lane.b32.xlu1 %v1980_v10, %s1714_s28 }
 0x129   :  { %992 = vrot.lane.b32.xlu0 %v1937_v52, %s1715_s18 }
 0x12a   :  { %994 = vrot.lane.b32.xlu1 %v1978_v9, %s1715_s18 }
 0x12d   :  { %1024 = vrot.lane.b32.xlu0 %v1941_v57, %s1715_s18 }
 0x12e   :  { %1026 = vrot.lane.b32.xlu1 %v1980_v10, %s1715_s18 }
 0x131   :  { %1121 = vrot.lane.b32.xlu0 %v1937_v52, %s1716_s7 }
 0x132   :  { %1123 = vrot.lane.b32.xlu1 %v1978_v9, %s1716_s7 }
 0x135   :  { %1153 = vrot.lane.b32.xlu0 %v1941_v57, %s1716_s7 }
 0x136   :  { %1155 = vrot.lane.b32.xlu1 %v1980_v10, %s1716_s7 }
 0x139   :  { %730 = vrot.lane.b32.xlu0 %v1954_v63, %s1713_s2 }
 0x13a   :  { %732 = vrot.lane.b32.xlu1 %v1999_v15, %s1713_s2 }
 0x13d   :  { %762 = vrot.lane.b32.xlu0 %v1956_v0, %s1713_s2 }
 0x13e   :  { %764 = vrot.lane.b32.xlu1 %v2001_v17, %s1713_s2 }
 0x141   :  { %859 = vrot.lane.b32.xlu0 %v1954_v63, %s1714_s28 }
 0x142   :  { %861 = vrot.lane.b32.xlu1 %v1999_v15, %s1714_s28 }
 0x145   :  { %891 = vrot.lane.b32.xlu0 %v1956_v0, %s1714_s28 }
 0x146   :  { %893 = vrot.lane.b32.xlu1 %v2001_v17, %s1714_s28 }
 0x149   :  { %988 = vrot.lane.b32.xlu0 %v1954_v63, %s1715_s18 }
 0x14a   :  { %990 = vrot.lane.b32.xlu1 %v1999_v15, %s1715_s18 }
 0x14b   :  { %v759_v45 = vpop.permute.xlu0 %758 }
 0x14c   :  { %v727_v56 = vpop.permute.xlu1 %726  ;;  %1456 = vst.msk [vmem:[%s3096_s3 + $0xc8] sm:$0xf] %vm689_vm2, %v759_v45 }
 0x14d   :  { %1440 = vst.msk [vmem:[%s3096_s3 + $0x88] sm:$0xf] %vm689_vm2, %v727_v56  ;;  %1020 = vrot.lane.b32.xlu0 %v1956_v0, %s1715_s18 }
 0x14e   :  { %1022 = vrot.lane.b32.xlu1 %v2001_v17, %s1715_s18 }
 0x14f   :  { %v856_v58 = vpop.permute.xlu0 %855 }
 0x150   :  { %v729_v59 = vpop.permute.xlu1 %728  ;;  %1472 = vst.msk [vmem:[%s3096_s3 + $0x108] sm:$0xf] %vm689_vm2, %v856_v58 }
 0x151   :  { %1441 = vst.msk [vmem:[%s3096_s3 + $0x8c] sm:$0xf] %vm689_vm2, %v729_v59  ;;  %1117 = vrot.lane.b32.xlu0 %v1954_v63, %s1716_s7 }
 0x152   :  { %1119 = vrot.lane.b32.xlu1 %v1999_v15, %s1716_s7 }
 0x153   :  { %v888_v60 = vpop.permute.xlu0 %887 }
 0x154   :  { %v761_v61 = vpop.permute.xlu1 %760  ;;  %1488 = vst.msk [vmem:[%s3096_s3 + $0x148] sm:$0xf] %vm689_vm2, %v888_v60 }
 0x155   :  { %1457 = vst.msk [vmem:[%s3096_s3 + $0xcc] sm:$0xf] %vm689_vm2, %v761_v61  ;;  %1149 = vrot.lane.b32.xlu0 %v1956_v0, %s1716_s7 }
 0x156   :  { %1151 = vrot.lane.b32.xlu1 %v2001_v17, %s1716_s7 }
 0x157   :  { %v985_v62 = vpop.permute.xlu0 %984 }
 0x158   :  { %v858_v1 = vpop.permute.xlu1 %857  ;;  %1504 = vst.msk [vmem:[%s3096_s3 + $0x188] sm:$0xf] %vm689_vm2, %v985_v62 }
 0x159   :  { %1473 = vst.msk [vmem:[%s3096_s3 + $0x10c] sm:$0xf] %vm689_vm2, %v858_v1  ;;  %742 = vrot.lane.b32.xlu0 %v2015_v23, %s1713_s2 }
 0x15a   :  { %744 = vrot.lane.b32.xlu1 %v2041_v36, %s1713_s2 }
 0x15b   :  { %v1017_v4 = vpop.permute.xlu0 %1016 }
 0x15c   :  { %v890_v5 = vpop.permute.xlu1 %889  ;;  %1520 = vst.msk [vmem:[%s3096_s3 + $0x1c8] sm:$0xf] %vm689_vm2, %v1017_v4 }
 0x15d   :  { %1489 = vst.msk [vmem:[%s3096_s3 + $0x14c] sm:$0xf] %vm689_vm2, %v890_v5  ;;  %774 = vrot.lane.b32.xlu0 %v2017_v25, %s1713_s2 }
 0x15e   :  { %776 = vrot.lane.b32.xlu1 %v2044_v41, %s1713_s2 }
 0x15f   :  { %v1114_v6 = vpop.permute.xlu0 %1113 }
 0x160   :  { %v987_v7 = vpop.permute.xlu1 %986  ;;  %1536 = vst.msk [vmem:[%s3096_s3 + $0x208] sm:$0xf] %vm689_vm2, %v1114_v6 }
 0x161   :  { %1505 = vst.msk [vmem:[%s3096_s3 + $0x18c] sm:$0xf] %vm689_vm2, %v987_v7  ;;  %871 = vrot.lane.b32.xlu0 %v2015_v23, %s1714_s28 }
 0x162   :  { %873 = vrot.lane.b32.xlu1 %v2041_v36, %s1714_s28 }
 0x163   :  { %v1146_v8 = vpop.permute.xlu0 %1145 }
 0x164   :  { %v1019_v11 = vpop.permute.xlu1 %1018  ;;  %1552 = vst.msk [vmem:[%s3096_s3 + $0x248] sm:$0xf] %vm689_vm2, %v1146_v8 }
 0x165   :  { %1521 = vst.msk [vmem:[%s3096_s3 + $0x1cc] sm:$0xf] %vm689_vm2, %v1019_v11  ;;  %903 = vrot.lane.b32.xlu0 %v2017_v25, %s1714_s28 }
 0x166   :  { %905 = vrot.lane.b32.xlu1 %v2044_v41, %s1714_s28 }
 0x167   :  { %v723_v12 = vpop.permute.xlu0 %722 }
 0x168   :  { %v1116_v13 = vpop.permute.xlu1 %1115  ;;  %1438 = vst.msk [vmem:[%s3096_s3 + $0x80] sm:$0xf] %vm689_vm2, %v723_v12 }
 0x169   :  { %1537 = vst.msk [vmem:[%s3096_s3 + $0x20c] sm:$0xf] %vm689_vm2, %v1116_v13  ;;  %1000 = vrot.lane.b32.xlu0 %v2015_v23, %s1715_s18 }
 0x16a   :  { %1002 = vrot.lane.b32.xlu1 %v2041_v36, %s1715_s18 }
 0x16b   :  { %v755_v14 = vpop.permute.xlu0 %754 }
 0x16c   :  { %v1148_v18 = vpop.permute.xlu1 %1147  ;;  %1454 = vst.msk [vmem:[%s3096_s3 + $0xc0] sm:$0xf] %vm689_vm2, %v755_v14 }
 0x16d   :  { %1553 = vst.msk [vmem:[%s3096_s3 + $0x24c] sm:$0xf] %vm689_vm2, %v1148_v18  ;;  %1032 = vrot.lane.b32.xlu0 %v2017_v25, %s1715_s18 }
 0x16e   :  { %1034 = vrot.lane.b32.xlu1 %v2044_v41, %s1715_s18 }
 0x16f   :  { %v852_v20 = vpop.permute.xlu0 %851 }
 0x170   :  { %v757_v21 = vpop.permute.xlu1 %756  ;;  %1470 = vst.msk [vmem:[%s3096_s3 + $0x100] sm:$0xf] %vm689_vm2, %v852_v20 }
 0x171   :  { %1455 = vst.msk [vmem:[%s3096_s3 + $0xc4] sm:$0xf] %vm689_vm2, %v757_v21  ;;  %1129 = vrot.lane.b32.xlu0 %v2015_v23, %s1716_s7 }
 0x172   :  { %1131 = vrot.lane.b32.xlu1 %v2041_v36, %s1716_s7 }
 0x173   :  { %v884_v22 = vpop.permute.xlu0 %883 }
 0x174   :  { %v854_v24 = vpop.permute.xlu1 %853  ;;  %1486 = vst.msk [vmem:[%s3096_s3 + $0x140] sm:$0xf] %vm689_vm2, %v884_v22 }
 0x175   :  { %1471 = vst.msk [vmem:[%s3096_s3 + $0x104] sm:$0xf] %vm689_vm2, %v854_v24  ;;  %1161 = vrot.lane.b32.xlu0 %v2017_v25, %s1716_s7 }
 0x176   :  { %1163 = vrot.lane.b32.xlu1 %v2044_v41, %s1716_s7 }
 0x177   :  { %v981_v28 = vpop.permute.xlu0 %980 }
 0x178   :  { %v886_v29 = vpop.permute.xlu1 %885  ;;  %1502 = vst.msk [vmem:[%s3096_s3 + $0x180] sm:$0xf] %vm689_vm2, %v981_v28 }
 0x179   :  { %1487 = vst.msk [vmem:[%s3096_s3 + $0x144] sm:$0xf] %vm689_vm2, %v886_v29  ;;  %738 = vrot.lane.b32.xlu0 %v2037_v33, %s1713_s2 }
 0x17a   :  { %740 = vrot.lane.b32.xlu1 %v2066_v43, %s1713_s2 }
 0x17b   :  { %v1013_v34 = vpop.permute.xlu0 %1012 }
 0x17c   :  { %v983_v37 = vpop.permute.xlu1 %982  ;;  %1518 = vst.msk [vmem:[%s3096_s3 + $0x1c0] sm:$0xf] %vm689_vm2, %v1013_v34 }
 0x17d   :  { %1503 = vst.msk [vmem:[%s3096_s3 + $0x184] sm:$0xf] %vm689_vm2, %v983_v37  ;;  %770 = vrot.lane.b32.xlu0 %v2039_v35, %s1713_s2 }
 0x17e   :  { %772 = vrot.lane.b32.xlu1 %v2073_v44, %s1713_s2 }
 0x17f   :  { %v1110_v42 = vpop.permute.xlu0 %1109 }
 0x180   :  { %v1015_v46 = vpop.permute.xlu1 %1014  ;;  %1534 = vst.msk [vmem:[%s3096_s3 + $0x200] sm:$0xf] %vm689_vm2, %v1110_v42 }
 0x181   :  { %1519 = vst.msk [vmem:[%s3096_s3 + $0x1c4] sm:$0xf] %vm689_vm2, %v1015_v46  ;;  %867 = vrot.lane.b32.xlu0 %v2037_v33, %s1714_s28 }
 0x182   :  { %869 = vrot.lane.b32.xlu1 %v2066_v43, %s1714_s28 }
 0x183   :  { %v1142_v47 = vpop.permute.xlu0 %1141 }
 0x184   :  { %v1112_v48 = vpop.permute.xlu1 %1111  ;;  %1550 = vst.msk [vmem:[%s3096_s3 + $0x240] sm:$0xf] %vm689_vm2, %v1142_v47 }
 0x185   :  { %1535 = vst.msk [vmem:[%s3096_s3 + $0x204] sm:$0xf] %vm689_vm2, %v1112_v48  ;;  %899 = vrot.lane.b32.xlu0 %v2039_v35, %s1714_s28 }
 0x186   :  { %901 = vrot.lane.b32.xlu1 %v2073_v44, %s1714_s28 }
 0x187   :  { %v725_v50 = vpop.permute.xlu0 %724 }
 0x188   :  { %v1144_v49 = vpop.permute.xlu1 %1143  ;;  %1439 = vst.msk [vmem:[%s3096_s3 + $0x84] sm:$0xf] %vm689_vm2, %v725_v50 }
 0x189   :  { %1551 = vst.msk [vmem:[%s3096_s3 + $0x244] sm:$0xf] %vm689_vm2, %v1144_v49  ;;  %996 = vrot.lane.b32.xlu0 %v2037_v33, %s1715_s18 }
 0x18a   :  { %998 = vrot.lane.b32.xlu1 %v2066_v43, %s1715_s18 }
 0x18b   :  { %v735_v45 = vpop.permute.xlu0 %734 }
 0x18c   :  { %v737_v56 = vpop.permute.xlu1 %736  ;;  %1444 = vst.msk [vmem:[%s3096_s3 + $0x98] sm:$0xf] %vm689_vm2, %v735_v45 }
 0x18d   :  { %1445 = vst.msk [vmem:[%s3096_s3 + $0x9c] sm:$0xf] %vm689_vm2, %v737_v56  ;;  %1028 = vrot.lane.b32.xlu0 %v2039_v35, %s1715_s18 }
 0x18e   :  { %1030 = vrot.lane.b32.xlu1 %v2073_v44, %s1715_s18 }
 0x18f   :  { %v767_v58 = vpop.permute.xlu0 %766 }
 0x190   :  { %v769_v59 = vpop.permute.xlu1 %768  ;;  %1460 = vst.msk [vmem:[%s3096_s3 + $0xd8] sm:$0xf] %vm689_vm2, %v767_v58 }
 0x191   :  { %1461 = vst.msk [vmem:[%s3096_s3 + $0xdc] sm:$0xf] %vm689_vm2, %v769_v59  ;;  %1125 = vrot.lane.b32.xlu0 %v2037_v33, %s1716_s7 }
 0x192   :  { %1127 = vrot.lane.b32.xlu1 %v2066_v43, %s1716_s7 }
 0x193   :  { %v864_v60 = vpop.permute.xlu0 %863 }
 0x194   :  { %v866_v61 = vpop.permute.xlu1 %865  ;;  %1476 = vst.msk [vmem:[%s3096_s3 + $0x118] sm:$0xf] %vm689_vm2, %v864_v60 }
 0x195   :  { %1477 = vst.msk [vmem:[%s3096_s3 + $0x11c] sm:$0xf] %vm689_vm2, %v866_v61  ;;  %1157 = vrot.lane.b32.xlu0 %v2039_v35, %s1716_s7 }
 0x196   :  { %1159 = vrot.lane.b32.xlu1 %v2073_v44, %s1716_s7 }
 0x197   :  { %v896_v62 = vpop.permute.xlu0 %895 }
 0x198   :  { %v898_v1 = vpop.permute.xlu1 %897  ;;  %1492 = vst.msk [vmem:[%s3096_s3 + $0x158] sm:$0xf] %vm689_vm2, %v896_v62 }
 0x199   :  { %1493 = vst.msk [vmem:[%s3096_s3 + $0x15c] sm:$0xf] %vm689_vm2, %v898_v1  ;;  %750 = vrot.lane.b32.xlu0 %v2133_v30, %s1713_s2 }
 0x19a   :  { %752 = vrot.lane.b32.xlu1 %v2135_v31, %s1713_s2 }
 0x19b   :  { %v993_v4 = vpop.permute.xlu0 %992 }
 0x19c   :  { %v995_v5 = vpop.permute.xlu1 %994  ;;  %1508 = vst.msk [vmem:[%s3096_s3 + $0x198] sm:$0xf] %vm689_vm2, %v993_v4 }
 0x19d   :  { %1509 = vst.msk [vmem:[%s3096_s3 + $0x19c] sm:$0xf] %vm689_vm2, %v995_v5  ;;  %782 = vrot.lane.b32.xlu0 %v2169_v51, %s1713_s2 }
 0x19e   :  { %784 = vrot.lane.b32.xlu1 %v2171_v53, %s1713_s2 }
 0x19f   :  { %v1025_v6 = vpop.permute.xlu0 %1024 }
 0x1a0   :  { %v1027_v7 = vpop.permute.xlu1 %1026  ;;  %1524 = vst.msk [vmem:[%s3096_s3 + $0x1d8] sm:$0xf] %vm689_vm2, %v1025_v6 }
 0x1a1   :  { %1525 = vst.msk [vmem:[%s3096_s3 + $0x1dc] sm:$0xf] %vm689_vm2, %v1027_v7  ;;  %879 = vrot.lane.b32.xlu0 %v2133_v30, %s1714_s28 }
 0x1a2   :  { %881 = vrot.lane.b32.xlu1 %v2135_v31, %s1714_s28 }
 0x1a3   :  { %v1122_v8 = vpop.permute.xlu0 %1121 }
 0x1a4   :  { %v1124_v11 = vpop.permute.xlu1 %1123  ;;  %1540 = vst.msk [vmem:[%s3096_s3 + $0x218] sm:$0xf] %vm689_vm2, %v1122_v8 }
 0x1a5   :  { %1541 = vst.msk [vmem:[%s3096_s3 + $0x21c] sm:$0xf] %vm689_vm2, %v1124_v11  ;;  %911 = vrot.lane.b32.xlu0 %v2169_v51, %s1714_s28 }
 0x1a6   :  { %913 = vrot.lane.b32.xlu1 %v2171_v53, %s1714_s28 }
 0x1a7   :  { %v1154_v12 = vpop.permute.xlu0 %1153 }
 0x1a8   :  { %v1156_v13 = vpop.permute.xlu1 %1155  ;;  %1556 = vst.msk [vmem:[%s3096_s3 + $0x258] sm:$0xf] %vm689_vm2, %v1154_v12 }
 0x1a9   :  { %1557 = vst.msk [vmem:[%s3096_s3 + $0x25c] sm:$0xf] %vm689_vm2, %v1156_v13  ;;  %1008 = vrot.lane.b32.xlu0 %v2133_v30, %s1715_s18 }
 0x1aa   :  { %1010 = vrot.lane.b32.xlu1 %v2135_v31, %s1715_s18 }
 0x1ab   :  { %v731_v14 = vpop.permute.xlu0 %730 }
 0x1ac   :  { %v733_v18 = vpop.permute.xlu1 %732  ;;  %1442 = vst.msk [vmem:[%s3096_s3 + $0x90] sm:$0xf] %vm689_vm2, %v731_v14 }
 0x1ad   :  { %1443 = vst.msk [vmem:[%s3096_s3 + $0x94] sm:$0xf] %vm689_vm2, %v733_v18  ;;  %1040 = vrot.lane.b32.xlu0 %v2169_v51, %s1715_s18 }
 0x1ae   :  { %1042 = vrot.lane.b32.xlu1 %v2171_v53, %s1715_s18 }
 0x1af   :  { %v763_v20 = vpop.permute.xlu0 %762 }
 0x1b0   :  { %v765_v21 = vpop.permute.xlu1 %764  ;;  %1458 = vst.msk [vmem:[%s3096_s3 + $0xd0] sm:$0xf] %vm689_vm2, %v763_v20 }
 0x1b1   :  { %1459 = vst.msk [vmem:[%s3096_s3 + $0xd4] sm:$0xf] %vm689_vm2, %v765_v21  ;;  %1137 = vrot.lane.b32.xlu0 %v2133_v30, %s1716_s7 }
 0x1b2   :  { %1139 = vrot.lane.b32.xlu1 %v2135_v31, %s1716_s7 }
 0x1b3   :  { %v860_v22 = vpop.permute.xlu0 %859 }
 0x1b4   :  { %v862_v24 = vpop.permute.xlu1 %861  ;;  %1474 = vst.msk [vmem:[%s3096_s3 + $0x110] sm:$0xf] %vm689_vm2, %v860_v22 }
 0x1b5   :  { %1475 = vst.msk [vmem:[%s3096_s3 + $0x114] sm:$0xf] %vm689_vm2, %v862_v24  ;;  %746 = vrot.lane.b32.xlu0 %v2137_v32, %s1713_s2 }
 0x1b6   :  { %748 = vrot.lane.b32.xlu1 %v2143_v38, %s1713_s2 }
 0x1b7   :  { %v892_v28 = vpop.permute.xlu0 %891 }
 0x1b8   :  { %v894_v29 = vpop.permute.xlu1 %893  ;;  %1490 = vst.msk [vmem:[%s3096_s3 + $0x150] sm:$0xf] %vm689_vm2, %v892_v28 }
 0x1b9   :  { %1491 = vst.msk [vmem:[%s3096_s3 + $0x154] sm:$0xf] %vm689_vm2, %v894_v29  ;;  %778 = vrot.lane.b32.xlu0 %v2173_v54, %s1713_s2 }
 0x1ba   :  { %780 = vrot.lane.b32.xlu1 %v2179_v55, %s1713_s2 }
 0x1bb   :  { %v989_v34 = vpop.permute.xlu0 %988 }
 0x1bc   :  { %v991_v37 = vpop.permute.xlu1 %990  ;;  %1506 = vst.msk [vmem:[%s3096_s3 + $0x190] sm:$0xf] %vm689_vm2, %v989_v34 }
 0x1bd   :  { %1507 = vst.msk [vmem:[%s3096_s3 + $0x194] sm:$0xf] %vm689_vm2, %v991_v37  ;;  %875 = vrot.lane.b32.xlu0 %v2137_v32, %s1714_s28 }
 0x1be   :  { %877 = vrot.lane.b32.xlu1 %v2143_v38, %s1714_s28 }
 0x1bf   :  { %v1021_v42 = vpop.permute.xlu0 %1020 }
 0x1c0   :  { %v1023_v46 = vpop.permute.xlu1 %1022  ;;  %1522 = vst.msk [vmem:[%s3096_s3 + $0x1d0] sm:$0xf] %vm689_vm2, %v1021_v42 }
 0x1c1   :  { %1523 = vst.msk [vmem:[%s3096_s3 + $0x1d4] sm:$0xf] %vm689_vm2, %v1023_v46  ;;  %907 = vrot.lane.b32.xlu0 %v2173_v54, %s1714_s28 }
 0x1c2   :  { %909 = vrot.lane.b32.xlu1 %v2179_v55, %s1714_s28 }
 0x1c3   :  { %v1118_v47 = vpop.permute.xlu0 %1117 }
 0x1c4   :  { %v1120_v48 = vpop.permute.xlu1 %1119  ;;  %1538 = vst.msk [vmem:[%s3096_s3 + $0x210] sm:$0xf] %vm689_vm2, %v1118_v47 }
 0x1c5   :  { %1539 = vst.msk [vmem:[%s3096_s3 + $0x214] sm:$0xf] %vm689_vm2, %v1120_v48  ;;  %1004 = vrot.lane.b32.xlu0 %v2137_v32, %s1715_s18 }
 0x1c6   :  { %1006 = vrot.lane.b32.xlu1 %v2143_v38, %s1715_s18 }
 0x1c7   :  { %v1150_v49 = vpop.permute.xlu0 %1149 }
 0x1c8   :  { %v1152_v50 = vpop.permute.xlu1 %1151  ;;  %1554 = vst.msk [vmem:[%s3096_s3 + $0x250] sm:$0xf] %vm689_vm2, %v1150_v49 }
 0x1c9   :  { %1555 = vst.msk [vmem:[%s3096_s3 + $0x254] sm:$0xf] %vm689_vm2, %v1152_v50  ;;  %1036 = vrot.lane.b32.xlu0 %v2173_v54, %s1715_s18 }
 0x1ca   :  { %1038 = vrot.lane.b32.xlu1 %v2179_v55, %s1715_s18 }
 0x1cb   :  { %v743_v45 = vpop.permute.xlu0 %742 }
 0x1cc   :  { %v745_v56 = vpop.permute.xlu1 %744  ;;  %1448 = vst.msk [vmem:[%s3096_s3 + $0xa8] sm:$0xf] %vm689_vm2, %v743_v45 }
 0x1cd   :  { %1449 = vst.msk [vmem:[%s3096_s3 + $0xac] sm:$0xf] %vm689_vm2, %v745_v56  ;;  %1133 = vrot.lane.b32.xlu0 %v2137_v32, %s1716_s7 }
 0x1ce   :  { %1135 = vrot.lane.b32.xlu1 %v2143_v38, %s1716_s7 }
 0x1cf   :  { %v775_v58 = vpop.permute.xlu0 %774 }
 0x1d0   :  { %v777_v59 = vpop.permute.xlu1 %776  ;;  %1464 = vst.msk [vmem:[%s3096_s3 + $0xe8] sm:$0xf] %vm689_vm2, %v775_v58 }
 0x1d1   :  { %1465 = vst.msk [vmem:[%s3096_s3 + $0xec] sm:$0xf] %vm689_vm2, %v777_v59  ;;  %1165 = vrot.lane.b32.xlu0 %v2173_v54, %s1716_s7 }
 0x1d2   :  { %1167 = vrot.lane.b32.xlu1 %v2179_v55, %s1716_s7 }
 0x1d3   :  { %v872_v60 = vpop.permute.xlu0 %871 }
 0x1d4   :  { %v874_v61 = vpop.permute.xlu1 %873  ;;  %1480 = vst.msk [vmem:[%s3096_s3 + $0x128] sm:$0xf] %vm689_vm2, %v872_v60 }
 0x1d5   :  { %1481 = vst.msk [vmem:[%s3096_s3 + $0x12c] sm:$0xf] %vm689_vm2, %v874_v61  ;;  %1169 = vrot.lane.b32.xlu0 %v2169_v51, %s1716_s7 }
 0x1d6   :  { %1171 = vrot.lane.b32.xlu1 %v2171_v53, %s1716_s7 }
 0x1d7   :  { %v904_v62 = vpop.permute.xlu0 %903 }
 0x1d8   :  { %v906_v1 = vpop.permute.xlu1 %905  ;;  %1496 = vst.msk [vmem:[%s3096_s3 + $0x168] sm:$0xf] %vm689_vm2, %v904_v62 }
 0x1d9   :  { %1497 = vst.msk [vmem:[%s3096_s3 + $0x16c] sm:$0xf] %vm689_vm2, %v906_v1  ;;  %1238 = vrot.lane.b32.xlu0 %v1881_v16, %s1717_s17 }
 0x1da   :  { %1240 = vrot.lane.b32.xlu1 %v1921_v40, %s1717_s17 }
 0x1db   :  { %v1001_v4 = vpop.permute.xlu0 %1000 }
 0x1dc   :  { %v1003_v5 = vpop.permute.xlu1 %1002  ;;  %1512 = vst.msk [vmem:[%s3096_s3 + $0x1a8] sm:$0xf] %vm689_vm2, %v1001_v4 }
 0x1dd   :  { %1513 = vst.msk [vmem:[%s3096_s3 + $0x1ac] sm:$0xf] %vm689_vm2, %v1003_v5  ;;  %1242 = vrot.lane.b32.xlu0 %v1859_v3, %s1717_s17 }
 0x1de   :  { %1244 = vrot.lane.b32.xlu1 %v1887_v26, %s1717_s17 }
 0x1df   :  { %v1033_v16 = vpop.permute.xlu0 %1032 }
 0x1e0   :  { %v1035_v40 = vpop.permute.xlu1 %1034  ;;  %1528 = vst.msk [vmem:[%s3096_s3 + $0x1e8] sm:$0xf] %vm689_vm2, %v1033_v16 }
 0x1e1   :  { %1529 = vst.msk [vmem:[%s3096_s3 + $0x1ec] sm:$0xf] %vm689_vm2, %v1035_v40  ;;  %1246 = vrot.lane.b32.xlu0 %v1954_v63, %s1717_s17 }
 0x1e2   :  { %1248 = vrot.lane.b32.xlu1 %v1999_v15, %s1717_s17 }
 0x1e3   :  { %v1130_v3 = vpop.permute.xlu0 %1129 }
 0x1e4   :  { %v1132_v26 = vpop.permute.xlu1 %1131  ;;  %1544 = vst.msk [vmem:[%s3096_s3 + $0x228] sm:$0xf] %vm689_vm2, %v1130_v3 }
 0x1e5   :  { %1545 = vst.msk [vmem:[%s3096_s3 + $0x22c] sm:$0xf] %vm689_vm2, %v1132_v26  ;;  %1250 = vrot.lane.b32.xlu0 %v1937_v52, %s1717_s17 }
 0x1e6   :  { %1252 = vrot.lane.b32.xlu1 %v1978_v9, %s1717_s17 }
 0x1e7   :  { %v1162_v63 = vpop.permute.xlu0 %1161 }
 0x1e8   :  { %v1164_v15 = vpop.permute.xlu1 %1163  ;;  %1560 = vst.msk [vmem:[%s3096_s3 + $0x268] sm:$0xf] %vm689_vm2, %v1162_v63 }
 0x1e9   :  { %1561 = vst.msk [vmem:[%s3096_s3 + $0x26c] sm:$0xf] %vm689_vm2, %v1164_v15  ;;  %1254 = vrot.lane.b32.xlu0 %v2037_v33, %s1717_s17 }
 0x1ea   :  { %1256 = vrot.lane.b32.xlu1 %v2066_v43, %s1717_s17 }
 0x1eb   :  { %v739_v52 = vpop.permute.xlu0 %738 }
 0x1ec   :  { %v741_v9 = vpop.permute.xlu1 %740  ;;  %1446 = vst.msk [vmem:[%s3096_s3 + $0xa0] sm:$0xf] %vm689_vm2, %v739_v52 }
 0x1ed   :  { %1447 = vst.msk [vmem:[%s3096_s3 + $0xa4] sm:$0xf] %vm689_vm2, %v741_v9  ;;  %1258 = vrot.lane.b32.xlu0 %v2015_v23, %s1717_s17 }
 0x1ee   :  { %1260 = vrot.lane.b32.xlu1 %v2041_v36, %s1717_s17 }
 0x1ef   :  { %v771_v33 = vpop.permute.xlu0 %770 }
 0x1f0   :  { %v773_v43 = vpop.permute.xlu1 %772  ;;  %1462 = vst.msk [vmem:[%s3096_s3 + $0xe0] sm:$0xf] %vm689_vm2, %v771_v33 }
 0x1f1   :  { %1463 = vst.msk [vmem:[%s3096_s3 + $0xe4] sm:$0xf] %vm689_vm2, %v773_v43  ;;  %1262 = vrot.lane.b32.xlu0 %v2137_v32, %s1717_s17 }
 0x1f2   :  { %1264 = vrot.lane.b32.xlu1 %v2143_v38, %s1717_s17 }
 0x1f3   :  { %v868_v23 = vpop.permute.xlu0 %867 }
 0x1f4   :  { %v870_v36 = vpop.permute.xlu1 %869  ;;  %1478 = vst.msk [vmem:[%s3096_s3 + $0x120] sm:$0xf] %vm689_vm2, %v868_v23 }
 0x1f5   :  { %1479 = vst.msk [vmem:[%s3096_s3 + $0x124] sm:$0xf] %vm689_vm2, %v870_v36  ;;  %1266 = vrot.lane.b32.xlu0 %v2133_v30, %s1717_s17 }
 0x1f6   :  { %1268 = vrot.lane.b32.xlu1 %v2135_v31, %s1717_s17 }
 0x1f7   :  { %v900_v32 = vpop.permute.xlu0 %899 }
 0x1f8   :  { %v902_v38 = vpop.permute.xlu1 %901  ;;  %1494 = vst.msk [vmem:[%s3096_s3 + $0x160] sm:$0xf] %vm689_vm2, %v900_v32 }
 0x1f9   :  { %1495 = vst.msk [vmem:[%s3096_s3 + $0x164] sm:$0xf] %vm689_vm2, %v902_v38  ;;  %1270 = vrot.lane.b32.xlu0 %v1883_v19, %s1717_s17 }
 0x1fa   :  { %1272 = vrot.lane.b32.xlu1 %v1919_v39, %s1717_s17 }
 0x1fb   :  { %v997_v30 = vpop.permute.xlu0 %996 }
 0x1fc   :  { %v999_v31 = vpop.permute.xlu1 %998  ;;  %1510 = vst.msk [vmem:[%s3096_s3 + $0x1a0] sm:$0xf] %vm689_vm2, %v997_v30 }
 0x1fd   :  { %1511 = vst.msk [vmem:[%s3096_s3 + $0x1a4] sm:$0xf] %vm689_vm2, %v999_v31  ;;  %1274 = vrot.lane.b32.xlu0 %v1857_v2, %s1717_s17 }
 0x1fe   :  { %1276 = vrot.lane.b32.xlu1 %v1889_v27, %s1717_s17 }
 0x1ff   :  { %v1029_v19 = vpop.permute.xlu0 %1028 }
 0x200   :  { %v1031_v39 = vpop.permute.xlu1 %1030  ;;  %1526 = vst.msk [vmem:[%s3096_s3 + $0x1e0] sm:$0xf] %vm689_vm2, %v1029_v19 }
 0x201   :  { %1527 = vst.msk [vmem:[%s3096_s3 + $0x1e4] sm:$0xf] %vm689_vm2, %v1031_v39  ;;  %1278 = vrot.lane.b32.xlu0 %v1956_v0, %s1717_s17 }
 0x202   :  { %1280 = vrot.lane.b32.xlu1 %v2001_v17, %s1717_s17 }
 0x203   :  { %v1126_v2 = vpop.permute.xlu0 %1125 }
 0x204   :  { %v1128_v27 = vpop.permute.xlu1 %1127  ;;  %1542 = vst.msk [vmem:[%s3096_s3 + $0x220] sm:$0xf] %vm689_vm2, %v1126_v2 }
 0x205   :  { %1543 = vst.msk [vmem:[%s3096_s3 + $0x224] sm:$0xf] %vm689_vm2, %v1128_v27  ;;  %1282 = vrot.lane.b32.xlu0 %v1941_v57, %s1717_s17 }
 0x206   :  { %1284 = vrot.lane.b32.xlu1 %v1980_v10, %s1717_s17 }
 0x207   :  { %v1158_v0 = vpop.permute.xlu0 %1157 }
 0x208   :  { %v1160_v17 = vpop.permute.xlu1 %1159  ;;  %1558 = vst.msk [vmem:[%s3096_s3 + $0x260] sm:$0xf] %vm689_vm2, %v1158_v0 }
 0x209   :  { %1559 = vst.msk [vmem:[%s3096_s3 + $0x264] sm:$0xf] %vm689_vm2, %v1160_v17  ;;  %1286 = vrot.lane.b32.xlu0 %v2039_v35, %s1717_s17 }
 0x20a   :  { %1288 = vrot.lane.b32.xlu1 %v2073_v44, %s1717_s17 }
 0x20b   :  { %v751_v57 = vpop.permute.xlu0 %750 }
 0x20c   :  { %v753_v10 = vpop.permute.xlu1 %752  ;;  %1452 = vst.msk [vmem:[%s3096_s3 + $0xb8] sm:$0xf] %vm689_vm2, %v751_v57 }
 0x20d   :  { %1453 = vst.msk [vmem:[%s3096_s3 + $0xbc] sm:$0xf] %vm689_vm2, %v753_v10  ;;  %1290 = vrot.lane.b32.xlu0 %v2017_v25, %s1717_s17 }
 0x20e   :  { %1292 = vrot.lane.b32.xlu1 %v2044_v41, %s1717_s17 }
 0x20f   :  { %v783_v35 = vpop.permute.xlu0 %782 }
 0x210   :  { %v785_v44 = vpop.permute.xlu1 %784  ;;  %1468 = vst.msk [vmem:[%s3096_s3 + $0xf8] sm:$0xf] %vm689_vm2, %v783_v35 }
 0x211   :  { %1469 = vst.msk [vmem:[%s3096_s3 + $0xfc] sm:$0xf] %vm689_vm2, %v785_v44  ;;  %1294 = vrot.lane.b32.xlu0 %v2173_v54, %s1717_s17 }
 0x212   :  { %1296 = vrot.lane.b32.xlu1 %v2179_v55, %s1717_s17 }
 0x213   :  { %v880_v25 = vpop.permute.xlu0 %879 }
 0x214   :  { %v882_v41 = vpop.permute.xlu1 %881  ;;  %1484 = vst.msk [vmem:[%s3096_s3 + $0x138] sm:$0xf] %vm689_vm2, %v880_v25 }
 0x215   :  { %1485 = vst.msk [vmem:[%s3096_s3 + $0x13c] sm:$0xf] %vm689_vm2, %v882_v41  ;;  %1298 = vrot.lane.b32.xlu0 %v2169_v51, %s1717_s17 }
 0x216   :  { %1300 = vrot.lane.b32.xlu1 %v2171_v53, %s1717_s17 }
 0x217   :  { %v912_v54 = vpop.permute.xlu0 %911 }
 0x218   :  { %v914_v55 = vpop.permute.xlu1 %913  ;;  %1500 = vst.msk [vmem:[%s3096_s3 + $0x178] sm:$0xf] %vm689_vm2, %v912_v54 }
 0x219   :  { %1501 = vst.msk [vmem:[%s3096_s3 + $0x17c] sm:$0xf] %vm689_vm2, %v914_v55 }
 0x21b   :  { %v1009_v6 = vpop.permute.xlu0 %1008 }
 0x21c   :  { %v1011_v7 = vpop.permute.xlu1 %1010  ;;  %1516 = vst.msk [vmem:[%s3096_s3 + $0x1b8] sm:$0xf] %vm689_vm2, %v1009_v6 }
 0x21d   :  { %1517 = vst.msk [vmem:[%s3096_s3 + $0x1bc] sm:$0xf] %vm689_vm2, %v1011_v7 }
 0x21f   :  { %v1041_v51 = vpop.permute.xlu0 %1040 }
 0x220   :  { %v1043_v53 = vpop.permute.xlu1 %1042  ;;  %1532 = vst.msk [vmem:[%s3096_s3 + $0x1f8] sm:$0xf] %vm689_vm2, %v1041_v51 }
 0x221   :  { %1533 = vst.msk [vmem:[%s3096_s3 + $0x1fc] sm:$0xf] %vm689_vm2, %v1043_v53 }
 0x223   :  { %v1138_v8 = vpop.permute.xlu0 %1137 }
 0x224   :  { %v1140_v11 = vpop.permute.xlu1 %1139  ;;  %1548 = vst.msk [vmem:[%s3096_s3 + $0x238] sm:$0xf] %vm689_vm2, %v1138_v8 }
 0x225   :  { %1549 = vst.msk [vmem:[%s3096_s3 + $0x23c] sm:$0xf] %vm689_vm2, %v1140_v11 }
 0x227   :  { %v747_v12 = vpop.permute.xlu0 %746 }
 0x228   :  { %v749_v13 = vpop.permute.xlu1 %748  ;;  %1450 = vst.msk [vmem:[%s3096_s3 + $0xb0] sm:$0xf] %vm689_vm2, %v747_v12 }
 0x229   :  { %1451 = vst.msk [vmem:[%s3096_s3 + $0xb4] sm:$0xf] %vm689_vm2, %v749_v13 }
 0x22b   :  { %v779_v14 = vpop.permute.xlu0 %778 }
 0x22c   :  { %v781_v18 = vpop.permute.xlu1 %780  ;;  %1466 = vst.msk [vmem:[%s3096_s3 + $0xf0] sm:$0xf] %vm689_vm2, %v779_v14 }
 0x22d   :  { %1467 = vst.msk [vmem:[%s3096_s3 + $0xf4] sm:$0xf] %vm689_vm2, %v781_v18 }
 0x22f   :  { %v876_v20 = vpop.permute.xlu0 %875 }
 0x230   :  { %v878_v21 = vpop.permute.xlu1 %877  ;;  %1482 = vst.msk [vmem:[%s3096_s3 + $0x130] sm:$0xf] %vm689_vm2, %v876_v20 }
 0x231   :  { %1483 = vst.msk [vmem:[%s3096_s3 + $0x134] sm:$0xf] %vm689_vm2, %v878_v21 }
 0x233   :  { %v908_v22 = vpop.permute.xlu0 %907 }
 0x234   :  { %v910_v24 = vpop.permute.xlu1 %909  ;;  %1498 = vst.msk [vmem:[%s3096_s3 + $0x170] sm:$0xf] %vm689_vm2, %v908_v22 }
 0x235   :  { %1499 = vst.msk [vmem:[%s3096_s3 + $0x174] sm:$0xf] %vm689_vm2, %v910_v24 }
 0x237   :  { %v1005_v28 = vpop.permute.xlu0 %1004 }
 0x238   :  { %v1007_v29 = vpop.permute.xlu1 %1006  ;;  %1514 = vst.msk [vmem:[%s3096_s3 + $0x1b0] sm:$0xf] %vm689_vm2, %v1005_v28 }
 0x239   :  { %1515 = vst.msk [vmem:[%s3096_s3 + $0x1b4] sm:$0xf] %vm689_vm2, %v1007_v29 }
 0x23b   :  { %v1037_v34 = vpop.permute.xlu0 %1036 }
 0x23c   :  { %v1039_v37 = vpop.permute.xlu1 %1038  ;;  %1530 = vst.msk [vmem:[%s3096_s3 + $0x1f0] sm:$0xf] %vm689_vm2, %v1037_v34 }
 0x23d   :  { %1531 = vst.msk [vmem:[%s3096_s3 + $0x1f4] sm:$0xf] %vm689_vm2, %v1039_v37 }
 0x23f   :  { %v1134_v42 = vpop.permute.xlu0 %1133 }
 0x240   :  { %v1136_v46 = vpop.permute.xlu1 %1135  ;;  %1546 = vst.msk [vmem:[%s3096_s3 + $0x230] sm:$0xf] %vm689_vm2, %v1134_v42 }
 0x241   :  { %1547 = vst.msk [vmem:[%s3096_s3 + $0x234] sm:$0xf] %vm689_vm2, %v1136_v46 }
 0x243   :  { %v1166_v47 = vpop.permute.xlu0 %1165 }
 0x244   :  { %v1168_v48 = vpop.permute.xlu1 %1167  ;;  %1562 = vst.msk [vmem:[%s3096_s3 + $0x270] sm:$0xf] %vm689_vm2, %v1166_v47 }
 0x245   :  { %1563 = vst.msk [vmem:[%s3096_s3 + $0x274] sm:$0xf] %vm689_vm2, %v1168_v48 }
 0x247   :  { %v1170_v49 = vpop.permute.xlu0 %1169 }
 0x248   :  { %v1172_v50 = vpop.permute.xlu1 %1171  ;;  %1564 = vst.msk [vmem:[%s3096_s3 + $0x278] sm:$0xf] %vm689_vm2, %v1170_v49 }
 0x249   :  { %1565 = vst.msk [vmem:[%s3096_s3 + $0x27c] sm:$0xf] %vm689_vm2, %v1172_v50 }
 0x24b   :  { %v1239_v45 = vpop.permute.xlu0 %1238 }
 0x24c   :  { %v1241_v56 = vpop.permute.xlu1 %1240  ;;  %1566 = vst.msk [vmem:[%s3096_s3 + $0x280] sm:$0xf] %vm689_vm2, %v1239_v45 }
 0x24d   :  { %1567 = vst.msk [vmem:[%s3096_s3 + $0x284] sm:$0xf] %vm689_vm2, %v1241_v56 }
 0x24f   :  { %v1243_v58 = vpop.permute.xlu0 %1242 }
 0x250   :  { %v1245_v59 = vpop.permute.xlu1 %1244  ;;  %1568 = vst.msk [vmem:[%s3096_s3 + $0x288] sm:$0xf] %vm689_vm2, %v1243_v58 }
 0x251   :  { %1569 = vst.msk [vmem:[%s3096_s3 + $0x28c] sm:$0xf] %vm689_vm2, %v1245_v59 }
 0x253   :  { %v1247_v60 = vpop.permute.xlu0 %1246 }
 0x254   :  { %v1249_v61 = vpop.permute.xlu1 %1248  ;;  %1570 = vst.msk [vmem:[%s3096_s3 + $0x290] sm:$0xf] %vm689_vm2, %v1247_v60 }
 0x255   :  { %1571 = vst.msk [vmem:[%s3096_s3 + $0x294] sm:$0xf] %vm689_vm2, %v1249_v61 }
 0x257   :  { %v1251_v62 = vpop.permute.xlu0 %1250 }
 0x258   :  { %v1253_v1 = vpop.permute.xlu1 %1252  ;;  %1572 = vst.msk [vmem:[%s3096_s3 + $0x298] sm:$0xf] %vm689_vm2, %v1251_v62 }
 0x259   :  { %1573 = vst.msk [vmem:[%s3096_s3 + $0x29c] sm:$0xf] %vm689_vm2, %v1253_v1 }
 0x25b   :  { %v1255_v4 = vpop.permute.xlu0 %1254 }
 0x25c   :  { %v1257_v5 = vpop.permute.xlu1 %1256  ;;  %1574 = vst.msk [vmem:[%s3096_s3 + $0x2a0] sm:$0xf] %vm689_vm2, %v1255_v4 }
 0x25d   :  { %1575 = vst.msk [vmem:[%s3096_s3 + $0x2a4] sm:$0xf] %vm689_vm2, %v1257_v5 }
 0x25f   :  { %v1259_v16 = vpop.permute.xlu0 %1258 }
 0x260   :  { %v1261_v40 = vpop.permute.xlu1 %1260  ;;  %1576 = vst.msk [vmem:[%s3096_s3 + $0x2a8] sm:$0xf] %vm689_vm2, %v1259_v16 }
 0x261   :  { %1577 = vst.msk [vmem:[%s3096_s3 + $0x2ac] sm:$0xf] %vm689_vm2, %v1261_v40 }
 0x263   :  { %v1263_v3 = vpop.permute.xlu0 %1262 }
 0x264   :  { %v1265_v26 = vpop.permute.xlu1 %1264  ;;  %1578 = vst.msk [vmem:[%s3096_s3 + $0x2b0] sm:$0xf] %vm689_vm2, %v1263_v3 }
 0x265   :  { %1579 = vst.msk [vmem:[%s3096_s3 + $0x2b4] sm:$0xf] %vm689_vm2, %v1265_v26 }
 0x267   :  { %v1267_v63 = vpop.permute.xlu0 %1266 }
 0x268   :  { %v1269_v15 = vpop.permute.xlu1 %1268  ;;  %1580 = vst.msk [vmem:[%s3096_s3 + $0x2b8] sm:$0xf] %vm689_vm2, %v1267_v63 }
 0x269   :  { %1581 = vst.msk [vmem:[%s3096_s3 + $0x2bc] sm:$0xf] %vm689_vm2, %v1269_v15 }
 0x26b   :  { %v1271_v52 = vpop.permute.xlu0 %1270 }
 0x26c   :  { %v1273_v9 = vpop.permute.xlu1 %1272  ;;  %1582 = vst.msk [vmem:[%s3096_s3 + $0x2c0] sm:$0xf] %vm689_vm2, %v1271_v52 }
 0x26d   :  { %1583 = vst.msk [vmem:[%s3096_s3 + $0x2c4] sm:$0xf] %vm689_vm2, %v1273_v9 }
 0x26f   :  { %v1275_v33 = vpop.permute.xlu0 %1274 }
 0x270   :  { %v1277_v43 = vpop.permute.xlu1 %1276  ;;  %1584 = vst.msk [vmem:[%s3096_s3 + $0x2c8] sm:$0xf] %vm689_vm2, %v1275_v33 }
 0x271   :  { %1585 = vst.msk [vmem:[%s3096_s3 + $0x2cc] sm:$0xf] %vm689_vm2, %v1277_v43 }
 0x273   :  { %v1279_v23 = vpop.permute.xlu0 %1278 }
 0x274   :  { %v1281_v36 = vpop.permute.xlu1 %1280  ;;  %1586 = vst.msk [vmem:[%s3096_s3 + $0x2d0] sm:$0xf] %vm689_vm2, %v1279_v23 }
 0x275   :  { %1587 = vst.msk [vmem:[%s3096_s3 + $0x2d4] sm:$0xf] %vm689_vm2, %v1281_v36 }
 0x277   :  { %v1283_v32 = vpop.permute.xlu0 %1282 }
 0x278   :  { %v1285_v38 = vpop.permute.xlu1 %1284  ;;  %1588 = vst.msk [vmem:[%s3096_s3 + $0x2d8] sm:$0xf] %vm689_vm2, %v1283_v32 }
 0x279   :  { %1589 = vst.msk [vmem:[%s3096_s3 + $0x2dc] sm:$0xf] %vm689_vm2, %v1285_v38 }
 0x27b   :  { %v1287_v30 = vpop.permute.xlu0 %1286 }
 0x27c   :  { %v1289_v31 = vpop.permute.xlu1 %1288  ;;  %1590 = vst.msk [vmem:[%s3096_s3 + $0x2e0] sm:$0xf] %vm689_vm2, %v1287_v30 }
 0x27d   :  { %1591 = vst.msk [vmem:[%s3096_s3 + $0x2e4] sm:$0xf] %vm689_vm2, %v1289_v31 }
 0x27f   :  { %v1291_v19 = vpop.permute.xlu0 %1290 }
 0x280   :  { %v1293_v39 = vpop.permute.xlu1 %1292  ;;  %1592 = vst.msk [vmem:[%s3096_s3 + $0x2e8] sm:$0xf] %vm689_vm2, %v1291_v19 }
 0x281   :  { %1593 = vst.msk [vmem:[%s3096_s3 + $0x2ec] sm:$0xf] %vm689_vm2, %v1293_v39 }
 0x283   :  { %v1295_v2 = vpop.permute.xlu0 %1294 }
 0x284   :  { %v1297_v27 = vpop.permute.xlu1 %1296  ;;  %1594 = vst.msk [vmem:[%s3096_s3 + $0x2f0] sm:$0xf] %vm689_vm2, %v1295_v2 }
 0x285   :  { %1595 = vst.msk [vmem:[%s3096_s3 + $0x2f4] sm:$0xf] %vm689_vm2, %v1297_v27 }
 0x287   :  { %v1299_v0 = vpop.permute.xlu0 %1298 }
 0x288   :  { %v1301_v17 = vpop.permute.xlu1 %1300  ;;  %1596 = vst.msk [vmem:[%s3096_s3 + $0x2f8] sm:$0xf] %vm689_vm2, %v1299_v0 }
 0x289   :  { %1597 = vst.msk [vmem:[%s3096_s3 + $0x2fc] sm:$0xf] %vm689_vm2, %v1301_v17 }

// kernel: jointbert_forward.20
= control target key start
LH: loop header
LB: loop body
LE: loop exit
PB: predicated region body
PF: predicated region fallthrough
CT: control target
= control target key end

     0   :  { %vm211_vm0 = vcmask 261120   ;;  %s1762_s1 = inlined_call_operand.vmem [shape: bf16[32,128], index: 1, kind: input, shape index: {}]   ;;  %s1763_s0 = inlined_call_operand.vmem [shape: bf16[256,32], index: 0, kind: input, shape index: {}]   ;;  %s1764_s2 = inlined_call_operand.vmem [shape: f32[1,128], index: 2, kind: input, shape index: {}]   ;;  %s1765_s3 = inlined_call_operand.vmem [shape: bf16[256,128], index: 3, kind: output, shape index: {}]  }
   0x1   :  { %v1263_v0 = vld [vmem:[%s1762_s1 + $0x8] sm:$0xff]   ;;  %v1264_v1 = vld [vmem:[%s1762_s1] sm:$0xff]   ;;  %v1269_v6 = vld [vmem:[%s1763_s0 + $0x10] sm:$0xff]  }
   0x2   :  { %1223 = vmatprep.subr.bf16.mxu0 %v1263_v0  ;;  %1259 = vmatprep.subr.bf16.mxu1 %v1263_v0  ;;  %v1265_v2 = vld [vmem:[%s1763_s0] sm:$0xff]   ;;  %v1267_v4 = vld [vmem:[%s1763_s0 + $0x8] sm:$0xff]   ;;  %v1270_v7 = vld [vmem:[%s1763_s0 + $0x50] sm:$0xff]  }
   0x3   :  { %1224 = vmatpush3.bf16.msra.mxu0 %v1263_v0  ;;  %1261 = vmatpush3.bf16.msra.mxu1 %v1263_v0  ;;  %v1266_v3 = vld [vmem:[%s1763_s0 + $0x40] sm:$0xff]   ;;  %v1268_v5 = vld [vmem:[%s1763_s0 + $0x48] sm:$0xff]   ;;  %v1271_v8 = vld [vmem:[%s1763_s0 + $0x18] sm:$0xff]  }
   0x4   :  { %1225 = vmatprep.subr.bf16.mxu0 %v1264_v1  ;;  %1260 = vmatprep.subr.bf16.mxu1 %v1264_v1  ;;  %v1272_v9 = vld [vmem:[%s1763_s0 + $0x58] sm:$0xff]   ;;  %v1273_v10 = vld [vmem:[%s1763_s0 + $0x20] sm:$0xff]   ;;  %v1275_v12 = vld [vmem:[%s1763_s0 + $0x28] sm:$0xff]  }
   0x5   :  { %1227 = vmatprep.mubr.msk.bf16.mxu0 %vm211_vm0, %v1265_v2  ;;  %1243 = vmatprep.mubr.msk.bf16.mxu1 %vm211_vm0, %v1266_v3  ;;  %v1274_v11 = vld [vmem:[%s1763_s0 + $0x60] sm:$0xff]   ;;  %v1276_v13 = vld [vmem:[%s1763_s0 + $0x68] sm:$0xff]   ;;  %v1277_v14 = vld [vmem:[%s1763_s0 + $0x30] sm:$0xff]  }
   0x6   :  { %v1278_v15 = vld [vmem:[%s1763_s0 + $0x70] sm:$0xff]   ;;  %v1279_v16 = vld [vmem:[%s1763_s0 + $0x38] sm:$0xff]   ;;  %v1438_v18 = vld [vmem:[%s1764_s2] ss:$0 sm:$0xff] }
   0x7   :  { %1226 = vmatpush3.bf16.msra.mxu0 %v1264_v1  ;;  %1262 = vmatpush3.bf16.msra.mxu1 %v1264_v1  ;;  %v1280_v17 = vld [vmem:[%s1763_s0 + $0x78] sm:$0xff]  }
   0xa   :  { %1228 = vmatmul.mubr.msk.bf16.vlgmr.msra.gmra.mxu0 %vm211_vm0, %v1267_v4  ;;  %1244 = vmatmul.mubr.msk.bf16.vlgmr.msra.gmra.mxu1 %vm211_vm0, %v1268_v5 }
   0xb   :  { %1231 = vmatprep.mubr.msk.bf16.mxu0 %vm211_vm0, %v1269_v6  ;;  %1247 = vmatprep.mubr.msk.bf16.mxu1 %vm211_vm0, %v1270_v7 }
  0x12   :  { %1232 = vmatmul.mubr.msk.bf16.gmra.mxu0 %vm211_vm0, %v1271_v8  ;;  %1248 = vmatmul.mubr.msk.bf16.gmra.mxu1 %vm211_vm0, %v1272_v9 }
  0x13   :  { %1235 = vmatprep.mubr.msk.bf16.mxu0 %vm211_vm0, %v1273_v10  ;;  %1251 = vmatprep.mubr.msk.bf16.mxu1 %vm211_vm0, %v1274_v11 }
  0x1a   :  { %1236 = vmatmul.mubr.msk.bf16.gmra.mxu0 %vm211_vm0, %v1275_v12  ;;  %1252 = vmatmul.mubr.msk.bf16.gmra.mxu1 %vm211_vm0, %v1276_v13 }
  0x1b   :  { %1239 = vmatprep.mubr.msk.bf16.mxu0 %vm211_vm0, %v1277_v14  ;;  %1255 = vmatprep.mubr.msk.bf16.mxu1 %vm211_vm0, %v1278_v15 }
  0x22   :  { %1240 = vmatmul.mubr.msk.bf16.gmra.mxu0 %vm211_vm0, %v1279_v16  ;;  %1256 = vmatmul.mubr.msk.bf16.gmra.mxu1 %vm211_vm0, %v1280_v17 }
  0xca   :  { %v1229_v19 = vpop.f32.mrf.mxu0  ;;  %v1245_v20 = vpop.f32.mrf.mxu1 }
  0xcb   :  { %v1441_v21 = vadd.f32 %v1229_v19, %v1438_v18  ;;  %v1444_v22 = vadd.f32 %v1245_v20, %v1438_v18 }
  0xcc   :  { %v294_v23 = vpop.f32.mrf.mxu0  ;;  %v358_v24 = vpop.f32.mrf.mxu1 }
  0xcd   :  { %v593_v25 = vmul.f32 0.044715, %v1441_v21  ;;  %v609_v26 = vmul.f32 0.044715, %v1444_v22  ;;  %v1449_v27 = vadd.f32 %v1438_v18, %v294_v23  ;;  %v1452_v28 = vadd.f32 %v1438_v18, %v358_v24 }
  0xce   :  { %v1230_v29 = vpop.f32.mrf.mxu0  ;;  %v1246_v30 = vpop.f32.mrf.mxu1  ;;  %v561_v19 = vmul.f32 0.5, %v1441_v21 }
  0xcf   :  { %v625_v31 = vmul.f32 %v593_v25, %v1441_v21  ;;  %v641_v32 = vmul.f32 %v609_v26, %v1444_v22  ;;  %v1457_v33 = vadd.f32 %v1230_v29, %v1438_v18  ;;  %v1460_v34 = vadd.f32 %v1246_v30, %v1438_v18 }
  0xd0   :  { %v591_v35 = vmul.f32 0.044715, %v1449_v27  ;;  %v607_v36 = vmul.f32 0.044715, %v1452_v28  ;;  %v297_v37 = vpop.f32.mrf.mxu0  ;;  %v361_v38 = vpop.f32.mrf.mxu1 }
  0xd1   :  { %v657_v39 = vmul.f32 %v625_v31, %v1441_v21  ;;  %v673_v40 = vmul.f32 %v641_v32, %v1444_v22  ;;  %v594_v41 = vmul.f32 0.044715, %v1457_v33  ;;  %v610_v44 = vmul.f32 0.044715, %v1460_v34 }
  0xd2   :  { %v623_v42 = vmul.f32 %v591_v35, %v1449_v27  ;;  %v639_v43 = vmul.f32 %v607_v36, %v1452_v28  ;;  %v1474_v48 = vadd.f32 %v1438_v18, %v297_v37  ;;  %v1233_v49 = vpop.f32.mrf.mxu0  ;;  %v1480_v53 = vadd.f32 %v1438_v18, %v361_v38  ;;  %v1249_v54 = vpop.f32.mrf.mxu1 }
  0xd3   :  { %v689_v45 = vadd.f32 %v657_v39, %v1441_v21  ;;  %v705_v46 = vadd.f32 %v673_v40, %v1444_v22  ;;  %v626_v47 = vmul.f32 %v594_v41, %v1457_v33  ;;  %v642_v52 = vmul.f32 %v610_v44, %v1460_v34 }
  0xd4   :  { %v655_v50 = vmul.f32 %v623_v42, %v1449_v27  ;;  %v671_v51 = vmul.f32 %v639_v43, %v1452_v28  ;;  %v592_v61 = vmul.f32 0.044715, %v1474_v48  ;;  %v608_v63 = vmul.f32 0.044715, %v1480_v53  ;;  %v310_v0 = vpop.f32.mrf.mxu0  ;;  %v374_v4 = vpop.f32.mrf.mxu1 }
  0xd5   :  { %v721_v55 = vmul.f32 0.7978846, %v689_v45  ;;  %v737_v56 = vmul.f32 0.7978846, %v705_v46  ;;  %v658_v57 = vmul.f32 %v626_v47, %v1457_v33  ;;  %v674_v60 = vmul.f32 %v642_v52, %v1460_v34 }
  0xd6   :  { %v687_v58 = vadd.f32 %v655_v50, %v1449_v27  ;;  %v703_v59 = vadd.f32 %v671_v51, %v1452_v28  ;;  %v624_v6 = vmul.f32 %v592_v61, %v1474_v48  ;;  %v640_v7 = vmul.f32 %v608_v63, %v1480_v53  ;;  %v1234_v16 = vpop.f32.mrf.mxu0  ;;  %v1250_v17 = vpop.f32.mrf.mxu1 }
  0xd7   :  { %1281 = vtanh.f32 %v721_v55  ;;  %v690_v62 = vadd.f32 %v658_v57, %v1457_v33  ;;  %v706_v3 = vadd.f32 %v674_v60, %v1460_v34  ;;  %v1493_v8 = vadd.f32 %v1233_v49, %v1438_v18 }
  0xd8   :  { %1283 = vtanh.f32 %v737_v56  ;;  %v719_v1 = vmul.f32 0.7978846, %v687_v58  ;;  %v735_v2 = vmul.f32 0.7978846, %v703_v59  ;;  %v1496_v10 = vadd.f32 %v1249_v54, %v1438_v18  ;;  %v313_v47 = vpop.f32.mrf.mxu0 }
  0xd9   :  { %v722_v5 = vmul.f32 0.7978846, %v690_v62  ;;  %v738_v9 = vmul.f32 0.7978846, %v706_v3  ;;  %v1499_v11 = vadd.f32 %v1438_v18, %v310_v0  ;;  %v656_v12 = vmul.f32 %v624_v6, %v1474_v48 }
  0xda   :  { %1285 = vtanh.f32 %v719_v1  ;;  %v672_v13 = vmul.f32 %v640_v7, %v1480_v53  ;;  %v597_v14 = vmul.f32 0.044715, %v1493_v8  ;;  %v613_v15 = vmul.f32 0.044715, %v1496_v10 }
  0xdb   :  { %1287 = vtanh.f32 %v735_v2  ;;  %v688_v20 = vadd.f32 %v656_v12, %v1474_v48  ;;  %v595_v26 = vmul.f32 0.044715, %v1499_v11  ;;  %v1512_v29 = vadd.f32 %v1438_v18, %v374_v4  ;;  %v1237_v2 = vpop.f32.mrf.mxu0 }
  0xdc   :  { %1289 = vtanh.f32 %v722_v5  ;;  %v704_v23 = vadd.f32 %v672_v13, %v1480_v53  ;;  %v629_v24 = vmul.f32 %v597_v14, %v1493_v8  ;;  %v645_v25 = vmul.f32 %v613_v15, %v1496_v10 }
  0xdd   :  { %1291 = vtanh.f32 %v738_v9  ;;  %v720_v30 = vmul.f32 0.7978846, %v688_v20  ;;  %v1515_v32 = vadd.f32 %v1234_v16, %v1438_v18  ;;  %v1518_v21 = vadd.f32 %v1250_v17, %v1438_v18 }
  0xde   :  { %v736_v31 = vmul.f32 0.7978846, %v704_v23  ;;  %v577_v35 = vmul.f32 0.5, %v1444_v22  ;;  %v661_v36 = vmul.f32 %v629_v24, %v1493_v8  ;;  %v677_v37 = vmul.f32 %v645_v25, %v1496_v10  ;;  %v326_v25 = vpop.f32.mrf.mxu0 }
  0xdf   :  { %v627_v38 = vmul.f32 %v595_v26, %v1499_v11  ;;  %v1525_v39 = vmul.f32 0.5, %v1449_v27  ;;  %1293 = vtanh.f32 %v720_v30  ;;  %v611_v40 = vmul.f32 0.044715, %v1512_v29 }
  0xe0   :  { %v598_v41 = vmul.f32 0.044715, %v1515_v32  ;;  %1295 = vtanh.f32 %v736_v31  ;;  %v693_v42 = vadd.f32 %v661_v36, %v1493_v8  ;;  %v709_v43 = vadd.f32 %v677_v37, %v1496_v10 }
  0xe1   :  { %v659_v22 = vmul.f32 %v627_v38, %v1499_v11  ;;  %v1533_v44 = vmul.f32 0.5, %v1452_v28  ;;  %v643_v45 = vmul.f32 %v611_v40, %v1512_v29  ;;  %v614_v46 = vmul.f32 0.044715, %v1518_v21 }
  0xe2   :  { %v630_v27 = vmul.f32 %v598_v41, %v1515_v32  ;;  %v562_v50 = vmul.f32 0.5, %v1457_v33  ;;  %v725_v51 = vmul.f32 0.7978846, %v693_v42  ;;  %v741_v52 = vmul.f32 0.7978846, %v709_v43  ;;  %v377_v33 = vpop.f32.mrf.mxu1 }
  0xe3   :  { %v691_v54 = vadd.f32 %v659_v22, %v1499_v11  ;;  %v675_v57 = vmul.f32 %v643_v45, %v1512_v29  ;;  %v646_v58 = vmul.f32 %v614_v46, %v1518_v21  ;;  %v578_v60 = vmul.f32 0.5, %v1460_v34 }
  0xe4   :  { %v1282_v49 = vpop.eup %1281  ;;  %v662_v28 = vmul.f32 %v630_v27, %v1515_v32  ;;  %1297 = vtanh.f32 %v725_v51  ;;  %v1545_v61 = vadd.f32 %v1438_v18, %v313_v47  ;;  %v560_v4 = vmul.f32 0.5, %v1474_v48 }
  0xe5   :  { %v1284_v55 = vpop.eup %1283  ;;  %v785_v56 = vadd.f32 1.0, %v1282_v49  ;;  %1299 = vtanh.f32 %v741_v52  ;;  %v723_v63 = vmul.f32 0.7978846, %v691_v54  ;;  %v707_v0 = vadd.f32 %v675_v57, %v1512_v29 }
  0xe6   :  { %v801_v59 = vadd.f32 1.0, %v1284_v55  ;;  %v694_v1 = vadd.f32 %v662_v28, %v1515_v32  ;;  %v576_v5 = vmul.f32 0.5, %v1480_v53  ;;  %v1552_v34 = vmul.f32 0.5, %v1493_v8  ;;  %v1253_v53 = vpop.f32.mrf.mxu1 }
  0xe7   :  { %v1286_v62 = vpop.eup %1285  ;;  %v678_v6 = vmul.f32 %v646_v58, %v1518_v21  ;;  %v817_v9 = vmul.f32 %v785_v56, %v561_v19  ;;  %v1556_v14 = vadd.f32 %v1438_v18, %v377_v33  ;;  %v596_v48 = vmul.f32 0.044715, %v1545_v61 }
  0xe8   :  { %v1288_v3 = vpop.eup %1287  ;;  %v833_v12 = vmul.f32 %v801_v59, %v577_v35  ;;  %v726_v13 = vmul.f32 0.7978846, %v694_v1  ;;  %v783_v16 = vadd.f32 1.0, %v1286_v62  ;;  %1301 = vtanh.f32 %v723_v63  ;;  %v390_v55 = vpop.f32.mrf.mxu1 }
  0xe9   :  { %v1290_v7 = vpop.eup %1289  ;;  %v710_v20 = vadd.f32 %v678_v6, %v1518_v21  ;;  %v799_v23 = vadd.f32 1.0, %v1288_v3  ;;  %v739_v24 = vmul.f32 0.7978846, %v707_v0  ;;  %v628_v30 = vmul.f32 %v596_v48, %v1545_v61  ;;  %v1238_v6 = vpop.f32.mrf.mxu0 }
  0xea   :  { %v1292_v15 = vpop.eup %1291  ;;  %v786_v17 = vadd.f32 1.0, %v1290_v7  ;;  %1303 = vtanh.f32 %v726_v13  ;;  %v612_v35 = vmul.f32 0.044715, %v1556_v14  ;;  %v1563_v36 = vadd.f32 %v1237_v2, %v1438_v18 }
  0xeb   :  { %v802_v8 = vadd.f32 1.0, %v1292_v15  ;;  %v742_v19 = vmul.f32 0.7978846, %v710_v20  ;;  %v1566_v37 = vadd.f32 %v1253_v53, %v1438_v18  ;;  %v660_v41 = vmul.f32 %v628_v30, %v1545_v61  ;;  %v1254_v15 = vpop.f32.mrf.mxu1 }
  0xec   :  { %v818_v26 = vmul.f32 %v786_v17, %v562_v50  ;;  %v1294_v38 = vpop.eup %1293  ;;  %v1570_v42 = vadd.f32 %v1438_v18, %v326_v25  ;;  %v644_v27 = vmul.f32 %v612_v35, %v1556_v14  ;;  %v815_v46 = vmul.f32 %v783_v16, %v1525_v39  ;;  %v329_v35 = vpop.f32.mrf.mxu0 }
  0xed   :  { %v834_v31 = vmul.f32 %v802_v8, %v578_v60  ;;  %1305 = vtanh.f32 %v742_v19  ;;  %v1296_v43 = vpop.eup %1295  ;;  %v784_v45 = vadd.f32 1.0, %v1294_v38  ;;  %v692_v49 = vadd.f32 %v660_v41, %v1545_v61 }
  0xee   :  { %v1118_v40 = vpack.c.bf16 %v818_v26, %v817_v9  ;;  %1307 = vtanh.f32 %v739_v24  ;;  %v800_v47 = vadd.f32 1.0, %v1296_v43  ;;  %v601_v50 = vmul.f32 0.044715, %v1563_v36  ;;  %v393_v43 = vpop.f32.mrf.mxu1 }
  0xef   :  { %v1158_v22 = vpack.c.bf16 %v834_v31, %v833_v12  ;;  %v831_v51 = vmul.f32 %v799_v23, %v1533_v44  ;;  %v816_v52 = vmul.f32 %v784_v45, %v560_v4  ;;  %v676_v54 = vmul.f32 %v644_v27, %v1556_v14 }
  0xf0   :  { %1190 = vst [vmem:[%s1765_s3 + $0x8] sm:$0xff] %v1118_v40   ;;  %v617_v39 = vmul.f32 0.044715, %v1566_v37  ;;  %v832_v56 = vmul.f32 %v800_v47, %v576_v5  ;;  %v724_v57 = vmul.f32 0.7978846, %v692_v49  ;;  %v633_v28 = vmul.f32 %v601_v50, %v1563_v36 }
  0xf1   :  { %1198 = vst [vmem:[%s1765_s3 + $0x48] sm:$0xff] %v1158_v22   ;;  %v599_v58 = vmul.f32 0.044715, %v1570_v42  ;;  %v1298_v59 = vpop.eup %1297  ;;  %v1113_v60 = vpack.c.bf16 %v816_v52, %v815_v46  ;;  %v581_v44 = vmul.f32 0.5, %v1496_v10  ;;  %v708_v33 = vadd.f32 %v676_v54, %v1556_v14 }
  0xf2   :  { %v649_v62 = vmul.f32 %v617_v39, %v1566_v37  ;;  %v1300_v63 = vpop.eup %1299  ;;  %v1153_v0 = vpack.c.bf16 %v832_v56, %v831_v51  ;;  %1309 = vtanh.f32 %v724_v57  ;;  %v665_v1 = vmul.f32 %v633_v28, %v1563_v36  ;;  %v1241_v39 = vpop.f32.mrf.mxu0 }
  0xf3   :  { %v1592_v2 = vadd.f32 %v1438_v18, %v390_v55  ;;  %1114 = vst [vmem:[%s1765_s3] sm:$0xff] %v1113_v60   ;;  %v563_v3 = vmul.f32 0.5, %v1499_v11  ;;  %v740_v4 = vmul.f32 0.7978846, %v708_v33  ;;  %v631_v5 = vmul.f32 %v599_v58, %v1570_v42  ;;  %v1257_v58 = vpop.f32.mrf.mxu1 }
  0xf4   :  { %v681_v10 = vmul.f32 %v649_v62, %v1566_v37  ;;  %1197 = vst [vmem:[%s1765_s3 + $0x40] sm:$0xff] %v1153_v0   ;;  %v789_v7 = vadd.f32 1.0, %v1298_v59  ;;  %v1604_v9 = vmul.f32 0.5, %v1512_v29  ;;  %v566_v12 = vmul.f32 0.5, %v1515_v32 }
  0xf5   :  { %v697_v13 = vadd.f32 %v665_v1, %v1563_v36  ;;  %v805_v11 = vadd.f32 1.0, %v1300_v63  ;;  %1311 = vtanh.f32 %v740_v4  ;;  %v663_v17 = vmul.f32 %v631_v5, %v1570_v42  ;;  %v1302_v20 = vpop.eup %1301 }
  0xf6   :  { %v713_v16 = vadd.f32 %v681_v10, %v1566_v37  ;;  %v582_v48 = vmul.f32 0.5, %v1518_v21  ;;  %v615_v23 = vmul.f32 0.044715, %v1592_v2  ;;  %v1613_v29 = vadd.f32 %v1238_v6, %v1438_v18 }
  0xf7   :  { %v729_v53 = vmul.f32 0.7978846, %v697_v13  ;;  %v1304_v8 = vpop.eup %1303  ;;  %v564_v32 = vmul.f32 0.5, %v1545_v61  ;;  %v695_v25 = vadd.f32 %v663_v17, %v1570_v42  ;;  %v1618_v26 = vadd.f32 %v1254_v15, %v1438_v18 }
  0xf8   :  { %v745_v24 = vmul.f32 0.7978846, %v713_v16  ;;  %v821_v19 = vmul.f32 %v789_v7, %v1552_v34  ;;  %v790_v30 = vadd.f32 1.0, %v1304_v8  ;;  %v580_v21 = vmul.f32 0.5, %v1556_v14  ;;  %v406_v8 = vpop.f32.mrf.mxu1 }
  0xf9   :  { %v647_v31 = vmul.f32 %v615_v23, %v1592_v2  ;;  %v837_v40 = vmul.f32 %v805_v11, %v581_v44  ;;  %v787_v41 = vadd.f32 1.0, %v1302_v20  ;;  %1313 = vtanh.f32 %v729_v53  ;;  %v342_v20 = vpop.f32.mrf.mxu0 }
  0xfa   :  { %v1306_v38 = vpop.eup %1305  ;;  %v602_v61 = vmul.f32 0.044715, %v1613_v29  ;;  %v822_v45 = vmul.f32 %v790_v30, %v566_v12  ;;  %1315 = vtanh.f32 %v745_v24  ;;  %v727_v34 = vmul.f32 0.7978846, %v695_v25 }
  0xfb   :  { %v1308_v22 = vpop.eup %1307  ;;  %v806_v27 = vadd.f32 1.0, %v1306_v38  ;;  %v679_v46 = vmul.f32 %v647_v31, %v1592_v2  ;;  %v618_v14 = vmul.f32 0.044715, %v1618_v26  ;;  %v1628_v49 = vadd.f32 %v1438_v18, %v329_v35 }
  0xfc   :  { %v634_v47 = vmul.f32 %v602_v61, %v1613_v29  ;;  %v1128_v50 = vpack.c.bf16 %v822_v45, %v821_v19  ;;  %v1632_v54 = vadd.f32 %v1438_v18, %v393_v43  ;;  %v803_v55 = vadd.f32 1.0, %v1308_v22  ;;  %v1242_v45 = vpop.f32.mrf.mxu0 }
  0xfd   :  { %v838_v51 = vmul.f32 %v806_v27, %v582_v48  ;;  %v711_v52 = vadd.f32 %v679_v46, %v1592_v2  ;;  %v650_v57 = vmul.f32 %v618_v14, %v1618_v26  ;;  %v600_v28 = vmul.f32 0.044715, %v1628_v49  ;;  %v1258_v27 = vpop.f32.mrf.mxu1 }
  0xfe   :  { %v666_v56 = vmul.f32 %v634_v47, %v1613_v29  ;;  %v819_v59 = vmul.f32 %v787_v41, %v563_v3  ;;  %1192 = vst [vmem:[%s1765_s3 + $0x18] sm:$0xff] %v1128_v50   ;;  %v616_v33 = vmul.f32 0.044715, %v1632_v54  ;;  %v1645_v4 = vadd.f32 %v1241_v39, %v1438_v18 }
  0xff   :  { %v1168_v60 = vpack.c.bf16 %v838_v51, %v837_v40  ;;  %v743_v44 = vmul.f32 0.7978846, %v711_v52  ;;  %v1310_v62 = vpop.eup %1309  ;;  %v682_v0 = vmul.f32 %v650_v57, %v1618_v26  ;;  %v632_v1 = vmul.f32 %v600_v28, %v1628_v49  ;;  %v345_v28 = vpop.f32.mrf.mxu0 }
 0x100   :  { %v698_v63 = vadd.f32 %v666_v56, %v1613_v29  ;;  %v788_v3 = vadd.f32 1.0, %v1310_v62  ;;  %1317 = vtanh.f32 %v727_v34  ;;  %v648_v10 = vmul.f32 %v616_v33, %v1632_v54  ;;  %v409_v33 = vpop.f32.mrf.mxu1 }
 0x101   :  { %1200 = vst [vmem:[%s1765_s3 + $0x58] sm:$0xff] %v1168_v60   ;;  %v1652_v5 = vadd.f32 %v1257_v58, %v1438_v18  ;;  %v835_v6 = vmul.f32 %v803_v55, %v1604_v9  ;;  %v714_v12 = vadd.f32 %v682_v0, %v1618_v26  ;;  %v664_v13 = vmul.f32 %v632_v1, %v1628_v49 }
 0x102   :  { %v730_v7 = vmul.f32 0.7978846, %v698_v63  ;;  %v1312_v15 = vpop.eup %1311  ;;  %v820_v11 = vmul.f32 %v788_v3, %v564_v32  ;;  %1319 = vtanh.f32 %v743_v44  ;;  %v680_v16 = vmul.f32 %v648_v10, %v1632_v54 }
 0x103   :  { %v605_v17 = vmul.f32 0.044715, %v1645_v4  ;;  %v804_v48 = vadd.f32 1.0, %v1312_v15  ;;  %v746_v53 = vmul.f32 0.7978846, %v714_v12  ;;  %v696_v23 = vadd.f32 %v664_v13, %v1628_v49 }
 0x104   :  { %1321 = vtanh.f32 %v730_v7  ;;  %v1123_v9 = vpack.c.bf16 %v820_v11, %v819_v59  ;;  %v712_v24 = vadd.f32 %v680_v16, %v1632_v54  ;;  %v621_v19 = vmul.f32 0.044715, %v1652_v5 }
 0x105   :  { %v637_v25 = vmul.f32 %v605_v17, %v1645_v4  ;;  %v836_v32 = vmul.f32 %v804_v48, %v580_v21  ;;  %1323 = vtanh.f32 %v746_v53  ;;  %v728_v30 = vmul.f32 0.7978846, %v696_v23 }
 0x106   :  { %v1664_v31 = vadd.f32 %v1438_v18, %v342_v20  ;;  %v1314_v35 = vpop.eup %1313  ;;  %1191 = vst [vmem:[%s1765_s3 + $0x10] sm:$0xff] %v1123_v9   ;;  %v744_v38 = vmul.f32 0.7978846, %v712_v24  ;;  %v653_v41 = vmul.f32 %v621_v19, %v1652_v5  ;;  %v569_v22 = vmul.f32 0.5, %v1563_v36 }
 0x107   :  { %v669_v40 = vmul.f32 %v637_v25, %v1645_v4  ;;  %v1316_v61 = vpop.eup %1315  ;;  %v1163_v43 = vpack.c.bf16 %v836_v32, %v835_v6  ;;  %v585_v21 = vmul.f32 0.5, %v1566_v37  ;;  %1325 = vtanh.f32 %v728_v30 }
 0x108   :  { %v1674_v46 = vmul.f32 0.5, %v1570_v42  ;;  %1327 = vtanh.f32 %v744_v38  ;;  %v685_v47 = vmul.f32 %v653_v41, %v1652_v5  ;;  %v793_v14 = vadd.f32 1.0, %v1314_v35 }
 0x109   :  { %v701_v34 = vadd.f32 %v669_v40, %v1645_v4  ;;  %1199 = vst [vmem:[%s1765_s3 + $0x50] sm:$0xff] %v1163_v43   ;;  %v1682_v36 = vmul.f32 0.5, %v1592_v2  ;;  %v603_v37 = vmul.f32 0.044715, %v1664_v31  ;;  %v1686_v50 = vadd.f32 %v1438_v18, %v406_v8 }
 0x10a   :  { %v809_v42 = vadd.f32 1.0, %v1316_v61  ;;  %v717_v51 = vadd.f32 %v685_v47, %v1652_v5  ;;  %v1690_v52 = vadd.f32 %v1242_v45, %v1438_v18  ;;  %v1693_v39 = vadd.f32 %v1258_v27, %v1438_v18 }
 0x10b   :  { %v570_v55 = vmul.f32 0.5, %v1613_v29  ;;  %v586_v56 = vmul.f32 0.5, %v1618_v26  ;;  %v635_v2 = vmul.f32 %v603_v37, %v1664_v31  ;;  %v619_v57 = vmul.f32 0.044715, %v1686_v50 }
 0x10c   :  { %v568_v58 = vmul.f32 0.5, %v1628_v49  ;;  %v584_v59 = vmul.f32 0.5, %v1632_v54  ;;  %v733_v60 = vmul.f32 0.7978846, %v701_v34  ;;  %v606_v44 = vmul.f32 0.044715, %v1690_v52 }
 0x10d   :  { %v1318_v62 = vpop.eup %1317  ;;  %v825_v63 = vmul.f32 %v793_v14, %v569_v22  ;;  %v667_v0 = vmul.f32 %v635_v2, %v1664_v31  ;;  %v651_v29 = vmul.f32 %v619_v57, %v1686_v50  ;;  %v622_v26 = vmul.f32 0.044715, %v1693_v39 }
 0x10e   :  { %v841_v1 = vmul.f32 %v809_v42, %v585_v21  ;;  %v749_v3 = vmul.f32 0.7978846, %v717_v51  ;;  %v638_v10 = vmul.f32 %v606_v44, %v1690_v52  ;;  %v1707_v49 = vadd.f32 %v1438_v18, %v345_v28 }
 0x10f   :  { %v1320_v54 = vpop.eup %1319  ;;  %v699_v6 = vadd.f32 %v667_v0, %v1664_v31  ;;  %v683_v7 = vmul.f32 %v651_v29, %v1686_v50  ;;  %v654_v12 = vmul.f32 %v622_v26, %v1693_v39  ;;  %v1713_v13 = vadd.f32 %v1438_v18, %v409_v33 }
 0x110   :  { %v791_v11 = vadd.f32 1.0, %v1318_v62  ;;  %1329 = vtanh.f32 %v733_v60  ;;  %v670_v16 = vmul.f32 %v638_v10, %v1690_v52  ;;  %v604_v17 = vmul.f32 0.044715, %v1707_v49 }
 0x111   :  { %v1322_v15 = vpop.eup %1321  ;;  %v731_v48 = vmul.f32 0.7978846, %v699_v6  ;;  %v715_v53 = vadd.f32 %v683_v7, %v1686_v50  ;;  %v686_v23 = vmul.f32 %v654_v12, %v1693_v39  ;;  %1331 = vtanh.f32 %v749_v3 }
 0x112   :  { %v794_v20 = vadd.f32 1.0, %v1322_v15  ;;  %v1324_v8 = vpop.eup %1323  ;;  %v702_v9 = vadd.f32 %v670_v16, %v1690_v52  ;;  %v636_v18 = vmul.f32 %v604_v17, %v1707_v49  ;;  %v620_v24 = vmul.f32 0.044715, %v1713_v13 }
 0x113   :  { %v807_v25 = vadd.f32 1.0, %v1320_v54  ;;  %v810_v32 = vadd.f32 1.0, %v1324_v8  ;;  %1333 = vtanh.f32 %v731_v48  ;;  %v718_v38 = vadd.f32 %v686_v23, %v1693_v39 }
 0x114   :  { %v826_v19 = vmul.f32 %v794_v20, %v570_v55  ;;  %v1326_v30 = vpop.eup %1325  ;;  %v734_v35 = vmul.f32 0.7978846, %v702_v9  ;;  %v668_v40 = vmul.f32 %v636_v18, %v1707_v49  ;;  %v652_v41 = vmul.f32 %v620_v24, %v1713_v13 }
 0x115   :  { %v1328_v61 = vpop.eup %1327  ;;  %v842_v22 = vmul.f32 %v810_v32, %v586_v56  ;;  %v792_v21 = vadd.f32 1.0, %v1326_v30  ;;  %v747_v45 = vmul.f32 0.7978846, %v715_v53  ;;  %v750_v34 = vmul.f32 0.7978846, %v718_v38 }
 0x116   :  { %v1138_v43 = vpack.c.bf16 %v826_v19, %v825_v63  ;;  %v808_v27 = vadd.f32 1.0, %v1328_v61  ;;  %1335 = vtanh.f32 %v734_v35  ;;  %v700_v47 = vadd.f32 %v668_v40, %v1707_v49 }
 0x117   :  { %v823_v14 = vmul.f32 %v791_v11, %v1674_v46  ;;  %v1178_v37 = vpack.c.bf16 %v842_v22, %v841_v1  ;;  %v824_v42 = vmul.f32 %v792_v21, %v568_v58  ;;  %v684_v51 = vmul.f32 %v652_v41, %v1713_v13 }
 0x118   :  { %1194 = vst [vmem:[%s1765_s3 + $0x28] sm:$0xff] %v1138_v43   ;;  %v839_v55 = vmul.f32 %v807_v25, %v1682_v36  ;;  %v840_v56 = vmul.f32 %v808_v27, %v584_v59  ;;  %1337 = vtanh.f32 %v750_v34  ;;  %v732_v2 = vmul.f32 0.7978846, %v700_v47 }
 0x119   :  { %1202 = vst [vmem:[%s1765_s3 + $0x68] sm:$0xff] %v1178_v37   ;;  %v1133_v57 = vpack.c.bf16 %v824_v42, %v823_v14  ;;  %1339 = vtanh.f32 %v747_v45  ;;  %v716_v46 = vadd.f32 %v684_v51, %v1713_v13  ;;  %v573_v62 = vmul.f32 0.5, %v1645_v4 }
 0x11a   :  { %v1173_v28 = vpack.c.bf16 %v840_v56, %v839_v55  ;;  %1341 = vtanh.f32 %v732_v2  ;;  %v574_v0 = vmul.f32 0.5, %v1690_v52  ;;  %v589_v1 = vmul.f32 0.5, %v1652_v5 }
 0x11b   :  { %1193 = vst [vmem:[%s1765_s3 + $0x20] sm:$0xff] %v1133_v57   ;;  %v748_v58 = vmul.f32 0.7978846, %v716_v46  ;;  %v590_v3 = vmul.f32 0.5, %v1693_v39  ;;  %v571_v11 = vmul.f32 0.5, %v1664_v31  ;;  %v572_v16 = vmul.f32 0.5, %v1707_v49 }
 0x11c   :  { %1201 = vst [vmem:[%s1765_s3 + $0x60] sm:$0xff] %v1173_v28   ;;  %v587_v8 = vmul.f32 0.5, %v1686_v50  ;;  %v588_v9 = vmul.f32 0.5, %v1713_v13 }
 0x11d   :  { %v1330_v36 = vpop.eup %1329  ;;  %1343 = vtanh.f32 %v748_v58 }
 0x11e   :  { %v1332_v59 = vpop.eup %1331  ;;  %v797_v44 = vadd.f32 1.0, %v1330_v36 }
 0x11f   :  { %v813_v63 = vadd.f32 1.0, %v1332_v59 }
 0x120   :  { %v1334_v60 = vpop.eup %1333  ;;  %v829_v54 = vmul.f32 %v797_v44, %v573_v62 }
 0x121   :  { %v795_v6 = vadd.f32 1.0, %v1334_v60  ;;  %v845_v4 = vmul.f32 %v813_v63, %v589_v1 }
 0x123   :  { %v1336_v33 = vpop.eup %1335  ;;  %v827_v23 = vmul.f32 %v795_v6, %v571_v11 }
 0x124   :  { %v798_v29 = vadd.f32 1.0, %v1336_v33 }
 0x125   :  { %v1338_v26 = vpop.eup %1337 }
 0x126   :  { %v1340_v10 = vpop.eup %1339  ;;  %v830_v7 = vmul.f32 %v798_v29, %v574_v0  ;;  %v814_v12 = vadd.f32 1.0, %v1338_v26 }
 0x127   :  { %v1342_v15 = vpop.eup %1341  ;;  %v811_v48 = vadd.f32 1.0, %v1340_v10 }
 0x128   :  { %v1148_v17 = vpack.c.bf16 %v830_v7, %v829_v54  ;;  %v846_v20 = vmul.f32 %v814_v12, %v590_v3  ;;  %v796_v52 = vadd.f32 1.0, %v1342_v15 }
 0x129   :  { %v843_v18 = vmul.f32 %v811_v48, %v587_v8 }
 0x12a   :  { %v1344_v53 = vpop.eup %1343  ;;  %1196 = vst [vmem:[%s1765_s3 + $0x38] sm:$0xff] %v1148_v17   ;;  %v1188_v5 = vpack.c.bf16 %v846_v20, %v845_v4  ;;  %v828_v39 = vmul.f32 %v796_v52, %v572_v16 }
 0x12b   :  { %v812_v31 = vadd.f32 1.0, %v1344_v53 }
 0x12c   :  { %1204 = vst [vmem:[%s1765_s3 + $0x78] sm:$0xff] %v1188_v5   ;;  %v1143_v49 = vpack.c.bf16 %v828_v39, %v827_v23 }
 0x12d   :  { %v844_v24 = vmul.f32 %v812_v31, %v588_v9 }
 0x12e   :  { %1195 = vst [vmem:[%s1765_s3 + $0x30] sm:$0xff] %v1143_v49  }
 0x12f   :  { %v1183_v25 = vpack.c.bf16 %v844_v24, %v843_v18 }
 0x131   :  { %1203 = vst [vmem:[%s1765_s3 + $0x70] sm:$0xff] %v1183_v25  }

// kernel: jointbert_forward.29
= control target key start
LH: loop header
LB: loop body
LE: loop exit
PB: predicated region body
PF: predicated region fallthrough
CT: control target
= control target key end

     0   :  { %vm211_vm0 = vcmask 261120   ;;  %s929_s1 = inlined_call_operand.vmem [shape: bf16[32,128], index: 1, kind: input, shape index: {}]   ;;  %s930_s0 = inlined_call_operand.vmem [shape: bf16[256,32], index: 0, kind: input, shape index: {}]   ;;  %s931_s2 = inlined_call_operand.vmem [shape: f32[1,128], index: 2, kind: input, shape index: {}]   ;;  %s932_s3 = inlined_call_operand.vmem [shape: f32[256,128], index: 3, kind: output, shape index: {}]  }
   0x1   :  { %v688_v0 = vld [vmem:[%s929_s1 + $0x8] sm:$0xff]   ;;  %v689_v1 = vld [vmem:[%s929_s1] sm:$0xff]   ;;  %v694_v6 = vld [vmem:[%s930_s0 + $0x10] sm:$0xff]  }
   0x2   :  { %648 = vmatprep.subr.bf16.mxu0 %v688_v0  ;;  %684 = vmatprep.subr.bf16.mxu1 %v688_v0  ;;  %v690_v2 = vld [vmem:[%s930_s0] sm:$0xff]   ;;  %v692_v4 = vld [vmem:[%s930_s0 + $0x8] sm:$0xff]   ;;  %v695_v7 = vld [vmem:[%s930_s0 + $0x50] sm:$0xff]  }
   0x3   :  { %649 = vmatpush3.bf16.msra.mxu0 %v688_v0  ;;  %686 = vmatpush3.bf16.msra.mxu1 %v688_v0  ;;  %v691_v3 = vld [vmem:[%s930_s0 + $0x40] sm:$0xff]   ;;  %v693_v5 = vld [vmem:[%s930_s0 + $0x48] sm:$0xff]   ;;  %v696_v8 = vld [vmem:[%s930_s0 + $0x18] sm:$0xff]  }
   0x4   :  { %650 = vmatprep.subr.bf16.mxu0 %v689_v1  ;;  %685 = vmatprep.subr.bf16.mxu1 %v689_v1  ;;  %v697_v9 = vld [vmem:[%s930_s0 + $0x58] sm:$0xff]   ;;  %v698_v10 = vld [vmem:[%s930_s0 + $0x20] sm:$0xff]   ;;  %v700_v12 = vld [vmem:[%s930_s0 + $0x28] sm:$0xff]  }
   0x5   :  { %652 = vmatprep.mubr.msk.bf16.mxu0 %vm211_vm0, %v690_v2  ;;  %668 = vmatprep.mubr.msk.bf16.mxu1 %vm211_vm0, %v691_v3  ;;  %v699_v11 = vld [vmem:[%s930_s0 + $0x60] sm:$0xff]   ;;  %v701_v13 = vld [vmem:[%s930_s0 + $0x68] sm:$0xff]   ;;  %v702_v14 = vld [vmem:[%s930_s0 + $0x30] sm:$0xff]  }
   0x6   :  { %v703_v15 = vld [vmem:[%s930_s0 + $0x70] sm:$0xff]   ;;  %v704_v16 = vld [vmem:[%s930_s0 + $0x38] sm:$0xff]   ;;  %v799_v18 = vld [vmem:[%s931_s2] ss:$0 sm:$0xff] }
   0x7   :  { %651 = vmatpush3.bf16.msra.mxu0 %v689_v1  ;;  %687 = vmatpush3.bf16.msra.mxu1 %v689_v1  ;;  %v705_v17 = vld [vmem:[%s930_s0 + $0x78] sm:$0xff]  }
   0xa   :  { %653 = vmatmul.mubr.msk.bf16.vlgmr.msra.gmra.mxu0 %vm211_vm0, %v692_v4  ;;  %669 = vmatmul.mubr.msk.bf16.vlgmr.msra.gmra.mxu1 %vm211_vm0, %v693_v5 }
   0xb   :  { %656 = vmatprep.mubr.msk.bf16.mxu0 %vm211_vm0, %v694_v6  ;;  %672 = vmatprep.mubr.msk.bf16.mxu1 %vm211_vm0, %v695_v7 }
  0x12   :  { %657 = vmatmul.mubr.msk.bf16.gmra.mxu0 %vm211_vm0, %v696_v8  ;;  %673 = vmatmul.mubr.msk.bf16.gmra.mxu1 %vm211_vm0, %v697_v9 }
  0x13   :  { %660 = vmatprep.mubr.msk.bf16.mxu0 %vm211_vm0, %v698_v10  ;;  %676 = vmatprep.mubr.msk.bf16.mxu1 %vm211_vm0, %v699_v11 }
  0x1a   :  { %661 = vmatmul.mubr.msk.bf16.gmra.mxu0 %vm211_vm0, %v700_v12  ;;  %677 = vmatmul.mubr.msk.bf16.gmra.mxu1 %vm211_vm0, %v701_v13 }
  0x1b   :  { %664 = vmatprep.mubr.msk.bf16.mxu0 %vm211_vm0, %v702_v14  ;;  %680 = vmatprep.mubr.msk.bf16.mxu1 %vm211_vm0, %v703_v15 }
  0x22   :  { %665 = vmatmul.mubr.msk.bf16.gmra.mxu0 %vm211_vm0, %v704_v16  ;;  %681 = vmatmul.mubr.msk.bf16.gmra.mxu1 %vm211_vm0, %v705_v17 }
  0xca   :  { %v654_v19 = vpop.f32.mrf.mxu0  ;;  %v670_v20 = vpop.f32.mrf.mxu1 }
  0xcb   :  { %v529_v21 = vadd.f32 %v654_v19, %v799_v18  ;;  %v545_v22 = vadd.f32 %v670_v20, %v799_v18 }
  0xcc   :  { %v294_v23 = vpop.f32.mrf.mxu0  ;;  %v358_v24 = vpop.f32.mrf.mxu1 }
  0xcd   :  { %561 = vst [vmem:[%s932_s3 + $0x10] sm:$0xff] %v529_v21  ;;  %577 = vst [vmem:[%s932_s3 + $0x90] sm:$0xff] %v545_v22  ;;  %v527_v25 = vadd.f32 %v799_v18, %v294_v23  ;;  %v543_v26 = vadd.f32 %v799_v18, %v358_v24 }
  0xce   :  { %v655_v27 = vpop.f32.mrf.mxu0  ;;  %v671_v28 = vpop.f32.mrf.mxu1 }
  0xcf   :  { %559 = vst [vmem:[%s932_s3] sm:$0xff] %v527_v25  ;;  %575 = vst [vmem:[%s932_s3 + $0x80] sm:$0xff] %v543_v26  ;;  %v530_v29 = vadd.f32 %v655_v27, %v799_v18  ;;  %v546_v30 = vadd.f32 %v671_v28, %v799_v18 }
  0xd0   :  { %v297_v31 = vpop.f32.mrf.mxu0  ;;  %v361_v32 = vpop.f32.mrf.mxu1 }
  0xd1   :  { %562 = vst [vmem:[%s932_s3 + $0x18] sm:$0xff] %v530_v29  ;;  %578 = vst [vmem:[%s932_s3 + $0x98] sm:$0xff] %v546_v30  ;;  %v528_v33 = vadd.f32 %v799_v18, %v297_v31  ;;  %v544_v34 = vadd.f32 %v799_v18, %v361_v32 }
  0xd2   :  { %v658_v35 = vpop.f32.mrf.mxu0  ;;  %v674_v36 = vpop.f32.mrf.mxu1 }
  0xd3   :  { %560 = vst [vmem:[%s932_s3 + $0x8] sm:$0xff] %v528_v33  ;;  %576 = vst [vmem:[%s932_s3 + $0x88] sm:$0xff] %v544_v34  ;;  %v533_v37 = vadd.f32 %v658_v35, %v799_v18  ;;  %v549_v38 = vadd.f32 %v674_v36, %v799_v18 }
  0xd4   :  { %v310_v39 = vpop.f32.mrf.mxu0  ;;  %v374_v40 = vpop.f32.mrf.mxu1 }
  0xd5   :  { %565 = vst [vmem:[%s932_s3 + $0x30] sm:$0xff] %v533_v37  ;;  %581 = vst [vmem:[%s932_s3 + $0xb0] sm:$0xff] %v549_v38  ;;  %v531_v41 = vadd.f32 %v799_v18, %v310_v39  ;;  %v547_v42 = vadd.f32 %v799_v18, %v374_v40 }
  0xd6   :  { %v659_v43 = vpop.f32.mrf.mxu0  ;;  %v675_v44 = vpop.f32.mrf.mxu1 }
  0xd7   :  { %563 = vst [vmem:[%s932_s3 + $0x20] sm:$0xff] %v531_v41  ;;  %579 = vst [vmem:[%s932_s3 + $0xa0] sm:$0xff] %v547_v42  ;;  %v534_v45 = vadd.f32 %v659_v43, %v799_v18  ;;  %v550_v46 = vadd.f32 %v675_v44, %v799_v18 }
  0xd8   :  { %v313_v47 = vpop.f32.mrf.mxu0  ;;  %v377_v48 = vpop.f32.mrf.mxu1 }
  0xd9   :  { %566 = vst [vmem:[%s932_s3 + $0x38] sm:$0xff] %v534_v45  ;;  %582 = vst [vmem:[%s932_s3 + $0xb8] sm:$0xff] %v550_v46  ;;  %v532_v49 = vadd.f32 %v799_v18, %v313_v47  ;;  %v548_v50 = vadd.f32 %v799_v18, %v377_v48 }
  0xda   :  { %v662_v51 = vpop.f32.mrf.mxu0  ;;  %v678_v52 = vpop.f32.mrf.mxu1 }
  0xdb   :  { %564 = vst [vmem:[%s932_s3 + $0x28] sm:$0xff] %v532_v49  ;;  %580 = vst [vmem:[%s932_s3 + $0xa8] sm:$0xff] %v548_v50  ;;  %v537_v53 = vadd.f32 %v662_v51, %v799_v18  ;;  %v553_v54 = vadd.f32 %v678_v52, %v799_v18 }
  0xdc   :  { %v326_v55 = vpop.f32.mrf.mxu0  ;;  %v390_v56 = vpop.f32.mrf.mxu1 }
  0xdd   :  { %569 = vst [vmem:[%s932_s3 + $0x50] sm:$0xff] %v537_v53  ;;  %585 = vst [vmem:[%s932_s3 + $0xd0] sm:$0xff] %v553_v54  ;;  %v535_v57 = vadd.f32 %v799_v18, %v326_v55  ;;  %v551_v58 = vadd.f32 %v799_v18, %v390_v56 }
  0xde   :  { %v663_v59 = vpop.f32.mrf.mxu0  ;;  %v679_v60 = vpop.f32.mrf.mxu1 }
  0xdf   :  { %567 = vst [vmem:[%s932_s3 + $0x40] sm:$0xff] %v535_v57  ;;  %583 = vst [vmem:[%s932_s3 + $0xc0] sm:$0xff] %v551_v58  ;;  %v538_v61 = vadd.f32 %v663_v59, %v799_v18  ;;  %v554_v62 = vadd.f32 %v679_v60, %v799_v18 }
  0xe0   :  { %v329_v63 = vpop.f32.mrf.mxu0  ;;  %v393_v0 = vpop.f32.mrf.mxu1 }
  0xe1   :  { %570 = vst [vmem:[%s932_s3 + $0x58] sm:$0xff] %v538_v61  ;;  %586 = vst [vmem:[%s932_s3 + $0xd8] sm:$0xff] %v554_v62  ;;  %v536_v1 = vadd.f32 %v799_v18, %v329_v63  ;;  %v552_v2 = vadd.f32 %v799_v18, %v393_v0 }
  0xe2   :  { %v666_v3 = vpop.f32.mrf.mxu0  ;;  %v682_v4 = vpop.f32.mrf.mxu1 }
  0xe3   :  { %568 = vst [vmem:[%s932_s3 + $0x48] sm:$0xff] %v536_v1  ;;  %584 = vst [vmem:[%s932_s3 + $0xc8] sm:$0xff] %v552_v2  ;;  %v541_v5 = vadd.f32 %v666_v3, %v799_v18  ;;  %v557_v6 = vadd.f32 %v682_v4, %v799_v18 }
  0xe4   :  { %v342_v7 = vpop.f32.mrf.mxu0  ;;  %v406_v8 = vpop.f32.mrf.mxu1 }
  0xe5   :  { %573 = vst [vmem:[%s932_s3 + $0x70] sm:$0xff] %v541_v5  ;;  %589 = vst [vmem:[%s932_s3 + $0xf0] sm:$0xff] %v557_v6  ;;  %v539_v9 = vadd.f32 %v799_v18, %v342_v7  ;;  %v555_v10 = vadd.f32 %v799_v18, %v406_v8 }
  0xe6   :  { %v667_v11 = vpop.f32.mrf.mxu0  ;;  %v683_v12 = vpop.f32.mrf.mxu1 }
  0xe7   :  { %571 = vst [vmem:[%s932_s3 + $0x60] sm:$0xff] %v539_v9  ;;  %587 = vst [vmem:[%s932_s3 + $0xe0] sm:$0xff] %v555_v10  ;;  %v542_v13 = vadd.f32 %v667_v11, %v799_v18  ;;  %v558_v14 = vadd.f32 %v683_v12, %v799_v18 }
  0xe8   :  { %v345_v15 = vpop.f32.mrf.mxu0  ;;  %v409_v16 = vpop.f32.mrf.mxu1 }
  0xe9   :  { %574 = vst [vmem:[%s932_s3 + $0x78] sm:$0xff] %v542_v13  ;;  %590 = vst [vmem:[%s932_s3 + $0xf8] sm:$0xff] %v558_v14  ;;  %v540_v17 = vadd.f32 %v799_v18, %v345_v15  ;;  %v556_v19 = vadd.f32 %v799_v18, %v409_v16 }
  0xeb   :  { %572 = vst [vmem:[%s932_s3 + $0x68] sm:$0xff] %v540_v17  ;;  %588 = vst [vmem:[%s932_s3 + $0xe8] sm:$0xff] %v556_v19 }

// kernel: jointbert_forward.21
= control target key start
LH: loop header
LB: loop body
LE: loop exit
PB: predicated region body
PF: predicated region fallthrough
CT: control target
= control target key end

     0   :  { %vm28_vm0 = vcmask 261120   ;;  %v1688_v1 = vmov 0.0   ;;  %vm1304_vm1 = vcmask 257024   ;;  %s2515_s1 = inlined_call_operand.vmem [shape: bf16[128,32], index: 1, kind: input, shape index: {}]   ;;  %s2516_s0 = inlined_call_operand.vmem [shape: bf16[256,128], index: 0, kind: input, shape index: {}]   ;;  %s2517_s3 = inlined_call_operand.vmem [shape: bf16[256,32], index: 3, kind: input, shape index: {}]   ;;  %s2518_s2 = inlined_call_operand.vmem [shape: f32[1,32], index: 2, kind: input, shape index: {}]   ;;  %s2519_s4 = inlined_call_operand.vmem [shape: f32[1,32], index: 4, kind: input, shape index: {}]   ;;  %s2520_s5 = inlined_call_operand.vmem [shape: f32[1,32], index: 5, kind: input, shape index: {}]   ;;  %s2521_s6 = inlined_call_operand.vmem [shape: bf16[256,32], index: 6, kind: output, shape index: {}]  }
   0x1   :  { %v1600_v0 = vld [vmem:[%s2515_s1 + $0x38] sm:$0xff]   ;;  %31 = vst.msk [vmem:[#allocation2 + $0x10] sm:$0xff] %vm28_vm0, %v1688_v1  ;;  %29 = vst.msk [vmem:[#allocation2] sm:$0xff] %vm28_vm0, %v1688_v1  ;;  %v1601_v2 = vld [vmem:[%s2515_s1 + $0x30] sm:$0xff]  }
   0x2   :  { %30 = vst.msk [vmem:[#allocation2 + $0x8] sm:$0xff] %vm28_vm0, %v1688_v1  ;;  %32 = vst.msk [vmem:[#allocation2 + $0x18] sm:$0xff] %vm28_vm0, %v1688_v1  ;;  %1535 = vmatprep.subr.bf16.mxu0 %v1600_v0  ;;  %1583 = vmatprep.subr.bf16.mxu1 %v1600_v0  ;;  %v1602_v3 = vld [vmem:[%s2515_s1 + $0x28] sm:$0xff]   ;;  %v1603_v4 = vld [vmem:[%s2515_s1 + $0x20] sm:$0xff]  }
   0x3   :  { %33 = vst.msk [vmem:[#allocation2 + $0x20] sm:$0xff] %vm28_vm0, %v1688_v1  ;;  %34 = vst.msk [vmem:[#allocation2 + $0x28] sm:$0xff] %vm28_vm0, %v1688_v1  ;;  %1536 = vmatpush3.bf16.msra.mxu0 %v1600_v0  ;;  %1591 = vmatpush3.bf16.msra.mxu1 %v1600_v0  ;;  %v1608_v5 = vld [vmem:[%s2516_s0] sm:$0xff]   ;;  %v1604_v7 = vld [vmem:[%s2515_s1 + $0x18] sm:$0xff]  }
   0x4   :  { %35 = vst.msk [vmem:[#allocation2 + $0x30] sm:$0xff] %vm28_vm0, %v1688_v1  ;;  %36 = vst.msk [vmem:[#allocation2 + $0x38] sm:$0xff] %vm28_vm0, %v1688_v1  ;;  %1537 = vmatprep.subr.bf16.mxu0 %v1601_v2  ;;  %1584 = vmatprep.subr.bf16.mxu1 %v1601_v2  ;;  %v1609_v6 = vld [vmem:[%s2516_s0 + $0x40] sm:$0xff]   ;;  %v1605_v8 = vld [vmem:[%s2515_s1 + $0x10] sm:$0xff]  }
   0x5   :  { %37 = vst.msk [vmem:[#allocation2 + $0x40] sm:$0xff] %vm28_vm0, %v1688_v1  ;;  %38 = vst.msk [vmem:[#allocation2 + $0x48] sm:$0xff] %vm28_vm0, %v1688_v1  ;;  %1551 = vmatprep.mubr.bf16.mxu0 %v1608_v5  ;;  %1567 = vmatprep.mubr.bf16.mxu1 %v1609_v6  ;;  %v1606_v9 = vld [vmem:[%s2515_s1 + $0x8] sm:$0xff]   ;;  %v1607_v10 = vld [vmem:[%s2515_s1] sm:$0xff]  }
   0x6   :  { %39 = vst.msk [vmem:[#allocation2 + $0x50] sm:$0xff] %vm28_vm0, %v1688_v1  ;;  %40 = vst.msk [vmem:[#allocation2 + $0x58] sm:$0xff] %vm28_vm0, %v1688_v1  ;;  %v1610_v11 = vld [vmem:[%s2516_s0 + $0x8] sm:$0xff]   ;;  %v1612_v13 = vld [vmem:[%s2516_s0 + $0x10] sm:$0xff]  }
   0x7   :  { %41 = vst.msk [vmem:[#allocation2 + $0x60] sm:$0xff] %vm28_vm0, %v1688_v1  ;;  %42 = vst.msk [vmem:[#allocation2 + $0x68] sm:$0xff] %vm28_vm0, %v1688_v1  ;;  %1538 = vmatpush3.bf16.msra.mxu0 %v1601_v2  ;;  %1592 = vmatpush3.bf16.msra.mxu1 %v1601_v2  ;;  %v1611_v12 = vld [vmem:[%s2516_s0 + $0x48] sm:$0xff]   ;;  %v1614_v14 = vld [vmem:[%s2516_s0 + $0x50] sm:$0xff]  }
   0x8   :  { %43 = vst.msk [vmem:[#allocation2 + $0x70] sm:$0xff] %vm28_vm0, %v1688_v1  ;;  %44 = vst.msk [vmem:[#allocation2 + $0x78] sm:$0xff] %vm28_vm0, %v1688_v1  ;;  %1539 = vmatprep.subr.bf16.mxu0 %v1602_v3  ;;  %1585 = vmatprep.subr.bf16.mxu1 %v1602_v3  ;;  %v1613_v15 = vld [vmem:[%s2516_s0 + $0x18] sm:$0xff]   ;;  %v1616_v17 = vld [vmem:[%s2516_s0 + $0x20] sm:$0xff]  }
   0x9   :  { %45 = vst.msk [vmem:[#allocation2 + $0x80] sm:$0xff] %vm28_vm0, %v1688_v1  ;;  %46 = vst.msk [vmem:[#allocation2 + $0x88] sm:$0xff] %vm28_vm0, %v1688_v1  ;;  %v1615_v16 = vld [vmem:[%s2516_s0 + $0x58] sm:$0xff]   ;;  %v1618_v18 = vld [vmem:[%s2516_s0 + $0x60] sm:$0xff]  }
   0xa   :  { %47 = vst.msk [vmem:[#allocation2 + $0x90] sm:$0xff] %vm28_vm0, %v1688_v1  ;;  %48 = vst.msk [vmem:[#allocation2 + $0x98] sm:$0xff] %vm28_vm0, %v1688_v1  ;;  %v1617_v19 = vld [vmem:[%s2516_s0 + $0x28] sm:$0xff]   ;;  %v1620_v21 = vld [vmem:[%s2516_s0 + $0x30] sm:$0xff]  }
   0xb   :  { %49 = vst.msk [vmem:[#allocation2 + $0xa0] sm:$0xff] %vm28_vm0, %v1688_v1  ;;  %50 = vst.msk [vmem:[#allocation2 + $0xa8] sm:$0xff] %vm28_vm0, %v1688_v1  ;;  %1540 = vmatpush3.bf16.msra.mxu0 %v1602_v3  ;;  %1593 = vmatpush3.bf16.msra.mxu1 %v1602_v3  ;;  %v1619_v20 = vld [vmem:[%s2516_s0 + $0x68] sm:$0xff]   ;;  %v1622_v22 = vld [vmem:[%s2516_s0 + $0x70] sm:$0xff]  }
   0xc   :  { %51 = vst.msk [vmem:[#allocation2 + $0xb0] sm:$0xff] %vm28_vm0, %v1688_v1  ;;  %52 = vst.msk [vmem:[#allocation2 + $0xb8] sm:$0xff] %vm28_vm0, %v1688_v1  ;;  %1541 = vmatprep.subr.bf16.mxu0 %v1603_v4  ;;  %1586 = vmatprep.subr.bf16.mxu1 %v1603_v4  ;;  %v1621_v23 = vld [vmem:[%s2516_s0 + $0x38] sm:$0xff]   ;;  %v63_v25 = vld [vmem:[#allocation2 + $0x10] sm:$0xff] }
   0xd   :  { %53 = vst.msk [vmem:[#allocation2 + $0xc0] sm:$0xff] %vm28_vm0, %v1688_v1  ;;  %54 = vst.msk [vmem:[#allocation2 + $0xc8] sm:$0xff] %vm28_vm0, %v1688_v1  ;;  %v1623_v24 = vld [vmem:[%s2516_s0 + $0x78] sm:$0xff]   ;;  %v61_v29 = vld [vmem:[#allocation2] sm:$0xff] }
   0xe   :  { %55 = vst.msk [vmem:[#allocation2 + $0xd0] sm:$0xff] %vm28_vm0, %v1688_v1  ;;  %56 = vst.msk [vmem:[#allocation2 + $0xd8] sm:$0xff] %vm28_vm0, %v1688_v1  ;;  %v64_v35 = vld [vmem:[#allocation2 + $0x18] sm:$0xff]  ;;  %v62_v41 = vld [vmem:[#allocation2 + $0x8] sm:$0xff] }
   0xf   :  { %57 = vst.msk [vmem:[#allocation2 + $0xe0] sm:$0xff] %vm28_vm0, %v1688_v1  ;;  %58 = vst.msk [vmem:[#allocation2 + $0xe8] sm:$0xff] %vm28_vm0, %v1688_v1  ;;  %1542 = vmatpush3.bf16.msra.mxu0 %v1603_v4  ;;  %1594 = vmatpush3.bf16.msra.mxu1 %v1603_v4  ;;  %v67_v45 = vld [vmem:[#allocation2 + $0x30] sm:$0xff]  ;;  %v1835_v49 = vld [vmem:[%s2517_s3 + $0x48] sm:$0xff]  }
  0x10   :  { %59 = vst.msk [vmem:[#allocation2 + $0xf0] sm:$0xff] %vm28_vm0, %v1688_v1  ;;  %60 = vst.msk [vmem:[#allocation2 + $0xf8] sm:$0xff] %vm28_vm0, %v1688_v1  ;;  %1543 = vmatprep.subr.bf16.mxu0 %v1604_v7  ;;  %1587 = vmatprep.subr.bf16.mxu1 %v1604_v7  ;;  %v77_v30 = vld [vmem:[#allocation2 + $0x80] sm:$0xff]  ;;  %v78_v42 = vld [vmem:[#allocation2 + $0x88] sm:$0xff]  ;;  %v1470_v61 = vunpack.c.l.bf16 %v1835_v49 }
  0x11   :  { %v79_v26 = vld [vmem:[#allocation2 + $0x90] sm:$0xff]  ;;  %v80_v36 = vld [vmem:[#allocation2 + $0x98] sm:$0xff]  ;;  %v1840_v50 = vld [vmem:[%s2517_s3 + $0x8] sm:$0xff]  }
  0x12   :  { %v65_v54 = vld [vmem:[#allocation2 + $0x20] sm:$0xff]  ;;  %v68_v59 = vld [vmem:[#allocation2 + $0x38] sm:$0xff]  ;;  %v1438_v62 = vunpack.c.l.bf16 %v1840_v50 }
  0x13   :  { %1544 = vmatpush3.bf16.msra.mxu0 %v1604_v7  ;;  %1595 = vmatpush3.bf16.msra.mxu1 %v1604_v7  ;;  %v83_v48 = vld [vmem:[#allocation2 + $0xb0] sm:$0xff]  ;;  %v1847_v56 = vld [vmem:[%s2518_s2] ss:$0 sm:$0xff]  ;;  %v84_v4 = vld [vmem:[#allocation2 + $0xb8] sm:$0xff] }
  0x14   :  { %1545 = vmatprep.subr.bf16.mxu0 %v1605_v8  ;;  %1588 = vmatprep.subr.bf16.mxu1 %v1605_v8  ;;  %v81_v57 = vld [vmem:[#allocation2 + $0xa0] sm:$0xff] }
  0x15   :  { %v1856_v63 = vld [vmem:[%s2517_s3] sm:$0xff]  }
  0x17   :  { %1546 = vmatpush3.bf16.msra.mxu0 %v1605_v8  ;;  %1596 = vmatpush3.bf16.msra.mxu1 %v1605_v8 }
  0x18   :  { %1547 = vmatprep.subr.bf16.mxu0 %v1606_v9  ;;  %1589 = vmatprep.subr.bf16.mxu1 %v1606_v9 }
  0x1b   :  { %1548 = vmatpush3.bf16.msra.mxu0 %v1606_v9  ;;  %1597 = vmatpush3.bf16.msra.mxu1 %v1606_v9  ;;  %v66_v9 = vld [vmem:[#allocation2 + $0x28] sm:$0xff] }
  0x1c   :  { %1549 = vmatprep.subr.bf16.mxu0 %v1607_v10  ;;  %1590 = vmatprep.subr.bf16.mxu1 %v1607_v10 }
  0x1f   :  { %1550 = vmatpush3.bf16.msra.mxu0 %v1607_v10  ;;  %1598 = vmatpush3.bf16.msra.mxu1 %v1607_v10  ;;  %v1865_v10 = vld [vmem:[%s2517_s3 + $0x40] sm:$0xff]  }
  0x22   :  { %1552 = vmatmul.mubr.bf16.vlgmr.msra.gmra.mxu0 %v1610_v11  ;;  %1568 = vmatmul.mubr.bf16.vlgmr.msra.gmra.mxu1 %v1611_v12 }
  0x23   :  { %1555 = vmatprep.mubr.bf16.mxu0 %v1612_v13  ;;  %1571 = vmatprep.mubr.bf16.mxu1 %v1614_v14  ;;  %v82_v13 = vld [vmem:[#allocation2 + $0xa8] sm:$0xff] }
  0x2a   :  { %1556 = vmatmul.mubr.bf16.gmra.mxu0 %v1613_v15  ;;  %1572 = vmatmul.mubr.bf16.gmra.mxu1 %v1615_v16  ;;  %v1434_v15 = vunpack.c.l.bf16 %v1856_v63 }
  0x2b   :  { %1559 = vmatprep.mubr.bf16.mxu0 %v1616_v17  ;;  %1575 = vmatprep.mubr.bf16.mxu1 %v1618_v18 }
  0x32   :  { %1560 = vmatmul.mubr.bf16.gmra.mxu0 %v1617_v19  ;;  %1576 = vmatmul.mubr.bf16.gmra.mxu1 %v1619_v20 }
  0x33   :  { %1563 = vmatprep.mubr.bf16.mxu0 %v1620_v21  ;;  %1579 = vmatprep.mubr.bf16.mxu1 %v1622_v22 }
  0x3a   :  { %1564 = vmatmul.mubr.bf16.gmra.mxu0 %v1621_v23  ;;  %1580 = vmatmul.mubr.bf16.gmra.mxu1 %v1623_v24 }
  0xe2   :  { %v1553_v27 = vpop.f32.mrf.mxu0  ;;  %v1569_v28 = vpop.f32.mrf.mxu1 }
  0xe3   :  { %v448_v31 = vadd.f32 %v1553_v27, %v63_v25  ;;  %v464_v32 = vadd.f32 %v1569_v28, %v79_v26  ;;  %v1439_v25 = vunpack.c.h.bf16 %v1840_v50  ;;  %v1466_v27 = vunpack.c.l.bf16 %v1865_v10  ;;  %v72_v50 = vld [vmem:[#allocation2 + $0x58] sm:$0xff] }
  0xe4   :  { %v319_v33 = vpop.f32.mrf.mxu0  ;;  %v383_v34 = vpop.f32.mrf.mxu1 }
  0xe5   :  { %481 = vst.msk [vmem:[#allocation2 + $0x10] sm:$0xff] %vm28_vm0, %v448_v31  ;;  %497 = vst.msk [vmem:[#allocation2 + $0x90] sm:$0xff] %vm28_vm0, %v464_v32  ;;  %v446_v37 = vadd.f32 %v319_v33, %v61_v29  ;;  %v462_v38 = vadd.f32 %v383_v34, %v77_v30  ;;  %v71_v29 = vld [vmem:[#allocation2 + $0x50] sm:$0xff] }
  0xe6   :  { %v1554_v39 = vpop.f32.mrf.mxu0  ;;  %v1570_v40 = vpop.f32.mrf.mxu1  ;;  %v87_v34 = vld [vmem:[#allocation2 + $0xd0] sm:$0xff] }
  0xe7   :  { %479 = vst.msk [vmem:[#allocation2] sm:$0xff] %vm28_vm0, %v446_v37  ;;  %495 = vst.msk [vmem:[#allocation2 + $0x80] sm:$0xff] %vm28_vm0, %v462_v38  ;;  %v449_v43 = vadd.f32 %v1554_v39, %v64_v35  ;;  %v465_v44 = vadd.f32 %v1570_v40, %v80_v36  ;;  %v1471_v37 = vunpack.c.h.bf16 %v1835_v49  ;;  %v69_v40 = vld [vmem:[#allocation2 + $0x40] sm:$0xff] }
  0xe8   :  { %v322_v46 = vpop.f32.mrf.mxu0  ;;  %v386_v47 = vpop.f32.mrf.mxu1 }
  0xe9   :  { %482 = vst.msk [vmem:[#allocation2 + $0x18] sm:$0xff] %vm28_vm0, %v449_v43  ;;  %498 = vst.msk [vmem:[#allocation2 + $0x98] sm:$0xff] %vm28_vm0, %v465_v44  ;;  %v447_v51 = vadd.f32 %v322_v46, %v62_v41  ;;  %v463_v52 = vadd.f32 %v386_v47, %v78_v42 }
  0xea   :  { %v1557_v53 = vpop.f32.mrf.mxu0  ;;  %v1573_v55 = vpop.f32.mrf.mxu1 }
  0xeb   :  { %480 = vst.msk [vmem:[#allocation2 + $0x8] sm:$0xff] %vm28_vm0, %v447_v51  ;;  %496 = vst.msk [vmem:[#allocation2 + $0x88] sm:$0xff] %vm28_vm0, %v463_v52  ;;  %v452_v58 = vadd.f32 %v1557_v53, %v67_v45  ;;  %v468_v60 = vadd.f32 %v1573_v55, %v83_v48  ;;  %v85_v45 = vld [vmem:[#allocation2 + $0xc0] sm:$0xff]  ;;  %v1467_v48 = vunpack.c.h.bf16 %v1865_v10 }
  0xec   :  { %v335_v0 = vpop.f32.mrf.mxu0  ;;  %v532_v1 = vld [vmem:[#allocation2 + $0x90] sm:$0xff]  ;;  %v399_v2 = vpop.f32.mrf.mxu1 }
  0xed   :  { %v516_v3 = vld [vmem:[#allocation2 + $0x10] sm:$0xff]  ;;  %485 = vst.msk [vmem:[#allocation2 + $0x30] sm:$0xff] %vm28_vm0, %v452_v58  ;;  %v450_v5 = vadd.f32 %v335_v0, %v65_v54  ;;  %501 = vst.msk [vmem:[#allocation2 + $0xb0] sm:$0xff] %vm28_vm0, %v468_v60  ;;  %v571_v6 = vadd.f32 %v1847_v56, %v532_v1  ;;  %v466_v7 = vadd.f32 %v399_v2, %v81_v57  ;;  %v1498_v54 = vld [vmem:[%s2517_s3 + $0x18] sm:$0xff]   ;;  %v1435_v58 = vunpack.c.h.bf16 %v1856_v63 }
  0xee   :  { %v555_v8 = vadd.f32 %v1847_v56, %v516_v3  ;;  %v1558_v11 = vpop.f32.mrf.mxu0  ;;  %v1574_v12 = vpop.f32.mrf.mxu1  ;;  %v514_v14 = vld [vmem:[#allocation2] sm:$0xff]  ;;  %v88_v60 = vld [vmem:[#allocation2 + $0xd8] sm:$0xff]  ;;  %v70_v3 = vld [vmem:[#allocation2 + $0x48] sm:$0xff] }
  0xef   :  { %v530_v16 = vld [vmem:[#allocation2 + $0x80] sm:$0xff]  ;;  %483 = vst.msk [vmem:[#allocation2 + $0x20] sm:$0xff] %vm28_vm0, %v450_v5  ;;  %v453_v17 = vadd.f32 %v1558_v11, %v68_v59  ;;  %v1869_v18 = vadd.f32 %v1470_v61, %v571_v6  ;;  %499 = vst.msk [vmem:[#allocation2 + $0xa0] sm:$0xff] %vm28_vm0, %v466_v7  ;;  %v469_v20 = vadd.f32 %v1574_v12, %v84_v4  ;;  %v86_v5 = vld [vmem:[#allocation2 + $0xc8] sm:$0xff]  ;;  %v1446_v7 = vunpack.c.l.bf16 %v1498_v54 }
  0xf0   :  { %v1872_v19 = vadd.f32 %v1438_v62, %v555_v8  ;;  %v338_v21 = vpop.f32.mrf.mxu0  ;;  %v402_v22 = vpop.f32.mrf.mxu1  ;;  %v553_v23 = vadd.f32 %v1847_v56, %v514_v14  ;;  %v517_v24 = vld [vmem:[#allocation2 + $0x18] sm:$0xff]  ;;  %v569_v26 = vadd.f32 %v1847_v56, %v530_v16  ;;  %v1447_v11 = vunpack.c.h.bf16 %v1498_v54  ;;  %v75_v16 = vld [vmem:[#allocation2 + $0x70] sm:$0xff] }
  0xf1   :  { %v533_v28 = vld [vmem:[#allocation2 + $0x98] sm:$0xff]  ;;  %486 = vst.msk [vmem:[#allocation2 + $0x38] sm:$0xff] %vm28_vm0, %v453_v17  ;;  %v735_v30 = vsel %vm28_vm0, %v1869_v18, 0.0  ;;  %v451_v32 = vadd.f32 %v338_v21, %v66_v9  ;;  %502 = vst.msk [vmem:[#allocation2 + $0xb8] sm:$0xff] %vm28_vm0, %v469_v20  ;;  %v467_v33 = vadd.f32 %v402_v22, %v82_v13  ;;  %v556_v36 = vadd.f32 %v1847_v56, %v517_v24  ;;  %v91_v24 = vld [vmem:[#allocation2 + $0xf0] sm:$0xff] }
  0xf2   :  { %v687_v31 = vsel %vm28_vm0, %v1872_v19, 0.0  ;;  %736 = vadd.xlane.f32.xlu0 %v735_v30  ;;  %v1884_v35 = vadd.f32 %v1434_v15, %v553_v23  ;;  %v1561_v38 = vpop.f32.mrf.mxu0  ;;  %v515_v39 = vld [vmem:[#allocation2 + $0x8] sm:$0xff]  ;;  %v1577_v41 = vpop.f32.mrf.mxu1  ;;  %v572_v42 = vadd.f32 %v1847_v56, %v533_v28  ;;  %v1893_v47 = vadd.f32 %v1466_v27, %v569_v26  ;;  %v1506_v8 = vld [vmem:[%s2517_s3 + $0x58] sm:$0xff]   ;;  %v73_v28 = vld [vmem:[#allocation2 + $0x60] sm:$0xff] }
  0xf3   :  { %688 = vadd.xlane.f32.xlu1 %v687_v31  ;;  %484 = vst.msk [vmem:[#allocation2 + $0x28] sm:$0xff] %vm28_vm0, %v451_v32  ;;  %500 = vst.msk [vmem:[#allocation2 + $0xa8] sm:$0xff] %vm28_vm0, %v467_v33  ;;  %v456_v43 = vadd.f32 %v1561_v38, %v71_v29  ;;  %v531_v44 = vld [vmem:[#allocation2 + $0x88] sm:$0xff]  ;;  %v1891_v46 = vadd.f32 %v1439_v25, %v556_v36  ;;  %v472_v51 = vadd.f32 %v1577_v41, %v87_v34  ;;  %v89_v34 = vld [vmem:[#allocation2 + $0xe0] sm:$0xff] }
  0xf4   :  { %v351_v49 = vpop.f32.mrf.mxu0  ;;  %v415_v52 = vpop.f32.mrf.mxu1  ;;  %v520_v53 = vld [vmem:[#allocation2 + $0x30] sm:$0xff]  ;;  %v681_v55 = vsel %vm28_vm0, %v1884_v35, 0.0  ;;  %v554_v57 = vadd.f32 %v1847_v56, %v515_v39  ;;  %v1906_v62 = vadd.f32 %v1471_v37, %v572_v42  ;;  %v570_v0 = vadd.f32 %v1847_v56, %v531_v44 }
  0xf5   :  { %489 = vst.msk [vmem:[#allocation2 + $0x50] sm:$0xff] %vm28_vm0, %v456_v43  ;;  %v454_v59 = vadd.f32 %v351_v49, %v69_v40  ;;  %v690_v61 = vsel %vm28_vm0, %v1891_v46, 0.0  ;;  %505 = vst.msk [vmem:[#allocation2 + $0xd0] sm:$0xff] %vm28_vm0, %v472_v51  ;;  %v470_v2 = vadd.f32 %v415_v52, %v85_v45  ;;  %v559_v6 = vadd.f32 %v1847_v56, %v520_v53  ;;  %v536_v15 = vld [vmem:[#allocation2 + $0xb0] sm:$0xff]  ;;  %v76_v40 = vld [vmem:[#allocation2 + $0x78] sm:$0xff] }
  0xf6   :  { %682 = vadd.xlane.f32.xlu0 %v681_v55  ;;  %v1562_v1 = vpop.f32.mrf.mxu0  ;;  %v1578_v4 = vpop.f32.mrf.mxu1  ;;  %v729_v9 = vsel %vm28_vm0, %v1893_v47, 0.0  ;;  %v1918_v17 = vadd.f32 %v1435_v58, %v554_v57  ;;  %v738_v25 = vsel %vm28_vm0, %v1906_v62, 0.0  ;;  %v1924_v26 = vadd.f32 %v1467_v48, %v570_v0  ;;  %v92_v43 = vld [vmem:[#allocation2 + $0xf8] sm:$0xff]  ;;  %v1497_v45 = vld [vmem:[%s2517_s3 + $0x10] sm:$0xff]   ;;  %v74_v52 = vld [vmem:[#allocation2 + $0x68] sm:$0xff] }
  0xf7   :  { %691 = vadd.xlane.f32.xlu1 %v690_v61  ;;  %487 = vst.msk [vmem:[#allocation2 + $0x40] sm:$0xff] %vm28_vm0, %v454_v59  ;;  %v457_v63 = vadd.f32 %v1562_v1, %v72_v50  ;;  %503 = vst.msk [vmem:[#allocation2 + $0xc0] sm:$0xff] %vm28_vm0, %v470_v2  ;;  %v473_v13 = vadd.f32 %v1578_v4, %v88_v60  ;;  %v1927_v30 = vadd.f32 %v1446_v7, %v559_v6  ;;  %v518_v50 = vld [vmem:[#allocation2 + $0x20] sm:$0xff]  ;;  %v90_v55 = vld [vmem:[#allocation2 + $0xe8] sm:$0xff] }
  0xf8   :  { %v521_v10 = vld [vmem:[#allocation2 + $0x38] sm:$0xff]  ;;  %v354_v12 = vpop.f32.mrf.mxu0  ;;  %v418_v14 = vpop.f32.mrf.mxu1  ;;  %v575_v31 = vadd.f32 %v1847_v56, %v536_v15  ;;  %v1478_v32 = vunpack.c.l.bf16 %v1506_v8  ;;  %v1479_v38 = vunpack.c.h.bf16 %v1506_v8  ;;  %v684_v44 = vsel %vm28_vm0, %v1918_v17, 0.0  ;;  %v1500_v15 = vld [vmem:[%s2517_s3 + $0x28] sm:$0xff]  }
  0xf9   :  { %490 = vst.msk [vmem:[#allocation2 + $0x58] sm:$0xff] %vm28_vm0, %v457_v63  ;;  %v560_v20 = vadd.f32 %v1847_v56, %v521_v10  ;;  %v455_v21 = vadd.f32 %v354_v12, %v70_v3  ;;  %v471_v22 = vadd.f32 %v418_v14, %v86_v5  ;;  %v537_v23 = vld [vmem:[#allocation2 + $0xb8] sm:$0xff]  ;;  %506 = vst.msk [vmem:[#allocation2 + $0xd8] sm:$0xff] %vm28_vm0, %v473_v13  ;;  %v732_v49 = vsel %vm28_vm0, %v1924_v26, 0.0  ;;  %v1505_v10 = vld [vmem:[%s2517_s3 + $0x50] sm:$0xff]  }
  0xfa   :  { %730 = vadd.xlane.f32.xlu0 %v729_v9  ;;  %v1565_v27 = vpop.f32.mrf.mxu0  ;;  %v1581_v29 = vpop.f32.mrf.mxu1  ;;  %v576_v37 = vadd.f32 %v1847_v56, %v537_v23  ;;  %v699_v57 = vsel %vm28_vm0, %v1927_v30, 0.0  ;;  %v1946_v58 = vadd.f32 %v1478_v32, %v575_v31  ;;  %v519_v59 = vld [vmem:[#allocation2 + $0x28] sm:$0xff]  ;;  %v557_v4 = vadd.f32 %v1847_v56, %v518_v50  ;;  %v534_v9 = vld [vmem:[#allocation2 + $0xa0] sm:$0xff] }
  0xfb   :  { %739 = vadd.xlane.f32.xlu1 %v738_v25  ;;  %488 = vst.msk [vmem:[#allocation2 + $0x48] sm:$0xff] %vm28_vm0, %v455_v21  ;;  %504 = vst.msk [vmem:[#allocation2 + $0xc8] sm:$0xff] %vm28_vm0, %v471_v22  ;;  %v460_v33 = vadd.f32 %v1565_v27, %v75_v16  ;;  %v1932_v36 = vadd.f32 %v1447_v11, %v560_v20  ;;  %v476_v41 = vadd.f32 %v1581_v29, %v91_v24  ;;  %v535_v12 = vld [vmem:[#allocation2 + $0xa8] sm:$0xff] }
  0xfc   :  { %v367_v39 = vpop.f32.mrf.mxu0  ;;  %v431_v42 = vpop.f32.mrf.mxu1  ;;  %v1951_v1 = vadd.f32 %v1479_v38, %v576_v37  ;;  %v1442_v5 = vunpack.c.l.bf16 %v1497_v45  ;;  %v558_v7 = vadd.f32 %v1847_v56, %v519_v59  ;;  %v1443_v8 = vunpack.c.h.bf16 %v1497_v45  ;;  %v524_v14 = vld [vmem:[#allocation2 + $0x50] sm:$0xff] }
  0xfd   :  { %493 = vst.msk [vmem:[#allocation2 + $0x70] sm:$0xff] %vm28_vm0, %v460_v33  ;;  %v458_v48 = vadd.f32 %v367_v39, %v73_v28  ;;  %509 = vst.msk [vmem:[#allocation2 + $0xf0] sm:$0xff] %vm28_vm0, %v476_v41  ;;  %v474_v53 = vadd.f32 %v431_v42, %v89_v34  ;;  %v702_v0 = vsel %vm28_vm0, %v1932_v36, 0.0  ;;  %v747_v11 = vsel %vm28_vm0, %v1946_v58, 0.0  ;;  %v540_v32 = vld [vmem:[#allocation2 + $0xd0] sm:$0xff]  ;;  %v1508_v33 = vld [vmem:[%s2517_s3 + $0x68] sm:$0xff]  }
  0xfe   :  { %685 = vadd.xlane.f32.xlu0 %v684_v44  ;;  %v1566_v51 = vpop.f32.mrf.mxu0  ;;  %v1582_v54 = vpop.f32.mrf.mxu1  ;;  %v750_v13 = vsel %vm28_vm0, %v1951_v1, 0.0  ;;  %v1970_v16 = vadd.f32 %v1442_v5, %v557_v4  ;;  %v573_v20 = vadd.f32 %v1847_v56, %v534_v9  ;;  %v1474_v21 = vunpack.c.l.bf16 %v1505_v10  ;;  %v1507_v4 = vld [vmem:[%s2517_s3 + $0x60] sm:$0xff]  }
  0xff   :  { %733 = vadd.xlane.f32.xlu1 %v732_v49  ;;  %491 = vst.msk [vmem:[#allocation2 + $0x60] sm:$0xff] %vm28_vm0, %v458_v48  ;;  %v461_v60 = vadd.f32 %v1566_v51, %v76_v40  ;;  %v477_v61 = vadd.f32 %v1582_v54, %v92_v43  ;;  %507 = vst.msk [vmem:[#allocation2 + $0xe0] sm:$0xff] %vm28_vm0, %v474_v53  ;;  %v1973_v23 = vadd.f32 %v1443_v8, %v558_v7  ;;  %v522_v51 = vld [vmem:[#allocation2 + $0x40] sm:$0xff]  ;;  %v1502_v8 = vld [vmem:[%s2517_s3 + $0x38] sm:$0xff]  }
 0x100   :  { %v370_v2 = vpop.f32.mrf.mxu0  ;;  %v434_v3 = vpop.f32.mrf.mxu1  ;;  %v525_v22 = vld [vmem:[#allocation2 + $0x58] sm:$0xff]  ;;  %v574_v24 = vadd.f32 %v1847_v56, %v535_v12  ;;  %v1475_v25 = vunpack.c.h.bf16 %v1505_v10  ;;  %v563_v27 = vadd.f32 %v1847_v56, %v524_v14  ;;  %v1454_v28 = vunpack.c.l.bf16 %v1500_v15 }
 0x101   :  { %494 = vst.msk [vmem:[#allocation2 + $0x78] sm:$0xff] %vm28_vm0, %v461_v60  ;;  %v459_v63 = vadd.f32 %v370_v2, %v74_v52  ;;  %510 = vst.msk [vmem:[#allocation2 + $0xf8] sm:$0xff] %vm28_vm0, %v477_v61  ;;  %v475_v6 = vadd.f32 %v434_v3, %v90_v55  ;;  %v564_v29 = vadd.f32 %v1847_v56, %v525_v22  ;;  %v1455_v31 = vunpack.c.h.bf16 %v1500_v15  ;;  %v541_v38 = vld [vmem:[#allocation2 + $0xd8] sm:$0xff]  ;;  %v1499_v52 = vld [vmem:[%s2517_s3 + $0x20] sm:$0xff]  }
 0x102   :  { %700 = vadd.xlane.f32.xlu0 %v699_v57  ;;  %v693_v34 = vsel %vm28_vm0, %v1970_v16, 0.0  ;;  %v1983_v37 = vadd.f32 %v1474_v21, %v573_v20  ;;  %v696_v39 = vsel %vm28_vm0, %v1973_v23, 0.0  ;;  %v1987_v40 = vadd.f32 %v1475_v25, %v574_v24  ;;  %v523_v55 = vld [vmem:[#allocation2 + $0x48] sm:$0xff]  ;;  %v538_v3 = vld [vmem:[#allocation2 + $0xc0] sm:$0xff] }
 0x103   :  { %703 = vadd.xlane.f32.xlu1 %v702_v0  ;;  %492 = vst.msk [vmem:[#allocation2 + $0x68] sm:$0xff] %vm28_vm0, %v459_v63  ;;  %508 = vst.msk [vmem:[#allocation2 + $0xe8] sm:$0xff] %vm28_vm0, %v475_v6  ;;  %v1989_v41 = vadd.f32 %v1454_v28, %v563_v27  ;;  %v579_v42 = vadd.f32 %v1847_v56, %v540_v32  ;;  %v1486_v43 = vunpack.c.l.bf16 %v1508_v33  ;;  %v1487_v48 = vunpack.c.h.bf16 %v1508_v33  ;;  %v539_v63 = vld [vmem:[#allocation2 + $0xc8] sm:$0xff]  ;;  %v1501_v32 = vld [vmem:[%s2517_s3 + $0x30] sm:$0xff]  }
 0x104   :  { %v1992_v44 = vadd.f32 %v1455_v31, %v564_v29  ;;  %v580_v45 = vadd.f32 %v1847_v56, %v541_v38  ;;  %v741_v49 = vsel %vm28_vm0, %v1983_v37, 0.0  ;;  %v744_v50 = vsel %vm28_vm0, %v1987_v40, 0.0  ;;  %v528_v7 = vld [vmem:[#allocation2 + $0x70] sm:$0xff] }
 0x105   :  { %v711_v53 = vsel %vm28_vm0, %v1989_v41, 0.0  ;;  %v2004_v54 = vadd.f32 %v1486_v43, %v579_v42  ;;  %v561_v60 = vadd.f32 %v1847_v56, %v522_v51  ;;  %v1450_v61 = vunpack.c.l.bf16 %v1499_v52  ;;  %v1509_v51 = vld [vmem:[%s2517_s3 + $0x70] sm:$0xff]  }
 0x106   :  { %748 = vadd.xlane.f32.xlu0 %v747_v11  ;;  %v714_v57 = vsel %vm28_vm0, %v1992_v44, 0.0  ;;  %v2008_v59 = vadd.f32 %v1487_v48, %v580_v45  ;;  %v562_v0 = vadd.f32 %v1847_v56, %v523_v55  ;;  %v1451_v2 = vunpack.c.h.bf16 %v1499_v52  ;;  %v526_v31 = vld [vmem:[#allocation2 + $0x60] sm:$0xff] }
 0x107   :  { %751 = vadd.xlane.f32.xlu1 %v750_v13  ;;  %v759_v5 = vsel %vm28_vm0, %v2004_v54, 0.0  ;;  %v2022_v9 = vadd.f32 %v1450_v61, %v561_v60  ;;  %v577_v10 = vadd.f32 %v1847_v56, %v538_v3  ;;  %v1482_v11 = vunpack.c.l.bf16 %v1507_v4 }
 0x108   :  { %v762_v6 = vsel %vm28_vm0, %v2008_v59, 0.0  ;;  %v529_v12 = vld [vmem:[#allocation2 + $0x78] sm:$0xff]  ;;  %v2025_v13 = vadd.f32 %v1451_v2, %v562_v0  ;;  %v578_v14 = vadd.f32 %v1847_v56, %v539_v63  ;;  %v1483_v15 = vunpack.c.h.bf16 %v1507_v4  ;;  %v544_v4 = vld [vmem:[#allocation2 + $0xf0] sm:$0xff] }
 0x109   :  { %v567_v20 = vadd.f32 %v1847_v56, %v528_v7  ;;  %v1462_v21 = vunpack.c.l.bf16 %v1502_v8  ;;  %v568_v22 = vadd.f32 %v1847_v56, %v529_v12  ;;  %v1463_v24 = vunpack.c.h.bf16 %v1502_v8  ;;  %v545_v63 = vld [vmem:[#allocation2 + $0xf8] sm:$0xff] }
 0x10a   :  { %694 = vadd.xlane.f32.xlu0 %v693_v34  ;;  %v705_v25 = vsel %vm28_vm0, %v2022_v9, 0.0  ;;  %v2032_v27 = vadd.f32 %v1482_v11, %v577_v10  ;;  %v708_v28 = vsel %vm28_vm0, %v2025_v13, 0.0  ;;  %v2036_v29 = vadd.f32 %v1483_v15, %v578_v14  ;;  %v527_v34 = vld [vmem:[#allocation2 + $0x68] sm:$0xff] }
 0x10b   :  { %697 = vadd.xlane.f32.xlu1 %v696_v39  ;;  %v2041_v33 = vadd.f32 %v1462_v21, %v567_v20  ;;  %v2043_v38 = vadd.f32 %v1463_v24, %v568_v22  ;;  %v565_v42 = vadd.f32 %v1847_v56, %v526_v31  ;;  %v1458_v43 = vunpack.c.l.bf16 %v1501_v32 }
 0x10c   :  { %v753_v39 = vsel %vm28_vm0, %v2032_v27, 0.0  ;;  %v756_v45 = vsel %vm28_vm0, %v2036_v29, 0.0  ;;  %v566_v48 = vadd.f32 %v1847_v56, %v527_v34  ;;  %v1490_v61 = vunpack.c.l.bf16 %v1509_v51 }
 0x10d   :  { %v723_v52 = vsel %vm28_vm0, %v2041_v33, 0.0  ;;  %v726_v55 = vsel %vm28_vm0, %v2043_v38, 0.0  ;;  %v1491_v3 = vunpack.c.h.bf16 %v1509_v51  ;;  %v583_v8 = vadd.f32 %v1847_v56, %v544_v4 }
 0x10e   :  { %742 = vadd.xlane.f32.xlu0 %v741_v49  ;;  %v1459_v49 = vunpack.c.h.bf16 %v1501_v32  ;;  %v584_v14 = vadd.f32 %v1847_v56, %v545_v63 }
 0x10f   :  { %745 = vadd.xlane.f32.xlu1 %v744_v50  ;;  %v542_v50 = vld [vmem:[#allocation2 + $0xe0] sm:$0xff] }
 0x110   :  { %v581_v60 = vadd.f32 %v1847_v56, %v542_v50  ;;  %v2061_v0 = vadd.f32 %v1459_v49, %v566_v48 }
 0x112   :  { %712 = vadd.xlane.f32.xlu0 %v711_v53  ;;  %v543_v53 = vld [vmem:[#allocation2 + $0xe8] sm:$0xff]  ;;  %v2069_v7 = vadd.f32 %v1490_v61, %v581_v60  ;;  %v720_v11 = vsel %vm28_vm0, %v2061_v0, 0.0 }
 0x113   :  { %715 = vadd.xlane.f32.xlu1 %v714_v57  ;;  %v2058_v57 = vadd.f32 %v1458_v43, %v565_v42  ;;  %v582_v2 = vadd.f32 %v1847_v56, %v543_v53 }
 0x114   :  { %v765_v20 = vsel %vm28_vm0, %v2069_v7, 0.0 }
 0x115   :  { %v2074_v12 = vadd.f32 %v1491_v3, %v582_v2 }
 0x116   :  { %760 = vadd.xlane.f32.xlu0 %v759_v5  ;;  %v1510_v5 = vld [vmem:[%s2517_s3 + $0x78] sm:$0xff]  }
 0x117   :  { %763 = vadd.xlane.f32.xlu1 %v762_v6  ;;  %v717_v6 = vsel %vm28_vm0, %v2058_v57, 0.0  ;;  %v1494_v10 = vunpack.c.l.bf16 %v1510_v5  ;;  %v1495_v15 = vunpack.c.h.bf16 %v1510_v5  ;;  %v768_v22 = vsel %vm28_vm0, %v2074_v12, 0.0 }
 0x119   :  { %v2079_v21 = vadd.f32 %v1494_v10, %v583_v8  ;;  %v2083_v24 = vadd.f32 %v1495_v15, %v584_v14 }
 0x11a   :  { %706 = vadd.xlane.f32.xlu0 %v705_v25 }
 0x11b   :  { %709 = vadd.xlane.f32.xlu1 %v708_v28  ;;  %v771_v25 = vsel %vm28_vm0, %v2079_v21, 0.0  ;;  %v774_v56 = vsel %vm28_vm0, %v2083_v24, 0.0 }
 0x11e   :  { %754 = vadd.xlane.f32.xlu0 %v753_v39 }
 0x11f   :  { %757 = vadd.xlane.f32.xlu1 %v756_v45 }
 0x122   :  { %724 = vadd.xlane.f32.xlu0 %v723_v52 }
 0x123   :  { %727 = vadd.xlane.f32.xlu1 %v726_v55 }
 0x126   :  { %718 = vadd.xlane.f32.xlu0 %v717_v6 }
 0x127   :  { %721 = vadd.xlane.f32.xlu1 %v720_v11 }
 0x12a   :  { %766 = vadd.xlane.f32.xlu0 %v765_v20 }
 0x12b   :  { %769 = vadd.xlane.f32.xlu1 %v768_v22 }
 0x12e   :  { %772 = vadd.xlane.f32.xlu0 %v771_v25 }
 0x12f   :  { %775 = vadd.xlane.f32.xlu1 %v774_v56 }
 0x17b   :  { %v737_v28 = vpop.xlane.xlu0 %736 }
 0x17c   :  { %v689_v31 = vpop.xlane.xlu1 %688  ;;  %v796_v32 = vmul.f32 0.03125, %v737_v28 }
 0x17d   :  { %v780_v34 = vmul.f32 0.03125, %v689_v31 }
 0x17e   :  { %v2090_v39 = vsub.f32 %v1869_v18, %v796_v32 }
 0x17f   :  { %v2093_v42 = vsub.f32 %v1872_v19, %v780_v34  ;;  %v683_v43 = vpop.xlane.xlu0 %682 }
 0x180   :  { %v778_v45 = vmul.f32 0.03125, %v683_v43  ;;  %v692_v48 = vpop.xlane.xlu1 %691  ;;  %v860_v53 = vmul.f32 %v2090_v39, %v2090_v39 }
 0x181   :  { %v844_v49 = vmul.f32 %v2093_v42, %v2093_v42  ;;  %v781_v50 = vmul.f32 0.03125, %v692_v48 }
 0x182   :  { %v2098_v51 = vsub.f32 %v1884_v35, %v778_v45  ;;  %v928_v35 = vsel %vm28_vm0, %v860_v53, 0.0 }
 0x183   :  { %v880_v52 = vsel %vm28_vm0, %v844_v49, 0.0  ;;  %v2104_v18 = vsub.f32 %v1891_v46, %v781_v50  ;;  %v731_v19 = vpop.xlane.xlu0 %730 }
 0x184   :  { %881 = vadd.xlane.f32.xlu0 %v880_v52  ;;  %v794_v55 = vmul.f32 0.03125, %v731_v19  ;;  %v740_v60 = vpop.xlane.xlu1 %739  ;;  %v842_v4 = vmul.f32 %v2098_v51, %v2098_v51 }
 0x185   :  { %v797_v61 = vmul.f32 0.03125, %v740_v60  ;;  %v845_v2 = vmul.f32 %v2104_v18, %v2104_v18 }
 0x186   :  { %v2109_v3 = vsub.f32 %v1893_v47, %v794_v55  ;;  %v874_v14 = vsel %vm28_vm0, %v842_v4, 0.0 }
 0x187   :  { %v2115_v5 = vsub.f32 %v1906_v62, %v797_v61  ;;  %v686_v46 = vpop.xlane.xlu0 %685  ;;  %v883_v63 = vsel %vm28_vm0, %v845_v2, 0.0 }
 0x188   :  { %929 = vadd.xlane.f32.xlu0 %v928_v35  ;;  %v734_v6 = vpop.xlane.xlu1 %733  ;;  %v779_v8 = vmul.f32 0.03125, %v686_v46  ;;  %884 = vadd.xlane.f32.xlu1 %v883_v63  ;;  %v858_v62 = vmul.f32 %v2109_v3, %v2109_v3 }
 0x189   :  { %v795_v10 = vmul.f32 0.03125, %v734_v6  ;;  %v861_v47 = vmul.f32 %v2115_v5, %v2115_v5 }
 0x18a   :  { %v2121_v11 = vsub.f32 %v1918_v17, %v779_v8  ;;  %v922_v32 = vsel %vm28_vm0, %v858_v62, 0.0 }
 0x18b   :  { %v2127_v15 = vsub.f32 %v1924_v26, %v795_v10  ;;  %v701_v20 = vpop.xlane.xlu0 %700  ;;  %v931_v22 = vsel %vm28_vm0, %v861_v47, 0.0 }
 0x18c   :  { %875 = vadd.xlane.f32.xlu0 %v874_v14  ;;  %v784_v25 = vmul.f32 0.03125, %v701_v20  ;;  %v704_v56 = vpop.xlane.xlu1 %703  ;;  %932 = vadd.xlane.f32.xlu1 %v931_v22  ;;  %v843_v28 = vmul.f32 %v2121_v11, %v2121_v11 }
 0x18d   :  { %v785_v17 = vmul.f32 0.03125, %v704_v56  ;;  %v859_v45 = vmul.f32 %v2127_v15, %v2127_v15 }
 0x18e   :  { %v2133_v31 = vsub.f32 %v1927_v30, %v784_v25  ;;  %v877_v34 = vsel %vm28_vm0, %v843_v28, 0.0 }
 0x18f   :  { %v2138_v26 = vsub.f32 %v1932_v36, %v785_v17  ;;  %v749_v43 = vpop.xlane.xlu0 %748  ;;  %v925_v55 = vsel %vm28_vm0, %v859_v45, 0.0 }
 0x190   :  { %923 = vadd.xlane.f32.xlu0 %v922_v32  ;;  %v800_v48 = vmul.f32 0.03125, %v749_v43  ;;  %v752_v49 = vpop.xlane.xlu1 %751  ;;  %878 = vadd.xlane.f32.xlu1 %v877_v34  ;;  %v848_v50 = vmul.f32 %v2133_v31, %v2133_v31 }
 0x191   :  { %v801_v30 = vmul.f32 0.03125, %v752_v49  ;;  %v849_v60 = vmul.f32 %v2138_v26, %v2138_v26 }
 0x192   :  { %v2145_v52 = vsub.f32 %v1946_v58, %v800_v48  ;;  %v892_v53 = vsel %vm28_vm0, %v848_v50, 0.0 }
 0x193   :  { %v2149_v36 = vsub.f32 %v1951_v1, %v801_v30  ;;  %v695_v19 = vpop.xlane.xlu0 %694  ;;  %v895_v6 = vsel %vm28_vm0, %v849_v60, 0.0 }
 0x194   :  { %893 = vadd.xlane.f32.xlu0 %v892_v53  ;;  %v782_v61 = vmul.f32 0.03125, %v695_v19  ;;  %v698_v2 = vpop.xlane.xlu1 %697  ;;  %926 = vadd.xlane.f32.xlu1 %v925_v55  ;;  %v864_v35 = vmul.f32 %v2145_v52, %v2145_v52 }
 0x195   :  { %v783_v58 = vmul.f32 0.03125, %v698_v2  ;;  %v865_v8 = vmul.f32 %v2149_v36, %v2149_v36 }
 0x196   :  { %v2157_v4 = vsub.f32 %v1970_v16, %v782_v61  ;;  %v940_v1 = vsel %vm28_vm0, %v864_v35, 0.0 }
 0x197   :  { %v2161_v46 = vsub.f32 %v1973_v23, %v783_v58  ;;  %v743_v63 = vpop.xlane.xlu0 %742  ;;  %v943_v25 = vsel %vm28_vm0, %v865_v8, 0.0 }
 0x198   :  { %941 = vadd.xlane.f32.xlu0 %v940_v1  ;;  %v798_v10 = vmul.f32 0.03125, %v743_v63  ;;  %v746_v47 = vpop.xlane.xlu1 %745  ;;  %896 = vadd.xlane.f32.xlu1 %v895_v6  ;;  %v846_v14 = vmul.f32 %v2157_v4, %v2157_v4 }
 0x199   :  { %v799_v16 = vmul.f32 0.03125, %v746_v47  ;;  %v847_v56 = vmul.f32 %v2161_v46, %v2161_v46 }
 0x19a   :  { %v2169_v62 = vsub.f32 %v1983_v37, %v798_v10  ;;  %v886_v23 = vsel %vm28_vm0, %v846_v14, 0.0 }
 0x19b   :  { %v2173_v20 = vsub.f32 %v1987_v40, %v799_v16  ;;  %v713_v22 = vpop.xlane.xlu0 %712  ;;  %v889_v48 = vsel %vm28_vm0, %v847_v56, 0.0 }
 0x19c   :  { %887 = vadd.xlane.f32.xlu0 %v886_v23  ;;  %v788_v28 = vmul.f32 0.03125, %v713_v22  ;;  %v716_v17 = vpop.xlane.xlu1 %715  ;;  %944 = vadd.xlane.f32.xlu1 %v943_v25  ;;  %v862_v32 = vmul.f32 %v2169_v62, %v2169_v62 }
 0x19d   :  { %v789_v37 = vmul.f32 0.03125, %v716_v17  ;;  %v863_v49 = vmul.f32 %v2173_v20, %v2173_v20 }
 0x19e   :  { %v2181_v34 = vsub.f32 %v1989_v41, %v788_v28  ;;  %v934_v40 = vsel %vm28_vm0, %v862_v32, 0.0 }
 0x19f   :  { %v2185_v43 = vsub.f32 %v1992_v44, %v789_v37  ;;  %v761_v45 = vpop.xlane.xlu0 %760  ;;  %v937_v61 = vsel %vm28_vm0, %v863_v49, 0.0 }
 0x1a0   :  { %935 = vadd.xlane.f32.xlu0 %v934_v40  ;;  %v804_v50 = vmul.f32 0.03125, %v761_v45  ;;  %v764_v30 = vpop.xlane.xlu1 %763  ;;  %890 = vadd.xlane.f32.xlu1 %v889_v48  ;;  %v852_v53 = vmul.f32 %v2181_v34, %v2181_v34 }
 0x1a1   :  { %v805_v41 = vmul.f32 0.03125, %v764_v30  ;;  %v853_v2 = vmul.f32 %v2185_v43, %v2185_v43 }
 0x1a2   :  { %v2193_v19 = vsub.f32 %v2004_v54, %v804_v50  ;;  %v904_v44 = vsel %vm28_vm0, %v852_v53, 0.0 }
 0x1a3   :  { %v2197_v55 = vsub.f32 %v2008_v59, %v805_v41  ;;  %v707_v60 = vpop.xlane.xlu0 %706  ;;  %v907_v10 = vsel %vm28_vm0, %v853_v2, 0.0 }
 0x1a4   :  { %905 = vadd.xlane.f32.xlu0 %v904_v44  ;;  %v786_v35 = vmul.f32 0.03125, %v707_v60  ;;  %v710_v58 = vpop.xlane.xlu1 %709  ;;  %938 = vadd.xlane.f32.xlu1 %v937_v61  ;;  %v868_v1 = vmul.f32 %v2193_v19, %v2193_v19 }
 0x1a5   :  { %v787_v54 = vmul.f32 0.03125, %v710_v58  ;;  %v869_v47 = vmul.f32 %v2197_v55, %v2197_v55 }
 0x1a6   :  { %v2205_v63 = vsub.f32 %v2022_v9, %v786_v35  ;;  %v952_v59 = vsel %vm28_vm0, %v868_v1, 0.0 }
 0x1a7   :  { %v2209_v6 = vsub.f32 %v2025_v13, %v787_v54  ;;  %v755_v8 = vpop.xlane.xlu0 %754  ;;  %v955_v28 = vsel %vm28_vm0, %v869_v47, 0.0 }
 0x1a8   :  { %953 = vadd.xlane.f32.xlu0 %v952_v59  ;;  %v802_v14 = vmul.f32 0.03125, %v755_v8  ;;  %v758_v16 = vpop.xlane.xlu1 %757  ;;  %908 = vadd.xlane.f32.xlu1 %v907_v10  ;;  %v850_v23 = vmul.f32 %v2205_v63, %v2205_v63 }
 0x1a9   :  { %v803_v9 = vmul.f32 0.03125, %v758_v16  ;;  %v851_v17 = vmul.f32 %v2209_v6, %v2209_v6 }
 0x1aa   :  { %v2217_v22 = vsub.f32 %v2032_v27, %v802_v14  ;;  %v898_v13 = vsel %vm28_vm0, %v850_v23, 0.0 }
 0x1ab   :  { %v2221_v25 = vsub.f32 %v2036_v29, %v803_v9  ;;  %v725_v56 = vpop.xlane.xlu0 %724  ;;  %v901_v50 = vsel %vm28_vm0, %v851_v17, 0.0 }
 0x1ac   :  { %899 = vadd.xlane.f32.xlu0 %v898_v13  ;;  %v792_v32 = vmul.f32 0.03125, %v725_v56  ;;  %v728_v37 = vpop.xlane.xlu1 %727  ;;  %956 = vadd.xlane.f32.xlu1 %v955_v28  ;;  %v866_v40 = vmul.f32 %v2217_v22, %v2217_v22 }
 0x1ad   :  { %v793_v27 = vmul.f32 0.03125, %v728_v37  ;;  %v867_v30 = vmul.f32 %v2221_v25, %v2221_v25 }
 0x1ae   :  { %v2229_v45 = vsub.f32 %v2041_v33, %v792_v32  ;;  %v946_v29 = vsel %vm28_vm0, %v866_v40, 0.0 }
 0x1af   :  { %v2233_v48 = vsub.f32 %v2043_v38, %v793_v27  ;;  %v719_v49 = vpop.xlane.xlu0 %718  ;;  %v949_v35 = vsel %vm28_vm0, %v867_v30, 0.0 }
 0x1b0   :  { %947 = vadd.xlane.f32.xlu0 %v946_v29  ;;  %v790_v53 = vmul.f32 0.03125, %v719_v49  ;;  %902 = vadd.xlane.f32.xlu1 %v901_v50  ;;  %v722_v41 = vpop.xlane.xlu1 %721  ;;  %v856_v44 = vmul.f32 %v2229_v45, %v2229_v45 }
 0x1b1   :  { %v791_v33 = vmul.f32 0.03125, %v722_v41  ;;  %v857_v58 = vmul.f32 %v2233_v48, %v2233_v48 }
 0x1b2   :  { %v2241_v60 = vsub.f32 %v2058_v57, %v790_v53  ;;  %v916_v38 = vsel %vm28_vm0, %v856_v44, 0.0 }
 0x1b3   :  { %v2245_v61 = vsub.f32 %v2061_v0, %v791_v33  ;;  %v767_v2 = vpop.xlane.xlu0 %766  ;;  %v919_v14 = vsel %vm28_vm0, %v857_v58, 0.0 }
 0x1b4   :  { %917 = vadd.xlane.f32.xlu0 %v916_v38  ;;  %v806_v1 = vmul.f32 0.03125, %v767_v2  ;;  %950 = vadd.xlane.f32.xlu1 %v949_v35  ;;  %v770_v54 = vpop.xlane.xlu1 %769  ;;  %v854_v59 = vmul.f32 %v2241_v60, %v2241_v60 }
 0x1b5   :  { %v807_v57 = vmul.f32 0.03125, %v770_v54  ;;  %v855_v16 = vmul.f32 %v2245_v61, %v2245_v61 }
 0x1b6   :  { %v2253_v8 = vsub.f32 %v2069_v7, %v806_v1  ;;  %v910_v0 = vsel %vm28_vm0, %v854_v59, 0.0 }
 0x1b7   :  { %v2257_v10 = vsub.f32 %v2074_v12, %v807_v57  ;;  %v773_v47 = vpop.xlane.xlu0 %772  ;;  %v913_v17 = vsel %vm28_vm0, %v855_v16, 0.0 }
 0x1b8   :  { %911 = vadd.xlane.f32.xlu0 %v910_v0  ;;  %v808_v23 = vmul.f32 0.03125, %v773_v47  ;;  %920 = vadd.xlane.f32.xlu1 %v919_v14  ;;  %v776_v9 = vpop.xlane.xlu1 %775  ;;  %v870_v13 = vmul.f32 %v2253_v8, %v2253_v8 }
 0x1b9   :  { %v809_v7 = vmul.f32 0.03125, %v776_v9  ;;  %v871_v32 = vmul.f32 %v2257_v10, %v2257_v10 }
 0x1ba   :  { %v2265_v56 = vsub.f32 %v2079_v21, %v808_v23  ;;  %v958_v12 = vsel %vm28_vm0, %v870_v13, 0.0 }
 0x1bb   :  { %v2269_v28 = vsub.f32 %v2083_v24, %v809_v7  ;;  %v961_v21 = vsel %vm28_vm0, %v871_v32, 0.0 }
 0x1bc   :  { %959 = vadd.xlane.f32.xlu0 %v958_v12  ;;  %914 = vadd.xlane.f32.xlu1 %v913_v17  ;;  %v872_v37 = vmul.f32 %v2265_v56, %v2265_v56  ;;  %v2284_v17 = vld [vmem:[%s2519_s4] ss:$0 sm:$0xff] }
 0x1bd   :  { %v873_v27 = vmul.f32 %v2269_v28, %v2269_v28 }
 0x1be   :  { %v964_v40 = vsel %vm28_vm0, %v872_v37, 0.0 }
 0x1bf   :  { %v967_v24 = vsel %vm28_vm0, %v873_v27, 0.0 }
 0x1c0   :  { %965 = vadd.xlane.f32.xlu0 %v964_v40  ;;  %962 = vadd.xlane.f32.xlu1 %v961_v21  ;;  %v2290_v21 = vld [vmem:[%s2520_s5] ss:$0 sm:$0xff] }
 0x1c4   :  { %968 = vadd.xlane.f32.xlu1 %v967_v24 }
 0x20d   :  { %v882_v29 = vpop.xlane.xlu0 %881 }
 0x20e   :  { %v972_v49 = vmul.f32 0.03125, %v882_v29 }
 0x210   :  { %v1004_v50 = vadd.f32 1e-12, %v972_v49 }
 0x211   :  { %v930_v30 = vpop.xlane.xlu0 %929  ;;  %v885_v41 = vpop.xlane.xlu1 %884 }
 0x212   :  { %1624 = vrsqrt.f32 %v1004_v50  ;;  %v988_v53 = vmul.f32 0.03125, %v930_v30  ;;  %v973_v44 = vmul.f32 0.03125, %v885_v41 }
 0x214   :  { %v1020_v33 = vadd.f32 1e-12, %v988_v53  ;;  %v1005_v38 = vadd.f32 1e-12, %v973_v44 }
 0x215   :  { %v876_v2 = vpop.xlane.xlu0 %875  ;;  %v933_v58 = vpop.xlane.xlu1 %932 }
 0x216   :  { %1626 = vrsqrt.f32 %v1020_v33  ;;  %v970_v35 = vmul.f32 0.03125, %v876_v2  ;;  %v989_v1 = vmul.f32 0.03125, %v933_v58 }
 0x217   :  { %1628 = vrsqrt.f32 %v1005_v38 }
 0x218   :  { %v1002_v54 = vadd.f32 1e-12, %v970_v35  ;;  %v1021_v59 = vadd.f32 1e-12, %v989_v1 }
 0x219   :  { %v924_v57 = vpop.xlane.xlu0 %923  ;;  %v879_v47 = vpop.xlane.xlu1 %878 }
 0x21a   :  { %1630 = vrsqrt.f32 %v1002_v54  ;;  %v986_v0 = vmul.f32 0.03125, %v924_v57  ;;  %v971_v14 = vmul.f32 0.03125, %v879_v47 }
 0x21b   :  { %1632 = vrsqrt.f32 %v1021_v59 }
 0x21c   :  { %v1018_v16 = vadd.f32 1e-12, %v986_v0  ;;  %v1003_v23 = vadd.f32 1e-12, %v971_v14 }
 0x21d   :  { %v894_v9 = vpop.xlane.xlu0 %893  ;;  %v927_v7 = vpop.xlane.xlu1 %926 }
 0x21e   :  { %1634 = vrsqrt.f32 %v1018_v16  ;;  %v976_v13 = vmul.f32 0.03125, %v894_v9  ;;  %v987_v32 = vmul.f32 0.03125, %v927_v7 }
 0x21f   :  { %v1625_v12 = vpop.eup %1624  ;;  %1636 = vrsqrt.f32 %v1003_v23 }
 0x220   :  { %v1068_v37 = vmul.f32 %v1625_v12, %v2093_v42  ;;  %v1008_v40 = vadd.f32 1e-12, %v976_v13  ;;  %v1019_v27 = vadd.f32 1e-12, %v987_v32 }
 0x221   :  { %v942_v24 = vpop.xlane.xlu0 %941  ;;  %v897_v50 = vpop.xlane.xlu1 %896 }
 0x222   :  { %v1107_v29 = vmul.f32 %v2284_v17, %v1068_v37  ;;  %1638 = vrsqrt.f32 %v1008_v40  ;;  %v992_v49 = vmul.f32 0.03125, %v942_v24  ;;  %v977_v53 = vmul.f32 0.03125, %v897_v50 }
 0x223   :  { %v1627_v30 = vpop.eup %1626  ;;  %1640 = vrsqrt.f32 %v1019_v27 }
 0x224   :  { %v1629_v41 = vpop.eup %1628  ;;  %v1146_v44 = vadd.f32 %v2290_v21, %v1107_v29  ;;  %v1084_v42 = vmul.f32 %v1627_v30, %v2090_v39  ;;  %v1024_v33 = vadd.f32 1e-12, %v992_v49  ;;  %v1009_v2 = vadd.f32 1e-12, %v977_v53 }
 0x225   :  { %v1069_v38 = vmul.f32 %v1629_v41, %v2104_v18  ;;  %v888_v35 = vpop.xlane.xlu0 %887  ;;  %v945_v59 = vpop.xlane.xlu1 %944 }
 0x226   :  { %v1402_v58 = vpack.c.bf16 %v1146_v44, %v1146_v44  ;;  %v1123_v1 = vmul.f32 %v2284_v17, %v1084_v42  ;;  %1642 = vrsqrt.f32 %v1024_v33  ;;  %v974_v54 = vmul.f32 0.03125, %v888_v35 }
 0x227   :  { %v1631_v57 = vpop.eup %1630  ;;  %v1108_v0 = vmul.f32 %v2284_v17, %v1069_v38  ;;  %1644 = vrsqrt.f32 %v1009_v2  ;;  %v993_v47 = vmul.f32 0.03125, %v945_v59 }
 0x228   :  { %v1633_v14 = vpop.eup %1632  ;;  %1307 = vst.msk [vmem:[%s2521_s6 + $0x8] sm:$0xf] %vm1304_vm1, %v1402_v58  ;;  %v1162_v39 = vadd.f32 %v2290_v21, %v1123_v1  ;;  %v1066_v18 = vmul.f32 %v1631_v57, %v2098_v51  ;;  %v1006_v16 = vadd.f32 1e-12, %v974_v54 }
 0x229   :  { %v1147_v23 = vadd.f32 %v2290_v21, %v1108_v0  ;;  %v1085_v9 = vmul.f32 %v1633_v14, %v2115_v5  ;;  %v1025_v13 = vadd.f32 1e-12, %v993_v47  ;;  %v936_v7 = vpop.xlane.xlu0 %935  ;;  %v891_v40 = vpop.xlane.xlu1 %890 }
 0x22a   :  { %v1418_v12 = vpack.c.bf16 %v1162_v39, %v1162_v39  ;;  %v1105_v32 = vmul.f32 %v2284_v17, %v1066_v18  ;;  %1646 = vrsqrt.f32 %v1006_v16  ;;  %v990_v37 = vmul.f32 0.03125, %v936_v7 }
 0x22b   :  { %v1635_v27 = vpop.eup %1634  ;;  %v1403_v24 = vpack.c.bf16 %v1147_v23, %v1147_v23  ;;  %v1124_v29 = vmul.f32 %v2284_v17, %v1085_v9  ;;  %1648 = vrsqrt.f32 %v1025_v13  ;;  %v975_v49 = vmul.f32 0.03125, %v891_v40 }
 0x22c   :  { %v1637_v51 = vpop.eup %1636  ;;  %1323 = vst.msk [vmem:[%s2521_s6 + $0x48] sm:$0xf] %vm1304_vm1, %v1418_v12  ;;  %v1144_v5 = vadd.f32 %v2290_v21, %v1105_v32  ;;  %v1082_v50 = vmul.f32 %v1635_v27, %v2109_v3  ;;  %v1022_v30 = vadd.f32 1e-12, %v990_v37 }
 0x22d   :  { %1308 = vst.msk [vmem:[%s2521_s6 + $0xc] sm:$0xf] %vm1304_vm1, %v1403_v24  ;;  %v1163_v53 = vadd.f32 %v2290_v21, %v1124_v29  ;;  %v1067_v41 = vmul.f32 %v1637_v51, %v2121_v11  ;;  %v1007_v44 = vadd.f32 1e-12, %v975_v49  ;;  %v906_v42 = vpop.xlane.xlu0 %905  ;;  %v939_v35 = vpop.xlane.xlu1 %938 }
 0x22e   :  { %v1400_v33 = vpack.c.bf16 %v1144_v5, %v1144_v5  ;;  %v1121_v38 = vmul.f32 %v2284_v17, %v1082_v50  ;;  %1650 = vrsqrt.f32 %v1022_v30  ;;  %v980_v2 = vmul.f32 0.03125, %v906_v42 }
 0x22f   :  { %v1639_v58 = vpop.eup %1638  ;;  %v1419_v3 = vpack.c.bf16 %v1163_v53, %v1163_v53  ;;  %v1106_v1 = vmul.f32 %v2284_v17, %v1067_v41  ;;  %1652 = vrsqrt.f32 %v1007_v44  ;;  %v991_v54 = vmul.f32 0.03125, %v939_v35 }
 0x230   :  { %v1641_v59 = vpop.eup %1640  ;;  %1305 = vst.msk [vmem:[%s2521_s6] sm:$0xf] %vm1304_vm1, %v1400_v33  ;;  %v1160_v11 = vadd.f32 %v2290_v21, %v1121_v38  ;;  %v1072_v57 = vmul.f32 %v1639_v58, %v2133_v31  ;;  %v1012_v0 = vadd.f32 1e-12, %v980_v2 }
 0x231   :  { %1324 = vst.msk [vmem:[%s2521_s6 + $0x4c] sm:$0xf] %vm1304_vm1, %v1419_v3  ;;  %v1145_v47 = vadd.f32 %v2290_v21, %v1106_v1  ;;  %v1083_v14 = vmul.f32 %v1641_v59, %v2127_v15  ;;  %v1023_v39 = vadd.f32 1e-12, %v991_v54  ;;  %v954_v18 = vpop.xlane.xlu0 %953  ;;  %v909_v13 = vpop.xlane.xlu1 %908 }
 0x232   :  { %v1416_v16 = vpack.c.bf16 %v1160_v11, %v1160_v11  ;;  %v1111_v23 = vmul.f32 %v2284_v17, %v1072_v57  ;;  %1654 = vrsqrt.f32 %v1012_v0  ;;  %v996_v9 = vmul.f32 0.03125, %v954_v18 }
 0x233   :  { %v1643_v7 = vpop.eup %1642  ;;  %v1401_v31 = vpack.c.bf16 %v1145_v47, %v1145_v47  ;;  %v1122_v12 = vmul.f32 %v2284_v17, %v1083_v14  ;;  %1656 = vrsqrt.f32 %v1023_v39  ;;  %v981_v32 = vmul.f32 0.03125, %v909_v13 }
 0x234   :  { %v1645_v37 = vpop.eup %1644  ;;  %1321 = vst.msk [vmem:[%s2521_s6 + $0x40] sm:$0xf] %vm1304_vm1, %v1416_v16  ;;  %v1150_v15 = vadd.f32 %v2290_v21, %v1111_v23  ;;  %v1088_v40 = vmul.f32 %v1643_v7, %v2145_v52  ;;  %v1028_v27 = vadd.f32 1e-12, %v996_v9 }
 0x235   :  { %1306 = vst.msk [vmem:[%s2521_s6 + $0x4] sm:$0xf] %vm1304_vm1, %v1401_v31  ;;  %v1161_v24 = vadd.f32 %v2290_v21, %v1122_v12  ;;  %v1073_v29 = vmul.f32 %v1645_v37, %v2138_v26  ;;  %v1013_v49 = vadd.f32 1e-12, %v981_v32  ;;  %v900_v51 = vpop.xlane.xlu0 %899  ;;  %v957_v53 = vpop.xlane.xlu1 %956 }
 0x236   :  { %v1406_v5 = vpack.c.bf16 %v1150_v15, %v1150_v15  ;;  %v1127_v50 = vmul.f32 %v2284_v17, %v1088_v40  ;;  %1658 = vrsqrt.f32 %v1028_v27  ;;  %v978_v30 = vmul.f32 0.03125, %v900_v51 }
 0x237   :  { %v1647_v41 = vpop.eup %1646  ;;  %v1417_v52 = vpack.c.bf16 %v1161_v24, %v1161_v24  ;;  %v1112_v44 = vmul.f32 %v2284_v17, %v1073_v29  ;;  %1660 = vrsqrt.f32 %v1013_v49  ;;  %v997_v42 = vmul.f32 0.03125, %v957_v53 }
 0x238   :  { %v1649_v33 = vpop.eup %1648  ;;  %1311 = vst.msk [vmem:[%s2521_s6 + $0x18] sm:$0xf] %vm1304_vm1, %v1406_v5  ;;  %v1166_v26 = vadd.f32 %v2290_v21, %v1127_v50  ;;  %v1070_v38 = vmul.f32 %v1647_v41, %v2157_v4  ;;  %v1010_v2 = vadd.f32 1e-12, %v978_v30 }
 0x239   :  { %1322 = vst.msk [vmem:[%s2521_s6 + $0x44] sm:$0xf] %vm1304_vm1, %v1417_v52  ;;  %v1151_v35 = vadd.f32 %v2290_v21, %v1112_v44  ;;  %v1089_v58 = vmul.f32 %v1649_v33, %v2149_v36  ;;  %v1029_v3 = vadd.f32 1e-12, %v997_v42  ;;  %v948_v1 = vpop.xlane.xlu0 %947  ;;  %v903_v57 = vpop.xlane.xlu1 %902 }
 0x23a   :  { %v1422_v54 = vpack.c.bf16 %v1166_v26, %v1166_v26  ;;  %v1109_v59 = vmul.f32 %v2284_v17, %v1070_v38  ;;  %1662 = vrsqrt.f32 %v1010_v2  ;;  %v994_v11 = vmul.f32 0.03125, %v948_v1 }
 0x23b   :  { %v1651_v0 = vpop.eup %1650  ;;  %v1407_v4 = vpack.c.bf16 %v1151_v35, %v1151_v35  ;;  %v1128_v47 = vmul.f32 %v2284_v17, %v1089_v58  ;;  %1664 = vrsqrt.f32 %v1029_v3  ;;  %v979_v14 = vmul.f32 0.03125, %v903_v57 }
 0x23c   :  { %v1653_v39 = vpop.eup %1652  ;;  %1327 = vst.msk [vmem:[%s2521_s6 + $0x58] sm:$0xf] %vm1304_vm1, %v1422_v54  ;;  %v1148_v36 = vadd.f32 %v2290_v21, %v1109_v59  ;;  %v1086_v18 = vmul.f32 %v1651_v0, %v2169_v62  ;;  %v1026_v16 = vadd.f32 1e-12, %v994_v11 }
 0x23d   :  { %1312 = vst.msk [vmem:[%s2521_s6 + $0x1c] sm:$0xf] %vm1304_vm1, %v1407_v4  ;;  %v1167_v23 = vadd.f32 %v2290_v21, %v1128_v47  ;;  %v1071_v9 = vmul.f32 %v1653_v39, %v2161_v46  ;;  %v1011_v13 = vadd.f32 1e-12, %v979_v14  ;;  %v918_v7 = vpop.xlane.xlu0 %917  ;;  %v951_v37 = vpop.xlane.xlu1 %950 }
 0x23e   :  { %v1404_v31 = vpack.c.bf16 %v1148_v36, %v1148_v36  ;;  %v1125_v12 = vmul.f32 %v2284_v17, %v1086_v18  ;;  %1666 = vrsqrt.f32 %v1026_v16  ;;  %v984_v32 = vmul.f32 0.03125, %v918_v7 }
 0x23f   :  { %v1655_v15 = vpop.eup %1654  ;;  %v1423_v62 = vpack.c.bf16 %v1167_v23, %v1167_v23  ;;  %v1110_v40 = vmul.f32 %v2284_v17, %v1071_v9  ;;  %1668 = vrsqrt.f32 %v1011_v13  ;;  %v995_v27 = vmul.f32 0.03125, %v951_v37 }
 0x240   :  { %v1657_v24 = vpop.eup %1656  ;;  %1309 = vst.msk [vmem:[%s2521_s6 + $0x10] sm:$0xf] %vm1304_vm1, %v1404_v31  ;;  %v1164_v46 = vadd.f32 %v2290_v21, %v1125_v12  ;;  %v1076_v29 = vmul.f32 %v1655_v15, %v2181_v34  ;;  %v1016_v49 = vadd.f32 1e-12, %v984_v32 }
 0x241   :  { %1328 = vst.msk [vmem:[%s2521_s6 + $0x5c] sm:$0xf] %vm1304_vm1, %v1423_v62  ;;  %v1149_v51 = vadd.f32 %v2290_v21, %v1110_v40  ;;  %v1087_v5 = vmul.f32 %v1657_v24, %v2173_v20  ;;  %v1027_v50 = vadd.f32 1e-12, %v995_v27  ;;  %v912_v30 = vpop.xlane.xlu0 %911  ;;  %v921_v44 = vpop.xlane.xlu1 %920 }
 0x242   :  { %v1420_v53 = vpack.c.bf16 %v1164_v46, %v1164_v46  ;;  %v1115_v41 = vmul.f32 %v2284_v17, %v1076_v29  ;;  %1670 = vrsqrt.f32 %v1016_v49  ;;  %v982_v52 = vmul.f32 0.03125, %v912_v30 }
 0x243   :  { %v1659_v42 = vpop.eup %1658  ;;  %v1405_v34 = vpack.c.bf16 %v1149_v51, %v1149_v51  ;;  %v1126_v33 = vmul.f32 %v2284_v17, %v1087_v5  ;;  %1672 = vrsqrt.f32 %v1027_v50  ;;  %v985_v26 = vmul.f32 0.03125, %v921_v44 }
 0x244   :  { %v1661_v38 = vpop.eup %1660  ;;  %1325 = vst.msk [vmem:[%s2521_s6 + $0x50] sm:$0xf] %vm1304_vm1, %v1420_v53  ;;  %v1154_v20 = vadd.f32 %v2290_v21, %v1115_v41  ;;  %v1092_v2 = vmul.f32 %v1659_v42, %v2193_v19  ;;  %v1014_v35 = vadd.f32 1e-12, %v982_v52 }
 0x245   :  { %1310 = vst.msk [vmem:[%s2521_s6 + $0x14] sm:$0xf] %vm1304_vm1, %v1405_v34  ;;  %v1165_v58 = vadd.f32 %v2290_v21, %v1126_v33  ;;  %v1077_v3 = vmul.f32 %v1661_v38, %v2185_v43  ;;  %v1017_v1 = vadd.f32 1e-12, %v985_v26  ;;  %v960_v54 = vpop.xlane.xlu0 %959  ;;  %v915_v0 = vpop.xlane.xlu1 %914 }
 0x246   :  { %v1410_v59 = vpack.c.bf16 %v1154_v20, %v1154_v20  ;;  %v1131_v11 = vmul.f32 %v2284_v17, %v1092_v2  ;;  %1674 = vrsqrt.f32 %v1014_v35  ;;  %v998_v57 = vmul.f32 0.03125, %v960_v54 }
 0x247   :  { %v1663_v4 = vpop.eup %1662  ;;  %v1421_v19 = vpack.c.bf16 %v1165_v58, %v1165_v58  ;;  %v1116_v47 = vmul.f32 %v2284_v17, %v1077_v3  ;;  %1676 = vrsqrt.f32 %v1017_v1  ;;  %v983_v14 = vmul.f32 0.03125, %v915_v0 }
 0x248   :  { %v1665_v39 = vpop.eup %1664  ;;  %1315 = vst.msk [vmem:[%s2521_s6 + $0x28] sm:$0xf] %vm1304_vm1, %v1410_v59  ;;  %v1170_v43 = vadd.f32 %v2290_v21, %v1131_v11  ;;  %v1074_v36 = vmul.f32 %v1663_v4, %v2205_v63  ;;  %v1030_v18 = vadd.f32 1e-12, %v998_v57 }
 0x249   :  { %1326 = vst.msk [vmem:[%s2521_s6 + $0x54] sm:$0xf] %vm1304_vm1, %v1421_v19  ;;  %v1155_v16 = vadd.f32 %v2290_v21, %v1116_v47  ;;  %v1093_v23 = vmul.f32 %v1665_v39, %v2197_v55  ;;  %v1015_v9 = vadd.f32 1e-12, %v983_v14  ;;  %v966_v13 = vpop.xlane.xlu0 %965  ;;  %v963_v32 = vpop.xlane.xlu1 %962 }
 0x24a   :  { %v1426_v7 = vpack.c.bf16 %v1170_v43, %v1170_v43  ;;  %v1113_v31 = vmul.f32 %v2284_v17, %v1074_v36  ;;  %1678 = vrsqrt.f32 %v1030_v18  ;;  %v1000_v12 = vmul.f32 0.03125, %v966_v13 }
 0x24b   :  { %v1667_v37 = vpop.eup %1666  ;;  %v1411_v63 = vpack.c.bf16 %v1155_v16, %v1155_v16  ;;  %v1132_v15 = vmul.f32 %v2284_v17, %v1093_v23  ;;  %1680 = vrsqrt.f32 %v1015_v9  ;;  %v999_v62 = vmul.f32 0.03125, %v963_v32 }
 0x24c   :  { %v1669_v40 = vpop.eup %1668  ;;  %1331 = vst.msk [vmem:[%s2521_s6 + $0x68] sm:$0xf] %vm1304_vm1, %v1426_v7  ;;  %v1152_v55 = vadd.f32 %v2290_v21, %v1113_v31  ;;  %v1090_v27 = vmul.f32 %v1667_v37, %v2217_v22  ;;  %v1032_v24 = vadd.f32 1e-12, %v1000_v12 }
 0x24d   :  { %1316 = vst.msk [vmem:[%s2521_s6 + $0x2c] sm:$0xf] %vm1304_vm1, %v1411_v63  ;;  %v1171_v46 = vadd.f32 %v2290_v21, %v1132_v15  ;;  %v1075_v29 = vmul.f32 %v1669_v40, %v2209_v6  ;;  %v1031_v49 = vadd.f32 1e-12, %v999_v62  ;;  %v969_v50 = vpop.xlane.xlu1 %968 }
 0x24e   :  { %v1408_v51 = vpack.c.bf16 %v1152_v55, %v1152_v55  ;;  %v1129_v5 = vmul.f32 %v2284_v17, %v1090_v27  ;;  %1682 = vrsqrt.f32 %v1032_v24  ;;  %v1001_v41 = vmul.f32 0.03125, %v969_v50 }
 0x24f   :  { %v1671_v30 = vpop.eup %1670  ;;  %v1427_v53 = vpack.c.bf16 %v1171_v46, %v1171_v46  ;;  %v1114_v22 = vmul.f32 %v2284_v17, %v1075_v29  ;;  %1684 = vrsqrt.f32 %v1031_v49 }
 0x250   :  { %v1673_v52 = vpop.eup %1672  ;;  %1313 = vst.msk [vmem:[%s2521_s6 + $0x20] sm:$0xf] %vm1304_vm1, %v1408_v51  ;;  %v1168_v6 = vadd.f32 %v2290_v21, %v1129_v5  ;;  %v1080_v44 = vmul.f32 %v1671_v30, %v2229_v45  ;;  %v1033_v33 = vadd.f32 1e-12, %v1001_v41 }
 0x251   :  { %1332 = vst.msk [vmem:[%s2521_s6 + $0x6c] sm:$0xf] %vm1304_vm1, %v1427_v53  ;;  %v1153_v42 = vadd.f32 %v2290_v21, %v1114_v22  ;;  %v1091_v34 = vmul.f32 %v1673_v52, %v2221_v25 }
 0x252   :  { %v1424_v26 = vpack.c.bf16 %v1168_v6, %v1168_v6  ;;  %v1119_v38 = vmul.f32 %v2284_v17, %v1080_v44  ;;  %1686 = vrsqrt.f32 %v1033_v33 }
 0x253   :  { %v1675_v20 = vpop.eup %1674  ;;  %v1409_v2 = vpack.c.bf16 %v1153_v42, %v1153_v42  ;;  %v1130_v35 = vmul.f32 %v2284_v17, %v1091_v34 }
 0x254   :  { %v1677_v58 = vpop.eup %1676  ;;  %1329 = vst.msk [vmem:[%s2521_s6 + $0x60] sm:$0xf] %vm1304_vm1, %v1424_v26  ;;  %v1158_v45 = vadd.f32 %v2290_v21, %v1119_v38  ;;  %v1078_v3 = vmul.f32 %v1675_v20, %v2241_v60 }
 0x255   :  { %1314 = vst.msk [vmem:[%s2521_s6 + $0x24] sm:$0xf] %vm1304_vm1, %v1409_v2  ;;  %v1169_v25 = vadd.f32 %v2290_v21, %v1130_v35  ;;  %v1081_v1 = vmul.f32 %v1677_v58, %v2233_v48 }
 0x256   :  { %v1414_v54 = vpack.c.bf16 %v1158_v45, %v1158_v45  ;;  %v1117_v59 = vmul.f32 %v2284_v17, %v1078_v3 }
 0x257   :  { %v1679_v11 = vpop.eup %1678  ;;  %v1425_v57 = vpack.c.bf16 %v1169_v25, %v1169_v25  ;;  %v1120_v0 = vmul.f32 %v2284_v17, %v1081_v1 }
 0x258   :  { %v1681_v4 = vpop.eup %1680  ;;  %1319 = vst.msk [vmem:[%s2521_s6 + $0x38] sm:$0xf] %vm1304_vm1, %v1414_v54  ;;  %v1156_v60 = vadd.f32 %v2290_v21, %v1117_v59  ;;  %v1094_v19 = vmul.f32 %v1679_v11, %v2253_v8 }
 0x259   :  { %1330 = vst.msk [vmem:[%s2521_s6 + $0x64] sm:$0xf] %vm1304_vm1, %v1425_v57  ;;  %v1159_v48 = vadd.f32 %v2290_v21, %v1120_v0  ;;  %v1079_v47 = vmul.f32 %v1681_v4, %v2245_v61 }
 0x25a   :  { %v1412_v14 = vpack.c.bf16 %v1156_v60, %v1156_v60  ;;  %v1133_v39 = vmul.f32 %v2284_v17, %v1094_v19 }
 0x25b   :  { %v1683_v43 = vpop.eup %1682  ;;  %v1415_v36 = vpack.c.bf16 %v1159_v48, %v1159_v48  ;;  %v1118_v18 = vmul.f32 %v2284_v17, %v1079_v47 }
 0x25c   :  { %v1685_v16 = vpop.eup %1684  ;;  %1317 = vst.msk [vmem:[%s2521_s6 + $0x30] sm:$0xf] %vm1304_vm1, %v1412_v14  ;;  %v1172_v8 = vadd.f32 %v2290_v21, %v1133_v39  ;;  %v1096_v23 = vmul.f32 %v1683_v43, %v2265_v56 }
 0x25d   :  { %1320 = vst.msk [vmem:[%s2521_s6 + $0x3c] sm:$0xf] %vm1304_vm1, %v1415_v36  ;;  %v1157_v61 = vadd.f32 %v2290_v21, %v1118_v18  ;;  %v1095_v9 = vmul.f32 %v1685_v16, %v2257_v10 }
 0x25e   :  { %v1428_v13 = vpack.c.bf16 %v1172_v8, %v1172_v8  ;;  %v1135_v7 = vmul.f32 %v2284_v17, %v1096_v23 }
 0x25f   :  { %v1413_v31 = vpack.c.bf16 %v1157_v61, %v1157_v61  ;;  %v1134_v12 = vmul.f32 %v2284_v17, %v1095_v9  ;;  %v1687_v32 = vpop.eup %1686 }
 0x260   :  { %1333 = vst.msk [vmem:[%s2521_s6 + $0x70] sm:$0xf] %vm1304_vm1, %v1428_v13  ;;  %v1174_v56 = vadd.f32 %v2290_v21, %v1135_v7  ;;  %v1097_v37 = vmul.f32 %v1687_v32, %v2269_v28 }
 0x261   :  { %1318 = vst.msk [vmem:[%s2521_s6 + $0x34] sm:$0xf] %vm1304_vm1, %v1413_v31  ;;  %v1173_v10 = vadd.f32 %v2290_v21, %v1134_v12 }
 0x262   :  { %v1430_v63 = vpack.c.bf16 %v1174_v56, %v1174_v56  ;;  %v1136_v62 = vmul.f32 %v2284_v17, %v1097_v37 }
 0x263   :  { %v1429_v15 = vpack.c.bf16 %v1173_v10, %v1173_v10 }
 0x264   :  { %1335 = vst.msk [vmem:[%s2521_s6 + $0x78] sm:$0xf] %vm1304_vm1, %v1430_v63  ;;  %v1175_v40 = vadd.f32 %v2290_v21, %v1136_v62 }
 0x265   :  { %1334 = vst.msk [vmem:[%s2521_s6 + $0x74] sm:$0xf] %vm1304_vm1, %v1429_v15 }
 0x266   :  { %v1431_v55 = vpack.c.bf16 %v1175_v40, %v1175_v40 }
 0x268   :  { %1336 = vst.msk [vmem:[%s2521_s6 + $0x7c] sm:$0xf] %vm1304_vm1, %v1431_v55 }

// kernel: jointbert_forward.27
= control target key start
LH: loop header
LB: loop body
LE: loop exit
PB: predicated region body
PF: predicated region fallthrough
CT: control target
= control target key end

     0   :  { %v159_v0 = vmov 0.0   ;;  %vm160_vm0 = vmmov 0   ;;  %vm46_vm1 = vcmask 261120   ;;  %s196_s1 = inlined_call_operand.vmem [shape: bf16[32,128], index: 1, kind: input, shape index: {}]   ;;  %s197_s0 = inlined_call_operand.vmem [shape: bf16[16,32], index: 0, kind: input, shape index: {}]   ;;  %s198_s2 = inlined_call_operand.vmem [shape: f32[1,128], index: 2, kind: input, shape index: {}]   ;;  %s199_s3 = inlined_call_operand.vmem [shape: bf16[16,128], index: 3, kind: output, shape index: {}]  }
   0x1   :  { %142 = vmatprep.subr.bf16.mxu0 %v159_v0  ;;  %v152_v1 = vld [vmem:[%s196_s1 + $0x8] sm:$0xff]   ;;  %146 = vmatprep.mubr.msk.bf16.mxu0 %vm160_vm0, %v159_v0  ;;  %v153_v2 = vld [vmem:[%s196_s1] sm:$0xff]  }
   0x2   :  { %143 = vmatpush3.bf16.msra.mxu0 %v152_v1  ;;  %v154_v3 = vld [vmem:[%s197_s0] sm:$0xff]  }
   0x3   :  { %144 = vmatprep.subr.bf16.mxu0 %v159_v0  ;;  %v129_v4 = vld [vmem:[%s198_s2] ss:$0 sm:$0xff] }
   0x6   :  { %145 = vmatpush3.bf16.msra.mxu0 %v153_v2 }
   0x9   :  { %147 = vmatmul.mubr.msk.bf16.vlgmr.msra.gmra.mxu0 %vm46_vm1, %v154_v3 }
  0xc9   :  { %v84_v5 = vpop.f32.mrf.mxu0 }
  0xca   :  { %v107_v6 = vadd.f32 %v129_v4, %v84_v5 }
  0xcb   :  { %v148_v7 = vpop.f32.mrf.mxu0 }
  0xcc   :  { %155 = vtanh.f32 %v107_v6 }
  0xcd   :  { %v87_v8 = vpop.f32.mrf.mxu0 }
  0xce   :  { %v108_v9 = vadd.f32 %v129_v4, %v87_v8 }
  0xcf   :  { %v149_v10 = vpop.f32.mrf.mxu0 }
  0xd0   :  { %157 = vtanh.f32 %v108_v9 }
  0xd9   :  { %v156_v11 = vpop.eup %155 }
  0xdd   :  { %v158_v12 = vpop.eup %157 }
  0xde   :  { %v137_v13 = vpack.c.bf16 %v158_v12, %v156_v11 }
  0xe0   :  { %138 = vst [vmem:[%s199_s3] sm:$0xff] %v137_v13  }

// kernel: jointbert_forward.31
= control target key start
LH: loop header
LB: loop body
LE: loop exit
PB: predicated region body
PF: predicated region fallthrough
CT: control target
= control target key end

     0   :  { %v112_v0 = vlaneseq  ;;  %v1142_v1 = vmov 0   ;;  %vm819_vm1 = vcmask 7168   ;;  %s2158_s0 = inlined_call_operand.vmem [shape: f32[256,128], index: 0, kind: input, shape index: {}]   ;;  %s2159_s1 = inlined_call_operand.vmem [shape: s32[256,1], index: 1, kind: input, shape index: {}]   ;;  %s2160_s2 = inlined_call_operand.vmem [shape: f32[256,1], index: 2, kind: input, shape index: {}]   ;;  %s2161_s4 = inlined_call_operand.vmem [shape: f32[1,8,128], index: 4, kind: output, shape index: {1}]   ;;  %s2162_s3 = inlined_call_operand.vmem [shape: f32[1,8,128], index: 3, kind: output, shape index: {0}]  }
   0x1   :  { %1013 = vset.pattern.permute.xlu1 %v1142_v1  ;;  %1012 = vset.pattern.permute.xlu0 %v1142_v1  ;;  %v18_v2 = vld [vmem:[%s2158_s0 + $0x10] sm:$0xff]  ;;  %v16_v4 = vld [vmem:[%s2158_s0] sm:$0xff]  ;;  %v19_v5 = vld [vmem:[%s2158_s0 + $0x18] sm:$0xff] }
   0x2   :  { %v1172_v3 = vand.u32 127, %v112_v0  ;;  %v17_v6 = vld [vmem:[%s2158_s0 + $0x8] sm:$0xff]  ;;  %v20_v12 = vld [vmem:[%s2158_s0 + $0x20] sm:$0xff]  ;;  %v23_v15 = vld [vmem:[%s2158_s0 + $0x38] sm:$0xff] }
   0x3   :  { %v21_v11 = vld [vmem:[%s2158_s0 + $0x28] sm:$0xff]  ;;  %v22_v16 = vld [vmem:[%s2158_s0 + $0x30] sm:$0xff]  ;;  %v24_v20 = vld [vmem:[%s2158_s0 + $0x40] sm:$0xff] }
   0x4   :  { %vm114_vm0 = vcmp.lt.s32.totalorder %v1172_v3, 7  ;;  %v25_v19 = vld [vmem:[%s2158_s0 + $0x48] sm:$0xff]  ;;  %v27_v23 = vld [vmem:[%s2158_s0 + $0x58] sm:$0xff]  ;;  %v26_v24 = vld [vmem:[%s2158_s0 + $0x50] sm:$0xff] }
   0x5   :  { %v1186_v7 = vsel %vm114_vm0, %v18_v2, -1e+30  ;;  %v1190_v8 = vsel %vm114_vm0, %v16_v4, -1e+30  ;;  %v1196_v9 = vsel %vm114_vm0, %v19_v5, -1e+30 }
   0x6   :  { %151 = vmax.xlane.f32.xlu1 %v1186_v7  ;;  %147 = vmax.xlane.f32.xlu0 %v1190_v8  ;;  %v1200_v10 = vsel %vm114_vm0, %v17_v6, -1e+30  ;;  %v1212_v13 = vsel %vm114_vm0, %v21_v11, -1e+30  ;;  %v1216_v14 = vsel %vm114_vm0, %v20_v12, -1e+30 }
   0x7   :  { %v1228_v17 = vsel %vm114_vm0, %v23_v15, -1e+30  ;;  %v1232_v18 = vsel %vm114_vm0, %v22_v16, -1e+30  ;;  %v1244_v21 = vsel %vm114_vm0, %v25_v19, -1e+30 }
   0x8   :  { %v1248_v22 = vsel %vm114_vm0, %v24_v20, -1e+30  ;;  %v1260_v25 = vsel %vm114_vm0, %v27_v23, -1e+30  ;;  %v1264_v26 = vsel %vm114_vm0, %v26_v24, -1e+30 }
   0x9   :  { %v29_v27 = vld [vmem:[%s2158_s0 + $0x68] sm:$0xff]  ;;  %v28_v28 = vld [vmem:[%s2158_s0 + $0x60] sm:$0xff]  ;;  %v31_v31 = vld [vmem:[%s2158_s0 + $0x78] sm:$0xff] }
   0xa   :  { %153 = vmax.xlane.f32.xlu1 %v1196_v9  ;;  %149 = vmax.xlane.f32.xlu0 %v1200_v10  ;;  %v1276_v29 = vsel %vm114_vm0, %v29_v27, -1e+30  ;;  %v1280_v30 = vsel %vm114_vm0, %v28_v28, -1e+30  ;;  %v30_v32 = vld [vmem:[%s2158_s0 + $0x70] sm:$0xff]  ;;  %v33_v35 = vld [vmem:[%s2158_s0 + $0x88] sm:$0xff] }
   0xb   :  { %v1292_v33 = vsel %vm114_vm0, %v31_v31, -1e+30  ;;  %v1296_v34 = vsel %vm114_vm0, %v30_v32, -1e+30  ;;  %v32_v36 = vld [vmem:[%s2158_s0 + $0x80] sm:$0xff]  ;;  %v35_v39 = vld [vmem:[%s2158_s0 + $0x98] sm:$0xff] }
   0xc   :  { %v1308_v37 = vsel %vm114_vm0, %v33_v35, -1e+30  ;;  %v1312_v38 = vsel %vm114_vm0, %v32_v36, -1e+30  ;;  %v34_v40 = vld [vmem:[%s2158_s0 + $0x90] sm:$0xff]  ;;  %v37_v43 = vld [vmem:[%s2158_s0 + $0xa8] sm:$0xff] }
   0xd   :  { %2213 = vst [vmem:[#allocation2_spill] sm:$0xff] %v1308_v37  ;;  %2214 = vst [vmem:[#allocation3_spill] sm:$0xff] %v1312_v38  ;;  %v1324_v41 = vsel %vm114_vm0, %v35_v39, -1e+30  ;;  %v1328_v42 = vsel %vm114_vm0, %v34_v40, -1e+30 }
   0xe   :  { %157 = vmax.xlane.f32.xlu1 %v1212_v13  ;;  %155 = vmax.xlane.f32.xlu0 %v1216_v14  ;;  %2215 = vst [vmem:[#allocation4_spill] sm:$0xff] %v1328_v42  ;;  %v36_v44 = vld [vmem:[%s2158_s0 + $0xa0] sm:$0xff]  ;;  %v1340_v45 = vsel %vm114_vm0, %v37_v43, -1e+30  ;;  %v39_v47 = vld [vmem:[%s2158_s0 + $0xb8] sm:$0xff]  ;;  %v38_v48 = vld [vmem:[%s2158_s0 + $0xb0] sm:$0xff] }
   0xf   :  { %v1344_v46 = vsel %vm114_vm0, %v36_v44, -1e+30  ;;  %v1356_v49 = vsel %vm114_vm0, %v39_v47, -1e+30  ;;  %v1360_v50 = vsel %vm114_vm0, %v38_v48, -1e+30 }
  0x10   :  { %v41_v51 = vld [vmem:[%s2158_s0 + $0xc8] sm:$0xff]  ;;  %v40_v52 = vld [vmem:[%s2158_s0 + $0xc0] sm:$0xff]  ;;  %v43_v55 = vld [vmem:[%s2158_s0 + $0xd8] sm:$0xff] }
  0x11   :  { %v1372_v53 = vsel %vm114_vm0, %v41_v51, -1e+30  ;;  %v1376_v54 = vsel %vm114_vm0, %v40_v52, -1e+30  ;;  %v42_v56 = vld [vmem:[%s2158_s0 + $0xd0] sm:$0xff]  ;;  %v45_v59 = vld [vmem:[%s2158_s0 + $0xe8] sm:$0xff] }
  0x12   :  { %161 = vmax.xlane.f32.xlu1 %v1228_v17  ;;  %159 = vmax.xlane.f32.xlu0 %v1232_v18  ;;  %v1388_v57 = vsel %vm114_vm0, %v43_v55, -1e+30  ;;  %v1392_v58 = vsel %vm114_vm0, %v42_v56, -1e+30  ;;  %v44_v60 = vld [vmem:[%s2158_s0 + $0xe0] sm:$0xff]  ;;  %v47_v63 = vld [vmem:[%s2158_s0 + $0xf8] sm:$0xff] }
  0x13   :  { %v1404_v61 = vsel %vm114_vm0, %v45_v59, -1e+30  ;;  %v1408_v62 = vsel %vm114_vm0, %v44_v60, -1e+30  ;;  %v46_v0 = vld [vmem:[%s2158_s0 + $0xf0] sm:$0xff]  ;;  %v49_v4 = vld [vmem:[%s2159_s1 + $0x8] sm:$0xff] }
  0x14   :  { %v1420_v1 = vsel %vm114_vm0, %v47_v63, -1e+30  ;;  %v1424_v2 = vsel %vm114_vm0, %v46_v0, -1e+30  ;;  %v50_v5 = vld [vmem:[%s2159_s1 + $0x10] sm:$0xff]  ;;  %v48_v6 = vld [vmem:[%s2159_s1] sm:$0xff] }
  0x15   :  { %v51_v11 = vld [vmem:[%s2159_s1 + $0x18] sm:$0xff]  ;;  %v57_v12 = vld [vmem:[%s2159_s1 + $0x48] sm:$0xff]  ;;  %v52_v15 = vld [vmem:[%s2159_s1 + $0x20] sm:$0xff] }
  0x16   :  { %165 = vmax.xlane.f32.xlu1 %v1244_v21  ;;  %163 = vmax.xlane.f32.xlu0 %v1248_v22  ;;  %v59_v16 = vld [vmem:[%s2159_s1 + $0x58] sm:$0xff]  ;;  %v53_v19 = vld [vmem:[%s2159_s1 + $0x28] sm:$0xff]  ;;  %v54_v23 = vld [vmem:[%s2159_s1 + $0x30] sm:$0xff] }
  0x17   :  { %v61_v20 = vld [vmem:[%s2159_s1 + $0x68] sm:$0xff]  ;;  %v63_v24 = vld [vmem:[%s2159_s1 + $0x78] sm:$0xff]  ;;  %v56_v31 = vld [vmem:[%s2159_s1 + $0x40] sm:$0xff] }
  0x18   :  { %v55_v27 = vld [vmem:[%s2159_s1 + $0x38] sm:$0xff]  ;;  %v65_v28 = vld [vmem:[%s2159_s1 + $0x88] sm:$0xff]  ;;  %v58_v32 = vld [vmem:[%s2159_s1 + $0x50] sm:$0xff] }
  0x19   :  { %v60_v35 = vld [vmem:[%s2159_s1 + $0x60] sm:$0xff]  ;;  %v62_v36 = vld [vmem:[%s2159_s1 + $0x70] sm:$0xff] }
  0x1a   :  { %169 = vmax.xlane.f32.xlu1 %v1260_v25  ;;  %167 = vmax.xlane.f32.xlu0 %v1264_v26  ;;  %v64_v39 = vld [vmem:[%s2159_s1 + $0x80] sm:$0xff]  ;;  %v66_v40 = vld [vmem:[%s2159_s1 + $0x90] sm:$0xff] }
  0x1e   :  { %173 = vmax.xlane.f32.xlu1 %v1276_v29  ;;  %171 = vmax.xlane.f32.xlu0 %v1280_v30 }
  0x22   :  { %177 = vmax.xlane.f32.xlu1 %v1292_v33  ;;  %175 = vmax.xlane.f32.xlu0 %v1296_v34 }
  0x26   :  { %181 = vmax.xlane.f32.xlu1 %v1308_v37  ;;  %179 = vmax.xlane.f32.xlu0 %v1312_v38 }
  0x2a   :  { %185 = vmax.xlane.f32.xlu1 %v1324_v41  ;;  %183 = vmax.xlane.f32.xlu0 %v1328_v42 }
  0x2e   :  { %189 = vmax.xlane.f32.xlu1 %v1340_v45  ;;  %187 = vmax.xlane.f32.xlu0 %v1344_v46 }
  0x32   :  { %193 = vmax.xlane.f32.xlu1 %v1356_v49  ;;  %191 = vmax.xlane.f32.xlu0 %v1360_v50 }
  0x36   :  { %197 = vmax.xlane.f32.xlu1 %v1372_v53  ;;  %195 = vmax.xlane.f32.xlu0 %v1376_v54 }
  0x3a   :  { %201 = vmax.xlane.f32.xlu1 %v1388_v57  ;;  %199 = vmax.xlane.f32.xlu0 %v1392_v58 }
  0x3e   :  { %205 = vmax.xlane.f32.xlu1 %v1404_v61  ;;  %203 = vmax.xlane.f32.xlu0 %v1408_v62 }
  0x42   :  { %209 = vmax.xlane.f32.xlu1 %v1420_v1  ;;  %207 = vmax.xlane.f32.xlu0 %v1424_v2 }
  0x53   :  { %471 = vperm.xlu1 %1013, %v49_v4  }
  0x57   :  { %474 = vperm.xlu1 %1013, %v50_v5  }
  0x58   :  { %468 = vperm.xlu0 %1012, %v48_v6  }
  0x5b   :  { %477 = vperm.xlu1 %1013, %v51_v11  }
  0x5c   :  { %495 = vperm.xlu0 %1012, %v57_v12  }
  0x5f   :  { %480 = vperm.xlu1 %1013, %v52_v15  }
  0x60   :  { %501 = vperm.xlu0 %1012, %v59_v16  }
  0x63   :  { %483 = vperm.xlu1 %1013, %v53_v19  }
  0x64   :  { %507 = vperm.xlu0 %1012, %v61_v20  }
  0x67   :  { %486 = vperm.xlu1 %1013, %v54_v23  }
  0x68   :  { %513 = vperm.xlu0 %1012, %v63_v24  }
  0x6b   :  { %489 = vperm.xlu1 %1013, %v55_v27  }
  0x6c   :  { %519 = vperm.xlu0 %1012, %v65_v28  }
  0x6f   :  { %492 = vperm.xlu1 %1013, %v56_v31  }
  0x73   :  { %498 = vperm.xlu1 %1013, %v58_v32  }
  0x77   :  { %504 = vperm.xlu1 %1013, %v60_v35  }
  0x7b   :  { %510 = vperm.xlu1 %1013, %v62_v36  }
  0x7f   :  { %516 = vperm.xlu1 %1013, %v64_v39  }
  0x83   :  { %522 = vperm.xlu1 %1013, %v66_v40  }
  0x8f   :  { %v1485_v43 = vpop.xlane.xlu1 %151  ;;  %v1487_v44 = vpop.xlane.xlu0 %147 }
  0x90   :  { %2216 = vst [vmem:[#allocation5_spill] sm:$0xff] %v1485_v43  ;;  %2217 = vst [vmem:[#allocation6_spill] sm:$0xff] %v1487_v44  ;;  %v213_v47 = vsub.f32 %v1186_v7, %v1485_v43  ;;  %v211_v48 = vsub.f32 %v1190_v8, %v1487_v44  ;;  %v1683_v43 = vld [vmem:[%s2160_s2 + $0x40] sm:$0xff] }
  0x91   :  { %2251 = vst [vmem:[#allocation40_spill] sm:$0xff] %v1683_v43 }
  0x92   :  { %v243_v51 = vmul.f32 1.442695, %v211_v48  ;;  %v247_v52 = vmul.f32 1.442695, %v213_v47 }
  0x93   :  { %v1493_v55 = vpop.xlane.xlu1 %153  ;;  %v1495_v56 = vpop.xlane.xlu0 %149 }
  0x94   :  { %2218 = vst [vmem:[#allocation7_spill] sm:$0xff] %v1493_v55  ;;  %2219 = vst [vmem:[#allocation8_spill] sm:$0xff] %v1495_v56  ;;  %v214_v59 = vsub.f32 %v1196_v9, %v1493_v55  ;;  %v212_v60 = vsub.f32 %v1200_v10, %v1495_v56  ;;  %1014 = vpow2.f32 %v243_v51  ;;  %v2191_v56 = vmov 0.0  }
  0x95   :  { %1016 = vpow2.f32 %v247_v52 }
  0x96   :  { %v245_v63 = vmul.f32 1.442695, %v212_v60  ;;  %v249_v5 = vmul.f32 1.442695, %v214_v59 }
  0x97   :  { %v1501_v0 = vpop.xlane.xlu1 %157  ;;  %v1503_v4 = vpop.xlane.xlu0 %155 }
  0x98   :  { %2220 = vst [vmem:[#allocation9_spill] sm:$0xff] %v1501_v0  ;;  %2221 = vst [vmem:[#allocation10_spill] sm:$0xff] %v1503_v4  ;;  %v216_v6 = vsub.f32 %v1212_v13, %v1501_v0  ;;  %v215_v11 = vsub.f32 %v1216_v14, %v1503_v4  ;;  %1018 = vpow2.f32 %v245_v63 }
  0x99   :  { %1020 = vpow2.f32 %v249_v5 }
  0x9a   :  { %v251_v12 = vmul.f32 1.442695, %v215_v11  ;;  %v253_v19 = vmul.f32 1.442695, %v216_v6 }
  0x9b   :  { %v1509_v15 = vpop.xlane.xlu1 %161  ;;  %v1511_v16 = vpop.xlane.xlu0 %159 }
  0x9c   :  { %2222 = vst [vmem:[#allocation11_spill] sm:$0xff] %v1509_v15  ;;  %2223 = vst [vmem:[#allocation12_spill] sm:$0xff] %v1511_v16  ;;  %v218_v20 = vsub.f32 %v1228_v17, %v1509_v15  ;;  %v217_v23 = vsub.f32 %v1232_v18, %v1511_v16  ;;  %1022 = vpow2.f32 %v251_v12 }
  0x9d   :  { %1024 = vpow2.f32 %v253_v19 }
  0x9e   :  { %v255_v24 = vmul.f32 1.442695, %v217_v23  ;;  %v257_v31 = vmul.f32 1.442695, %v218_v20 }
  0x9f   :  { %v1517_v27 = vpop.xlane.xlu1 %165  ;;  %v1519_v28 = vpop.xlane.xlu0 %163 }
  0xa0   :  { %2224 = vst [vmem:[#allocation13_spill] sm:$0xff] %v1517_v27  ;;  %2225 = vst [vmem:[#allocation14_spill] sm:$0xff] %v1519_v28  ;;  %v220_v32 = vsub.f32 %v1244_v21, %v1517_v27  ;;  %v219_v35 = vsub.f32 %v1248_v22, %v1519_v28  ;;  %1026 = vpow2.f32 %v255_v24 }
  0xa1   :  { %v1015_v36 = vpop.eup %1014  ;;  %1028 = vpow2.f32 %v257_v31 }
  0xa2   :  { %v259_v39 = vmul.f32 1.442695, %v219_v35  ;;  %307 = vadd.xlane.f32.xlu0 %v1015_v36  ;;  %v1017_v48 = vpop.eup %1016  ;;  %v261_v51 = vmul.f32 1.442695, %v220_v32 }
  0xa3   :  { %v1525_v40 = vpop.xlane.xlu1 %169  ;;  %v1527_v47 = vpop.xlane.xlu0 %167 }
  0xa4   :  { %2226 = vst [vmem:[#allocation15_spill] sm:$0xff] %v1525_v40  ;;  %2227 = vst [vmem:[#allocation16_spill] sm:$0xff] %v1527_v47  ;;  %v222_v52 = vsub.f32 %v1260_v25, %v1525_v40  ;;  %v221_v59 = vsub.f32 %v1264_v26, %v1527_v47  ;;  %1030 = vpow2.f32 %v259_v39  ;;  %v79_v40 = vld [vmem:[%s2159_s1 + $0xf8] sm:$0xff] }
  0xa5   :  { %v1019_v60 = vpop.eup %1018  ;;  %1032 = vpow2.f32 %v261_v51 }
  0xa6   :  { %v263_v63 = vmul.f32 1.442695, %v221_v59  ;;  %311 = vadd.xlane.f32.xlu0 %v1017_v48  ;;  %v265_v11 = vmul.f32 1.442695, %v222_v52  ;;  %v1021_v20 = vpop.eup %1020 }
  0xa7   :  { %v1533_v5 = vpop.xlane.xlu1 %173  ;;  %309 = vadd.xlane.f32.xlu1 %v1019_v60  ;;  %v1535_v6 = vpop.xlane.xlu0 %171 }
  0xa8   :  { %2228 = vst [vmem:[#allocation17_spill] sm:$0xff] %v1533_v5  ;;  %2229 = vst [vmem:[#allocation18_spill] sm:$0xff] %v1535_v6  ;;  %v224_v12 = vsub.f32 %v1276_v29, %v1533_v5  ;;  %v223_v19 = vsub.f32 %v1280_v30, %v1535_v6  ;;  %1034 = vpow2.f32 %v263_v63 }
  0xa9   :  { %v1023_v23 = vpop.eup %1022  ;;  %1036 = vpow2.f32 %v265_v11 }
  0xaa   :  { %v267_v24 = vmul.f32 1.442695, %v223_v19  ;;  %315 = vadd.xlane.f32.xlu0 %v1023_v23  ;;  %v269_v35 = vmul.f32 1.442695, %v224_v12  ;;  %v1025_v48 = vpop.eup %1024 }
  0xab   :  { %v1541_v31 = vpop.xlane.xlu1 %177  ;;  %313 = vadd.xlane.f32.xlu1 %v1021_v20  ;;  %v1543_v32 = vpop.xlane.xlu0 %175 }
  0xac   :  { %2230 = vst [vmem:[#allocation19_spill] sm:$0xff] %v1541_v31  ;;  %2231 = vst [vmem:[#allocation20_spill] sm:$0xff] %v1543_v32  ;;  %v226_v36 = vsub.f32 %v1292_v33, %v1541_v31  ;;  %v225_v39 = vsub.f32 %v1296_v34, %v1543_v32  ;;  %1038 = vpow2.f32 %v267_v24  ;;  %v1613_v31 = vld [vmem:[%s2160_s2 + $0x8] sm:$0xff] }
  0xad   :  { %v1027_v51 = vpop.eup %1026  ;;  %1040 = vpow2.f32 %v269_v35  ;;  %2240 = vst [vmem:[#allocation29_spill] sm:$0xff] %v1613_v31  ;;  %v890_v6 = vsel %vm819_vm1, %v1613_v31, 0.0 }
  0xae   :  { %v271_v52 = vmul.f32 1.442695, %v225_v39  ;;  %319 = vadd.xlane.f32.xlu0 %v1027_v51  ;;  %v273_v60 = vmul.f32 1.442695, %v226_v36  ;;  %v1029_v12 = vpop.eup %1028 }
  0xaf   :  { %317 = vadd.xlane.f32.xlu1 %v1025_v48  ;;  %v1549_v59 = vpop.xlane.xlu0 %179  ;;  %v1551_v63 = vpop.xlane.xlu1 %181 }
  0xb0   :  { %2232 = vst [vmem:[#allocation21_spill] sm:$0xff] %v1549_v59  ;;  %2233 = vst [vmem:[#allocation22_spill] sm:$0xff] %v1551_v63  ;;  %v227_v11 = vsub.f32 %v1312_v38, %v1549_v59  ;;  %1042 = vpow2.f32 %v271_v52  ;;  %v228_v19 = vsub.f32 %v1308_v37, %v1551_v63  ;;  %v76_v59 = vld [vmem:[%s2159_s1 + $0xe0] sm:$0xff] }
  0xb1   :  { %v1031_v20 = vpop.eup %1030  ;;  %1044 = vpow2.f32 %v273_v60 }
  0xb2   :  { %v275_v23 = vmul.f32 1.442695, %v227_v11  ;;  %323 = vadd.xlane.f32.xlu0 %v1031_v20  ;;  %v1033_v24 = vpop.eup %1032  ;;  %v277_v39 = vmul.f32 1.442695, %v228_v19 }
  0xb3   :  { %321 = vadd.xlane.f32.xlu1 %v1029_v12  ;;  %v1557_v51 = vpop.xlane.xlu1 %185 }
  0xb4   :  { %1046 = vpow2.f32 %v275_v23 }
  0xb5   :  { %v1035_v35 = vpop.eup %1034  ;;  %1048 = vpow2.f32 %v277_v39  ;;  %v68_v39 = vld [vmem:[%s2159_s1 + $0xa0] sm:$0xff] }
  0xb6   :  { %327 = vadd.xlane.f32.xlu0 %v1035_v35  ;;  %v1037_v36 = vpop.eup %1036 }
  0xb7   :  { %325 = vadd.xlane.f32.xlu1 %v1033_v24  ;;  %v1559_v11 = vpop.xlane.xlu1 %189 }
  0xb9   :  { %v1039_v48 = vpop.eup %1038 }
  0xba   :  { %331 = vadd.xlane.f32.xlu0 %v1039_v48  ;;  %v1041_v52 = vpop.eup %1040  ;;  %v69_v48 = vld [vmem:[%s2159_s1 + $0xa8] sm:$0xff] }
  0xbb   :  { %329 = vadd.xlane.f32.xlu1 %v1037_v36  ;;  %v1561_v20 = vpop.xlane.xlu1 %193  ;;  %v70_v36 = vld [vmem:[%s2159_s1 + $0xb0] sm:$0xff] }
  0xbd   :  { %v1043_v63 = vpop.eup %1042 }
  0xbe   :  { %335 = vadd.xlane.f32.xlu0 %v1043_v63  ;;  %v1045_v60 = vpop.eup %1044  ;;  %v67_v63 = vld [vmem:[%s2159_s1 + $0x98] sm:$0xff] }
  0xbf   :  { %333 = vadd.xlane.f32.xlu1 %v1041_v52  ;;  %v1563_v23 = vpop.xlane.xlu1 %197  ;;  %v1581_v52 = vpop.xlane.xlu0 %183 }
  0xc0   :  { %2234 = vst [vmem:[#allocation23_spill] sm:$0xff] %v1563_v23  ;;  %2237 = vst [vmem:[#allocation26_spill] sm:$0xff] %v1581_v52 }
  0xc1   :  { %v1047_v12 = vpop.eup %1046 }
  0xc2   :  { %339 = vadd.xlane.f32.xlu0 %v1047_v12  ;;  %v1049_v19 = vpop.eup %1048 }
  0xc3   :  { %337 = vadd.xlane.f32.xlu1 %v1045_v60  ;;  %v1565_v24 = vpop.xlane.xlu1 %201  ;;  %v72_v60 = vld [vmem:[%s2159_s1 + $0xc0] sm:$0xff] }
  0xc4   :  { %2235 = vst [vmem:[#allocation24_spill] sm:$0xff] %v1565_v24 }
  0xc7   :  { %341 = vadd.xlane.f32.xlu1 %v1049_v19  ;;  %v1573_v35 = vpop.xlane.xlu1 %205  ;;  %v71_v19 = vld [vmem:[%s2159_s1 + $0xb8] sm:$0xff] }
  0xc8   :  { %2236 = vst [vmem:[#allocation25_spill] sm:$0xff] %v1573_v35 }
  0xcb   :  { %v1586_v12 = vpop.xlane.xlu1 %209 }
  0xcc   :  { %2238 = vst [vmem:[#allocation27_spill] sm:$0xff] %v1586_v12 }
  0xd8   :  { %528 = vperm.xlu1 %1013, %v68_v39   ;;  %525 = vperm.xlu0 %1012, %v67_v63   ;;  %v74_v39 = vld [vmem:[%s2159_s1 + $0xd0] sm:$0xff]  ;;  %v73_v63 = vld [vmem:[%s2159_s1 + $0xc8] sm:$0xff] }
  0xdc   :  { %534 = vperm.xlu1 %1013, %v70_v36   ;;  %531 = vperm.xlu0 %1012, %v69_v48   ;;  %v1597_v36 = vpop.xlane.xlu0 %187  ;;  %v472_v48 = vpop.permute.xlu1 %471 }
  0xdd   :  { %vm564_vm2 = vcmp.eq.s32.totalorder %v1172_v3, %v472_v48 }
  0xe0   :  { %540 = vperm.xlu1 %1013, %v72_v60   ;;  %537 = vperm.xlu0 %1012, %v71_v19   ;;  %v75_v60 = vld [vmem:[%s2159_s1 + $0xd8] sm:$0xff]  ;;  %v1608_v19 = vld [vmem:[%s2160_s2] sm:$0xff]  ;;  %v475_v32 = vpop.permute.xlu1 %474 }
  0xe1   :  { %2239 = vst [vmem:[#allocation28_spill] sm:$0xff] %v1608_v19  ;;  %v889_v5 = vsel %vm819_vm1, %v1608_v19, 0.0  ;;  %v1667_v19 = vld [vmem:[%s2160_s2 + $0x30] sm:$0xff]  ;;  %vm565_vm4 = vcmp.eq.s32.totalorder %v1172_v3, %v475_v32 }
  0xe2   :  { %v891_v47 = vadd.f32 %v890_v6, %v889_v5  ;;  %v1649_v5 = vld [vmem:[%s2160_s2 + $0x20] sm:$0xff]  ;;  %2248 = vst [vmem:[#allocation37_spill] sm:$0xff] %v1667_v19 }
  0xe3   :  { %2244 = vst [vmem:[#allocation33_spill] sm:$0xff] %v1649_v5  ;;  %v896_v4 = vsel %vm819_vm1, %v1649_v5, 0.0  ;;  %v1674_v5 = vld [vmem:[%s2160_s2 + $0x38] sm:$0xff] }
  0xe4   :  { %546 = vperm.xlu1 %1013, %v74_v39   ;;  %543 = vperm.xlu0 %1012, %v73_v63   ;;  %v1615_v39 = vpop.xlane.xlu0 %191  ;;  %v78_v63 = vld [vmem:[%s2159_s1 + $0xf0] sm:$0xff]  ;;  %v478_v15 = vpop.permute.xlu1 %477  ;;  %2249 = vst [vmem:[#allocation38_spill] sm:$0xff] %v1674_v5 }
  0xe5   :  { %vm566_vm5 = vcmp.eq.s32.totalorder %v1172_v3, %v478_v15 }
  0xe8   :  { %552 = vperm.xlu1 %1013, %v76_v59   ;;  %549 = vperm.xlu0 %1012, %v75_v60   ;;  %v77_v59 = vld [vmem:[%s2159_s1 + $0xe8] sm:$0xff]  ;;  %v1630_v60 = vld [vmem:[%s2160_s2 + $0x10] sm:$0xff]  ;;  %v1635_v27 = vpop.xlane.xlu0 %195  ;;  %v481_v0 = vpop.permute.xlu1 %480 }
  0xe9   :  { %2241 = vst [vmem:[#allocation30_spill] sm:$0xff] %v1630_v60  ;;  %2242 = vst [vmem:[#allocation31_spill] sm:$0xff] %v1635_v27  ;;  %v892_v28 = vsel %vm819_vm1, %v1630_v60, 0.0  ;;  %vm567_vm6 = vcmp.eq.s32.totalorder %v1172_v3, %v481_v0 }
  0xea   :  { %v893_v16 = vadd.f32 %v892_v28, %v891_v47 }
  0xec   :  { %558 = vperm.xlu1 %1013, %v78_v63   ;;  %555 = vperm.xlu0 %1012, %v77_v59   ;;  %v1642_v63 = vld [vmem:[%s2160_s2 + $0x18] sm:$0xff]  ;;  %v1651_v6 = vpop.xlane.xlu0 %199  ;;  %v484_v55 = vpop.permute.xlu1 %483 }
  0xed   :  { %2243 = vst [vmem:[#allocation32_spill] sm:$0xff] %v1642_v63  ;;  %v894_v59 = vsel %vm819_vm1, %v1642_v63, 0.0  ;;  %2245 = vst [vmem:[#allocation34_spill] sm:$0xff] %v1651_v6  ;;  %vm568_vm7 = vcmp.eq.s32.totalorder %v1172_v3, %v484_v55 }
  0xee   :  { %v895_v60 = vadd.f32 %v894_v59, %v893_v16  ;;  %v900_v59 = vsel %vm819_vm1, %v1667_v19, 0.0  ;;  %v904_v19 = vsel %vm819_vm1, %v1683_v43, 0.0 }
  0xf0   :  { %561 = vperm.xlu0 %1012, %v79_v40   ;;  %v1658_v40 = vld [vmem:[%s2160_s2 + $0x28] sm:$0xff]  ;;  %v897_v28 = vadd.f32 %v896_v4, %v895_v60  ;;  %v1660_v47 = vpop.xlane.xlu0 %203  ;;  %v487_v60 = vpop.permute.xlu1 %486 }
  0xf1   :  { %2246 = vst [vmem:[#allocation35_spill] sm:$0xff] %v1658_v40  ;;  %2247 = vst [vmem:[#allocation36_spill] sm:$0xff] %v1660_v47  ;;  %v898_v63 = vsel %vm819_vm1, %v1658_v40, 0.0  ;;  %v902_v40 = vsel %vm819_vm1, %v1674_v5, 0.0  ;;  %vm569_vm8 = vcmp.eq.s32.totalorder %v1172_v3, %v487_v60 }
  0xf2   :  { %v899_v16 = vadd.f32 %v898_v63, %v897_v28 }
  0xf4   :  { %v1676_v4 = vpop.xlane.xlu0 %207  ;;  %v901_v31 = vadd.f32 %v900_v59, %v899_v16  ;;  %v490_v44 = vpop.permute.xlu1 %489  ;;  %v1692_v16 = vld [vmem:[%s2160_s2 + $0x48] sm:$0xff]  ;;  %v229_v59 = vsub.f32 %v1328_v42, %v1581_v52 }
  0xf5   :  { %2250 = vst [vmem:[#allocation39_spill] sm:$0xff] %v1676_v4  ;;  %2252 = vst [vmem:[#allocation41_spill] sm:$0xff] %v1692_v16  ;;  %v906_v48 = vsel %vm819_vm1, %v1692_v16, 0.0  ;;  %v2253_v16 = vmov 0.0   ;;  %vm570_vm9 = vcmp.eq.s32.totalorder %v1172_v3, %v490_v44 }
  0xf6   :  { %v903_v63 = vadd.f32 %v902_v40, %v901_v31  ;;  %v979_v40 = vsel %vm564_vm2, 1.0, %v2191_v56  ;;  %v980_v37 = vsel %vm565_vm4, 1.0, %v2253_v16  ;;  %v981_v32 = vsel %vm566_vm5, 1.0, %v2253_v16 }
  0xf7   :  { %v660_v43 = vmul.f32 %v979_v40, %v1200_v10  ;;  %v1720_v10 = vld [vmem:[%s2160_s2 + $0x58] sm:$0xff]  ;;  %v982_v0 = vsel %vm567_vm6, 1.0, %v2253_v16  ;;  %v984_v44 = vsel %vm569_vm8, 1.0, %v2253_v16 }
  0xf8   :  { %v469_v28 = vpop.permute.xlu0 %468  ;;  %v905_v5 = vadd.f32 %v904_v19, %v903_v63  ;;  %v230_v19 = vsub.f32 %v1324_v41, %v1557_v51  ;;  %v279_v63 = vmul.f32 1.442695, %v229_v59  ;;  %v493_v52 = vpop.permute.xlu1 %492  ;;  %v661_v59 = vmul.f32 %v980_v37, %v1186_v7  ;;  %v1735_v7 = vld [vmem:[%s2160_s2 + $0x60] sm:$0xff] }
  0xf9   :  { %vm563_vm3 = vcmp.eq.s32.totalorder %v1172_v3, %v469_v28  ;;  %v1705_v28 = vld [vmem:[%s2160_s2 + $0x50] sm:$0xff]  ;;  %v910_v55 = vsel %vm819_vm1, %v1720_v10, 0.0  ;;  %vm571_vm10 = vcmp.eq.s32.totalorder %v1172_v3, %v493_v52 }
  0xfa   :  { %v978_v31 = vsel %vm563_vm3, 1.0, %v2191_v56  ;;  %v907_v42 = vadd.f32 %v906_v48, %v905_v5  ;;  %v908_v15 = vsel %vm819_vm1, %v1705_v28, 0.0  ;;  %v231_v5 = vsub.f32 %v1344_v46, %v1597_v36 }
  0xfb   :  { %v659_v56 = vmul.f32 %v978_v31, %v1190_v8  ;;  %v281_v8 = vmul.f32 1.442695, %v230_v19  ;;  %1050 = vpow2.f32 %v279_v63  ;;  %v662_v31 = vmul.f32 %v981_v32, %v1196_v9 }
  0xfc   :  { %v496_v38 = vpop.permute.xlu0 %495  ;;  %v909_v40 = vadd.f32 %v908_v15, %v907_v42  ;;  %v232_v9 = vsub.f32 %v1340_v45, %v1559_v11  ;;  %v283_v37 = vmul.f32 1.442695, %v231_v5  ;;  %v663_v48 = vmul.f32 %v982_v0, %v1216_v14  ;;  %v1749_v15 = vld [vmem:[%s2160_s2 + $0x68] sm:$0xff] }
  0xfd   :  { %1052 = vpow2.f32 %v281_v8  ;;  %v985_v63 = vsel %vm570_vm9, 1.0, %v2253_v16  ;;  %v912_v32 = vsel %vm819_vm1, %v1735_v7, 0.0  ;;  %v665_v5 = vmul.f32 %v984_v44, %v1232_v18 }
  0xfe   :  { %v911_v19 = vadd.f32 %v910_v55, %v909_v40  ;;  %v285_v14 = vmul.f32 1.442695, %v232_v9  ;;  %1054 = vpow2.f32 %v283_v37  ;;  %v986_v52 = vsel %vm571_vm10, 1.0, %v2253_v16 }
  0xff   :  { %v914_v40 = vsel %vm819_vm1, %v1749_v15, 0.0  ;;  %vm572_vm11 = vcmp.eq.s32.totalorder %v1172_v3, %v496_v38  ;;  %v667_v55 = vmul.f32 %v986_v52, %v1248_v22 }
 0x100   :  { %v502_v42 = vpop.permute.xlu0 %501  ;;  %1056 = vpow2.f32 %v285_v14  ;;  %v987_v38 = vsel %vm572_vm11, 1.0, %v2253_v16 }
 0x101   :  { %v668_v14 = vmul.f32 %v987_v38, %v1244_v21  ;;  %vm574_vm13 = vcmp.eq.s32.totalorder %v1172_v3, %v502_v42 }
 0x102   :  { %v989_v42 = vsel %vm574_vm13, 1.0, %v2253_v16 }
 0x104   :  { %v1759_v0 = vpop.permute.xlu0 %507 }
 0x105   :  { %vm576_vm15 = vcmp.eq.s32.totalorder %v1172_v3, %v1759_v0 }
 0x108   :  { %v1051_v37 = vpop.eup %1050 }
 0x10a   :  { %v1053_v22 = vpop.eup %1052 }
 0x10f   :  { %693 = vadd.xlane.f32.xlu0 %v660_v43  ;;  %v983_v43 = vsel %vm568_vm7, 1.0, %v2253_v16 }
 0x110   :  { %691 = vadd.xlane.f32.xlu1 %v659_v56  ;;  %v499_v56 = vpop.permute.xlu1 %498  ;;  %v664_v60 = vmul.f32 %v983_v43, %v1212_v13  ;;  %v233_v13 = vsub.f32 %v1360_v50, %v1615_v39  ;;  %v1764_v43 = vld [vmem:[%s2160_s2 + $0x70] sm:$0xff] }
 0x111   :  { %vm573_vm12 = vcmp.eq.s32.totalorder %v1172_v3, %v499_v56 }
 0x112   :  { %v287_v18 = vmul.f32 1.442695, %v233_v13  ;;  %v988_v13 = vsel %vm573_vm12, 1.0, %v2253_v16 }
 0x113   :  { %695 = vadd.xlane.f32.xlu0 %v661_v59  ;;  %v666_v59 = vmul.f32 %v985_v63, %v1228_v17  ;;  %v234_v17 = vsub.f32 %v1356_v49, %v1561_v20  ;;  %v235_v63 = vsub.f32 %v1376_v54, %v1635_v27 }
 0x114   :  { %697 = vadd.xlane.f32.xlu1 %v662_v31  ;;  %v505_v8 = vpop.permute.xlu1 %504  ;;  %v913_v31 = vadd.f32 %v912_v32, %v911_v19  ;;  %v1778_v19 = vld [vmem:[%s2160_s2 + $0x78] sm:$0xff]  ;;  %1058 = vpow2.f32 %v287_v18  ;;  %v1782_v32 = vpop.permute.xlu0 %513 }
 0x115   :  { %v289_v44 = vmul.f32 1.442695, %v234_v17  ;;  %v291_v21 = vmul.f32 1.442695, %v235_v63  ;;  %v1055_v18 = vpop.eup %1054  ;;  %vm575_vm14 = vcmp.eq.s32.totalorder %v1172_v3, %v505_v8  ;;  %vm578_vm2 = vcmp.eq.s32.totalorder %v1172_v3, %v1782_v32 }
 0x116   :  { %v915_v9 = vadd.f32 %v914_v40, %v913_v31  ;;  %v236_v31 = vsub.f32 %v1372_v53, %v1563_v23  ;;  %v669_v40 = vmul.f32 %v988_v13, %v1264_v26  ;;  %v237_v26 = vsub.f32 %v1392_v58, %v1651_v6 }
 0x117   :  { %699 = vadd.xlane.f32.xlu0 %v663_v48  ;;  %v916_v48 = vsel %vm819_vm1, %v1764_v43, 0.0  ;;  %1060 = vpow2.f32 %v289_v44  ;;  %v990_v63 = vsel %vm575_vm14, 1.0, %v2253_v16  ;;  %v238_v13 = vsub.f32 %v1388_v57, %v1565_v24 }
 0x118   :  { %701 = vadd.xlane.f32.xlu1 %v664_v60  ;;  %v1773_v60 = vpop.permute.xlu1 %510  ;;  %v917_v56 = vadd.f32 %v916_v48, %v915_v9  ;;  %v1802_v9 = vpop.permute.xlu0 %519  ;;  %v293_v38 = vmul.f32 1.442695, %v236_v31  ;;  %1062 = vpow2.f32 %v291_v21  ;;  %v670_v48 = vmul.f32 %v989_v42, %v1260_v25  ;;  %v1825_v25 = vld [vmem:[%s2160_s2 + $0x90] sm:$0xff] }
 0x119   :  { %v671_v31 = vmul.f32 %v990_v63, %v1280_v30  ;;  %vm577_vm0 = vcmp.eq.s32.totalorder %v1172_v3, %v1773_v60  ;;  %v1842_v30 = vld [vmem:[%s2160_s2 + $0x98] sm:$0xff]  ;;  %vm580_vm4 = vcmp.eq.s32.totalorder %v1172_v3, %v1802_v9 }
 0x11a   :  { %1064 = vpow2.f32 %v293_v38  ;;  %v239_v38 = vsub.f32 %v1408_v62, %v1660_v47 }
 0x11b   :  { %703 = vadd.xlane.f32.xlu0 %v665_v5  ;;  %v918_v5 = vsel %vm819_vm1, %v1778_v19, 0.0 }
 0x11c   :  { %705 = vadd.xlane.f32.xlu1 %v666_v59  ;;  %v1792_v59 = vld [vmem:[%s2160_s2 + $0x80] sm:$0xff]  ;;  %v1796_v52 = vpop.permute.xlu1 %516  ;;  %v919_v17 = vadd.f32 %v918_v5, %v917_v56  ;;  %v295_v5 = vmul.f32 1.442695, %v237_v26 }
 0x11d   :  { %vm579_vm3 = vcmp.eq.s32.totalorder %v1172_v3, %v1796_v52 }
 0x11e   :  { %1066 = vpow2.f32 %v295_v5  ;;  %v299_v5 = vmul.f32 1.442695, %v239_v38  ;;  %v241_v38 = vsub.f32 %v1424_v2, %v1676_v4 }
 0x11f   :  { %707 = vadd.xlane.f32.xlu0 %v667_v55  ;;  %v920_v55 = vsel %vm819_vm1, %v1792_v59, 0.0 }
 0x120   :  { %343 = vadd.xlane.f32.xlu1 %v1051_v37  ;;  %v1808_v37 = vld [vmem:[%s2160_s2 + $0x88] sm:$0xff]  ;;  %v921_v44 = vadd.f32 %v920_v55, %v919_v17  ;;  %v924_v17 = vsel %vm819_vm1, %v1825_v25, 0.0  ;;  %v297_v55 = vmul.f32 1.442695, %v238_v13  ;;  %v240_v13 = vsub.f32 %v1404_v61, %v1573_v35 }
 0x121   :  { %v922_v8 = vsel %vm819_vm1, %v1808_v37, 0.0 }
 0x122   :  { %v923_v21 = vadd.f32 %v922_v8, %v921_v44  ;;  %v992_v44 = vsel %vm577_vm0, 1.0, %v2253_v16  ;;  %1068 = vpow2.f32 %v297_v55  ;;  %v301_v55 = vmul.f32 1.442695, %v240_v13 }
 0x123   :  { %709 = vadd.xlane.f32.xlu0 %v668_v14  ;;  %v1818_v14 = vpop.permute.xlu1 %522  ;;  %1070 = vpow2.f32 %v299_v5  ;;  %v242_v5 = vsub.f32 %v1420_v1, %v1586_v12 }
 0x124   :  { %345 = vadd.xlane.f32.xlu1 %v1053_v22  ;;  %v1057_v22 = vpop.eup %1056  ;;  %1072 = vpow2.f32 %v301_v55  ;;  %vm581_vm5 = vcmp.eq.s32.totalorder %v1172_v3, %v1818_v14 }
 0x125   :  { %v1059_v0 = vpop.eup %1058  ;;  %v996_v47 = vsel %vm581_vm5, 1.0, %v2253_v16 }
 0x126   :  { %v1061_v60 = vpop.eup %1060 }
 0x127   :  { %711 = vadd.xlane.f32.xlu0 %v669_v40  ;;  %v991_v40 = vsel %vm576_vm15, 1.0, %v2253_v16  ;;  %v1063_v32 = vpop.eup %1062 }
 0x128   :  { %347 = vadd.xlane.f32.xlu1 %v1055_v18  ;;  %v672_v26 = vmul.f32 %v991_v40, %v1276_v29  ;;  %v1859_v29 = vld [vmem:[%s2160_s2 + $0xa0] sm:$0xff]  ;;  %v1065_v52 = vpop.eup %1064 }
 0x129   :  { %v928_v40 = vsel %vm819_vm1, %v1859_v29, 0.0 }
 0x12b   :  { %713 = vadd.xlane.f32.xlu0 %v670_v48  ;;  %v1820_v56 = vpop.xlane.xlu0 %307  ;;  %v925_v48 = vadd.f32 %v924_v17, %v923_v21  ;;  %v1067_v9 = vpop.eup %1066 }
 0x12c   :  { %349 = vadd.xlane.f32.xlu1 %v1057_v22  ;;  %v926_v22 = vsel %vm819_vm1, %v1842_v30, 0.0 }
 0x12d   :  { %v927_v21 = vadd.f32 %v926_v22, %v925_v48 }
 0x12f   :  { %715 = vadd.xlane.f32.xlu0 %v671_v31  ;;  %v1835_v18 = vpop.xlane.xlu0 %311  ;;  %v673_v31 = vmul.f32 %v992_v44, %v1296_v34  ;;  %v1876_v34 = vld [vmem:[%s2160_s2 + $0xa8] sm:$0xff]  ;;  %v994_v44 = vsel %vm579_vm3, 1.0, %v2253_v16  ;;  %v1069_v12 = vpop.eup %1068 }
 0x130   :  { %v1837_v42 = vpop.xlane.xlu1 %309  ;;  %351 = vadd.xlane.f32.xlu1 %v1059_v0  ;;  %v993_v0 = vsel %vm578_vm2, 1.0, %v2253_v16  ;;  %v930_v22 = vsel %vm819_vm1, %v1876_v34, 0.0 }
 0x131   :  { %v674_v48 = vmul.f32 %v993_v0, %v1292_v33  ;;  %v1893_v33 = vld [vmem:[%s2160_s2 + $0xb0] sm:$0xff] }
 0x132   :  { %2254 = vst [vmem:[#allocation42_spill] sm:$0xff] %v1893_v33  ;;  %v932_v4 = vsel %vm819_vm1, %v1893_v33, 0.0 }
 0x133   :  { %717 = vadd.xlane.f32.xlu0 %v672_v26  ;;  %v1852_v63 = vpop.xlane.xlu0 %315 }
 0x134   :  { %v1854_v8 = vpop.xlane.xlu1 %313  ;;  %353 = vadd.xlane.f32.xlu1 %v1061_v60  ;;  %v929_v60 = vadd.f32 %v928_v40, %v927_v21  ;;  %v303_v21 = vmul.f32 1.442695, %v241_v38  ;;  %v1910_v38 = vld [vmem:[%s2160_s2 + $0xb8] sm:$0xff] }
 0x135   :  { %v934_v14 = vsel %vm819_vm1, %v1910_v38, 0.0 }
 0x136   :  { %v931_v40 = vadd.f32 %v930_v22, %v929_v60  ;;  %v305_v60 = vmul.f32 1.442695, %v242_v5  ;;  %1074 = vpow2.f32 %v303_v21  ;;  %v1923_v5 = vld [vmem:[%s2160_s2 + $0xc0] sm:$0xff]  ;;  %v2259_v21 = vld [vmem:[#allocation4_spill] sm:$0xff] }
 0x137   :  { %719 = vadd.xlane.f32.xlu0 %v673_v31  ;;  %v1869_v17 = vpop.xlane.xlu0 %319 }
 0x138   :  { %v1871_v26 = vpop.xlane.xlu1 %317  ;;  %355 = vadd.xlane.f32.xlu1 %v1063_v32  ;;  %v2255_v32 = vld [vmem:[#allocation3_spill] sm:$0xff]  ;;  %1076 = vpow2.f32 %v305_v60 }
 0x139   :  { %v675_v0 = vmul.f32 %v994_v44, %v2255_v32  ;;  %2256 = vst [vmem:[#allocation3_spill] sm:$0xff] %v1910_v38  ;;  %v2257_v44 = vld [vmem:[#allocation2_spill] sm:$0xff]  ;;  %v933_v32 = vadd.f32 %v932_v4, %v931_v40  ;;  %v677_v4 = vmul.f32 %v996_v47, %v2259_v21  ;;  %v1974_v38 = vld [vmem:[%s2160_s2 + $0xe8] sm:$0xff]  ;;  %1078 = vlog2.f32 %v1820_v56 }
 0x13a   :  { %2258 = vst [vmem:[#allocation2_spill] sm:$0xff] %v1923_v5  ;;  %2264 = vst [vmem:[#allocation46_spill] sm:$0xff] %v1974_v38  ;;  %1080 = vlog2.f32 %v1837_v42 }
 0x13b   :  { %721 = vadd.xlane.f32.xlu0 %v674_v48  ;;  %v1886_v31 = vpop.xlane.xlu0 %323  ;;  %v995_v48 = vsel %vm580_vm4, 1.0, %v2253_v16  ;;  %v935_v40 = vadd.f32 %v934_v14, %v933_v32  ;;  %v1944_v14 = vld [vmem:[%s2160_s2 + $0xd0] sm:$0xff]  ;;  %1082 = vlog2.f32 %v1835_v18 }
 0x13c   :  { %v1888_v13 = vpop.xlane.xlu1 %321  ;;  %357 = vadd.xlane.f32.xlu1 %v1065_v52  ;;  %v676_v22 = vmul.f32 %v995_v48, %v2257_v44  ;;  %v1071_v48 = vpop.eup %1070  ;;  %v936_v44 = vsel %vm819_vm1, %v1923_v5, 0.0  ;;  %2261 = vst [vmem:[#allocation43_spill] sm:$0xff] %v1944_v14  ;;  %1084 = vlog2.f32 %v1854_v8 }
 0x13d   :  { %v1073_v35 = vpop.eup %1072  ;;  %v937_v60 = vadd.f32 %v936_v44, %v935_v40  ;;  %v1955_v40 = vld [vmem:[%s2160_s2 + $0xd8] sm:$0xff]  ;;  %1086 = vlog2.f32 %v1852_v63  ;;  %v2265_v63 = vld [vmem:[#allocation8_spill] sm:$0xff] }
 0x13e   :  { %2262 = vst [vmem:[#allocation44_spill] sm:$0xff] %v1955_v40  ;;  %1088 = vlog2.f32 %v1871_v26  ;;  %v2266_v26 = vld [vmem:[#allocation6_spill] sm:$0xff] }
 0x13f   :  { %723 = vadd.xlane.f32.xlu0 %v675_v0  ;;  %v1903_v52 = vpop.xlane.xlu0 %327  ;;  %1090 = vlog2.f32 %v1869_v17 }
 0x140   :  { %v1905_v55 = vpop.xlane.xlu1 %325  ;;  %359 = vadd.xlane.f32.xlu1 %v1067_v9  ;;  %1092 = vlog2.f32 %v1888_v13 }
 0x141   :  { %1094 = vlog2.f32 %v1886_v31 }
 0x142   :  { %1096 = vlog2.f32 %v1905_v55 }
 0x143   :  { %725 = vadd.xlane.f32.xlu0 %v676_v22  ;;  %v1916_v0 = vpop.xlane.xlu0 %331  ;;  %1098 = vlog2.f32 %v1903_v52 }
 0x144   :  { %v1918_v9 = vpop.xlane.xlu1 %329  ;;  %361 = vadd.xlane.f32.xlu1 %v1069_v12  ;;  %v1933_v12 = vld [vmem:[%s2160_s2 + $0xc8] sm:$0xff] }
 0x145   :  { %2260 = vst [vmem:[#allocation4_spill] sm:$0xff] %v1933_v12  ;;  %v938_v47 = vsel %vm819_vm1, %v1933_v12, 0.0  ;;  %v942_v12 = vsel %vm819_vm1, %v1955_v40, 0.0  ;;  %1100 = vlog2.f32 %v1918_v9 }
 0x146   :  { %v939_v21 = vadd.f32 %v938_v47, %v937_v60  ;;  %1102 = vlog2.f32 %v1916_v0 }
 0x147   :  { %727 = vadd.xlane.f32.xlu0 %v677_v4  ;;  %v1935_v6 = vpop.xlane.xlu0 %335  ;;  %v1075_v4 = vpop.eup %1074 }
 0x148   :  { %v1928_v22 = vpop.xlane.xlu1 %333  ;;  %363 = vadd.xlane.f32.xlu1 %v1071_v48  ;;  %v940_v48 = vsel %vm819_vm1, %v1944_v14, 0.0  ;;  %v1077_v44 = vpop.eup %1076  ;;  %v1962_v14 = vld [vmem:[%s2160_s2 + $0xe0] sm:$0xff] }
 0x149   :  { %2263 = vst [vmem:[#allocation45_spill] sm:$0xff] %v1962_v14  ;;  %1104 = vlog2.f32 %v1928_v22 }
 0x14a   :  { %1106 = vlog2.f32 %v1935_v6 }
 0x14b   :  { %v1948_v5 = vpop.xlane.xlu0 %339 }
 0x14c   :  { %v1939_v32 = vpop.xlane.xlu1 %337  ;;  %365 = vadd.xlane.f32.xlu1 %v1073_v35  ;;  %v941_v35 = vadd.f32 %v940_v48, %v939_v21  ;;  %v944_v48 = vsel %vm819_vm1, %v1962_v14, 0.0  ;;  %v1984_v14 = vld [vmem:[%s2160_s2 + $0xf0] sm:$0xff] }
 0x14d   :  { %1108 = vlog2.f32 %v1939_v32 }
 0x14e   :  { %v943_v27 = vadd.f32 %v942_v12, %v941_v35 }
 0x150   :  { %v1950_v24 = vpop.xlane.xlu1 %341  ;;  %367 = vadd.xlane.f32.xlu1 %v1075_v4 }
 0x153   :  { %v526_v60 = vpop.permute.xlu0 %525 }
 0x154   :  { %v529_v47 = vpop.permute.xlu1 %528  ;;  %369 = vadd.xlane.f32.xlu1 %v1077_v44  ;;  %vm582_vm6 = vcmp.eq.s32.totalorder %v1172_v3, %v526_v60  ;;  %v945_v60 = vadd.f32 %v944_v48, %v943_v27  ;;  %v948_v48 = vsel %vm819_vm1, %v1984_v14, 0.0 }
 0x155   :  { %vm583_vm7 = vcmp.eq.s32.totalorder %v1172_v3, %v529_v47  ;;  %v997_v4 = vsel %vm582_vm6, 1.0, %v2253_v16 }
 0x156   :  { %v678_v21 = vmul.f32 %v997_v4, %v1324_v41  ;;  %v998_v40 = vsel %vm583_vm7, 1.0, %v2253_v16  ;;  %v946_v41 = vsel %vm819_vm1, %v1974_v38, 0.0 }
 0x157   :  { %v532_v44 = vpop.permute.xlu0 %531  ;;  %v679_v12 = vmul.f32 %v998_v40, %v1344_v46  ;;  %v947_v46 = vadd.f32 %v946_v41, %v945_v60 }
 0x158   :  { %v535_v33 = vpop.permute.xlu1 %534  ;;  %vm584_vm8 = vcmp.eq.s32.totalorder %v1172_v3, %v532_v44  ;;  %729 = vadd.xlane.f32.xlu0 %v678_v21 }
 0x159   :  { %v999_v35 = vsel %vm584_vm8, 1.0, %v2253_v16  ;;  %vm585_vm9 = vcmp.eq.s32.totalorder %v1172_v3, %v535_v33  ;;  %v1997_v33 = vld [vmem:[%s2160_s2 + $0xf8] sm:$0xff] }
 0x15a   :  { %v680_v40 = vmul.f32 %v999_v35, %v1340_v45  ;;  %v1000_v44 = vsel %vm585_vm9, 1.0, %v2253_v16  ;;  %v950_v41 = vsel %vm819_vm1, %v1997_v33, 0.0 }
 0x15b   :  { %v538_v47 = vpop.permute.xlu0 %537  ;;  %v681_v60 = vmul.f32 %v1000_v44, %v1360_v50 }
 0x15c   :  { %v541_v4 = vpop.permute.xlu1 %540  ;;  %vm586_vm10 = vcmp.eq.s32.totalorder %v1172_v3, %v538_v47  ;;  %731 = vadd.xlane.f32.xlu0 %v679_v12 }
 0x15d   :  { %v1001_v27 = vsel %vm586_vm10, 1.0, %v2253_v16  ;;  %vm587_vm11 = vcmp.eq.s32.totalorder %v1172_v3, %v541_v4 }
 0x15e   :  { %v682_v21 = vmul.f32 %v1001_v27, %v1356_v49  ;;  %v949_v49 = vadd.f32 %v948_v48, %v947_v46  ;;  %v1002_v35 = vsel %vm587_vm11, 1.0, %v2253_v16 }
 0x15f   :  { %v544_v38 = vpop.permute.xlu0 %543  ;;  %v683_v50 = vmul.f32 %v1002_v35, %v1376_v54 }
 0x160   :  { %v547_v23 = vpop.permute.xlu1 %546  ;;  %vm588_vm12 = vcmp.eq.s32.totalorder %v1172_v3, %v544_v38  ;;  %733 = vadd.xlane.f32.xlu0 %v680_v40  ;;  %737 = vadd.xlane.f32.xlu1 %v682_v21  ;;  %v951_v4 = vadd.f32 %v950_v41, %v949_v49 }
 0x161   :  { %v1003_v45 = vsel %vm588_vm12, 1.0, %v2253_v16  ;;  %vm589_vm13 = vcmp.eq.s32.totalorder %v1172_v3, %v547_v23 }
 0x162   :  { %v684_v12 = vmul.f32 %v1003_v45, %v1372_v53  ;;  %v1004_v46 = vsel %vm589_vm13, 1.0, %v2253_v16  ;;  %v952_v48 = vrot.slane %v951_v4, 4 }
 0x163   :  { %v550_v47 = vpop.permute.xlu0 %549  ;;  %v685_v44 = vmul.f32 %v1004_v46, %v1392_v58 }
 0x164   :  { %v553_v27 = vpop.permute.xlu1 %552  ;;  %vm590_vm14 = vcmp.eq.s32.totalorder %v1172_v3, %v550_v47  ;;  %735 = vadd.xlane.f32.xlu0 %v681_v60  ;;  %741 = vadd.xlane.f32.xlu1 %v684_v12  ;;  %v953_v60 = vadd.f32 %v952_v48, %v951_v4 }
 0x165   :  { %v1005_v38 = vsel %vm590_vm14, 1.0, %v2253_v16  ;;  %vm591_vm15 = vcmp.eq.s32.totalorder %v1172_v3, %v553_v27 }
 0x166   :  { %v686_v53 = vmul.f32 %v1005_v38, %v1388_v57  ;;  %v1006_v54 = vsel %vm591_vm15, 1.0, %v2253_v16 }
 0x167   :  { %v556_v40 = vpop.permute.xlu0 %555  ;;  %v687_v12 = vmul.f32 %v1006_v54, %v1408_v62  ;;  %v1079_v62 = vpop.eup %1078  ;;  %1110 = vlog2.f32 %v1948_v5 }
 0x168   :  { %vm592_vm0 = vcmp.eq.s32.totalorder %v1172_v3, %v556_v40  ;;  %739 = vadd.xlane.f32.xlu0 %v683_v50  ;;  %745 = vadd.xlane.f32.xlu1 %v686_v53  ;;  %v559_v21 = vpop.permute.xlu1 %558 }
 0x169   :  { %v1007_v23 = vsel %vm592_vm0, 1.0, %v2253_v16  ;;  %vm593_vm2 = vcmp.eq.s32.totalorder %v1172_v3, %v559_v21  ;;  %v2267_v21 = vld [vmem:[#allocation5_spill] sm:$0xff] }
 0x16a   :  { %v688_v45 = vmul.f32 %v1007_v23, %v1404_v61  ;;  %v1008_v58 = vsel %vm593_vm2, 1.0, %v2253_v16  ;;  %v954_v61 = vrot.slane %v953_v60, 2 }
 0x16b   :  { %v562_v57 = vpop.permute.xlu0 %561  ;;  %v689_v35 = vmul.f32 %v1008_v58, %v1424_v2 }
 0x16c   :  { %vm594_vm3 = vcmp.eq.s32.totalorder %v1172_v3, %v562_v57  ;;  %743 = vadd.xlane.f32.xlu0 %v685_v44  ;;  %749 = vadd.xlane.f32.xlu1 %v688_v45  ;;  %v955_v47 = vadd.f32 %v954_v61, %v953_v60  ;;  %v2268_v45 = vld [vmem:[#allocation29_spill] sm:$0xff]  ;;  %v2269_v57 = vld [vmem:[#allocation28_spill] sm:$0xff] }
 0x16d   :  { %v1009_v49 = vsel %vm594_vm3, 1.0, %v2253_v16  ;;  %v372_v16 = vmul.f32 0.6931472, %v1079_v62  ;;  %v2271_v62 = vld [vmem:[#allocation10_spill] sm:$0xff] }
 0x16e   :  { %v690_v41 = vmul.f32 %v1009_v49, %v1420_v1  ;;  %v956_v27 = vrot.slane %v955_v47, 1  ;;  %v1081_v1 = vpop.eup %1080  ;;  %v2270_v49 = vld [vmem:[#allocation7_spill] sm:$0xff]  ;;  %1112 = vlog2.f32 %v1950_v24 }
 0x16f   :  { %v1083_v2 = vpop.eup %1082  ;;  %v374_v38 = vmul.f32 0.6931472, %v1081_v1  ;;  %v435_v50 = vadd.f32 %v372_v16, %v2266_v26  ;;  %v2272_v16 = vld [vmem:[#allocation30_spill] sm:$0xff] }
 0x170   :  { %747 = vadd.xlane.f32.xlu0 %v687_v12  ;;  %753 = vadd.xlane.f32.xlu1 %v690_v41  ;;  %v957_v3 = vadd.f32 %v956_v27, %v955_v47  ;;  %v1085_v56 = vpop.eup %1084  ;;  %v376_v42 = vmul.f32 0.6931472, %v1083_v2 }
 0x171   :  { %v1087_v18 = vpop.eup %1086  ;;  %v378_v4 = vmul.f32 0.6931472, %v1085_v56  ;;  %v436_v8 = vadd.f32 %v374_v38, %v2265_v63  ;;  %v2273_v56 = vld [vmem:[#allocation32_spill] sm:$0xff] }
 0x172   :  { %v1089_v17 = vpop.eup %1088  ;;  %v380_v23 = vmul.f32 0.6931472, %v1087_v18  ;;  %v437_v31 = vadd.f32 %v376_v42, %v2267_v21  ;;  %v2274_v18 = vld [vmem:[#allocation9_spill] sm:$0xff] }
 0x173   :  { %v1091_v48 = vpop.eup %1090  ;;  %v382_v44 = vmul.f32 0.6931472, %v1089_v17  ;;  %v438_v60 = vadd.f32 %v378_v4, %v2270_v49  ;;  %v2276_v21 = vld [vmem:[#allocation33_spill] sm:$0xff] }
 0x174   :  { %751 = vadd.xlane.f32.xlu0 %v689_v35  ;;  %v1093_v12 = vpop.eup %1092  ;;  %v384_v52 = vmul.f32 0.6931472, %v1091_v48  ;;  %v439_v1 = vadd.f32 %v380_v23, %v2271_v62  ;;  %v2277_v48 = vld [vmem:[#allocation35_spill] sm:$0xff] }
 0x175   :  { %v386_v2 = vmul.f32 0.6931472, %v1093_v12  ;;  %v440_v4 = vadd.f32 %v382_v44, %v2274_v18  ;;  %v1095_v63 = vpop.eup %1094  ;;  %v2278_v44 = vld [vmem:[#allocation11_spill] sm:$0xff] }
 0x176   :  { %v388_v23 = vmul.f32 0.6931472, %v1095_v63 }
 0x181   :  { %966 = vperm.xlu1 %1013, %v957_v3  }
 0x198   :  { %v694_v53 = vpop.xlane.xlu0 %693 }
 0x199   :  { %v692_v46 = vpop.xlane.xlu1 %691  ;;  %v756_v13 = vsub.f32 %v436_v8, %v694_v53 }
 0x19a   :  { %v755_v40 = vsub.f32 %v435_v50, %v692_v46 }
 0x19b   :  { %v788_v54 = vmul.f32 %v756_v13, %v2268_v45  ;;  %v2275_v13 = vld [vmem:[#allocation12_spill] sm:$0xff] }
 0x19c   :  { %v787_v55 = vmul.f32 %v755_v40, %v2269_v57  ;;  %v696_v41 = vpop.xlane.xlu0 %695  ;;  %v441_v40 = vadd.f32 %v384_v52, %v2275_v13  ;;  %v1097_v57 = vpop.eup %1096 }
 0x19d   :  { %v698_v58 = vpop.xlane.xlu1 %697  ;;  %v821_v61 = vsel %vm819_vm1, %v788_v54, 0.0  ;;  %v757_v47 = vsub.f32 %v437_v31, %v696_v41  ;;  %v442_v54 = vadd.f32 %v386_v2, %v2278_v44 }
 0x19e   :  { %v820_v35 = vsel %vm819_vm1, %v787_v55, 0.0  ;;  %v758_v27 = vsub.f32 %v438_v60, %v698_v58 }
 0x19f   :  { %v822_v3 = vadd.f32 %v821_v61, %v820_v35  ;;  %v789_v38 = vmul.f32 %v757_v47, %v2272_v16  ;;  %v1099_v35 = vpop.eup %1098  ;;  %v390_v47 = vmul.f32 0.6931472, %v1097_v57 }
 0x1a0   :  { %v790_v42 = vmul.f32 %v758_v27, %v2273_v56  ;;  %v700_v8 = vpop.xlane.xlu0 %699  ;;  %v2279_v27 = vld [vmem:[#allocation37_spill] sm:$0xff]  ;;  %v1101_v22 = vpop.eup %1100 }
 0x1a1   :  { %v702_v26 = vpop.xlane.xlu1 %701  ;;  %v823_v50 = vsel %vm819_vm1, %v789_v38, 0.0  ;;  %v759_v53 = vsub.f32 %v439_v1, %v700_v8  ;;  %v2281_v1 = vld [vmem:[#allocation14_spill] sm:$0xff]  ;;  %v392_v8 = vmul.f32 0.6931472, %v1099_v35 }
 0x1a2   :  { %v825_v17 = vsel %vm819_vm1, %v790_v42, 0.0  ;;  %v760_v46 = vsub.f32 %v440_v4, %v702_v26  ;;  %v824_v9 = vadd.f32 %v823_v50, %v822_v3  ;;  %v2280_v3 = vld [vmem:[#allocation38_spill] sm:$0xff]  ;;  %v443_v2 = vadd.f32 %v388_v23, %v2281_v1  ;;  %v2282_v26 = vld [vmem:[#allocation40_spill] sm:$0xff] }
 0x1a3   :  { %v791_v31 = vmul.f32 %v759_v53, %v2276_v21 }
 0x1a4   :  { %v792_v45 = vmul.f32 %v760_v46, %v2277_v48  ;;  %v826_v55 = vadd.f32 %v825_v17, %v824_v9  ;;  %v704_v49 = vpop.xlane.xlu0 %703  ;;  %v2283_v17 = vld [vmem:[#allocation13_spill] sm:$0xff]  ;;  %v394_v48 = vmul.f32 0.6931472, %v1101_v22 }
 0x1a5   :  { %v706_v60 = vpop.xlane.xlu1 %705  ;;  %v827_v12 = vsel %vm819_vm1, %v791_v31, 0.0  ;;  %v761_v58 = vsub.f32 %v441_v40, %v704_v49  ;;  %v444_v53 = vadd.f32 %v390_v47, %v2283_v17  ;;  %v1103_v31 = vpop.eup %1102 }
 0x1a6   :  { %v829_v41 = vsel %vm819_vm1, %v792_v45, 0.0  ;;  %v762_v0 = vsub.f32 %v442_v54, %v706_v60  ;;  %v828_v61 = vadd.f32 %v827_v12, %v826_v55  ;;  %v2284_v45 = vld [vmem:[#allocation41_spill] sm:$0xff]  ;;  %v2285_v54 = vld [vmem:[#allocation16_spill] sm:$0xff] }
 0x1a7   :  { %v793_v52 = vmul.f32 %v761_v58, %v2279_v27  ;;  %v445_v6 = vadd.f32 %v392_v8, %v2285_v54  ;;  %v396_v58 = vmul.f32 0.6931472, %v1103_v31  ;;  %v2288_v8 = vld [vmem:[#allocation17_spill] sm:$0xff] }
 0x1a8   :  { %v794_v62 = vmul.f32 %v762_v0, %v2280_v3  ;;  %v830_v16 = vadd.f32 %v829_v41, %v828_v61  ;;  %v708_v38 = vpop.xlane.xlu0 %707  ;;  %v1105_v41 = vpop.eup %1104  ;;  %v2286_v61 = vld [vmem:[#allocation15_spill] sm:$0xff] }
 0x1a9   :  { %v2063_v56 = vpop.xlane.xlu1 %343  ;;  %v831_v42 = vsel %vm819_vm1, %v793_v52, 0.0  ;;  %v763_v4 = vsub.f32 %v443_v2, %v708_v38  ;;  %v446_v35 = vadd.f32 %v394_v48, %v2286_v61  ;;  %v2287_v2 = vld [vmem:[#allocation18_spill] sm:$0xff]  ;;  %v1107_v38 = vpop.eup %1106 }
 0x1aa   :  { %v833_v18 = vsel %vm819_vm1, %v794_v62, 0.0  ;;  %v832_v63 = vadd.f32 %v831_v42, %v830_v16  ;;  %v398_v62 = vmul.f32 0.6931472, %v1105_v41  ;;  %v447_v16 = vadd.f32 %v396_v58, %v2287_v2 }
 0x1ab   :  { %v795_v50 = vmul.f32 %v763_v4, %v2282_v26  ;;  %1114 = vlog2.f32 %v2063_v56 }
 0x1ac   :  { %v834_v46 = vadd.f32 %v833_v18, %v832_v63  ;;  %v710_v9 = vpop.xlane.xlu0 %709  ;;  %v400_v63 = vmul.f32 0.6931472, %v1107_v38  ;;  %v448_v26 = vadd.f32 %v398_v62, %v2288_v8  ;;  %v2292_v38 = vld [vmem:[#allocation22_spill] sm:$0xff] }
 0x1ad   :  { %v2070_v13 = vpop.xlane.xlu1 %345  ;;  %v835_v40 = vsel %vm819_vm1, %v795_v50, 0.0  ;;  %v764_v23 = vsub.f32 %v444_v53, %v710_v9  ;;  %v1109_v50 = vpop.eup %1108 }
 0x1ae   :  { %v836_v21 = vadd.f32 %v835_v40, %v834_v46  ;;  %v402_v9 = vmul.f32 0.6931472, %v1109_v50  ;;  %v1111_v31 = vpop.eup %1110  ;;  %1116 = vlog2.f32 %v2070_v13 }
 0x1af   :  { %v796_v44 = vmul.f32 %v764_v23, %v2284_v45  ;;  %v2289_v23 = vld [vmem:[#allocation20_spill] sm:$0xff] }
 0x1b0   :  { %v712_v57 = vpop.xlane.xlu0 %711 }
 0x1b1   :  { %v2076_v55 = vpop.xlane.xlu1 %347  ;;  %v837_v49 = vsel %vm819_vm1, %v796_v44, 0.0  ;;  %v765_v60 = vsub.f32 %v445_v6, %v712_v57  ;;  %v404_v6 = vmul.f32 0.6931472, %v1111_v31 }
 0x1b2   :  { %v838_v12 = vadd.f32 %v837_v49, %v836_v21  ;;  %v449_v21 = vadd.f32 %v400_v63, %v2289_v23  ;;  %v2290_v49 = vld [vmem:[#allocation19_spill] sm:$0xff]  ;;  %1118 = vlog2.f32 %v2076_v55  ;;  %v2293_v55 = vld [vmem:[#allocation26_spill] sm:$0xff] }
 0x1b3   :  { %v797_v0 = vmul.f32 %v765_v60, %v1705_v28  ;;  %v450_v60 = vadd.f32 %v402_v9, %v2290_v49 }
 0x1b4   :  { %v714_v32 = vpop.xlane.xlu0 %713 }
 0x1b5   :  { %v2082_v47 = vpop.xlane.xlu1 %349  ;;  %v839_v27 = vsel %vm819_vm1, %v797_v0, 0.0  ;;  %v766_v52 = vsub.f32 %v446_v35, %v714_v32 }
 0x1b6   :  { %v840_v3 = vadd.f32 %v839_v27, %v838_v12  ;;  %v1113_v12 = vpop.eup %1112  ;;  %v2291_v27 = vld [vmem:[#allocation21_spill] sm:$0xff]  ;;  %1120 = vlog2.f32 %v2082_v47 }
 0x1b7   :  { %v798_v1 = vmul.f32 %v766_v52, %v1720_v10  ;;  %v406_v35 = vmul.f32 0.6931472, %v1113_v12  ;;  %v451_v52 = vadd.f32 %v404_v6, %v2291_v27 }
 0x1b8   :  { %v716_v5 = vpop.xlane.xlu0 %715 }
 0x1b9   :  { %v352_v42 = vpop.xlane.xlu1 %351  ;;  %v841_v28 = vsel %vm819_vm1, %v798_v1, 0.0  ;;  %v767_v18 = vsub.f32 %v447_v16, %v716_v5  ;;  %v452_v5 = vadd.f32 %v406_v35, %v2292_v38 }
 0x1ba   :  { %v842_v4 = vadd.f32 %v841_v28, %v840_v3 }
 0x1bb   :  { %v799_v22 = vmul.f32 %v767_v18, %v1735_v7 }
 0x1bc   :  { %v718_v17 = vpop.xlane.xlu0 %717 }
 0x1bd   :  { %v354_v53 = vpop.xlane.xlu1 %353  ;;  %v843_v24 = vsel %vm819_vm1, %v799_v22, 0.0  ;;  %v768_v10 = vsub.f32 %v448_v26, %v718_v17 }
 0x1be   :  { %v844_v46 = vadd.f32 %v843_v24, %v842_v4  ;;  %1122 = vlog2.f32 %v354_v53 }
 0x1bf   :  { %v800_v40 = vmul.f32 %v768_v10, %v1749_v15  ;;  %1124 = vlog2.f32 %v352_v42 }
 0x1c0   :  { %v720_v48 = vpop.xlane.xlu0 %719 }
 0x1c1   :  { %v356_v45 = vpop.xlane.xlu1 %355  ;;  %v845_v44 = vsel %vm819_vm1, %v800_v40, 0.0  ;;  %v769_v7 = vsub.f32 %v449_v21, %v720_v48 }
 0x1c2   :  { %v846_v54 = vadd.f32 %v845_v44, %v844_v46 }
 0x1c3   :  { %v801_v57 = vmul.f32 %v769_v7, %v1764_v43 }
 0x1c4   :  { %v722_v41 = vpop.xlane.xlu0 %721 }
 0x1c5   :  { %v358_v58 = vpop.xlane.xlu1 %357  ;;  %v847_v0 = vsel %vm819_vm1, %v801_v57, 0.0  ;;  %v770_v15 = vsub.f32 %v450_v60, %v722_v41 }
 0x1c6   :  { %v848_v61 = vadd.f32 %v847_v0, %v846_v54  ;;  %1126 = vlog2.f32 %v358_v58 }
 0x1c7   :  { %v802_v32 = vmul.f32 %v770_v15, %v1778_v19  ;;  %1128 = vlog2.f32 %v356_v45 }
 0x1c8   :  { %v724_v3 = vpop.xlane.xlu0 %723 }
 0x1c9   :  { %v360_v62 = vpop.xlane.xlu1 %359  ;;  %v849_v1 = vsel %vm819_vm1, %v802_v32, 0.0  ;;  %v771_v2 = vsub.f32 %v451_v52, %v724_v3 }
 0x1ca   :  { %v850_v43 = vadd.f32 %v849_v1, %v848_v61 }
 0x1cb   :  { %v803_v16 = vmul.f32 %v771_v2, %v1792_v59  ;;  %v1115_v59 = vpop.eup %1114 }
 0x1cc   :  { %v726_v28 = vpop.xlane.xlu0 %725  ;;  %v1117_v50 = vpop.eup %1116  ;;  %v408_v17 = vmul.f32 0.6931472, %v1115_v59  ;;  %v2296_v59 = vld [vmem:[#allocation42_spill] sm:$0xff] }
 0x1cd   :  { %v362_v18 = vpop.xlane.xlu1 %361  ;;  %v851_v19 = vsel %vm819_vm1, %v803_v16, 0.0  ;;  %v772_v4 = vsub.f32 %v452_v5, %v726_v28  ;;  %v410_v24 = vmul.f32 0.6931472, %v1117_v50  ;;  %v1119_v10 = vpop.eup %1118  ;;  %v2297_v50 = vld [vmem:[#allocation31_spill] sm:$0xff] }
 0x1ce   :  { %v852_v63 = vadd.f32 %v851_v19, %v850_v43  ;;  %1130 = vlog2.f32 %v362_v18  ;;  %v453_v9 = vadd.f32 %v408_v17, %v2293_v55  ;;  %v412_v40 = vmul.f32 0.6931472, %v1119_v10  ;;  %v1121_v53 = vpop.eup %1120  ;;  %v2294_v18 = vld [vmem:[#allocation23_spill] sm:$0xff]  ;;  %v2298_v55 = vld [vmem:[#allocation24_spill] sm:$0xff] }
 0x1cf   :  { %v804_v22 = vmul.f32 %v772_v4, %v1808_v37  ;;  %1132 = vlog2.f32 %v360_v62  ;;  %v454_v47 = vadd.f32 %v410_v24, %v1557_v51  ;;  %v1123_v31 = vpop.eup %1122  ;;  %v414_v45 = vmul.f32 0.6931472, %v1121_v53 }
 0x1d0   :  { %v728_v46 = vpop.xlane.xlu0 %727  ;;  %v1125_v44 = vpop.eup %1124  ;;  %v455_v54 = vadd.f32 %v412_v40, %v1597_v36  ;;  %v418_v57 = vmul.f32 0.6931472, %v1123_v31 }
 0x1d1   :  { %v853_v8 = vsel %vm819_vm1, %v804_v22, 0.0  ;;  %v364_v56 = vpop.xlane.xlu1 %363  ;;  %v773_v23 = vsub.f32 %v453_v9, %v728_v46  ;;  %v416_v12 = vmul.f32 0.6931472, %v1125_v44  ;;  %v456_v0 = vadd.f32 %v414_v45, %v1559_v11  ;;  %v2300_v44 = vld [vmem:[#allocation4_spill] sm:$0xff] }
 0x1d2   :  { %v854_v26 = vadd.f32 %v853_v8, %v852_v63  ;;  %v458_v32 = vadd.f32 %v418_v57, %v1561_v20  ;;  %v2295_v8 = vld [vmem:[#allocation3_spill] sm:$0xff] }
 0x1d3   :  { %v805_v7 = vmul.f32 %v773_v23, %v1825_v25  ;;  %v1127_v51 = vpop.eup %1126  ;;  %v457_v3 = vadd.f32 %v416_v12, %v1615_v39 }
 0x1d4   :  { %v1129_v15 = vpop.eup %1128  ;;  %v422_v35 = vmul.f32 0.6931472, %v1127_v51 }
 0x1d5   :  { %v366_v13 = vpop.xlane.xlu1 %365  ;;  %v855_v41 = vsel %vm819_vm1, %v805_v7, 0.0  ;;  %v420_v1 = vmul.f32 0.6931472, %v1129_v15 }
 0x1d6   :  { %1134 = vlog2.f32 %v366_v13  ;;  %v856_v52 = vadd.f32 %v855_v41, %v854_v26  ;;  %v460_v20 = vadd.f32 %v422_v35, %v2294_v18  ;;  %v2302_v41 = vld [vmem:[#allocation25_spill] sm:$0xff] }
 0x1d7   :  { %1136 = vlog2.f32 %v364_v56 }
 0x1d9   :  { %v368_v37 = vpop.xlane.xlu1 %367 }
 0x1dd   :  { %v370_v48 = vpop.xlane.xlu1 %369 }
 0x1de   :  { %1138 = vlog2.f32 %v370_v48 }
 0x1df   :  { %1140 = vlog2.f32 %v368_v37 }
 0x1e1   :  { %v730_v21 = vpop.xlane.xlu0 %729 }
 0x1e2   :  { %v774_v42 = vsub.f32 %v454_v47, %v730_v21  ;;  %v2299_v21 = vld [vmem:[#allocation34_spill] sm:$0xff] }
 0x1e4   :  { %v806_v49 = vmul.f32 %v774_v42, %v1842_v30  ;;  %v1131_v30 = vpop.eup %1130 }
 0x1e5   :  { %v732_v6 = vpop.xlane.xlu0 %731  ;;  %v1133_v62 = vpop.eup %1132  ;;  %v426_v5 = vmul.f32 0.6931472, %v1131_v30 }
 0x1e6   :  { %v775_v60 = vsub.f32 %v455_v54, %v732_v6  ;;  %v857_v36 = vsel %vm819_vm1, %v806_v49, 0.0  ;;  %v1135_v4 = vpop.eup %1134  ;;  %v424_v63 = vmul.f32 0.6931472, %v1133_v62  ;;  %v2301_v54 = vld [vmem:[#allocation2_spill] sm:$0xff] }
 0x1e7   :  { %v858_v43 = vadd.f32 %v857_v36, %v856_v52  ;;  %v1137_v39 = vpop.eup %1136  ;;  %v430_v46 = vmul.f32 0.6931472, %v1135_v4  ;;  %v462_v9 = vadd.f32 %v426_v5, %v2298_v55  ;;  %v2305_v52 = vld [vmem:[#allocation43_spill] sm:$0xff] }
 0x1e8   :  { %v807_v58 = vmul.f32 %v775_v60, %v1859_v29  ;;  %v428_v47 = vmul.f32 0.6931472, %v1137_v39  ;;  %v461_v42 = vadd.f32 %v424_v63, %v2299_v21  ;;  %v2307_v5 = vld [vmem:[#allocation39_spill] sm:$0xff]  ;;  %v2309_v63 = vld [vmem:[#allocation45_spill] sm:$0xff] }
 0x1e9   :  { %v738_v61 = vpop.xlane.xlu1 %737  ;;  %v734_v25 = vpop.xlane.xlu0 %733 }
 0x1ea   :  { %v776_v27 = vsub.f32 %v456_v0, %v734_v25  ;;  %v859_v2 = vsel %vm819_vm1, %v807_v58, 0.0  ;;  %v778_v29 = vsub.f32 %v458_v32, %v738_v61  ;;  %v464_v58 = vadd.f32 %v430_v46, %v2302_v41  ;;  %v2303_v25 = vld [vmem:[#allocation36_spill] sm:$0xff] }
 0x1eb   :  { %v860_v22 = vadd.f32 %v859_v2, %v858_v43  ;;  %v1139_v23 = vpop.eup %1138  ;;  %v463_v35 = vadd.f32 %v428_v47, %v2303_v25  ;;  %v2304_v32 = vld [vmem:[#allocation44_spill] sm:$0xff] }
 0x1ec   :  { %v808_v11 = vmul.f32 %v776_v27, %v1876_v34  ;;  %v810_v56 = vmul.f32 %v778_v29, %v2295_v8  ;;  %v459_v34 = vadd.f32 %v420_v1, %v2297_v50  ;;  %v1141_v31 = vpop.eup %1140  ;;  %v434_v51 = vmul.f32 0.6931472, %v1139_v23 }
 0x1ed   :  { %v742_v16 = vpop.xlane.xlu1 %741  ;;  %v736_v38 = vpop.xlane.xlu0 %735  ;;  %v432_v15 = vmul.f32 0.6931472, %v1141_v31 }
 0x1ee   :  { %v861_v28 = vsel %vm819_vm1, %v808_v11, 0.0  ;;  %v777_v19 = vsub.f32 %v457_v3, %v736_v38  ;;  %v780_v26 = vsub.f32 %v460_v20, %v742_v16  ;;  %v865_v48 = vsel %vm819_vm1, %v810_v56, 0.0  ;;  %v2306_v11 = vld [vmem:[#allocation27_spill] sm:$0xff]  ;;  %v2308_v20 = vld [vmem:[#allocation46_spill] sm:$0xff] }
 0x1ef   :  { %v862_v17 = vadd.f32 %v861_v28, %v860_v22  ;;  %v466_v43 = vadd.f32 %v434_v51, %v2306_v11  ;;  %v465_v28 = vadd.f32 %v432_v15, %v2307_v5 }
 0x1f0   :  { %v809_v13 = vmul.f32 %v777_v19, %v2296_v59  ;;  %v812_v45 = vmul.f32 %v780_v26, %v2300_v44 }
 0x1f1   :  { %v746_v24 = vpop.xlane.xlu1 %745  ;;  %v740_v10 = vpop.xlane.xlu0 %739 }
 0x1f2   :  { %v863_v37 = vsel %vm819_vm1, %v809_v13, 0.0  ;;  %v779_v40 = vsub.f32 %v459_v34, %v740_v10  ;;  %v782_v7 = vsub.f32 %v462_v9, %v746_v24  ;;  %v869_v36 = vsel %vm819_vm1, %v812_v45, 0.0 }
 0x1f3   :  { %v864_v53 = vadd.f32 %v863_v37, %v862_v17 }
 0x1f4   :  { %v811_v6 = vmul.f32 %v779_v40, %v2301_v54  ;;  %v814_v27 = vmul.f32 %v782_v7, %v2304_v32 }
 0x1f5   :  { %v866_v57 = vadd.f32 %v865_v48, %v864_v53  ;;  %v750_v49 = vpop.xlane.xlu1 %749  ;;  %v744_v60 = vpop.xlane.xlu0 %743 }
 0x1f6   :  { %v867_v12 = vsel %vm819_vm1, %v811_v6, 0.0  ;;  %v781_v0 = vsub.f32 %v461_v42, %v744_v60  ;;  %v784_v30 = vsub.f32 %v464_v58, %v750_v49  ;;  %v873_v18 = vsel %vm819_vm1, %v814_v27, 0.0 }
 0x1f7   :  { %v868_v61 = vadd.f32 %v867_v12, %v866_v57 }
 0x1f8   :  { %v813_v3 = vmul.f32 %v781_v0, %v2305_v52  ;;  %v816_v19 = vmul.f32 %v784_v30, %v2308_v20 }
 0x1f9   :  { %v870_v62 = vadd.f32 %v869_v36, %v868_v61  ;;  %v754_v1 = vpop.xlane.xlu1 %753  ;;  %v748_v2 = vpop.xlane.xlu0 %747 }
 0x1fa   :  { %v871_v29 = vsel %vm819_vm1, %v813_v3, 0.0  ;;  %v783_v16 = vsub.f32 %v463_v35, %v748_v2  ;;  %v786_v4 = vsub.f32 %v466_v43, %v754_v1  ;;  %v877_v50 = vsel %vm819_vm1, %v816_v19, 0.0 }
 0x1fb   :  { %v872_v38 = vadd.f32 %v871_v29, %v870_v62 }
 0x1fc   :  { %v815_v22 = vmul.f32 %v783_v16, %v2309_v63  ;;  %v818_v34 = vmul.f32 %v786_v4, %v1997_v33 }
 0x1fd   :  { %v874_v39 = vadd.f32 %v873_v18, %v872_v38  ;;  %v967_v8 = vpop.permute.xlu1 %966  ;;  %v752_v56 = vpop.xlane.xlu0 %751 }
 0x1fe   :  { %v875_v26 = vsel %vm819_vm1, %v815_v22, 0.0  ;;  %969 = vst [vmem:[%s2161_s4] sm:$0xff] %v967_v8  ;;  %v785_v59 = vsub.f32 %v465_v28, %v752_v56  ;;  %v881_v37 = vsel %vm819_vm1, %v818_v34, 0.0 }
 0x1ff   :  { %v876_v13 = vadd.f32 %v875_v26, %v874_v39 }
 0x200   :  { %v817_v17 = vmul.f32 %v785_v59, %v1984_v14 }
 0x201   :  { %v878_v24 = vadd.f32 %v877_v50, %v876_v13 }
 0x202   :  { %v879_v10 = vsel %vm819_vm1, %v817_v17, 0.0 }
 0x203   :  { %v880_v46 = vadd.f32 %v879_v10, %v878_v24 }
 0x205   :  { %v882_v55 = vadd.f32 %v881_v37, %v880_v46 }
 0x207   :  { %v883_v9 = vrot.slane %v882_v55, 4 }
 0x209   :  { %v884_v40 = vadd.f32 %v883_v9, %v882_v55 }
 0x20b   :  { %v885_v23 = vrot.slane %v884_v40, 2 }
 0x20d   :  { %v886_v47 = vadd.f32 %v885_v23, %v884_v40 }
 0x20f   :  { %v887_v53 = vrot.slane %v886_v47, 1 }
 0x211   :  { %v888_v21 = vadd.f32 %v887_v53, %v886_v47 }
 0x213   :  { %960 = vperm.xlu0 %1012, %v888_v21  }
 0x28e   :  { %v961_v42 = vpop.permute.xlu0 %960 }
 0x28f   :  { %963 = vst [vmem:[%s2162_s3] sm:$0xff] %v961_v42 }

// kernel: jointbert_forward.28
= control target key start
LH: loop header
LB: loop body
LE: loop exit
PB: predicated region body
PF: predicated region fallthrough
CT: control target
= control target key end

     0   :  { %v210_v0 = vmov 0.0   ;;  %vm211_vm0 = vmmov 0   ;;  %s268_s1 = inlined_call_operand.vmem [shape: bf16[128,128], index: 1, kind: input, shape index: {}]   ;;  %s269_s0 = inlined_call_operand.vmem [shape: bf16[16,128], index: 0, kind: input, shape index: {}]   ;;  %s270_s2 = inlined_call_operand.vmem [shape: f32[1,128], index: 2, kind: input, shape index: {}]   ;;  %s271_s3 = inlined_call_operand.vmem [shape: f32[16,128], index: 3, kind: output, shape index: {}]  }
   0x1   :  { %179 = vmatprep.subr.bf16.mxu0 %v210_v0  ;;  %v201_v1 = vld [vmem:[%s268_s1 + $0x38] sm:$0xff]   ;;  %195 = vmatprep.mubr.msk.bf16.mxu0 %vm211_vm0, %v210_v0  ;;  %v202_v2 = vld [vmem:[%s268_s1 + $0x30] sm:$0xff]   ;;  %v203_v3 = vld [vmem:[%s268_s1 + $0x28] sm:$0xff]  }
   0x2   :  { %180 = vmatpush3.bf16.msra.mxu0 %v201_v1  ;;  %v204_v4 = vld [vmem:[%s268_s1 + $0x20] sm:$0xff]   ;;  %v205_v5 = vld [vmem:[%s268_s1 + $0x18] sm:$0xff]   ;;  %v206_v6 = vld [vmem:[%s268_s1 + $0x10] sm:$0xff]  }
   0x3   :  { %181 = vmatprep.subr.bf16.mxu0 %v210_v0  ;;  %v207_v7 = vld [vmem:[%s268_s1 + $0x8] sm:$0xff]   ;;  %v208_v8 = vld [vmem:[%s268_s1] sm:$0xff]  }
   0x4   :  { %v209_v9 = vld [vmem:[%s269_s0] sm:$0xff]  }
   0x5   :  { %v169_v10 = vld [vmem:[%s270_s2] ss:$0 sm:$0xff] }
   0x6   :  { %182 = vmatpush3.bf16.msra.mxu0 %v202_v2 }
   0x7   :  { %183 = vmatprep.subr.bf16.mxu0 %v210_v0 }
   0xa   :  { %184 = vmatpush3.bf16.msra.mxu0 %v203_v3 }
   0xb   :  { %185 = vmatprep.subr.bf16.mxu0 %v210_v0 }
   0xe   :  { %186 = vmatpush3.bf16.msra.mxu0 %v204_v4 }
   0xf   :  { %187 = vmatprep.subr.bf16.mxu0 %v210_v0 }
  0x12   :  { %188 = vmatpush3.bf16.msra.mxu0 %v205_v5 }
  0x13   :  { %189 = vmatprep.subr.bf16.mxu0 %v210_v0 }
  0x16   :  { %190 = vmatpush3.bf16.msra.mxu0 %v206_v6 }
  0x17   :  { %191 = vmatprep.subr.bf16.mxu0 %v210_v0 }
  0x1a   :  { %192 = vmatpush3.bf16.msra.mxu0 %v207_v7 }
  0x1b   :  { %193 = vmatprep.subr.bf16.mxu0 %v210_v0 }
  0x1e   :  { %194 = vmatpush3.bf16.msra.mxu0 %v208_v8 }
  0x21   :  { %196 = vmatmul.mubr.bf16.vlgmr.msra.gmra.mxu0 %v209_v9 }
  0xe1   :  { %v129_v11 = vpop.f32.mrf.mxu0 }
  0xe2   :  { %v152_v12 = vadd.f32 %v169_v10, %v129_v11 }
  0xe3   :  { %v197_v13 = vpop.f32.mrf.mxu0 }
  0xe4   :  { %154 = vst [vmem:[%s271_s3] sm:$0xff] %v152_v12 }
  0xe5   :  { %v132_v14 = vpop.f32.mrf.mxu0 }
  0xe6   :  { %v153_v15 = vadd.f32 %v169_v10, %v132_v14 }
  0xe7   :  { %v198_v16 = vpop.f32.mrf.mxu0 }
  0xe8   :  { %155 = vst [vmem:[%s271_s3 + $0x8] sm:$0xff] %v153_v15 }

// kernel: jointbert_forward.30
= control target key start
LH: loop header
LB: loop body
LE: loop exit
PB: predicated region body
PF: predicated region fallthrough
CT: control target
= control target key end

     0   :  { %v22_v0 = vlaneseq  ;;  %v122_v1 = vmov 0   ;;  %vm69_vm1 = vcmask 7168   ;;  %v123_v22 = vmov 0.0   ;;  %s177_s0 = inlined_call_operand.vmem [shape: f32[16,128], index: 0, kind: input, shape index: {}]   ;;  %s178_s1 = inlined_call_operand.vmem [shape: s32[16,1], index: 1, kind: input, shape index: {}]   ;;  %s179_s2 = inlined_call_operand.vmem [shape: f32[16,1], index: 2, kind: input, shape index: {}]   ;;  %s180_s4 = inlined_call_operand.vmem [shape: f32[1,8,128], index: 4, kind: output, shape index: {1}]   ;;  %s181_s3 = inlined_call_operand.vmem [shape: f32[1,8,128], index: 3, kind: output, shape index: {0}]  }
   0x1   :  { %112 = vset.pattern.permute.xlu1 %v122_v1  ;;  %v18_v2 = vld [vmem:[%s178_s1] sm:$0xff]  ;;  %113 = vset.pattern.permute.xlu0 %v122_v1  ;;  %v19_v5 = vld [vmem:[%s178_s1 + $0x8] sm:$0xff] }
   0x2   :  { %v16_v3 = vld [vmem:[%s177_s0] sm:$0xff]  ;;  %v23_v4 = vand.u32 127, %v22_v0  ;;  %48 = vperm.xlu1 %112, %v18_v2   ;;  %v17_v6 = vld [vmem:[%s177_s0 + $0x8] sm:$0xff] }
   0x3   :  { %v20_v14 = vld [vmem:[%s179_s2] sm:$0xff]  ;;  %v21_v15 = vld [vmem:[%s179_s2 + $0x8] sm:$0xff] }
   0x4   :  { %vm24_vm0 = vcmp.lt.s32.totalorder %v23_v4, 5  ;;  %v79_v18 = vsel %vm69_vm1, %v20_v14, 0.0  ;;  %v80_v19 = vsel %vm69_vm1, %v21_v15, 0.0 }
   0x5   :  { %v25_v7 = vsel %vm24_vm0, %v16_v3, -1e+30  ;;  %v26_v8 = vsel %vm24_vm0, %v17_v6, -1e+30  ;;  %v81_v20 = vadd.f32 %v80_v19, %v79_v18 }
   0x6   :  { %27 = vmax.xlane.f32.xlu0 %v25_v7  ;;  %51 = vperm.xlu1 %112, %v19_v5  }
   0x7   :  { %v82_v24 = vrot.slane %v81_v20, 4 }
   0x9   :  { %v83_v28 = vadd.f32 %v82_v24, %v81_v20 }
   0xa   :  { %29 = vmax.xlane.f32.xlu0 %v26_v8 }
   0xb   :  { %v84_v31 = vrot.slane %v83_v28, 2 }
   0xd   :  { %v85_v32 = vadd.f32 %v84_v31, %v83_v28 }
   0xf   :  { %v86_v33 = vrot.slane %v85_v32, 1 }
  0x11   :  { %v87_v34 = vadd.f32 %v86_v33, %v85_v32 }
  0x7d   :  { %v49_v17 = vpop.permute.xlu1 %48 }
  0x7e   :  { %vm53_vm2 = vcmp.eq.s32.totalorder %v23_v4, %v49_v17 }
  0x7f   :  { %v108_v23 = vsel %vm53_vm2, 1.0, %v123_v22 }
  0x80   :  { %v59_v26 = vmul.f32 %v108_v23, %v25_v7 }
  0x81   :  { %v52_v21 = vpop.permute.xlu1 %51 }
  0x82   :  { %vm54_vm3 = vcmp.eq.s32.totalorder %v23_v4, %v52_v21 }
  0x83   :  { %v109_v27 = vsel %vm54_vm3, 1.0, %v123_v22 }
  0x84   :  { %v60_v30 = vmul.f32 %v109_v27, %v26_v8 }
  0x8f   :  { %v28_v9 = vpop.xlane.xlu0 %27 }
  0x90   :  { %v31_v10 = vsub.f32 %v25_v7, %v28_v9 }
  0x92   :  { %v33_v11 = vmul.f32 1.442695, %v31_v10 }
  0x93   :  { %v30_v12 = vpop.xlane.xlu0 %29 }
  0x94   :  { %114 = vpow2.f32 %v33_v11  ;;  %v32_v13 = vsub.f32 %v26_v8, %v30_v12 }
  0x96   :  { %v35_v16 = vmul.f32 1.442695, %v32_v13 }
  0x98   :  { %116 = vpow2.f32 %v35_v16 }
  0xa1   :  { %v115_v25 = vpop.eup %114 }
  0xa2   :  { %37 = vadd.xlane.f32.xlu0 %v115_v25 }
  0xa5   :  { %v117_v29 = vpop.eup %116 }
  0xa6   :  { %39 = vadd.xlane.f32.xlu1 %v117_v29  ;;  %61 = vadd.xlane.f32.xlu0 %v59_v26 }
  0xaa   :  { %63 = vadd.xlane.f32.xlu0 %v60_v30 }
  0xb7   :  { %96 = vperm.xlu1 %112, %v87_v34  }
 0x12b   :  { %v38_v35 = vpop.xlane.xlu0 %37 }
 0x12c   :  { %118 = vlog2.f32 %v38_v35 }
 0x12f   :  { %v40_v36 = vpop.xlane.xlu1 %39  ;;  %v62_v40 = vpop.xlane.xlu0 %61 }
 0x130   :  { %120 = vlog2.f32 %v40_v36 }
 0x133   :  { %v97_v37 = vpop.permute.xlu1 %96  ;;  %v64_v46 = vpop.xlane.xlu0 %63 }
 0x134   :  { %99 = vst [vmem:[%s180_s4] sm:$0xff] %v97_v37 }
 0x139   :  { %v119_v38 = vpop.eup %118 }
 0x13a   :  { %v42_v39 = vmul.f32 0.6931472, %v119_v38 }
 0x13c   :  { %v45_v41 = vadd.f32 %v42_v39, %v28_v9 }
 0x13d   :  { %v121_v42 = vpop.eup %120 }
 0x13e   :  { %v44_v43 = vmul.f32 0.6931472, %v121_v42  ;;  %v65_v44 = vsub.f32 %v45_v41, %v62_v40 }
 0x140   :  { %v46_v45 = vadd.f32 %v44_v43, %v30_v12  ;;  %v67_v47 = vmul.f32 %v65_v44, %v20_v14 }
 0x142   :  { %v66_v48 = vsub.f32 %v46_v45, %v64_v46  ;;  %v70_v50 = vsel %vm69_vm1, %v67_v47, 0.0 }
 0x144   :  { %v68_v49 = vmul.f32 %v66_v48, %v21_v15 }
 0x146   :  { %v71_v51 = vsel %vm69_vm1, %v68_v49, 0.0 }
 0x147   :  { %v72_v52 = vadd.f32 %v71_v51, %v70_v50 }
 0x149   :  { %v73_v53 = vrot.slane %v72_v52, 4 }
 0x14b   :  { %v74_v54 = vadd.f32 %v73_v53, %v72_v52 }
 0x14d   :  { %v75_v55 = vrot.slane %v74_v54, 2 }
 0x14f   :  { %v76_v56 = vadd.f32 %v75_v55, %v74_v54 }
 0x151   :  { %v77_v57 = vrot.slane %v76_v56, 1 }
 0x153   :  { %v78_v58 = vadd.f32 %v77_v57, %v76_v56 }
 0x155   :  { %90 = vperm.xlu0 %113, %v78_v58  }
 0x1d0   :  { %v91_v59 = vpop.permute.xlu0 %90 }
 0x1d1   :  { %93 = vst [vmem:[%s181_s3] sm:$0xff] %v91_v59 }

</bundles_post_ra>
